<compile_context>
chip_gen: v5e
topology: v5e:2x2
jax: 0.10.0
libtpu: 0.0.40
codegen_flags: <defaults>
</compile_context>

<pallas_src>
import jax
import jax.numpy as jnp
from jax import lax
from jax.experimental import pallas as pl
from jax.experimental.pallas import tpu as pltpu

INPUT_DIM = 1
HIDDEN = 32
NUM_LAYERS = 2
OUTPUT_DIM = 1
P = 128  # lane width; each gate is padded to one full 128-lane block


# --------------------------------------------------------------------------------------
# Pallas kernel
# --------------------------------------------------------------------------------------
def gru_kernel(gi0_ref, w0_ref, bh0_ref, w1_ref, b1_ref, wfc_ref, bfc_ref, out_ref):
    # gi0_ref: (T, Bt, 3P) precomputed layer-0 input projection (incl. b_ih_l0), gate-padded
    # w0_ref:  (P, 3P)   padded w_hh_l0^T            bh0_ref: (1, 3P) padded b_hh_l0
    # w1_ref:  (2P, 4P)  fused padded [w_ih_l1^T ; w_hh_l1^T]   b1_ref: (1, 4P)
    # wfc_ref: (P, OUTPUT_DIM)   bfc_ref: (1, OUTPUT_DIM)
    T, Bt, _ = gi0_ref.shape

    # Hoist weight / bias loads out of the recurrence.
    w0 = w0_ref[...]
    bh0 = bh0_ref[...]
    w1 = w1_ref[...]
    b1 = b1_ref[...]

    h_init = jnp.zeros((Bt, P), jnp.float32)

    def step(t, carry):
        h0, h1 = carry
        # ---- layer 0: only the recurrent matmul is left on the serial path ----
        gi0 = gi0_ref[t]                                                  # (Bt, 3P)
        gh0 = jnp.dot(h0, w0, preferred_element_type=jnp.float32) + bh0   # (Bt, 3P)
        r0 = jax.nn.sigmoid(gi0[:, 0:P] + gh0[:, 0:P])
        z0 = jax.nn.sigmoid(gi0[:, P:2 * P] + gh0[:, P:2 * P])
        n0 = jnp.tanh(gi0[:, 2 * P:3 * P] + r0 * gh0[:, 2 * P:3 * P])
        h0 = (1.0 - z0) * n0 + z0 * h0

        # ---- layer 1: single fused matmul on [h0 | h1] ----
        cat = jnp.concatenate([h0, h1], axis=-1)                          # (Bt, 2P)
        g1 = jnp.dot(cat, w1, preferred_element_type=jnp.float32) + b1    # (Bt, 4P)
        r1 = jax.nn.sigmoid(g1[:, 0:P])
        z1 = jax.nn.sigmoid(g1[:, P:2 * P])
        n1 = jnp.tanh(g1[:, 2 * P:3 * P] + r1 * g1[:, 3 * P:4 * P])
        h1 = (1.0 - z1) * n1 + z1 * h1
        return (h0, h1)

    h0, h1 = lax.fori_loop(0, T, step, (h_init, h_init), unroll=min(T, 8))

    # out = fc(dropout(out[:, -1, :])) — dropout is identity in eval mode.
    # TODO(synk): training-mode dropout not implemented.
    out_ref[...] = (jnp.dot(h1, wfc_ref[...], preferred_element_type=jnp.float32)
                    + bfc_ref[...]).astype(out_ref.dtype)


# --------------------------------------------------------------------------------------
# Wrapper: weight layout plumbing + pallas_call
# --------------------------------------------------------------------------------------
def _round_up(x, m):
    return (x + m - 1) // m * m


def _pad_gates_last(a, ngates):
    """(..., ngates*H) -> (..., ngates*P): gate g occupies lanes [g*P, g*P + H)."""
    pad = jnp.zeros(a.shape[:-1] + (P - HIDDEN,), a.dtype)
    parts = []
    for g in range(ngates):
        parts.append(a[..., g * HIDDEN:(g + 1) * HIDDEN])
        parts.append(pad)
    return jnp.concatenate(parts, axis=-1)


def _prep_weights(params):
    H = HIDDEN
    # Layer 0 recurrent weight, transposed and gate-padded.
    whh0_t = params["w_hh_l0"].T                              # (H, 3H)
    w0 = jnp.zeros((P, 3 * P), jnp.float32)
    for g in range(3):
        w0 = w0.at[0:H, g * P:g * P + H].set(whh0_t[:, g * H:(g + 1) * H])
    bh0 = _pad_gates_last(params["b_hh_l0"], 3)               # (1, 3P)

    # Layer 1: fuse input & recurrent matmuls. Operand is [h0 | h1] (B, 2P).
    # Column blocks: [r_i + r_h, z_i + z_h, n_i, n_h] so r*(W_hn h + b_hn) stays separable.
    wih1_t = params["w_ih_l1"].T                              # (H, 3H)
    whh1_t = params["w_hh_l1"].T                              # (H, 3H)
    w1 = jnp.zeros((2 * P, 4 * P), jnp.float32)
    w1 = w1.at[0:H, 0:H].set(wih1_t[:, 0:H])
    w1 = w1.at[0:H, P:P + H].set(wih1_t[:, H:2 * H])
    w1 = w1.at[0:H, 2 * P:2 * P + H].set(wih1_t[:, 2 * H:3 * H])
    w1 = w1.at[P:P + H, 0:H].set(whh1_t[:, 0:H])
    w1 = w1.at[P:P + H, P:P + H].set(whh1_t[:, H:2 * H])
    w1 = w1.at[P:P + H, 3 * P:3 * P + H].set(whh1_t[:, 2 * H:3 * H])

    b1 = jnp.zeros((1, 4 * P), jnp.float32)
    b1 = b1.at[:, 0:H].set(params["b_ih_l1"][:, 0:H] + params["b_hh_l1"][:, 0:H])
    b1 = b1.at[:, P:P + H].set(params["b_ih_l1"][:, H:2 * H] + params["b_hh_l1"][:, H:2 * H])
    b1 = b1.at[:, 2 * P:2 * P + H].set(params["b_ih_l1"][:, 2 * H:3 * H])
    b1 = b1.at[:, 3 * P:3 * P + H].set(params["b_hh_l1"][:, 2 * H:3 * H])

    wfc = jnp.zeros((P, OUTPUT_DIM), jnp.float32).at[0:HIDDEN, :].set(params["w_fc"].T)
    return w0, bh0, w1, b1, wfc, params["b_fc"]


def gru_model_forward(x, params):
    """x: (B, T, INPUT_DIM) float32. Returns (B, OUTPUT_DIM)."""
    B, T, D = x.shape
    assert D == INPUT_DIM

    # Pad batch to a sublane multiple and tile it on a parallel grid axis.
    b_tile = min(128, _round_up(B, 8))
    Bp = _round_up(B, b_tile)
    x_p = x if Bp == B else jnp.concatenate(
        [x, jnp.zeros((Bp - B, T, D), x.dtype)], axis=0)
    x_tm = jnp.transpose(x_p, (1, 0, 2))                      # (T, Bp, 1) time-major

    # Precompute layer-0 input projection for all timesteps (D_in = 1 -> broadcast mul),
    # laid out with each gate in its own 128-lane block.
    gi0 = x_tm * params["w_ih_l0"][:, 0] + params["b_ih_l0"]  # (T, Bp, 3H)
    gi0 = _pad_gates_last(gi0, 3).astype(jnp.float32)         # (T, Bp, 3P)

    w0, bh0, w1, b1, wfc, bfc = _prep_weights(params)

    # TODO(synk): for long sequences, keep gi0 in HBM (memory_space=pl.ANY) and
    # double-buffer time chunks with manual DMA instead of holding (T, Bp, 3P) in VMEM.
    out = pl.pallas_call(
        gru_kernel,
        out_shape=jax.ShapeDtypeStruct((Bp, OUTPUT_DIM), jnp.float32),
        grid=(Bp // b_tile,),
        in_specs=[
            pl.BlockSpec((T, b_tile, 3 * P), lambda b: (0, b, 0)),   # gi0 (batch-tiled)
            pl.BlockSpec((P, 3 * P), lambda b: (0, 0)),              # w0
            pl.BlockSpec((1, 3 * P), lambda b: (0, 0)),              # bh0
            pl.BlockSpec((2 * P, 4 * P), lambda b: (0, 0)),          # w1 (fused)
            pl.BlockSpec((1, 4 * P), lambda b: (0, 0)),              # b1
            pl.BlockSpec((P, OUTPUT_DIM), lambda b: (0, 0)),         # wfc
            pl.BlockSpec((1, OUTPUT_DIM), lambda b: (0, 0)),         # bfc
        ],
        out_specs=pl.BlockSpec((b_tile, OUTPUT_DIM), lambda b: (b, 0)),
        compiler_params=pltpu.CompilerParams(
            dimension_semantics=("parallel",)),
    )(gi0, w0, bh0, w1, b1, wfc, bfc)
    return out[:B]


# --------------------------------------------------------------------------------------
# Params + pure-JAX reference (PyTorch GRU semantics) for verification
# --------------------------------------------------------------------------------------
def init_params(key):
    """Deterministic params matching nn.GRU / nn.Linear shapes (uniform ±1/sqrt(H))."""
    k = jax.random.split(key, 12)
    s = 1.0 / jnp.sqrt(jnp.float32(HIDDEN))

    def u(kk, shape):
        return jax.random.uniform(kk, shape, jnp.float32, minval=-s, maxval=s)

    return {
        "w_ih_l0": u(k[0], (3 * HIDDEN, INPUT_DIM)),
        "w_hh_l0": u(k[1], (3 * HIDDEN, HIDDEN)),
        "b_ih_l0": u(k[2], (1, 3 * HIDDEN)),
        "b_hh_l0": u(k[3], (1, 3 * HIDDEN)),
        "w_ih_l1": u(k[4], (3 * HIDDEN, HIDDEN)),
        "w_hh_l1": u(k[5], (3 * HIDDEN, HIDDEN)),
        "b_ih_l1": u(k[6], (1, 3 * HIDDEN)),
        "b_hh_l1": u(k[7], (1, 3 * HIDDEN)),
        "w_fc": u(k[8], (OUTPUT_DIM, HIDDEN)),
        "b_fc": u(k[9], (1, OUTPUT_DIM)),
    }


def _gru_cell_ref(x_t, h_prev, w_ih, w_hh, b_ih, b_hh):
    H = h_prev.shape[-1]
    gi = jnp.dot(x_t, w_ih.T) + b_ih
    gh = jnp.dot(h_prev, w_hh.T) + b_hh
    i_r, i_z, i_n = gi[:, 0:H], gi[:, H:2 * H], gi[:, 2 * H:3 * H]
    h_r, h_z, h_n = gh[:, 0:H], gh[:, H:2 * H], gh[:, 2 * H:3 * H]
    r = jax.nn.sigmoid(i_r + h_r)
    z = jax.nn.sigmoid(i_z + h_z)
    n = jnp.tanh(i_n + r * h_n)
    return (1.0 - z) * n + z * h_prev


def gru_model_reference(x, params):
    B, T, D = x.shape
    h0 = jnp.zeros((B, HIDDEN), jnp.float32)
    h1 = jnp.zeros((B, HIDDEN), jnp.float32)

    def step(carry, x_t):
        h0, h1 = carry
        h0 = _gru_cell_ref(x_t, h0, params["w_ih_l0"], params["w_hh_l0"],
                           params["b_ih_l0"], params["b_hh_l0"])
        h1 = _gru_cell_ref(h0, h1, params["w_ih_l1"], params["w_hh_l1"],
                           params["b_ih_l1"], params["b_hh_l1"])
        return (h0, h1), None

    (h0, h1), _ = lax.scan(step, (h0, h1), jnp.transpose(x, (1, 0, 2)))
    return jnp.dot(h1, params["w_fc"].T) + params["b_fc"]


if __name__ == "__main__":
    key = jax.random.PRNGKey(0)
    kp, kx = jax.random.split(key)
    params = init_params(kp)

    B, T = 2, 8
    x = jax.random.normal(kx, (B, T, INPUT_DIM), jnp.float32)

    out = gru_model_forward(x, params)
    out = jax.block_until_ready(out)

    ref = gru_model_reference(x, params)
    assert out.shape == (B, OUTPUT_DIM)
    assert jnp.allclose(out, ref, atol=1e-4, rtol=1e-4), (out, ref)

    print("KERNEL_OK")
</pallas_src>

<mosaic_0001>
module attributes {stable_mosaic.version = 11 : i64} {
  func.func @gru_kernel(%arg0: i32, %arg1: memref<8x8x384xf32, #tpu.memory_space<vmem>>, %arg2: memref<128x384xf32, #tpu.memory_space<vmem>>, %arg3: memref<1x384xf32, #tpu.memory_space<vmem>>, %arg4: memref<256x512xf32, #tpu.memory_space<vmem>>, %arg5: memref<1x512xf32, #tpu.memory_space<vmem>>, %arg6: memref<128x1xf32, #tpu.memory_space<vmem>>, %arg7: memref<1x1xf32, #tpu.memory_space<vmem>>, %arg8: memref<8x1xf32, #tpu.memory_space<vmem>>) attributes {dimension_semantics = [#tpu.dimension_semantics<parallel>], iteration_bounds = array<i64: 1>, scalar_prefetch = 0 : i64, scratch_operands = 0 : i64, tpu.core_type = #tpu.core_type<tc>, window_params = [{transform_indices = @transform_0, window_bounds = array<i64: 8, 8, 384>}, {pipeline_mode = #tpu.pipeline_mode<synchronous>, transform_indices = @transform_1, window_bounds = array<i64: 128, 384>}, {pipeline_mode = #tpu.pipeline_mode<synchronous>, transform_indices = @transform_2, window_bounds = array<i64: 1, 384>}, {pipeline_mode = #tpu.pipeline_mode<synchronous>, transform_indices = @transform_3, window_bounds = array<i64: 256, 512>}, {pipeline_mode = #tpu.pipeline_mode<synchronous>, transform_indices = @transform_4, window_bounds = array<i64: 1, 512>}, {pipeline_mode = #tpu.pipeline_mode<synchronous>, transform_indices = @transform_5, window_bounds = array<i64: 128, 1>}, {pipeline_mode = #tpu.pipeline_mode<synchronous>, transform_indices = @transform_6, window_bounds = array<i64: 1, 1>}, {transform_indices = @transform_7, window_bounds = array<i64: 8, 1>}]} {
    %c0 = arith.constant 0 : index
    %c0_0 = arith.constant 0 : index
    %0 = vector.load %arg2[%c0, %c0_0] : memref<128x384xf32, #tpu.memory_space<vmem>>, vector<128x384xf32>
    %c0_1 = arith.constant 0 : index
    %c0_2 = arith.constant 0 : index
    %1 = vector.load %arg3[%c0_1, %c0_2] : memref<1x384xf32, #tpu.memory_space<vmem>>, vector<1x384xf32>
    %c0_3 = arith.constant 0 : index
    %c0_4 = arith.constant 0 : index
    %2 = vector.load %arg4[%c0_3, %c0_4] : memref<256x512xf32, #tpu.memory_space<vmem>>, vector<256x512xf32>
    %c0_5 = arith.constant 0 : index
    %c0_6 = arith.constant 0 : index
    %3 = vector.load %arg5[%c0_5, %c0_6] : memref<1x512xf32, #tpu.memory_space<vmem>>, vector<1x512xf32>
    %cst = arith.constant 0.000000e+00 : f32
    %4 = vector.broadcast %cst : f32 to vector<8x128xf32>
    %c0_i32 = arith.constant 0 : i32
    %5 = arith.index_cast %c0_i32 : i32 to index
    %c0_7 = arith.constant 0 : index
    %c0_8 = arith.constant 0 : index
    %6 = vector.load %arg1[%5, %c0_7, %c0_8] : memref<8x8x384xf32, #tpu.memory_space<vmem>>, vector<1x8x384xf32>
    %7 = vector.shape_cast %6 : vector<1x8x384xf32> to vector<8x384xf32>
    %cst_9 = arith.constant dense<0.000000e+00> : vector<8x384xf32>
    %8 = tpu.matmul %4, %0, %cst_9 {dimension_numbers = #tpu.dot_dimension_numbers<[1], [0], [0], [1], [0, 0, 1, 1], [], []>} : vector<8x128xf32>, vector<128x384xf32>, vector<8x384xf32> -> vector<8x384xf32>
    %9 = vector.broadcast %1 : vector<1x384xf32> to vector<8x384xf32>
    %10 = arith.addf %8, %9 : vector<8x384xf32>
    %11 = vector.extract_strided_slice %7 {offsets = [0, 0], sizes = [8, 128], strides = [1, 1]} : vector<8x384xf32> to vector<8x128xf32>
    %12 = vector.extract_strided_slice %10 {offsets = [0, 0], sizes = [8, 128], strides = [1, 1]} : vector<8x384xf32> to vector<8x128xf32>
    %13 = arith.addf %11, %12 : vector<8x128xf32>
    %14 = arith.negf %13 : vector<8x128xf32>
    %15 = math.exp %14 : vector<8x128xf32>
    %cst_10 = arith.constant 1.000000e+00 : f32
    %16 = vector.broadcast %cst_10 : f32 to vector<8x128xf32>
    %17 = arith.addf %16, %15 : vector<8x128xf32>
    %18 = arith.divf %16, %17 : vector<8x128xf32>
    %19 = vector.extract_strided_slice %7 {offsets = [0, 128], sizes = [8, 128], strides = [1, 1]} : vector<8x384xf32> to vector<8x128xf32>
    %20 = vector.extract_strided_slice %10 {offsets = [0, 128], sizes = [8, 128], strides = [1, 1]} : vector<8x384xf32> to vector<8x128xf32>
    %21 = arith.addf %19, %20 : vector<8x128xf32>
    %22 = arith.negf %21 : vector<8x128xf32>
    %23 = math.exp %22 : vector<8x128xf32>
    %cst_11 = arith.constant 1.000000e+00 : f32
    %24 = vector.broadcast %cst_11 : f32 to vector<8x128xf32>
    %25 = arith.addf %24, %23 : vector<8x128xf32>
    %26 = arith.divf %24, %25 : vector<8x128xf32>
    %27 = vector.extract_strided_slice %7 {offsets = [0, 256], sizes = [8, 128], strides = [1, 1]} : vector<8x384xf32> to vector<8x128xf32>
    %28 = vector.extract_strided_slice %10 {offsets = [0, 256], sizes = [8, 128], strides = [1, 1]} : vector<8x384xf32> to vector<8x128xf32>
    %29 = arith.mulf %18, %28 : vector<8x128xf32>
    %30 = arith.addf %27, %29 : vector<8x128xf32>
    %31 = math.tanh %30 : vector<8x128xf32>
    %cst_12 = arith.constant 1.000000e+00 : f32
    %32 = vector.broadcast %cst_12 : f32 to vector<8x128xf32>
    %33 = arith.subf %32, %26 : vector<8x128xf32>
    %34 = arith.mulf %33, %31 : vector<8x128xf32>
    %35 = arith.mulf %26, %4 : vector<8x128xf32>
    %36 = arith.addf %34, %35 : vector<8x128xf32>
    %37 = tpu.concatenate %36, %4 in 1 : vector<8x128xf32>, vector<8x128xf32> -> vector<8x256xf32>
    %cst_13 = arith.constant dense<0.000000e+00> : vector<8x512xf32>
    %38 = tpu.matmul %37, %2, %cst_13 {dimension_numbers = #tpu.dot_dimension_numbers<[1], [0], [0], [1], [0, 0, 1, 1], [], []>} : vector<8x256xf32>, vector<256x512xf32>, vector<8x512xf32> -> vector<8x512xf32>
    %39 = vector.broadcast %3 : vector<1x512xf32> to vector<8x512xf32>
    %40 = arith.addf %38, %39 : vector<8x512xf32>
    %41 = vector.extract_strided_slice %40 {offsets = [0, 0], sizes = [8, 128], strides = [1, 1]} : vector<8x512xf32> to vector<8x128xf32>
    %42 = arith.negf %41 : vector<8x128xf32>
    %43 = math.exp %42 : vector<8x128xf32>
    %cst_14 = arith.constant 1.000000e+00 : f32
    %44 = vector.broadcast %cst_14 : f32 to vector<8x128xf32>
    %45 = arith.addf %44, %43 : vector<8x128xf32>
    %46 = arith.divf %44, %45 : vector<8x128xf32>
    %47 = vector.extract_strided_slice %40 {offsets = [0, 128], sizes = [8, 128], strides = [1, 1]} : vector<8x512xf32> to vector<8x128xf32>
    %48 = arith.negf %47 : vector<8x128xf32>
    %49 = math.exp %48 : vector<8x128xf32>
    %cst_15 = arith.constant 1.000000e+00 : f32
    %50 = vector.broadcast %cst_15 : f32 to vector<8x128xf32>
    %51 = arith.addf %50, %49 : vector<8x128xf32>
    %52 = arith.divf %50, %51 : vector<8x128xf32>
    %53 = vector.extract_strided_slice %40 {offsets = [0, 256], sizes = [8, 128], strides = [1, 1]} : vector<8x512xf32> to vector<8x128xf32>
    %54 = vector.extract_strided_slice %40 {offsets = [0, 384], sizes = [8, 128], strides = [1, 1]} : vector<8x512xf32> to vector<8x128xf32>
    %55 = arith.mulf %46, %54 : vector<8x128xf32>
    %56 = arith.addf %53, %55 : vector<8x128xf32>
    %57 = math.tanh %56 : vector<8x128xf32>
    %cst_16 = arith.constant 1.000000e+00 : f32
    %58 = vector.broadcast %cst_16 : f32 to vector<8x128xf32>
    %59 = arith.subf %58, %52 : vector<8x128xf32>
    %60 = arith.mulf %59, %57 : vector<8x128xf32>
    %61 = arith.mulf %52, %4 : vector<8x128xf32>
    %62 = arith.addf %60, %61 : vector<8x128xf32>
    %c1_i32 = arith.constant 1 : i32
    %63 = arith.index_cast %c1_i32 : i32 to index
    %c0_17 = arith.constant 0 : index
    %c0_18 = arith.constant 0 : index
    %64 = vector.load %arg1[%63, %c0_17, %c0_18] : memref<8x8x384xf32, #tpu.memory_space<vmem>>, vector<1x8x384xf32>
    %65 = vector.shape_cast %64 : vector<1x8x384xf32> to vector<8x384xf32>
    %cst_19 = arith.constant dense<0.000000e+00> : vector<8x384xf32>
    %66 = tpu.matmul %36, %0, %cst_19 {dimension_numbers = #tpu.dot_dimension_numbers<[1], [0], [0], [1], [0, 0, 1, 1], [], []>} : vector<8x128xf32>, vector<128x384xf32>, vector<8x384xf32> -> vector<8x384xf32>
    %67 = vector.broadcast %1 : vector<1x384xf32> to vector<8x384xf32>
    %68 = arith.addf %66, %67 : vector<8x384xf32>
    %69 = vector.extract_strided_slice %65 {offsets = [0, 0], sizes = [8, 128], strides = [1, 1]} : vector<8x384xf32> to vector<8x128xf32>
    %70 = vector.extract_strided_slice %68 {offsets = [0, 0], sizes = [8, 128], strides = [1, 1]} : vector<8x384xf32> to vector<8x128xf32>
    %71 = arith.addf %69, %70 : vector<8x128xf32>
    %72 = arith.negf %71 : vector<8x128xf32>
    %73 = math.exp %72 : vector<8x128xf32>
    %cst_20 = arith.constant 1.000000e+00 : f32
    %74 = vector.broadcast %cst_20 : f32 to vector<8x128xf32>
    %75 = arith.addf %74, %73 : vector<8x128xf32>
    %76 = arith.divf %74, %75 : vector<8x128xf32>
    %77 = vector.extract_strided_slice %65 {offsets = [0, 128], sizes = [8, 128], strides = [1, 1]} : vector<8x384xf32> to vector<8x128xf32>
    %78 = vector.extract_strided_slice %68 {offsets = [0, 128], sizes = [8, 128], strides = [1, 1]} : vector<8x384xf32> to vector<8x128xf32>
    %79 = arith.addf %77, %78 : vector<8x128xf32>
    %80 = arith.negf %79 : vector<8x128xf32>
    %81 = math.exp %80 : vector<8x128xf32>
    %cst_21 = arith.constant 1.000000e+00 : f32
    %82 = vector.broadcast %cst_21 : f32 to vector<8x128xf32>
    %83 = arith.addf %82, %81 : vector<8x128xf32>
    %84 = arith.divf %82, %83 : vector<8x128xf32>
    %85 = vector.extract_strided_slice %65 {offsets = [0, 256], sizes = [8, 128], strides = [1, 1]} : vector<8x384xf32> to vector<8x128xf32>
    %86 = vector.extract_strided_slice %68 {offsets = [0, 256], sizes = [8, 128], strides = [1, 1]} : vector<8x384xf32> to vector<8x128xf32>
    %87 = arith.mulf %76, %86 : vector<8x128xf32>
    %88 = arith.addf %85, %87 : vector<8x128xf32>
    %89 = math.tanh %88 : vector<8x128xf32>
    %cst_22 = arith.constant 1.000000e+00 : f32
    %90 = vector.broadcast %cst_22 : f32 to vector<8x128xf32>
    %91 = arith.subf %90, %84 : vector<8x128xf32>
    %92 = arith.mulf %91, %89 : vector<8x128xf32>
    %93 = arith.mulf %84, %36 : vector<8x128xf32>
    %94 = arith.addf %92, %93 : vector<8x128xf32>
    %95 = tpu.concatenate %94, %62 in 1 : vector<8x128xf32>, vector<8x128xf32> -> vector<8x256xf32>
    %cst_23 = arith.constant dense<0.000000e+00> : vector<8x512xf32>
    %96 = tpu.matmul %95, %2, %cst_23 {dimension_numbers = #tpu.dot_dimension_numbers<[1], [0], [0], [1], [0, 0, 1, 1], [], []>} : vector<8x256xf32>, vector<256x512xf32>, vector<8x512xf32> -> vector<8x512xf32>
    %97 = vector.broadcast %3 : vector<1x512xf32> to vector<8x512xf32>
    %98 = arith.addf %96, %97 : vector<8x512xf32>
    %99 = vector.extract_strided_slice %98 {offsets = [0, 0], sizes = [8, 128], strides = [1, 1]} : vector<8x512xf32> to vector<8x128xf32>
    %100 = arith.negf %99 : vector<8x128xf32>
    %101 = math.exp %100 : vector<8x128xf32>
    %cst_24 = arith.constant 1.000000e+00 : f32
    %102 = vector.broadcast %cst_24 : f32 to vector<8x128xf32>
    %103 = arith.addf %102, %101 : vector<8x128xf32>
    %104 = arith.divf %102, %103 : vector<8x128xf32>
    %105 = vector.extract_strided_slice %98 {offsets = [0, 128], sizes = [8, 128], strides = [1, 1]} : vector<8x512xf32> to vector<8x128xf32>
    %106 = arith.negf %105 : vector<8x128xf32>
    %107 = math.exp %106 : vector<8x128xf32>
    %cst_25 = arith.constant 1.000000e+00 : f32
    %108 = vector.broadcast %cst_25 : f32 to vector<8x128xf32>
    %109 = arith.addf %108, %107 : vector<8x128xf32>
    %110 = arith.divf %108, %109 : vector<8x128xf32>
    %111 = vector.extract_strided_slice %98 {offsets = [0, 256], sizes = [8, 128], strides = [1, 1]} : vector<8x512xf32> to vector<8x128xf32>
    %112 = vector.extract_strided_slice %98 {offsets = [0, 384], sizes = [8, 128], strides = [1, 1]} : vector<8x512xf32> to vector<8x128xf32>
    %113 = arith.mulf %104, %112 : vector<8x128xf32>
    %114 = arith.addf %111, %113 : vector<8x128xf32>
    %115 = math.tanh %114 : vector<8x128xf32>
    %cst_26 = arith.constant 1.000000e+00 : f32
    %116 = vector.broadcast %cst_26 : f32 to vector<8x128xf32>
    %117 = arith.subf %116, %110 : vector<8x128xf32>
    %118 = arith.mulf %117, %115 : vector<8x128xf32>
    %119 = arith.mulf %110, %62 : vector<8x128xf32>
    %120 = arith.addf %118, %119 : vector<8x128xf32>
    %c2_i32 = arith.constant 2 : i32
    %121 = arith.index_cast %c2_i32 : i32 to index
    %c0_27 = arith.constant 0 : index
    %c0_28 = arith.constant 0 : index
    %122 = vector.load %arg1[%121, %c0_27, %c0_28] : memref<8x8x384xf32, #tpu.memory_space<vmem>>, vector<1x8x384xf32>
    %123 = vector.shape_cast %122 : vector<1x8x384xf32> to vector<8x384xf32>
    %cst_29 = arith.constant dense<0.000000e+00> : vector<8x384xf32>
    %124 = tpu.matmul %94, %0, %cst_29 {dimension_numbers = #tpu.dot_dimension_numbers<[1], [0], [0], [1], [0, 0, 1, 1], [], []>} : vector<8x128xf32>, vector<128x384xf32>, vector<8x384xf32> -> vector<8x384xf32>
    %125 = vector.broadcast %1 : vector<1x384xf32> to vector<8x384xf32>
    %126 = arith.addf %124, %125 : vector<8x384xf32>
    %127 = vector.extract_strided_slice %123 {offsets = [0, 0], sizes = [8, 128], strides = [1, 1]} : vector<8x384xf32> to vector<8x128xf32>
    %128 = vector.extract_strided_slice %126 {offsets = [0, 0], sizes = [8, 128], strides = [1, 1]} : vector<8x384xf32> to vector<8x128xf32>
    %129 = arith.addf %127, %128 : vector<8x128xf32>
    %130 = arith.negf %129 : vector<8x128xf32>
    %131 = math.exp %130 : vector<8x128xf32>
    %cst_30 = arith.constant 1.000000e+00 : f32
    %132 = vector.broadcast %cst_30 : f32 to vector<8x128xf32>
    %133 = arith.addf %132, %131 : vector<8x128xf32>
    %134 = arith.divf %132, %133 : vector<8x128xf32>
    %135 = vector.extract_strided_slice %123 {offsets = [0, 128], sizes = [8, 128], strides = [1, 1]} : vector<8x384xf32> to vector<8x128xf32>
    %136 = vector.extract_strided_slice %126 {offsets = [0, 128], sizes = [8, 128], strides = [1, 1]} : vector<8x384xf32> to vector<8x128xf32>
    %137 = arith.addf %135, %136 : vector<8x128xf32>
    %138 = arith.negf %137 : vector<8x128xf32>
    %139 = math.exp %138 : vector<8x128xf32>
    %cst_31 = arith.constant 1.000000e+00 : f32
    %140 = vector.broadcast %cst_31 : f32 to vector<8x128xf32>
    %141 = arith.addf %140, %139 : vector<8x128xf32>
    %142 = arith.divf %140, %141 : vector<8x128xf32>
    %143 = vector.extract_strided_slice %123 {offsets = [0, 256], sizes = [8, 128], strides = [1, 1]} : vector<8x384xf32> to vector<8x128xf32>
    %144 = vector.extract_strided_slice %126 {offsets = [0, 256], sizes = [8, 128], strides = [1, 1]} : vector<8x384xf32> to vector<8x128xf32>
    %145 = arith.mulf %134, %144 : vector<8x128xf32>
    %146 = arith.addf %143, %145 : vector<8x128xf32>
    %147 = math.tanh %146 : vector<8x128xf32>
    %cst_32 = arith.constant 1.000000e+00 : f32
    %148 = vector.broadcast %cst_32 : f32 to vector<8x128xf32>
    %149 = arith.subf %148, %142 : vector<8x128xf32>
    %150 = arith.mulf %149, %147 : vector<8x128xf32>
    %151 = arith.mulf %142, %94 : vector<8x128xf32>
    %152 = arith.addf %150, %151 : vector<8x128xf32>
    %153 = tpu.concatenate %152, %120 in 1 : vector<8x128xf32>, vector<8x128xf32> -> vector<8x256xf32>
    %cst_33 = arith.constant dense<0.000000e+00> : vector<8x512xf32>
    %154 = tpu.matmul %153, %2, %cst_33 {dimension_numbers = #tpu.dot_dimension_numbers<[1], [0], [0], [1], [0, 0, 1, 1], [], []>} : vector<8x256xf32>, vector<256x512xf32>, vector<8x512xf32> -> vector<8x512xf32>
    %155 = vector.broadcast %3 : vector<1x512xf32> to vector<8x512xf32>
    %156 = arith.addf %154, %155 : vector<8x512xf32>
    %157 = vector.extract_strided_slice %156 {offsets = [0, 0], sizes = [8, 128], strides = [1, 1]} : vector<8x512xf32> to vector<8x128xf32>
    %158 = arith.negf %157 : vector<8x128xf32>
    %159 = math.exp %158 : vector<8x128xf32>
    %cst_34 = arith.constant 1.000000e+00 : f32
    %160 = vector.broadcast %cst_34 : f32 to vector<8x128xf32>
    %161 = arith.addf %160, %159 : vector<8x128xf32>
    %162 = arith.divf %160, %161 : vector<8x128xf32>
    %163 = vector.extract_strided_slice %156 {offsets = [0, 128], sizes = [8, 128], strides = [1, 1]} : vector<8x512xf32> to vector<8x128xf32>
    %164 = arith.negf %163 : vector<8x128xf32>
    %165 = math.exp %164 : vector<8x128xf32>
    %cst_35 = arith.constant 1.000000e+00 : f32
    %166 = vector.broadcast %cst_35 : f32 to vector<8x128xf32>
    %167 = arith.addf %166, %165 : vector<8x128xf32>
    %168 = arith.divf %166, %167 : vector<8x128xf32>
    %169 = vector.extract_strided_slice %156 {offsets = [0, 256], sizes = [8, 128], strides = [1, 1]} : vector<8x512xf32> to vector<8x128xf32>
    %170 = vector.extract_strided_slice %156 {offsets = [0, 384], sizes = [8, 128], strides = [1, 1]} : vector<8x512xf32> to vector<8x128xf32>
    %171 = arith.mulf %162, %170 : vector<8x128xf32>
    %172 = arith.addf %169, %171 : vector<8x128xf32>
    %173 = math.tanh %172 : vector<8x128xf32>
    %cst_36 = arith.constant 1.000000e+00 : f32
    %174 = vector.broadcast %cst_36 : f32 to vector<8x128xf32>
    %175 = arith.subf %174, %168 : vector<8x128xf32>
    %176 = arith.mulf %175, %173 : vector<8x128xf32>
    %177 = arith.mulf %168, %120 : vector<8x128xf32>
    %178 = arith.addf %176, %177 : vector<8x128xf32>
    %c3_i32 = arith.constant 3 : i32
    %179 = arith.index_cast %c3_i32 : i32 to index
    %c0_37 = arith.constant 0 : index
    %c0_38 = arith.constant 0 : index
    %180 = vector.load %arg1[%179, %c0_37, %c0_38] : memref<8x8x384xf32, #tpu.memory_space<vmem>>, vector<1x8x384xf32>
    %181 = vector.shape_cast %180 : vector<1x8x384xf32> to vector<8x384xf32>
    %cst_39 = arith.constant dense<0.000000e+00> : vector<8x384xf32>
    %182 = tpu.matmul %152, %0, %cst_39 {dimension_numbers = #tpu.dot_dimension_numbers<[1], [0], [0], [1], [0, 0, 1, 1], [], []>} : vector<8x128xf32>, vector<128x384xf32>, vector<8x384xf32> -> vector<8x384xf32>
    %183 = vector.broadcast %1 : vector<1x384xf32> to vector<8x384xf32>
    %184 = arith.addf %182, %183 : vector<8x384xf32>
    %185 = vector.extract_strided_slice %181 {offsets = [0, 0], sizes = [8, 128], strides = [1, 1]} : vector<8x384xf32> to vector<8x128xf32>
    %186 = vector.extract_strided_slice %184 {offsets = [0, 0], sizes = [8, 128], strides = [1, 1]} : vector<8x384xf32> to vector<8x128xf32>
    %187 = arith.addf %185, %186 : vector<8x128xf32>
    %188 = arith.negf %187 : vector<8x128xf32>
    %189 = math.exp %188 : vector<8x128xf32>
    %cst_40 = arith.constant 1.000000e+00 : f32
    %190 = vector.broadcast %cst_40 : f32 to vector<8x128xf32>
    %191 = arith.addf %190, %189 : vector<8x128xf32>
    %192 = arith.divf %190, %191 : vector<8x128xf32>
    %193 = vector.extract_strided_slice %181 {offsets = [0, 128], sizes = [8, 128], strides = [1, 1]} : vector<8x384xf32> to vector<8x128xf32>
    %194 = vector.extract_strided_slice %184 {offsets = [0, 128], sizes = [8, 128], strides = [1, 1]} : vector<8x384xf32> to vector<8x128xf32>
    %195 = arith.addf %193, %194 : vector<8x128xf32>
    %196 = arith.negf %195 : vector<8x128xf32>
    %197 = math.exp %196 : vector<8x128xf32>
    %cst_41 = arith.constant 1.000000e+00 : f32
    %198 = vector.broadcast %cst_41 : f32 to vector<8x128xf32>
    %199 = arith.addf %198, %197 : vector<8x128xf32>
    %200 = arith.divf %198, %199 : vector<8x128xf32>
    %201 = vector.extract_strided_slice %181 {offsets = [0, 256], sizes = [8, 128], strides = [1, 1]} : vector<8x384xf32> to vector<8x128xf32>
    %202 = vector.extract_strided_slice %184 {offsets = [0, 256], sizes = [8, 128], strides = [1, 1]} : vector<8x384xf32> to vector<8x128xf32>
    %203 = arith.mulf %192, %202 : vector<8x128xf32>
    %204 = arith.addf %201, %203 : vector<8x128xf32>
    %205 = math.tanh %204 : vector<8x128xf32>
    %cst_42 = arith.constant 1.000000e+00 : f32
    %206 = vector.broadcast %cst_42 : f32 to vector<8x128xf32>
    %207 = arith.subf %206, %200 : vector<8x128xf32>
    %208 = arith.mulf %207, %205 : vector<8x128xf32>
    %209 = arith.mulf %200, %152 : vector<8x128xf32>
    %210 = arith.addf %208, %209 : vector<8x128xf32>
    %211 = tpu.concatenate %210, %178 in 1 : vector<8x128xf32>, vector<8x128xf32> -> vector<8x256xf32>
    %cst_43 = arith.constant dense<0.000000e+00> : vector<8x512xf32>
    %212 = tpu.matmul %211, %2, %cst_43 {dimension_numbers = #tpu.dot_dimension_numbers<[1], [0], [0], [1], [0, 0, 1, 1], [], []>} : vector<8x256xf32>, vector<256x512xf32>, vector<8x512xf32> -> vector<8x512xf32>
    %213 = vector.broadcast %3 : vector<1x512xf32> to vector<8x512xf32>
    %214 = arith.addf %212, %213 : vector<8x512xf32>
    %215 = vector.extract_strided_slice %214 {offsets = [0, 0], sizes = [8, 128], strides = [1, 1]} : vector<8x512xf32> to vector<8x128xf32>
    %216 = arith.negf %215 : vector<8x128xf32>
    %217 = math.exp %216 : vector<8x128xf32>
    %cst_44 = arith.constant 1.000000e+00 : f32
    %218 = vector.broadcast %cst_44 : f32 to vector<8x128xf32>
    %219 = arith.addf %218, %217 : vector<8x128xf32>
    %220 = arith.divf %218, %219 : vector<8x128xf32>
    %221 = vector.extract_strided_slice %214 {offsets = [0, 128], sizes = [8, 128], strides = [1, 1]} : vector<8x512xf32> to vector<8x128xf32>
    %222 = arith.negf %221 : vector<8x128xf32>
    %223 = math.exp %222 : vector<8x128xf32>
    %cst_45 = arith.constant 1.000000e+00 : f32
    %224 = vector.broadcast %cst_45 : f32 to vector<8x128xf32>
    %225 = arith.addf %224, %223 : vector<8x128xf32>
    %226 = arith.divf %224, %225 : vector<8x128xf32>
    %227 = vector.extract_strided_slice %214 {offsets = [0, 256], sizes = [8, 128], strides = [1, 1]} : vector<8x512xf32> to vector<8x128xf32>
    %228 = vector.extract_strided_slice %214 {offsets = [0, 384], sizes = [8, 128], strides = [1, 1]} : vector<8x512xf32> to vector<8x128xf32>
    %229 = arith.mulf %220, %228 : vector<8x128xf32>
    %230 = arith.addf %227, %229 : vector<8x128xf32>
    %231 = math.tanh %230 : vector<8x128xf32>
    %cst_46 = arith.constant 1.000000e+00 : f32
    %232 = vector.broadcast %cst_46 : f32 to vector<8x128xf32>
    %233 = arith.subf %232, %226 : vector<8x128xf32>
    %234 = arith.mulf %233, %231 : vector<8x128xf32>
    %235 = arith.mulf %226, %178 : vector<8x128xf32>
    %236 = arith.addf %234, %235 : vector<8x128xf32>
    %c4_i32 = arith.constant 4 : i32
    %237 = arith.index_cast %c4_i32 : i32 to index
    %c0_47 = arith.constant 0 : index
    %c0_48 = arith.constant 0 : index
    %238 = vector.load %arg1[%237, %c0_47, %c0_48] : memref<8x8x384xf32, #tpu.memory_space<vmem>>, vector<1x8x384xf32>
    %239 = vector.shape_cast %238 : vector<1x8x384xf32> to vector<8x384xf32>
    %cst_49 = arith.constant dense<0.000000e+00> : vector<8x384xf32>
    %240 = tpu.matmul %210, %0, %cst_49 {dimension_numbers = #tpu.dot_dimension_numbers<[1], [0], [0], [1], [0, 0, 1, 1], [], []>} : vector<8x128xf32>, vector<128x384xf32>, vector<8x384xf32> -> vector<8x384xf32>
    %241 = vector.broadcast %1 : vector<1x384xf32> to vector<8x384xf32>
    %242 = arith.addf %240, %241 : vector<8x384xf32>
    %243 = vector.extract_strided_slice %239 {offsets = [0, 0], sizes = [8, 128], strides = [1, 1]} : vector<8x384xf32> to vector<8x128xf32>
    %244 = vector.extract_strided_slice %242 {offsets = [0, 0], sizes = [8, 128], strides = [1, 1]} : vector<8x384xf32> to vector<8x128xf32>
    %245 = arith.addf %243, %244 : vector<8x128xf32>
    %246 = arith.negf %245 : vector<8x128xf32>
    %247 = math.exp %246 : vector<8x128xf32>
    %cst_50 = arith.constant 1.000000e+00 : f32
    %248 = vector.broadcast %cst_50 : f32 to vector<8x128xf32>
    %249 = arith.addf %248, %247 : vector<8x128xf32>
    %250 = arith.divf %248, %249 : vector<8x128xf32>
    %251 = vector.extract_strided_slice %239 {offsets = [0, 128], sizes = [8, 128], strides = [1, 1]} : vector<8x384xf32> to vector<8x128xf32>
    %252 = vector.extract_strided_slice %242 {offsets = [0, 128], sizes = [8, 128], strides = [1, 1]} : vector<8x384xf32> to vector<8x128xf32>
    %253 = arith.addf %251, %252 : vector<8x128xf32>
    %254 = arith.negf %253 : vector<8x128xf32>
    %255 = math.exp %254 : vector<8x128xf32>
    %cst_51 = arith.constant 1.000000e+00 : f32
    %256 = vector.broadcast %cst_51 : f32 to vector<8x128xf32>
    %257 = arith.addf %256, %255 : vector<8x128xf32>
    %258 = arith.divf %256, %257 : vector<8x128xf32>
    %259 = vector.extract_strided_slice %239 {offsets = [0, 256], sizes = [8, 128], strides = [1, 1]} : vector<8x384xf32> to vector<8x128xf32>
    %260 = vector.extract_strided_slice %242 {offsets = [0, 256], sizes = [8, 128], strides = [1, 1]} : vector<8x384xf32> to vector<8x128xf32>
    %261 = arith.mulf %250, %260 : vector<8x128xf32>
    %262 = arith.addf %259, %261 : vector<8x128xf32>
    %263 = math.tanh %262 : vector<8x128xf32>
    %cst_52 = arith.constant 1.000000e+00 : f32
    %264 = vector.broadcast %cst_52 : f32 to vector<8x128xf32>
    %265 = arith.subf %264, %258 : vector<8x128xf32>
    %266 = arith.mulf %265, %263 : vector<8x128xf32>
    %267 = arith.mulf %258, %210 : vector<8x128xf32>
    %268 = arith.addf %266, %267 : vector<8x128xf32>
    %269 = tpu.concatenate %268, %236 in 1 : vector<8x128xf32>, vector<8x128xf32> -> vector<8x256xf32>
    %cst_53 = arith.constant dense<0.000000e+00> : vector<8x512xf32>
    %270 = tpu.matmul %269, %2, %cst_53 {dimension_numbers = #tpu.dot_dimension_numbers<[1], [0], [0], [1], [0, 0, 1, 1], [], []>} : vector<8x256xf32>, vector<256x512xf32>, vector<8x512xf32> -> vector<8x512xf32>
    %271 = vector.broadcast %3 : vector<1x512xf32> to vector<8x512xf32>
    %272 = arith.addf %270, %271 : vector<8x512xf32>
    %273 = vector.extract_strided_slice %272 {offsets = [0, 0], sizes = [8, 128], strides = [1, 1]} : vector<8x512xf32> to vector<8x128xf32>
    %274 = arith.negf %273 : vector<8x128xf32>
    %275 = math.exp %274 : vector<8x128xf32>
    %cst_54 = arith.constant 1.000000e+00 : f32
    %276 = vector.broadcast %cst_54 : f32 to vector<8x128xf32>
    %277 = arith.addf %276, %275 : vector<8x128xf32>
    %278 = arith.divf %276, %277 : vector<8x128xf32>
    %279 = vector.extract_strided_slice %272 {offsets = [0, 128], sizes = [8, 128], strides = [1, 1]} : vector<8x512xf32> to vector<8x128xf32>
    %280 = arith.negf %279 : vector<8x128xf32>
    %281 = math.exp %280 : vector<8x128xf32>
    %cst_55 = arith.constant 1.000000e+00 : f32
    %282 = vector.broadcast %cst_55 : f32 to vector<8x128xf32>
    %283 = arith.addf %282, %281 : vector<8x128xf32>
    %284 = arith.divf %282, %283 : vector<8x128xf32>
    %285 = vector.extract_strided_slice %272 {offsets = [0, 256], sizes = [8, 128], strides = [1, 1]} : vector<8x512xf32> to vector<8x128xf32>
    %286 = vector.extract_strided_slice %272 {offsets = [0, 384], sizes = [8, 128], strides = [1, 1]} : vector<8x512xf32> to vector<8x128xf32>
    %287 = arith.mulf %278, %286 : vector<8x128xf32>
    %288 = arith.addf %285, %287 : vector<8x128xf32>
    %289 = math.tanh %288 : vector<8x128xf32>
    %cst_56 = arith.constant 1.000000e+00 : f32
    %290 = vector.broadcast %cst_56 : f32 to vector<8x128xf32>
    %291 = arith.subf %290, %284 : vector<8x128xf32>
    %292 = arith.mulf %291, %289 : vector<8x128xf32>
    %293 = arith.mulf %284, %236 : vector<8x128xf32>
    %294 = arith.addf %292, %293 : vector<8x128xf32>
    %c5_i32 = arith.constant 5 : i32
    %295 = arith.index_cast %c5_i32 : i32 to index
    %c0_57 = arith.constant 0 : index
    %c0_58 = arith.constant 0 : index
    %296 = vector.load %arg1[%295, %c0_57, %c0_58] : memref<8x8x384xf32, #tpu.memory_space<vmem>>, vector<1x8x384xf32>
    %297 = vector.shape_cast %296 : vector<1x8x384xf32> to vector<8x384xf32>
    %cst_59 = arith.constant dense<0.000000e+00> : vector<8x384xf32>
    %298 = tpu.matmul %268, %0, %cst_59 {dimension_numbers = #tpu.dot_dimension_numbers<[1], [0], [0], [1], [0, 0, 1, 1], [], []>} : vector<8x128xf32>, vector<128x384xf32>, vector<8x384xf32> -> vector<8x384xf32>
    %299 = vector.broadcast %1 : vector<1x384xf32> to vector<8x384xf32>
    %300 = arith.addf %298, %299 : vector<8x384xf32>
    %301 = vector.extract_strided_slice %297 {offsets = [0, 0], sizes = [8, 128], strides = [1, 1]} : vector<8x384xf32> to vector<8x128xf32>
    %302 = vector.extract_strided_slice %300 {offsets = [0, 0], sizes = [8, 128], strides = [1, 1]} : vector<8x384xf32> to vector<8x128xf32>
    %303 = arith.addf %301, %302 : vector<8x128xf32>
    %304 = arith.negf %303 : vector<8x128xf32>
    %305 = math.exp %304 : vector<8x128xf32>
    %cst_60 = arith.constant 1.000000e+00 : f32
    %306 = vector.broadcast %cst_60 : f32 to vector<8x128xf32>
    %307 = arith.addf %306, %305 : vector<8x128xf32>
    %308 = arith.divf %306, %307 : vector<8x128xf32>
    %309 = vector.extract_strided_slice %297 {offsets = [0, 128], sizes = [8, 128], strides = [1, 1]} : vector<8x384xf32> to vector<8x128xf32>
    %310 = vector.extract_strided_slice %300 {offsets = [0, 128], sizes = [8, 128], strides = [1, 1]} : vector<8x384xf32> to vector<8x128xf32>
    %311 = arith.addf %309, %310 : vector<8x128xf32>
    %312 = arith.negf %311 : vector<8x128xf32>
    %313 = math.exp %312 : vector<8x128xf32>
    %cst_61 = arith.constant 1.000000e+00 : f32
    %314 = vector.broadcast %cst_61 : f32 to vector<8x128xf32>
    %315 = arith.addf %314, %313 : vector<8x128xf32>
    %316 = arith.divf %314, %315 : vector<8x128xf32>
    %317 = vector.extract_strided_slice %297 {offsets = [0, 256], sizes = [8, 128], strides = [1, 1]} : vector<8x384xf32> to vector<8x128xf32>
    %318 = vector.extract_strided_slice %300 {offsets = [0, 256], sizes = [8, 128], strides = [1, 1]} : vector<8x384xf32> to vector<8x128xf32>
    %319 = arith.mulf %308, %318 : vector<8x128xf32>
    %320 = arith.addf %317, %319 : vector<8x128xf32>
    %321 = math.tanh %320 : vector<8x128xf32>
    %cst_62 = arith.constant 1.000000e+00 : f32
    %322 = vector.broadcast %cst_62 : f32 to vector<8x128xf32>
    %323 = arith.subf %322, %316 : vector<8x128xf32>
    %324 = arith.mulf %323, %321 : vector<8x128xf32>
    %325 = arith.mulf %316, %268 : vector<8x128xf32>
    %326 = arith.addf %324, %325 : vector<8x128xf32>
    %327 = tpu.concatenate %326, %294 in 1 : vector<8x128xf32>, vector<8x128xf32> -> vector<8x256xf32>
    %cst_63 = arith.constant dense<0.000000e+00> : vector<8x512xf32>
    %328 = tpu.matmul %327, %2, %cst_63 {dimension_numbers = #tpu.dot_dimension_numbers<[1], [0], [0], [1], [0, 0, 1, 1], [], []>} : vector<8x256xf32>, vector<256x512xf32>, vector<8x512xf32> -> vector<8x512xf32>
    %329 = vector.broadcast %3 : vector<1x512xf32> to vector<8x512xf32>
    %330 = arith.addf %328, %329 : vector<8x512xf32>
    %331 = vector.extract_strided_slice %330 {offsets = [0, 0], sizes = [8, 128], strides = [1, 1]} : vector<8x512xf32> to vector<8x128xf32>
    %332 = arith.negf %331 : vector<8x128xf32>
    %333 = math.exp %332 : vector<8x128xf32>
    %cst_64 = arith.constant 1.000000e+00 : f32
    %334 = vector.broadcast %cst_64 : f32 to vector<8x128xf32>
    %335 = arith.addf %334, %333 : vector<8x128xf32>
    %336 = arith.divf %334, %335 : vector<8x128xf32>
    %337 = vector.extract_strided_slice %330 {offsets = [0, 128], sizes = [8, 128], strides = [1, 1]} : vector<8x512xf32> to vector<8x128xf32>
    %338 = arith.negf %337 : vector<8x128xf32>
    %339 = math.exp %338 : vector<8x128xf32>
    %cst_65 = arith.constant 1.000000e+00 : f32
    %340 = vector.broadcast %cst_65 : f32 to vector<8x128xf32>
    %341 = arith.addf %340, %339 : vector<8x128xf32>
    %342 = arith.divf %340, %341 : vector<8x128xf32>
    %343 = vector.extract_strided_slice %330 {offsets = [0, 256], sizes = [8, 128], strides = [1, 1]} : vector<8x512xf32> to vector<8x128xf32>
    %344 = vector.extract_strided_slice %330 {offsets = [0, 384], sizes = [8, 128], strides = [1, 1]} : vector<8x512xf32> to vector<8x128xf32>
    %345 = arith.mulf %336, %344 : vector<8x128xf32>
    %346 = arith.addf %343, %345 : vector<8x128xf32>
    %347 = math.tanh %346 : vector<8x128xf32>
    %cst_66 = arith.constant 1.000000e+00 : f32
    %348 = vector.broadcast %cst_66 : f32 to vector<8x128xf32>
    %349 = arith.subf %348, %342 : vector<8x128xf32>
    %350 = arith.mulf %349, %347 : vector<8x128xf32>
    %351 = arith.mulf %342, %294 : vector<8x128xf32>
    %352 = arith.addf %350, %351 : vector<8x128xf32>
    %c6_i32 = arith.constant 6 : i32
    %353 = arith.index_cast %c6_i32 : i32 to index
    %c0_67 = arith.constant 0 : index
    %c0_68 = arith.constant 0 : index
    %354 = vector.load %arg1[%353, %c0_67, %c0_68] : memref<8x8x384xf32, #tpu.memory_space<vmem>>, vector<1x8x384xf32>
    %355 = vector.shape_cast %354 : vector<1x8x384xf32> to vector<8x384xf32>
    %cst_69 = arith.constant dense<0.000000e+00> : vector<8x384xf32>
    %356 = tpu.matmul %326, %0, %cst_69 {dimension_numbers = #tpu.dot_dimension_numbers<[1], [0], [0], [1], [0, 0, 1, 1], [], []>} : vector<8x128xf32>, vector<128x384xf32>, vector<8x384xf32> -> vector<8x384xf32>
    %357 = vector.broadcast %1 : vector<1x384xf32> to vector<8x384xf32>
    %358 = arith.addf %356, %357 : vector<8x384xf32>
    %359 = vector.extract_strided_slice %355 {offsets = [0, 0], sizes = [8, 128], strides = [1, 1]} : vector<8x384xf32> to vector<8x128xf32>
    %360 = vector.extract_strided_slice %358 {offsets = [0, 0], sizes = [8, 128], strides = [1, 1]} : vector<8x384xf32> to vector<8x128xf32>
    %361 = arith.addf %359, %360 : vector<8x128xf32>
    %362 = arith.negf %361 : vector<8x128xf32>
    %363 = math.exp %362 : vector<8x128xf32>
    %cst_70 = arith.constant 1.000000e+00 : f32
    %364 = vector.broadcast %cst_70 : f32 to vector<8x128xf32>
    %365 = arith.addf %364, %363 : vector<8x128xf32>
    %366 = arith.divf %364, %365 : vector<8x128xf32>
    %367 = vector.extract_strided_slice %355 {offsets = [0, 128], sizes = [8, 128], strides = [1, 1]} : vector<8x384xf32> to vector<8x128xf32>
    %368 = vector.extract_strided_slice %358 {offsets = [0, 128], sizes = [8, 128], strides = [1, 1]} : vector<8x384xf32> to vector<8x128xf32>
    %369 = arith.addf %367, %368 : vector<8x128xf32>
    %370 = arith.negf %369 : vector<8x128xf32>
    %371 = math.exp %370 : vector<8x128xf32>
    %cst_71 = arith.constant 1.000000e+00 : f32
    %372 = vector.broadcast %cst_71 : f32 to vector<8x128xf32>
    %373 = arith.addf %372, %371 : vector<8x128xf32>
    %374 = arith.divf %372, %373 : vector<8x128xf32>
    %375 = vector.extract_strided_slice %355 {offsets = [0, 256], sizes = [8, 128], strides = [1, 1]} : vector<8x384xf32> to vector<8x128xf32>
    %376 = vector.extract_strided_slice %358 {offsets = [0, 256], sizes = [8, 128], strides = [1, 1]} : vector<8x384xf32> to vector<8x128xf32>
    %377 = arith.mulf %366, %376 : vector<8x128xf32>
    %378 = arith.addf %375, %377 : vector<8x128xf32>
    %379 = math.tanh %378 : vector<8x128xf32>
    %cst_72 = arith.constant 1.000000e+00 : f32
    %380 = vector.broadcast %cst_72 : f32 to vector<8x128xf32>
    %381 = arith.subf %380, %374 : vector<8x128xf32>
    %382 = arith.mulf %381, %379 : vector<8x128xf32>
    %383 = arith.mulf %374, %326 : vector<8x128xf32>
    %384 = arith.addf %382, %383 : vector<8x128xf32>
    %385 = tpu.concatenate %384, %352 in 1 : vector<8x128xf32>, vector<8x128xf32> -> vector<8x256xf32>
    %cst_73 = arith.constant dense<0.000000e+00> : vector<8x512xf32>
    %386 = tpu.matmul %385, %2, %cst_73 {dimension_numbers = #tpu.dot_dimension_numbers<[1], [0], [0], [1], [0, 0, 1, 1], [], []>} : vector<8x256xf32>, vector<256x512xf32>, vector<8x512xf32> -> vector<8x512xf32>
    %387 = vector.broadcast %3 : vector<1x512xf32> to vector<8x512xf32>
    %388 = arith.addf %386, %387 : vector<8x512xf32>
    %389 = vector.extract_strided_slice %388 {offsets = [0, 0], sizes = [8, 128], strides = [1, 1]} : vector<8x512xf32> to vector<8x128xf32>
    %390 = arith.negf %389 : vector<8x128xf32>
    %391 = math.exp %390 : vector<8x128xf32>
    %cst_74 = arith.constant 1.000000e+00 : f32
    %392 = vector.broadcast %cst_74 : f32 to vector<8x128xf32>
    %393 = arith.addf %392, %391 : vector<8x128xf32>
    %394 = arith.divf %392, %393 : vector<8x128xf32>
    %395 = vector.extract_strided_slice %388 {offsets = [0, 128], sizes = [8, 128], strides = [1, 1]} : vector<8x512xf32> to vector<8x128xf32>
    %396 = arith.negf %395 : vector<8x128xf32>
    %397 = math.exp %396 : vector<8x128xf32>
    %cst_75 = arith.constant 1.000000e+00 : f32
    %398 = vector.broadcast %cst_75 : f32 to vector<8x128xf32>
    %399 = arith.addf %398, %397 : vector<8x128xf32>
    %400 = arith.divf %398, %399 : vector<8x128xf32>
    %401 = vector.extract_strided_slice %388 {offsets = [0, 256], sizes = [8, 128], strides = [1, 1]} : vector<8x512xf32> to vector<8x128xf32>
    %402 = vector.extract_strided_slice %388 {offsets = [0, 384], sizes = [8, 128], strides = [1, 1]} : vector<8x512xf32> to vector<8x128xf32>
    %403 = arith.mulf %394, %402 : vector<8x128xf32>
    %404 = arith.addf %401, %403 : vector<8x128xf32>
    %405 = math.tanh %404 : vector<8x128xf32>
    %cst_76 = arith.constant 1.000000e+00 : f32
    %406 = vector.broadcast %cst_76 : f32 to vector<8x128xf32>
    %407 = arith.subf %406, %400 : vector<8x128xf32>
    %408 = arith.mulf %407, %405 : vector<8x128xf32>
    %409 = arith.mulf %400, %352 : vector<8x128xf32>
    %410 = arith.addf %408, %409 : vector<8x128xf32>
    %c7_i32 = arith.constant 7 : i32
    %411 = arith.index_cast %c7_i32 : i32 to index
    %c0_77 = arith.constant 0 : index
    %c0_78 = arith.constant 0 : index
    %412 = vector.load %arg1[%411, %c0_77, %c0_78] : memref<8x8x384xf32, #tpu.memory_space<vmem>>, vector<1x8x384xf32>
    %413 = vector.shape_cast %412 : vector<1x8x384xf32> to vector<8x384xf32>
    %cst_79 = arith.constant dense<0.000000e+00> : vector<8x384xf32>
    %414 = tpu.matmul %384, %0, %cst_79 {dimension_numbers = #tpu.dot_dimension_numbers<[1], [0], [0], [1], [0, 0, 1, 1], [], []>} : vector<8x128xf32>, vector<128x384xf32>, vector<8x384xf32> -> vector<8x384xf32>
    %415 = vector.broadcast %1 : vector<1x384xf32> to vector<8x384xf32>
    %416 = arith.addf %414, %415 : vector<8x384xf32>
    %417 = vector.extract_strided_slice %413 {offsets = [0, 0], sizes = [8, 128], strides = [1, 1]} : vector<8x384xf32> to vector<8x128xf32>
    %418 = vector.extract_strided_slice %416 {offsets = [0, 0], sizes = [8, 128], strides = [1, 1]} : vector<8x384xf32> to vector<8x128xf32>
    %419 = arith.addf %417, %418 : vector<8x128xf32>
    %420 = arith.negf %419 : vector<8x128xf32>
    %421 = math.exp %420 : vector<8x128xf32>
    %cst_80 = arith.constant 1.000000e+00 : f32
    %422 = vector.broadcast %cst_80 : f32 to vector<8x128xf32>
    %423 = arith.addf %422, %421 : vector<8x128xf32>
    %424 = arith.divf %422, %423 : vector<8x128xf32>
    %425 = vector.extract_strided_slice %413 {offsets = [0, 128], sizes = [8, 128], strides = [1, 1]} : vector<8x384xf32> to vector<8x128xf32>
    %426 = vector.extract_strided_slice %416 {offsets = [0, 128], sizes = [8, 128], strides = [1, 1]} : vector<8x384xf32> to vector<8x128xf32>
    %427 = arith.addf %425, %426 : vector<8x128xf32>
    %428 = arith.negf %427 : vector<8x128xf32>
    %429 = math.exp %428 : vector<8x128xf32>
    %cst_81 = arith.constant 1.000000e+00 : f32
    %430 = vector.broadcast %cst_81 : f32 to vector<8x128xf32>
    %431 = arith.addf %430, %429 : vector<8x128xf32>
    %432 = arith.divf %430, %431 : vector<8x128xf32>
    %433 = vector.extract_strided_slice %413 {offsets = [0, 256], sizes = [8, 128], strides = [1, 1]} : vector<8x384xf32> to vector<8x128xf32>
    %434 = vector.extract_strided_slice %416 {offsets = [0, 256], sizes = [8, 128], strides = [1, 1]} : vector<8x384xf32> to vector<8x128xf32>
    %435 = arith.mulf %424, %434 : vector<8x128xf32>
    %436 = arith.addf %433, %435 : vector<8x128xf32>
    %437 = math.tanh %436 : vector<8x128xf32>
    %cst_82 = arith.constant 1.000000e+00 : f32
    %438 = vector.broadcast %cst_82 : f32 to vector<8x128xf32>
    %439 = arith.subf %438, %432 : vector<8x128xf32>
    %440 = arith.mulf %439, %437 : vector<8x128xf32>
    %441 = arith.mulf %432, %384 : vector<8x128xf32>
    %442 = arith.addf %440, %441 : vector<8x128xf32>
    %443 = tpu.concatenate %442, %410 in 1 : vector<8x128xf32>, vector<8x128xf32> -> vector<8x256xf32>
    %cst_83 = arith.constant dense<0.000000e+00> : vector<8x512xf32>
    %444 = tpu.matmul %443, %2, %cst_83 {dimension_numbers = #tpu.dot_dimension_numbers<[1], [0], [0], [1], [0, 0, 1, 1], [], []>} : vector<8x256xf32>, vector<256x512xf32>, vector<8x512xf32> -> vector<8x512xf32>
    %445 = vector.broadcast %3 : vector<1x512xf32> to vector<8x512xf32>
    %446 = arith.addf %444, %445 : vector<8x512xf32>
    %447 = vector.extract_strided_slice %446 {offsets = [0, 0], sizes = [8, 128], strides = [1, 1]} : vector<8x512xf32> to vector<8x128xf32>
    %448 = arith.negf %447 : vector<8x128xf32>
    %449 = math.exp %448 : vector<8x128xf32>
    %cst_84 = arith.constant 1.000000e+00 : f32
    %450 = vector.broadcast %cst_84 : f32 to vector<8x128xf32>
    %451 = arith.addf %450, %449 : vector<8x128xf32>
    %452 = arith.divf %450, %451 : vector<8x128xf32>
    %453 = vector.extract_strided_slice %446 {offsets = [0, 128], sizes = [8, 128], strides = [1, 1]} : vector<8x512xf32> to vector<8x128xf32>
    %454 = arith.negf %453 : vector<8x128xf32>
    %455 = math.exp %454 : vector<8x128xf32>
    %cst_85 = arith.constant 1.000000e+00 : f32
    %456 = vector.broadcast %cst_85 : f32 to vector<8x128xf32>
    %457 = arith.addf %456, %455 : vector<8x128xf32>
    %458 = arith.divf %456, %457 : vector<8x128xf32>
    %459 = vector.extract_strided_slice %446 {offsets = [0, 256], sizes = [8, 128], strides = [1, 1]} : vector<8x512xf32> to vector<8x128xf32>
    %460 = vector.extract_strided_slice %446 {offsets = [0, 384], sizes = [8, 128], strides = [1, 1]} : vector<8x512xf32> to vector<8x128xf32>
    %461 = arith.mulf %452, %460 : vector<8x128xf32>
    %462 = arith.addf %459, %461 : vector<8x128xf32>
    %463 = math.tanh %462 : vector<8x128xf32>
    %cst_86 = arith.constant 1.000000e+00 : f32
    %464 = vector.broadcast %cst_86 : f32 to vector<8x128xf32>
    %465 = arith.subf %464, %458 : vector<8x128xf32>
    %466 = arith.mulf %465, %463 : vector<8x128xf32>
    %467 = arith.mulf %458, %410 : vector<8x128xf32>
    %468 = arith.addf %466, %467 : vector<8x128xf32>
    %c8_i32 = arith.constant 8 : i32
    %c0_87 = arith.constant 0 : index
    %c0_88 = arith.constant 0 : index
    %469 = vector.load %arg6[%c0_87, %c0_88] : memref<128x1xf32, #tpu.memory_space<vmem>>, vector<128x1xf32>
    %cst_89 = arith.constant dense<0.000000e+00> : vector<8x1xf32>
    %470 = tpu.matmul %468, %469, %cst_89 {dimension_numbers = #tpu.dot_dimension_numbers<[1], [0], [0], [1], [0, 0, 1, 1], [], []>} : vector<8x128xf32>, vector<128x1xf32>, vector<8x1xf32> -> vector<8x1xf32>
    %c0_90 = arith.constant 0 : index
    %c0_91 = arith.constant 0 : index
    %471 = vector.load %arg7[%c0_90, %c0_91] : memref<1x1xf32, #tpu.memory_space<vmem>>, vector<1x1xf32>
    %472 = vector.broadcast %471 : vector<1x1xf32> to vector<8x1xf32>
    %473 = arith.addf %470, %472 : vector<8x1xf32>
    %c0_92 = arith.constant 0 : index
    %c0_93 = arith.constant 0 : index
    %474 = vector.load %arg8[%c0_92, %c0_93] : memref<8x1xf32, #tpu.memory_space<vmem>>, vector<8x1xf32>
    tpu.vector_store %arg8[%c0_92, %c0_93], %473 {strides = array<i32>} : memref<8x1xf32, #tpu.memory_space<vmem>>, vector<8x1xf32>,
    return
  }
  func.func @transform_0(%arg0: i32) -> (i32, i32, i32) {
    %c0_i32 = arith.constant 0 : i32
    %c0_i32_0 = arith.constant 0 : i32
    %c0_i32_1 = arith.constant 0 : i32
    return %c0_i32, %arg0, %c0_i32_0 : i32, i32, i32
  }
  func.func @transform_1(%arg0: i32) -> (i32, i32) {
    %c0_i32 = arith.constant 0 : i32
    %c0_i32_0 = arith.constant 0 : i32
    %c0_i32_1 = arith.constant 0 : i32
    return %c0_i32, %c0_i32_0 : i32, i32
  }
  func.func @transform_2(%arg0: i32) -> (i32, i32) {
    %c0_i32 = arith.constant 0 : i32
    %c0_i32_0 = arith.constant 0 : i32
    %c0_i32_1 = arith.constant 0 : i32
    return %c0_i32, %c0_i32_0 : i32, i32
  }
  func.func @transform_3(%arg0: i32) -> (i32, i32) {
    %c0_i32 = arith.constant 0 : i32
    %c0_i32_0 = arith.constant 0 : i32
    %c0_i32_1 = arith.constant 0 : i32
    return %c0_i32, %c0_i32_0 : i32, i32
  }
  func.func @transform_4(%arg0: i32) -> (i32, i32) {
    %c0_i32 = arith.constant 0 : i32
    %c0_i32_0 = arith.constant 0 : i32
    %c0_i32_1 = arith.constant 0 : i32
    return %c0_i32, %c0_i32_0 : i32, i32
  }
  func.func @transform_5(%arg0: i32) -> (i32, i32) {
    %c0_i32 = arith.constant 0 : i32
    %c0_i32_0 = arith.constant 0 : i32
    %c0_i32_1 = arith.constant 0 : i32
    return %c0_i32, %c0_i32_0 : i32, i32
  }
  func.func @transform_6(%arg0: i32) -> (i32, i32) {
    %c0_i32 = arith.constant 0 : i32
    %c0_i32_0 = arith.constant 0 : i32
    %c0_i32_1 = arith.constant 0 : i32
    return %c0_i32, %c0_i32_0 : i32, i32
  }
  func.func @transform_7(%arg0: i32) -> (i32, i32) {
    %c0_i32 = arith.constant 0 : i32
    %c0_i32_0 = arith.constant 0 : i32
    return %arg0, %c0_i32 : i32, i32
  }
}

</mosaic_0001>

<bundles_post_ra>
// kernel: tpu_custom_call.1
= control target key start
LH: loop header
LB: loop body
LE: loop exit
PB: predicated region body
PF: predicated region fallthrough
CT: control target
= control target key end

     0   :  { %s6808_s0 = inlined_call_operand.hbm [shape: f32[8,8,384], index: 0, kind: input, shape index: {}]   ;;  %s6809_s1 = inlined_call_operand.hbm [shape: f32[128,384], index: 1, kind: input, shape index: {}]   ;;  %s6810_s2 = inlined_call_operand.vmem [shape: f32[1,384], index: 2, kind: input, shape index: {}]   ;;  %s6811_s3 = inlined_call_operand.hbm [shape: f32[256,512], index: 3, kind: input, shape index: {}]   ;;  %s6812_s4 = inlined_call_operand.vmem [shape: f32[1,512], index: 4, kind: input, shape index: {}]   ;;  %s6813_s5 = inlined_call_operand.vmem [shape: f32[128,1], index: 5, kind: input, shape index: {}]   ;;  %s6814_s6 = inlined_call_operand.<no memory space> [shape: f32[1,1], index: 6, kind: input, shape index: {}]   ;;  %s6815_s7 = inlined_call_operand.vmem [shape: f32[8,1], index: 7, kind: output, shape index: {}]  }
   0x1   :  { %v12_v0 = vstv %s6814_s6 }
   0x2   :  { %13 = vst [vmem:[#allocation2] sm:$0x1] %v12_v0 }
   0x3   :  { %14 = vsyncpa [#allocation4], 0 }
   0x4   :  { %15 = vsyncpa [#allocation6], 0  ;;  %s33_s28 = sshll.u32 %s6809_s1, 4  ;;  %s3649_s29 = smov [#allocation5]   ;;  %s34_s28 = int_to_ptr.hbm [resolvable:$true] %s33_s28 }
   0x5   :  { %s35_s30 = sshll.u32 %s3649_s29, 4  ;;  %s20_s10 = sshll.u32 %s6808_s0, 4  ;;  %s36_s30 = int_to_ptr.vmem [resolvable:$true] %s35_s30  ;;  %s21_s10 = int_to_ptr.hbm [resolvable:$true] %s20_s10 }
   0x6   :  { %s3650_s11 = smov 384   ;;  %s3651_s12 = smov 24  }
   0x7   :  { %41 = dma.hbm_to_vmem [thread:$0]  %s34_s28, 6144, %s36_s30, [#allocation6], %s3650_s11, %s3650_s11, %s3651_s12  }
   0x8   :  { %s3652_s6 = smov [#allocation3]   ;;  %s48_s16 = sshll.u32 %s6811_s3, 4  ;;  %s49_s16 = int_to_ptr.hbm [resolvable:$true] %s48_s16 }
   0x9   :  { %s22_s13 = sshll.u32 %s3652_s6, 4  ;;  %s3653_s1 = smov [#allocation7]   ;;  %s23_s13 = int_to_ptr.vmem [resolvable:$true] %s22_s13 }
   0xa   :  { %28 = dma.hbm_to_vmem [thread:$0]  %s21_s10, 3072, %s23_s13, [#allocation4], %s3650_s11, %s3650_s11, %s3651_s12  }
   0xb   :  { %s50_s17 = sshll.u32 %s3653_s1, 4  ;;  %s3654_s18 = smov 512   ;;  %s51_s17 = int_to_ptr.vmem [resolvable:$true] %s50_s17 }
   0xc   :  { %s3655_s19 = smov 32  }
   0xd   :  { %56 = dma.hbm_to_vmem [thread:$0]  %s49_s16, 16384, %s51_s17, [#allocation6], %s3654_s18, %s3654_s18, %s3655_s19  }
   0xe   :  { %3645 = dma.done.wait [#allocation4], 3072  }
   0xf   :  { %3646 = vsyncadd [#allocation4], 4294964224 }
  0x10   :  { %3647 = dma.done.wait [#allocation6], 22528  }
  0x11   :  { %3648 = vsyncadd [#allocation6], 4294944768  ;;  %v3709_v1 = vld [vmem:[#allocation5 + $0x168] sm:$0xff]  ;;  %v3711_v2 = vld [vmem:[#allocation5 + $0x170] sm:$0xff]  ;;  %v6816_v48 = vmov 0.0  }
  0x12   :  { %v3713_v3 = vld [vmem:[#allocation5 + $0x150] sm:$0xff]  ;;  %263 = vmatpush.msra.mxu0 %v3709_v1  ;;  %283 = vmatpush.msra.mxu1 %v3711_v2  ;;  %v3717_v4 = vld [vmem:[#allocation5 + $0x158] sm:$0xff]  ;;  %v3721_v6 = vld [vmem:[#allocation5 + $0x140] sm:$0xff] }
  0x13   :  { %v3719_v5 = vld [vmem:[#allocation5 + $0x138] sm:$0xff]  ;;  %v3725_v7 = vld [vmem:[#allocation5 + $0x120] sm:$0xff]  ;;  %v3727_v8 = vld [vmem:[#allocation5 + $0x128] sm:$0xff] }
  0x14   :  { %264 = vmatpush.msra.mxu0 %v3713_v3  ;;  %284 = vmatpush.msra.mxu1 %v3717_v4  ;;  %7341 = vst [vmem:[#allocation10_spill] sm:$0xff] %v3725_v7  ;;  %v3731_v9 = vld [vmem:[#allocation5 + $0x108] sm:$0xff]  ;;  %v3733_v10 = vld [vmem:[#allocation5 + $0x110] sm:$0xff]  ;;  %v3739_v12 = vld [vmem:[#allocation5 + $0xf8] sm:$0xff] }
  0x15   :  { %7342 = vst [vmem:[#allocation11_spill] sm:$0xff] %v3731_v9  ;;  %v3737_v11 = vld [vmem:[#allocation5 + $0xf0] sm:$0xff]  ;;  %v3741_v13 = vld [vmem:[#allocation5 + $0x178] sm:$0xff]  ;;  %v3745_v14 = vld [vmem:[#allocation5 + $0x160] sm:$0xff] }
  0x16   :  { %265 = vmatpush.msra.mxu0 %v3719_v5  ;;  %285 = vmatpush.msra.mxu1 %v3721_v6  ;;  %7343 = vst [vmem:[#allocation12_spill] sm:$0xff] %v3737_v11  ;;  %v3747_v15 = vld [vmem:[#allocation5 + $0xd8] sm:$0xff]  ;;  %v3749_v16 = vld [vmem:[#allocation5 + $0xe0] sm:$0xff]  ;;  %v3754_v17 = vld [vmem:[#allocation5 + $0x148] sm:$0xff] }
  0x17   :  { %7344 = vst [vmem:[#allocation13_spill] sm:$0xff] %v3747_v15  ;;  %303 = vmatpush.msra.mxu2 %v3741_v13  ;;  %v3756_v18 = vld [vmem:[#allocation5 + $0xc0] sm:$0xff]  ;;  %v3758_v19 = vld [vmem:[#allocation5 + $0xc8] sm:$0xff]  ;;  %v3763_v20 = vld [vmem:[#allocation5 + $0x130] sm:$0xff] }
  0x18   :  { %266 = vmatpush.msra.mxu0 %v3725_v7  ;;  %286 = vmatpush.msra.mxu1 %v3727_v8  ;;  %7345 = vst [vmem:[#allocation14_spill] sm:$0xff] %v3756_v18  ;;  %v3765_v21 = vld [vmem:[#allocation5 + $0xa8] sm:$0xff]  ;;  %v3767_v22 = vld [vmem:[#allocation5 + $0xb0] sm:$0xff]  ;;  %v3772_v23 = vld [vmem:[#allocation5 + $0x118] sm:$0xff] }
  0x19   :  { %304 = vmatpush.msra.mxu2 %v3745_v14  ;;  %7346 = vst [vmem:[#allocation15_spill] sm:$0xff] %v3763_v20  ;;  %v3774_v24 = vld [vmem:[#allocation5 + $0x90] sm:$0xff]  ;;  %v3776_v25 = vld [vmem:[#allocation5 + $0x98] sm:$0xff]  ;;  %v3781_v26 = vld [vmem:[#allocation5 + $0x100] sm:$0xff] }
  0x1a   :  { %267 = vmatpush.msra.mxu0 %v3731_v9  ;;  %287 = vmatpush.msra.mxu1 %v3733_v10  ;;  %7347 = vst [vmem:[#allocation16_spill] sm:$0xff] %v3765_v21  ;;  %v3783_v27 = vld [vmem:[#allocation5 + $0x78] sm:$0xff]  ;;  %v3785_v28 = vld [vmem:[#allocation5 + $0x80] sm:$0xff]  ;;  %v3790_v29 = vld [vmem:[#allocation5 + $0xe8] sm:$0xff] }
  0x1b   :  { %305 = vmatpush.msra.mxu2 %v3754_v17  ;;  %7348 = vst [vmem:[#allocation17_spill] sm:$0xff] %v3772_v23  ;;  %v3792_v30 = vld [vmem:[#allocation5 + $0x60] sm:$0xff]  ;;  %v3794_v31 = vld [vmem:[#allocation5 + $0x68] sm:$0xff]  ;;  %v3799_v32 = vld [vmem:[#allocation5 + $0xd0] sm:$0xff] }
  0x1c   :  { %268 = vmatpush.msra.mxu0 %v3737_v11  ;;  %288 = vmatpush.msra.mxu1 %v3739_v12  ;;  %7349 = vst [vmem:[#allocation18_spill] sm:$0xff] %v3774_v24  ;;  %v3801_v33 = vld [vmem:[#allocation5 + $0x48] sm:$0xff]  ;;  %v3803_v34 = vld [vmem:[#allocation5 + $0x50] sm:$0xff]  ;;  %v3808_v35 = vld [vmem:[#allocation5 + $0xb8] sm:$0xff] }
  0x1d   :  { %306 = vmatpush.msra.mxu2 %v3763_v20  ;;  %7350 = vst [vmem:[#allocation19_spill] sm:$0xff] %v3781_v26  ;;  %v3810_v36 = vld [vmem:[#allocation5 + $0x30] sm:$0xff]  ;;  %v3812_v37 = vld [vmem:[#allocation5 + $0x38] sm:$0xff]  ;;  %v3817_v38 = vld [vmem:[#allocation5 + $0xa0] sm:$0xff] }
  0x1e   :  { %269 = vmatpush.msra.mxu0 %v3747_v15  ;;  %289 = vmatpush.msra.mxu1 %v3749_v16  ;;  %7351 = vst [vmem:[#allocation20_spill] sm:$0xff] %v3783_v27  ;;  %v3819_v39 = vld [vmem:[#allocation5 + $0x18] sm:$0xff]  ;;  %v3821_v40 = vld [vmem:[#allocation5 + $0x20] sm:$0xff]  ;;  %v3826_v41 = vld [vmem:[#allocation5 + $0x88] sm:$0xff] }
  0x1f   :  { %307 = vmatpush.msra.mxu2 %v3772_v23  ;;  %7352 = vst [vmem:[#allocation21_spill] sm:$0xff] %v3790_v29  ;;  %v3828_v42 = vld [vmem:[#allocation5] sm:$0xff]  ;;  %v3830_v43 = vld [vmem:[#allocation5 + $0x8] sm:$0xff]  ;;  %v3836_v44 = vld [vmem:[#allocation5 + $0x70] sm:$0xff] }
  0x20   :  { %270 = vmatpush.msra.mxu0 %v3756_v18  ;;  %290 = vmatpush.msra.mxu1 %v3758_v19  ;;  %7353 = vst [vmem:[#allocation22_spill] sm:$0xff] %v3792_v30  ;;  %v3838_v45 = vld [vmem:[#allocation7 + $0x3e0] sm:$0xff]  ;;  %v3844_v47 = vld [vmem:[#allocation7 + $0x1e8] sm:$0xff]  ;;  %v3848_v49 = vld [vmem:[#allocation5 + $0x58] sm:$0xff] }
  0x21   :  { %308 = vmatpush.msra.mxu2 %v3781_v26  ;;  %7354 = vst [vmem:[#allocation23_spill] sm:$0xff] %v3799_v32  ;;  %v3842_v46 = vld [vmem:[#allocation7 + $0x1e0] sm:$0xff]  ;;  %v3856_v52 = vld [vmem:[#allocation7 + $0x1c8] sm:$0xff]  ;;  %v3882_v61 = vld [vmem:[#allocation5 + $0x10] sm:$0xff] }
  0x22   :  { %271 = vmatpush.msra.mxu0 %v3765_v21  ;;  %291 = vmatpush.msra.mxu1 %v3767_v22  ;;  %7355 = vst [vmem:[#allocation24_spill] sm:$0xff] %v3801_v33  ;;  %v3850_v50 = vld [vmem:[#allocation7 + $0x3c0] sm:$0xff]  ;;  %v3868_v56 = vld [vmem:[#allocation7 + $0x1a8] sm:$0xff]  ;;  %v4087_v26 = vld [vmem:[#allocation7 + $0x210] sm:$0xff] }
  0x23   :  { %309 = vmatpush.msra.mxu2 %v3790_v29  ;;  %7356 = vst [vmem:[#allocation25_spill] sm:$0xff] %v3808_v35  ;;  %v3854_v51 = vld [vmem:[#allocation7 + $0x1c0] sm:$0xff]  ;;  %379 = vmatpush.msra.mxu3 %v3842_v46  ;;  %v3870_v57 = vld [vmem:[#allocation5 + $0x28] sm:$0xff]  ;;  %v4075_v29 = vld [vmem:[#allocation7 + $0x230] sm:$0xff] }
  0x24   :  { %272 = vmatpush.msra.mxu0 %v3774_v24  ;;  %292 = vmatpush.msra.mxu1 %v3776_v25  ;;  %7357 = vst [vmem:[#allocation26_spill] sm:$0xff] %v3810_v36  ;;  %v3858_v53 = vld [vmem:[#allocation5 + $0x40] sm:$0xff]  ;;  %v3880_v60 = vld [vmem:[#allocation7 + $0x188] sm:$0xff]  ;;  %v4089_v11 = vld [vmem:[#allocation7 + $0x1f0] sm:$0xff] }
  0x25   :  { %310 = vmatpush.msra.mxu2 %v3799_v32  ;;  %7358 = vst [vmem:[#allocation27_spill] sm:$0xff] %v3817_v38  ;;  %v3860_v54 = vld [vmem:[#allocation7 + $0x3a0] sm:$0xff]  ;;  %380 = vmatpush.msra.mxu3 %v3854_v51  ;;  %v4063_v32 = vld [vmem:[#allocation7 + $0x250] sm:$0xff]  ;;  %v4091_v23 = vld [vmem:[#allocation7 + $0x1f8] sm:$0xff] }
  0x26   :  { %273 = vmatpush.msra.mxu0 %v3783_v27  ;;  %293 = vmatpush.msra.mxu1 %v3785_v28  ;;  %7359 = vst [vmem:[#allocation28_spill] sm:$0xff] %v3819_v39  ;;  %v3866_v55 = vld [vmem:[#allocation7 + $0x1a0] sm:$0xff]  ;;  %v4105_v9 = vld [vmem:[#allocation7 + $0x208] sm:$0xff]  ;;  %v4186_v7 = vld [vmem:[#allocation7 + $0x338] sm:$0xff] }
  0x27   :  { %311 = vmatpush.msra.mxu2 %v3808_v35  ;;  %7360 = vst [vmem:[#allocation29_spill] sm:$0xff] %v3826_v41  ;;  %v3872_v58 = vld [vmem:[#allocation7 + $0x380] sm:$0xff]  ;;  %381 = vmatpush.msra.mxu3 %v3866_v55  ;;  %v4051_v35 = vld [vmem:[#allocation7 + $0x270] sm:$0xff] }
  0x28   :  { %274 = vmatpush.msra.mxu0 %v3792_v30  ;;  %294 = vmatpush.msra.mxu1 %v3794_v31  ;;  %7361 = vst [vmem:[#allocation30_spill] sm:$0xff] %v3828_v42  ;;  %v3878_v59 = vld [vmem:[#allocation7 + $0x180] sm:$0xff] }
  0x29   :  { %312 = vmatpush.msra.mxu2 %v3817_v38  ;;  %7362 = vst [vmem:[#allocation31_spill] sm:$0xff] %v3836_v44  ;;  %v3884_v62 = vld [vmem:[#allocation7 + $0x360] sm:$0xff]  ;;  %382 = vmatpush.msra.mxu3 %v3878_v59  ;;  %v4039_v38 = vld [vmem:[#allocation7 + $0x290] sm:$0xff] }
  0x2a   :  { %275 = vmatpush.msra.mxu0 %v3801_v33  ;;  %295 = vmatpush.msra.mxu1 %v3803_v34  ;;  %7363 = vst [vmem:[#allocation32_spill] sm:$0xff] %v3838_v45  ;;  %v3890_v63 = vld [vmem:[#allocation7 + $0x160] sm:$0xff] }
  0x2b   :  { %313 = vmatpush.msra.mxu2 %v3826_v41  ;;  %7364 = vst [vmem:[#allocation33_spill] sm:$0xff] %v3848_v49  ;;  %v3892_v0 = vld [vmem:[#allocation7 + $0x340] sm:$0xff]  ;;  %383 = vmatpush.msra.mxu3 %v3890_v63  ;;  %v4027_v41 = vld [vmem:[#allocation7 + $0x2b0] sm:$0xff] }
  0x2c   :  { %276 = vmatpush.msra.mxu0 %v3810_v36  ;;  %296 = vmatpush.msra.mxu1 %v3812_v37  ;;  %7365 = vst [vmem:[#allocation34_spill] sm:$0xff] %v3850_v50  ;;  %v3934_v36 = vld [vmem:[#allocation7 + $0x2c0] sm:$0xff] }
  0x2d   :  { %314 = vmatpush.msra.mxu2 %v3836_v44  ;;  %7366 = vst [vmem:[#allocation35_spill] sm:$0xff] %v3858_v53  ;;  %v4007_v33 = vld [vmem:[#allocation7 + $0xc0] sm:$0xff]  ;;  %v4015_v44 = vld [vmem:[#allocation7 + $0x2d0] sm:$0xff] }
  0x2e   :  { %277 = vmatpush.msra.mxu0 %v3819_v39  ;;  %297 = vmatpush.msra.mxu1 %v3821_v40  ;;  %7367 = vst [vmem:[#allocation36_spill] sm:$0xff] %v3860_v54  ;;  %v3919_v39 = vld [vmem:[#allocation7 + $0x3a8] sm:$0xff]  ;;  %v4019_v30 = vld [vmem:[#allocation7 + $0xa0] sm:$0xff] }
  0x2f   :  { %315 = vmatpush.msra.mxu2 %v3848_v49  ;;  %7368 = vst [vmem:[#allocation37_spill] sm:$0xff] %v3870_v57  ;;  %v3945_v49 = vld [vmem:[#allocation7 + $0x280] sm:$0xff] }
  0x30   :  { %278 = vmatpush.msra.mxu0 %v3828_v42  ;;  %298 = vmatpush.msra.mxu1 %v3830_v43  ;;  %7369 = vst [vmem:[#allocation38_spill] sm:$0xff] %v3872_v58  ;;  %v3907_v42 = vld [vmem:[#allocation7 + $0x3c8] sm:$0xff]  ;;  %v4031_v27 = vld [vmem:[#allocation7 + $0x80] sm:$0xff] }
  0x31   :  { %279 = vmatmul.f32.vlgmr.msra.gmra.mxu0 %v6816_v48  ;;  %299 = vmatmul.f32.vlgmr.msra.gmra.mxu1 %v6816_v48  ;;  %7370 = vst [vmem:[#allocation39_spill] sm:$0xff] %v3882_v61  ;;  %v3894_v48 = vld [vmem:[#allocation7 + $0x3e8] sm:$0xff]  ;;  %v4043_v24 = vld [vmem:[#allocation7 + $0x60] sm:$0xff] }
  0x32   :  { %399 = vmatpush.msrb.mxu0 %v3838_v45  ;;  %419 = vmatpush.msrb.mxu1 %v3844_v47  ;;  %7371 = vst [vmem:[#allocation40_spill] sm:$0xff] %v3884_v62  ;;  %v7374_v45 = vmov 0.0   ;;  %v4055_v21 = vld [vmem:[#allocation7 + $0x40] sm:$0xff] }
  0x33   :  { %316 = vmatpush.msra.mxu2 %v3858_v53  ;;  %7372 = vst [vmem:[#allocation41_spill] sm:$0xff] %v3892_v0  ;;  %v3924_v53 = vld [vmem:[#allocation7 + $0x128] sm:$0xff]  ;;  %v4067_v18 = vld [vmem:[#allocation7 + $0x20] sm:$0xff] }
  0x34   :  { %400 = vmatpush.msrb.mxu0 %v3850_v50  ;;  %420 = vmatpush.msrb.mxu1 %v3856_v52  ;;  %7373 = vst [vmem:[#allocation42_spill] sm:$0xff] %v3894_v48  ;;  %v3902_v50 = vld [vmem:[#allocation7 + $0x140] sm:$0xff] }
  0x35   :  { %317 = vmatpush.msra.mxu2 %v3870_v57  ;;  %7376 = vst [vmem:[#allocation44_spill] sm:$0xff] %v3907_v42  ;;  %v3912_v57 = vld [vmem:[#allocation7 + $0x148] sm:$0xff]  ;;  %384 = vmatpush.msra.mxu3 %v3902_v50  ;;  %v4079_v15 = vld [vmem:[#allocation7] sm:$0xff] }
  0x36   :  { %401 = vmatpush.msrb.mxu0 %v3860_v54  ;;  %421 = vmatpush.msrb.mxu1 %v3868_v56  ;;  %v3900_v54 = vld [vmem:[#allocation7 + $0x168] sm:$0xff]  ;;  %7378 = vst [vmem:[#allocation46_spill] sm:$0xff] %v3919_v39  ;;  %v253_v20 = vld [vmem:[#allocation3] sm:$0xff] }
  0x37   :  { %318 = vmatpush.msra.mxu2 %v3882_v61  ;;  %v3914_v61 = vld [vmem:[#allocation7 + $0x120] sm:$0xff]  ;;  %7381 = vst [vmem:[#allocation49_spill] sm:$0xff] %v3934_v36 }
  0x38   :  { %402 = vmatpush.msrb.mxu0 %v3872_v58  ;;  %422 = vmatpush.msrb.mxu1 %v3880_v60  ;;  %v3905_v58 = vld [vmem:[#allocation7 + $0x320] sm:$0xff]  ;;  %7384 = vst [vmem:[#allocation52_spill] sm:$0xff] %v3945_v49 }
  0x39   :  { %319 = vmatmul.f32.vlgmr.msra.gmra.mxu2 %v7374_v45  ;;  %7375 = vst [vmem:[#allocation43_spill] sm:$0xff] %v3905_v58  ;;  %385 = vmatpush.msra.mxu3 %v3914_v61 }
  0x3a   :  { %403 = vmatpush.msrb.mxu0 %v3884_v62  ;;  %439 = vmatpush.msrb.mxu2 %v3894_v48  ;;  %v3916_v62 = vld [vmem:[#allocation7 + $0x300] sm:$0xff]  ;;  %v3929_v48 = vld [vmem:[#allocation7 + $0x388] sm:$0xff]  ;;  %7401 = vst [vmem:[#allocation69_spill] sm:$0xff] %v4015_v44 }
  0x3b   :  { %7377 = vst [vmem:[#allocation45_spill] sm:$0xff] %v3916_v62  ;;  %423 = vmatpush.msrb.mxu1 %v3900_v54 }
  0x3c   :  { %404 = vmatpush.msrb.mxu0 %v3892_v0  ;;  %440 = vmatpush.msrb.mxu2 %v3907_v42  ;;  %v3926_v0 = vld [vmem:[#allocation7 + $0x2e0] sm:$0xff]  ;;  %7380 = vst [vmem:[#allocation48_spill] sm:$0xff] %v3929_v48 }
  0x3d   :  { %7379 = vst [vmem:[#allocation47_spill] sm:$0xff] %v3926_v0  ;;  %424 = vmatpush.msrb.mxu1 %v3912_v57  ;;  %v3941_v42 = vld [vmem:[#allocation7 + $0x2a0] sm:$0xff] }
  0x3e   :  { %405 = vmatpush.msrb.mxu0 %v3905_v58  ;;  %441 = vmatpush.msrb.mxu2 %v3919_v39  ;;  %v3937_v58 = vld [vmem:[#allocation7 + $0x368] sm:$0xff]  ;;  %7383 = vst [vmem:[#allocation51_spill] sm:$0xff] %v3941_v42  ;;  %v3951_v39 = vld [vmem:[#allocation7 + $0x240] sm:$0xff] }
  0x3f   :  { %425 = vmatpush.msrb.mxu1 %v3924_v53  ;;  %7382 = vst [vmem:[#allocation50_spill] sm:$0xff] %v3937_v58 }
  0x40   :  { %406 = vmatpush.msrb.mxu0 %v3916_v62  ;;  %442 = vmatpush.msrb.mxu2 %v3929_v48  ;;  %v3948_v62 = vld [vmem:[#allocation7 + $0x260] sm:$0xff]  ;;  %7386 = vst [vmem:[#allocation54_spill] sm:$0xff] %v3951_v39 }
  0x41   :  { %7385 = vst [vmem:[#allocation53_spill] sm:$0xff] %v3948_v62  ;;  %v3957_v48 = vld [vmem:[#allocation7 + $0x200] sm:$0xff] }
  0x42   :  { %407 = vmatpush.msrb.mxu0 %v3926_v0  ;;  %443 = vmatpush.msrb.mxu2 %v3937_v58  ;;  %v3954_v0 = vld [vmem:[#allocation7 + $0x220] sm:$0xff]  ;;  %7388 = vst [vmem:[#allocation56_spill] sm:$0xff] %v3957_v48  ;;  %v3987_v58 = vld [vmem:[#allocation7 + $0x348] sm:$0xff] }
  0x43   :  { %7387 = vst [vmem:[#allocation55_spill] sm:$0xff] %v3954_v0 }
  0x44   :  { %408 = vmatpush.msrb.mxu0 %v3934_v36  ;;  %v3960_v36 = vld [vmem:[#allocation7 + $0x3f0] sm:$0xff]  ;;  %7396 = vst [vmem:[#allocation64_spill] sm:$0xff] %v3987_v58  ;;  %444 = vmatpush.msrb.mxu2 %v3987_v58  ;;  %v4009_v58 = vld [vmem:[#allocation7 + $0xc8] sm:$0xff] }
  0x45   :  { %7389 = vst [vmem:[#allocation57_spill] sm:$0xff] %v3960_v36 }
  0x46   :  { %409 = vmatpush.msrb.mxu0 %v3941_v42  ;;  %v3963_v42 = vld [vmem:[#allocation7 + $0x3d0] sm:$0xff]  ;;  %7403 = vst [vmem:[#allocation71_spill] sm:$0xff] %v4027_v41 }
  0x47   :  { %7390 = vst [vmem:[#allocation58_spill] sm:$0xff] %v3963_v42 }
  0x48   :  { %410 = vmatpush.msrb.mxu0 %v3945_v49  ;;  %v3966_v49 = vld [vmem:[#allocation7 + $0x3b0] sm:$0xff]  ;;  %7405 = vst [vmem:[#allocation73_spill] sm:$0xff] %v4039_v38 }
  0x49   :  { %7391 = vst [vmem:[#allocation59_spill] sm:$0xff] %v3966_v49 }
  0x4a   :  { %411 = vmatpush.msrb.mxu0 %v3948_v62  ;;  %v3970_v62 = vld [vmem:[#allocation7 + $0x390] sm:$0xff]  ;;  %7407 = vst [vmem:[#allocation75_spill] sm:$0xff] %v4051_v35 }
  0x4b   :  { %7392 = vst [vmem:[#allocation60_spill] sm:$0xff] %v3970_v62 }
  0x4c   :  { %412 = vmatpush.msrb.mxu0 %v3951_v39  ;;  %v3973_v39 = vld [vmem:[#allocation7 + $0x370] sm:$0xff]  ;;  %7409 = vst [vmem:[#allocation77_spill] sm:$0xff] %v4063_v32 }
  0x4d   :  { %7393 = vst [vmem:[#allocation61_spill] sm:$0xff] %v3973_v39 }
  0x4e   :  { %413 = vmatpush.msrb.mxu0 %v3954_v0  ;;  %v3976_v0 = vld [vmem:[#allocation7 + $0x350] sm:$0xff]  ;;  %7411 = vst [vmem:[#allocation79_spill] sm:$0xff] %v4075_v29 }
  0x4f   :  { %7394 = vst [vmem:[#allocation62_spill] sm:$0xff] %v3976_v0 }
  0x50   :  { %414 = vmatpush.msrb.mxu0 %v3957_v48  ;;  %v3979_v48 = vld [vmem:[#allocation7 + $0x330] sm:$0xff]  ;;  %7412 = vst [vmem:[#allocation80_spill] sm:$0xff] %v4079_v15 }
  0x51   :  { %415 = vmatmul.f32.vlgmr.msrb.gmra.mxu0 %v7374_v45  ;;  %7395 = vst [vmem:[#allocation63_spill] sm:$0xff] %v3979_v48 }
  0x52   :  { %479 = vmatpush.msra.mxu0 %v3960_v36  ;;  %v3983_v36 = vld [vmem:[#allocation7 + $0x100] sm:$0xff]  ;;  %7414 = vst [vmem:[#allocation82_spill] sm:$0xff] %v4087_v26 }
  0x53   :  { %386 = vmatpush.msra.mxu3 %v3983_v36  ;;  %7415 = vst [vmem:[#allocation83_spill] sm:$0xff] %v4089_v11 }
  0x54   :  { %480 = vmatpush.msra.mxu0 %v3963_v42  ;;  %v3985_v42 = vld [vmem:[#allocation7 + $0x108] sm:$0xff]  ;;  %7416 = vst [vmem:[#allocation84_spill] sm:$0xff] %v4091_v23 }
  0x55   :  { %426 = vmatpush.msrb.mxu1 %v3985_v42  ;;  %7420 = vst [vmem:[#allocation88_spill] sm:$0xff] %v4105_v9 }
  0x56   :  { %481 = vmatpush.msra.mxu0 %v3966_v49  ;;  %v4003_v49 = vld [vmem:[#allocation7 + $0x2f0] sm:$0xff]  ;;  %7439 = vst [vmem:[#allocation107_spill] sm:$0xff] %v4186_v7 }
  0x57   :  { %7399 = vst [vmem:[#allocation67_spill] sm:$0xff] %v4003_v49 }
  0x58   :  { %482 = vmatpush.msra.mxu0 %v3970_v62  ;;  %v3991_v62 = vld [vmem:[#allocation7 + $0x310] sm:$0xff] }
  0x59   :  { %7397 = vst [vmem:[#allocation65_spill] sm:$0xff] %v3991_v62 }
  0x5a   :  { %483 = vmatpush.msra.mxu0 %v3973_v39  ;;  %v3995_v39 = vld [vmem:[#allocation7 + $0xe0] sm:$0xff] }
  0x5b   :  { %387 = vmatpush.msra.mxu3 %v3995_v39 }
  0x5c   :  { %484 = vmatpush.msra.mxu0 %v3976_v0  ;;  %v3997_v0 = vld [vmem:[#allocation7 + $0xe8] sm:$0xff] }
  0x5d   :  { %427 = vmatpush.msrb.mxu1 %v3997_v0  ;;  %388 = vmatpush.msra.mxu3 %v4007_v33 }
  0x5e   :  { %485 = vmatpush.msra.mxu0 %v3979_v48  ;;  %v4001_v48 = vld [vmem:[#allocation7 + $0x328] sm:$0xff] }
  0x5f   :  { %7398 = vst [vmem:[#allocation66_spill] sm:$0xff] %v4001_v48  ;;  %445 = vmatpush.msrb.mxu2 %v4001_v48  ;;  %428 = vmatpush.msrb.mxu1 %v4009_v58  ;;  %v4021_v48 = vld [vmem:[#allocation7 + $0xa8] sm:$0xff] }
  0x60   :  { %486 = vmatpush.msra.mxu0 %v3991_v62  ;;  %v4011_v62 = vld [vmem:[#allocation7 + $0x308] sm:$0xff]  ;;  %389 = vmatpush.msra.mxu3 %v4019_v30 }
  0x61   :  { %7400 = vst [vmem:[#allocation68_spill] sm:$0xff] %v4011_v62  ;;  %446 = vmatpush.msrb.mxu2 %v4011_v62  ;;  %429 = vmatpush.msrb.mxu1 %v4021_v48  ;;  %v4033_v62 = vld [vmem:[#allocation7 + $0x88] sm:$0xff] }
  0x62   :  { %487 = vmatpush.msra.mxu0 %v4003_v49  ;;  %v4023_v49 = vld [vmem:[#allocation7 + $0x2e8] sm:$0xff]  ;;  %390 = vmatpush.msra.mxu3 %v4031_v27 }
  0x63   :  { %7402 = vst [vmem:[#allocation70_spill] sm:$0xff] %v4023_v49  ;;  %447 = vmatpush.msrb.mxu2 %v4023_v49  ;;  %430 = vmatpush.msrb.mxu1 %v4033_v62  ;;  %v4045_v49 = vld [vmem:[#allocation7 + $0x68] sm:$0xff] }
  0x64   :  { %488 = vmatpush.msra.mxu0 %v4015_v44  ;;  %v4035_v44 = vld [vmem:[#allocation7 + $0x2c8] sm:$0xff]  ;;  %391 = vmatpush.msra.mxu3 %v4043_v24 }
  0x65   :  { %7404 = vst [vmem:[#allocation72_spill] sm:$0xff] %v4035_v44  ;;  %448 = vmatpush.msrb.mxu2 %v4035_v44  ;;  %431 = vmatpush.msrb.mxu1 %v4045_v49  ;;  %v4057_v44 = vld [vmem:[#allocation7 + $0x48] sm:$0xff] }
  0x66   :  { %489 = vmatpush.msra.mxu0 %v4027_v41  ;;  %v4047_v41 = vld [vmem:[#allocation7 + $0x2a8] sm:$0xff]  ;;  %392 = vmatpush.msra.mxu3 %v4055_v21 }
  0x67   :  { %7406 = vst [vmem:[#allocation74_spill] sm:$0xff] %v4047_v41  ;;  %449 = vmatpush.msrb.mxu2 %v4047_v41  ;;  %432 = vmatpush.msrb.mxu1 %v4057_v44  ;;  %v4069_v41 = vld [vmem:[#allocation7 + $0x28] sm:$0xff] }
  0x68   :  { %490 = vmatpush.msra.mxu0 %v4039_v38  ;;  %v4059_v38 = vld [vmem:[#allocation7 + $0x288] sm:$0xff]  ;;  %393 = vmatpush.msra.mxu3 %v4067_v18 }
  0x69   :  { %7408 = vst [vmem:[#allocation76_spill] sm:$0xff] %v4059_v38  ;;  %450 = vmatpush.msrb.mxu2 %v4059_v38  ;;  %433 = vmatpush.msrb.mxu1 %v4069_v41  ;;  %v4081_v38 = vld [vmem:[#allocation7 + $0x8] sm:$0xff] }
  0x6a   :  { %491 = vmatpush.msra.mxu0 %v4051_v35  ;;  %v4071_v35 = vld [vmem:[#allocation7 + $0x268] sm:$0xff]  ;;  %394 = vmatpush.msra.mxu3 %v4079_v15  ;;  %v4101_v15 = vld [vmem:[#allocation7 + $0x1d8] sm:$0xff] }
  0x6b   :  { %7410 = vst [vmem:[#allocation78_spill] sm:$0xff] %v4071_v35  ;;  %451 = vmatpush.msrb.mxu2 %v4071_v35  ;;  %434 = vmatpush.msrb.mxu1 %v4081_v38  ;;  %v4099_v35 = vld [vmem:[#allocation7 + $0x1d0] sm:$0xff] }
  0x6c   :  { %492 = vmatpush.msra.mxu0 %v4063_v32  ;;  %v4083_v32 = vld [vmem:[#allocation7 + $0x248] sm:$0xff]  ;;  %459 = vmatpush.msrb.mxu3 %v4089_v11  ;;  %7418 = vst [vmem:[#allocation86_spill] sm:$0xff] %v4099_v35  ;;  %v4113_v11 = vld [vmem:[#allocation7 + $0x3f8] sm:$0xff] }
  0x6d   :  { %7413 = vst [vmem:[#allocation81_spill] sm:$0xff] %v4083_v32  ;;  %452 = vmatpush.msrb.mxu2 %v4083_v32  ;;  %499 = vmatpush.msra.mxu1 %v4091_v23  ;;  %v4111_v32 = vld [vmem:[#allocation7 + $0x1b8] sm:$0xff]  ;;  %v254_v23 = vld [vmem:[#allocation3 + $0x8] sm:$0xff] }
  0x6e   :  { %493 = vmatpush.msra.mxu0 %v4075_v29  ;;  %v4095_v29 = vld [vmem:[#allocation7 + $0x228] sm:$0xff]  ;;  %7419 = vst [vmem:[#allocation87_spill] sm:$0xff] %v4101_v15  ;;  %460 = vmatpush.msrb.mxu3 %v4099_v35  ;;  %v4123_v35 = vld [vmem:[#allocation7 + $0x3d8] sm:$0xff] }
  0x6f   :  { %7417 = vst [vmem:[#allocation85_spill] sm:$0xff] %v4095_v29  ;;  %453 = vmatpush.msrb.mxu2 %v4095_v29  ;;  %500 = vmatpush.msra.mxu1 %v4101_v15  ;;  %v4121_v29 = vld [vmem:[#allocation7 + $0x198] sm:$0xff] }
  0x70   :  { %494 = vmatpush.msra.mxu0 %v4087_v26  ;;  %v4109_v26 = vld [vmem:[#allocation7 + $0x1b0] sm:$0xff]  ;;  %7422 = vst [vmem:[#allocation90_spill] sm:$0xff] %v4111_v32  ;;  %v4154_v15 = vld [vmem:[#allocation7 + $0x138] sm:$0xff] }
  0x71   :  { %7421 = vst [vmem:[#allocation89_spill] sm:$0xff] %v4109_v26  ;;  %454 = vmatpush.msrb.mxu2 %v4105_v9  ;;  %461 = vmatpush.msrb.mxu3 %v4109_v26  ;;  %v4131_v9 = vld [vmem:[#allocation7 + $0x178] sm:$0xff] }
  0x72   :  { %608 = vmatpush.msrb.mxu0 %v3711_v2  ;;  %7423 = vst [vmem:[#allocation91_spill] sm:$0xff] %v4113_v11  ;;  %501 = vmatpush.msra.mxu1 %v4111_v32  ;;  %v4119_v2 = vld [vmem:[#allocation7 + $0x190] sm:$0xff]  ;;  %v4133_v26 = vld [vmem:[#allocation7 + $0x3b8] sm:$0xff] }
  0x73   :  { %7424 = vst [vmem:[#allocation92_spill] sm:$0xff] %v4119_v2  ;;  %519 = vmatpush.msra.mxu2 %v4113_v11  ;;  %462 = vmatpush.msrb.mxu3 %v4119_v2  ;;  %v4138_v32 = vld [vmem:[%s6810_s2] sm:$0x7] }
  0x74   :  { %609 = vmatpush.msrb.mxu0 %v3717_v4  ;;  %7425 = vst [vmem:[#allocation93_spill] sm:$0xff] %v4121_v29  ;;  %502 = vmatpush.msra.mxu1 %v4121_v29  ;;  %v4129_v4 = vld [vmem:[#allocation7 + $0x170] sm:$0xff]  ;;  %v4146_v11 = vld [vmem:[#allocation7 + $0x158] sm:$0xff] }
  0x75   :  { %7426 = vst [vmem:[#allocation94_spill] sm:$0xff] %v4123_v35  ;;  %520 = vmatpush.msra.mxu2 %v4123_v35  ;;  %463 = vmatpush.msrb.mxu3 %v4129_v4  ;;  %v4148_v2 = vld [vmem:[#allocation7 + $0x398] sm:$0xff]  ;;  %v4152_v29 = vld [vmem:[#allocation7 + $0x130] sm:$0xff]  ;;  %v4160_v35 = vperm.slane %v4138_v32, 1 }
  0x76   :  { %610 = vmatpush.msrb.mxu0 %v3721_v6  ;;  %7427 = vst [vmem:[#allocation95_spill] sm:$0xff] %v4129_v4  ;;  %503 = vmatpush.msra.mxu1 %v4131_v9  ;;  %v4144_v6 = vld [vmem:[#allocation7 + $0x150] sm:$0xff]  ;;  %v4164_v4 = vld [vmem:[#allocation7 + $0x378] sm:$0xff] }
  0x77   :  { %7428 = vst [vmem:[#allocation96_spill] sm:$0xff] %v4131_v9  ;;  %521 = vmatpush.msra.mxu2 %v4133_v26  ;;  %464 = vmatpush.msrb.mxu3 %v4144_v6  ;;  %v4174_v9 = vld [vmem:[#allocation7 + $0x358] sm:$0xff] }
  0x78   :  { %7429 = vst [vmem:[#allocation97_spill] sm:$0xff] %v4133_v26  ;;  %611 = vmatpush.msrb.mxu0 %v3727_v8  ;;  %v4157_v8 = vperm.slane %v4138_v32, 0  ;;  %504 = vmatpush.msra.mxu1 %v4146_v11  ;;  %v4172_v26 = vld [vmem:[#allocation7 + $0x118] sm:$0xff] }
  0x79   :  { %7430 = vst [vmem:[#allocation98_spill] sm:$0xff] %v4144_v6  ;;  %522 = vmatpush.msra.mxu2 %v4148_v2  ;;  %465 = vmatpush.msrb.mxu3 %v4152_v29 }
  0x7a   :  { %7431 = vst [vmem:[#allocation99_spill] sm:$0xff] %v4146_v11  ;;  %612 = vmatpush.msrb.mxu0 %v3733_v10  ;;  %505 = vmatpush.msra.mxu1 %v4154_v15  ;;  %v4170_v10 = vld [vmem:[#allocation7 + $0x110] sm:$0xff] }
  0x7b   :  { %7432 = vst [vmem:[#allocation100_spill] sm:$0xff] %v4148_v2  ;;  %523 = vmatpush.msra.mxu2 %v4164_v4  ;;  %466 = vmatpush.msrb.mxu3 %v4170_v10 }
  0x7c   :  { %7433 = vst [vmem:[#allocation101_spill] sm:$0xff] %v4152_v29  ;;  %613 = vmatpush.msrb.mxu0 %v3739_v12  ;;  %506 = vmatpush.msra.mxu1 %v4172_v26  ;;  %v4182_v29 = vld [vmem:[#allocation7 + $0xf0] sm:$0xff] }
  0x7d   :  { %7434 = vst [vmem:[#allocation102_spill] sm:$0xff] %v4154_v15  ;;  %v4184_v15 = vld [vmem:[#allocation7 + $0xf8] sm:$0xff]  ;;  %524 = vmatpush.msra.mxu2 %v4174_v9  ;;  %467 = vmatpush.msrb.mxu3 %v4182_v29 }
  0x7e   :  { %7435 = vst [vmem:[#allocation103_spill] sm:$0xff] %v4157_v8  ;;  %614 = vmatpush.msrb.mxu0 %v3749_v16  ;;  %507 = vmatpush.msra.mxu1 %v4184_v15 }
  0x7f   :  { %7436 = vst [vmem:[#allocation104_spill] sm:$0xff] %v4160_v35  ;;  %525 = vmatpush.msra.mxu2 %v4186_v7  ;;  %495 = vmatmul.f32.vlgmr.msra.gmra.mxu0 %v7374_v45 }
  0x80   :  { %7437 = vst [vmem:[#allocation105_spill] sm:$0xff] %v4164_v4  ;;  %615 = vmatpush.msrb.mxu0 %v3758_v19  ;;  %v4202_v19 = vld [vmem:[#allocation7 + $0xb0] sm:$0xff]  ;;  %455 = vmatmul.f32.vlgmr.msrb.gmra.mxu2 %v7374_v45 }
  0x81   :  { %7438 = vst [vmem:[#allocation106_spill] sm:$0xff] %v4174_v9 }
  0x82   :  { %616 = vmatpush.msrb.mxu0 %v3767_v22  ;;  %v4212_v22 = vld [vmem:[#allocation7 + $0x90] sm:$0xff] }
  0x84   :  { %617 = vmatpush.msrb.mxu0 %v3776_v25  ;;  %v4222_v25 = vld [vmem:[#allocation7 + $0x70] sm:$0xff] }
  0x85   :  { %7443 = vst [vmem:[#allocation111_spill] sm:$0xff] %v4222_v25 }
  0x86   :  { %618 = vmatpush.msrb.mxu0 %v3785_v28  ;;  %v4234_v28 = vld [vmem:[#allocation7 + $0x58] sm:$0xff] }
  0x88   :  { %619 = vmatpush.msrb.mxu0 %v3794_v31  ;;  %v4242_v31 = vld [vmem:[#allocation7 + $0x30] sm:$0xff] }
  0x8a   :  { %620 = vmatpush.msrb.mxu0 %v3803_v34  ;;  %v4254_v34 = vld [vmem:[#allocation7 + $0x10] sm:$0xff] }
  0x8b   :  { %7449 = vst [vmem:[#allocation117_spill] sm:$0xff] %v4254_v34 }
  0x8c   :  { %621 = vmatpush.msrb.mxu0 %v3812_v37  ;;  %v4267_v37 = vld [vmem:[#allocation7 + $0x238] sm:$0xff] }
  0x8d   :  { %7452 = vst [vmem:[#allocation120_spill] sm:$0xff] %v4267_v37 }
  0x8e   :  { %622 = vmatpush.msrb.mxu0 %v3821_v40 }
  0x90   :  { %623 = vmatpush.msrb.mxu0 %v3830_v43  ;;  %v4281_v43 = vperm.slane %v4138_v32, 2 }
  0x92   :  { %735 = vmatpush.msra.mxu0 %v3844_v47 }
  0x94   :  { %736 = vmatpush.msra.mxu0 %v3856_v52 }
  0x96   :  { %737 = vmatpush.msra.mxu0 %v3868_v56 }
  0x98   :  { %738 = vmatpush.msra.mxu0 %v3880_v60 }
  0x9a   :  { %739 = vmatpush.msra.mxu0 %v3900_v54 }
  0x9c   :  { %740 = vmatpush.msra.mxu0 %v3912_v57 }
  0x9e   :  { %741 = vmatpush.msra.mxu0 %v3924_v53 }
  0xa0   :  { %742 = vmatpush.msra.mxu0 %v3985_v42 }
  0xa2   :  { %743 = vmatpush.msra.mxu0 %v3997_v0 }
  0xa4   :  { %744 = vmatpush.msra.mxu0 %v4009_v58 }
  0xa6   :  { %745 = vmatpush.msra.mxu0 %v4021_v48  ;;  %v7471_v48 = vld [vmem:[#allocation93_spill] sm:$0xff] }
  0xa8   :  { %746 = vmatpush.msra.mxu0 %v4033_v62  ;;  %v7474_v62 = vld [vmem:[#allocation25_spill] sm:$0xff] }
  0xaa   :  { %747 = vmatpush.msra.mxu0 %v4045_v49  ;;  %v7472_v49 = vld [vmem:[#allocation16_spill] sm:$0xff] }
  0xac   :  { %748 = vmatpush.msra.mxu0 %v4057_v44  ;;  %v7470_v44 = vld [vmem:[#allocation23_spill] sm:$0xff] }
  0xae   :  { %v280_v6 = vpop.f32.mrf.mxu0  ;;  %v300_v11 = vpop.f32.mrf.mxu1  ;;  %749 = vmatpush.msra.mxu0 %v4069_v41  ;;  %v7469_v41 = vld [vmem:[#allocation89_spill] sm:$0xff] }
  0xaf   :  { %v281_v12 = vadd.f32 %v280_v6, %v4157_v8  ;;  %v301_v2 = vadd.f32 %v300_v11, %v4160_v35  ;;  %v4192_v11 = vld [vmem:[#allocation7 + $0xd0] sm:$0xff]  ;;  %v4194_v6 = vld [vmem:[#allocation7 + $0xd8] sm:$0xff] }
  0xb0   :  { %v4196_v8 = vld [vmem:[#allocation7 + $0x318] sm:$0xff]  ;;  %468 = vmatpush.msrb.mxu3 %v4192_v11  ;;  %508 = vmatpush.msra.mxu1 %v4194_v6 }
  0xb1   :  { %v323_v4 = vadd.f32 %v281_v12, %v253_v20  ;;  %v343_v16 = vadd.f32 %v301_v2, %v254_v23  ;;  %7440 = vst [vmem:[#allocation108_spill] sm:$0xff] %v4196_v8  ;;  %v4204_v20 = vld [vmem:[#allocation7 + $0xb8] sm:$0xff]  ;;  %526 = vmatpush.msra.mxu2 %v4196_v8  ;;  %750 = vmatpush.msra.mxu0 %v4081_v38  ;;  %v7467_v38 = vld [vmem:[#allocation90_spill] sm:$0xff] }
  0xb2   :  { %v4208_v23 = vld [vmem:[#allocation7 + $0x2f8] sm:$0xff]  ;;  %469 = vmatpush.msrb.mxu3 %v4202_v19  ;;  %509 = vmatpush.msra.mxu1 %v4204_v20 }
  0xb3   :  { %v2844_v35 = vmul.f32 -1.442695, %v323_v4  ;;  %v2845_v9 = vmul.f32 -1.442695, %v343_v16  ;;  %7441 = vst [vmem:[#allocation109_spill] sm:$0xff] %v4208_v23  ;;  %v4214_v2 = vld [vmem:[#allocation7 + $0x98] sm:$0xff]  ;;  %527 = vmatpush.msra.mxu2 %v4208_v23 }
  0xb4   :  { %v4216_v4 = vld [vmem:[#allocation7 + $0x2d8] sm:$0xff]  ;;  %470 = vmatpush.msrb.mxu3 %v4212_v22  ;;  %510 = vmatpush.msra.mxu1 %v4214_v2 }
  0xb5   :  { %2885 = vpow2.f32 %v2844_v35  ;;  %7442 = vst [vmem:[#allocation110_spill] sm:$0xff] %v4216_v4  ;;  %v4224_v35 = vld [vmem:[#allocation7 + $0x78] sm:$0xff]  ;;  %528 = vmatpush.msra.mxu2 %v4216_v4 }
  0xb6   :  { %2887 = vpow2.f32 %v2845_v9  ;;  %7444 = vst [vmem:[#allocation112_spill] sm:$0xff] %v4224_v35  ;;  %v4226_v12 = vld [vmem:[#allocation7 + $0x2b8] sm:$0xff]  ;;  %471 = vmatpush.msrb.mxu3 %v4222_v25  ;;  %v4232_v9 = vld [vmem:[#allocation7 + $0x50] sm:$0xff]  ;;  %511 = vmatpush.msra.mxu1 %v4224_v35 }
  0xb7   :  { %7445 = vst [vmem:[#allocation113_spill] sm:$0xff] %v4226_v12  ;;  %v4236_v16 = vld [vmem:[#allocation7 + $0x298] sm:$0xff]  ;;  %529 = vmatpush.msra.mxu2 %v4226_v12 }
  0xb8   :  { %7446 = vst [vmem:[#allocation114_spill] sm:$0xff] %v4236_v16  ;;  %472 = vmatpush.msrb.mxu3 %v4232_v9  ;;  %v4244_v4 = vld [vmem:[#allocation7 + $0x38] sm:$0xff]  ;;  %512 = vmatpush.msra.mxu1 %v4234_v28 }
  0xb9   :  { %7447 = vst [vmem:[#allocation115_spill] sm:$0xff] %v4244_v4  ;;  %530 = vmatpush.msra.mxu2 %v4236_v16  ;;  %v4248_v25 = vld [vmem:[#allocation7 + $0x278] sm:$0xff] }
  0xba   :  { %7448 = vst [vmem:[#allocation116_spill] sm:$0xff] %v4248_v25  ;;  %v4256_v12 = vld [vmem:[#allocation7 + $0x18] sm:$0xff]  ;;  %473 = vmatpush.msrb.mxu3 %v4242_v31  ;;  %513 = vmatpush.msra.mxu1 %v4244_v4 }
  0xbb   :  { %v2886_v23 = vpop.eup %2885  ;;  %7450 = vst [vmem:[#allocation118_spill] sm:$0xff] %v4256_v12  ;;  %531 = vmatpush.msra.mxu2 %v4248_v25 }
  0xbc   :  { %v2888_v8 = vpop.eup %2887  ;;  %v327_v7 = vadd.f32 1.0, %v2886_v23  ;;  %v4260_v23 = vld [vmem:[#allocation7 + $0x258] sm:$0xff]  ;;  %474 = vmatpush.msrb.mxu3 %v4254_v34  ;;  %514 = vmatpush.msra.mxu1 %v4256_v12 }
  0xbd   :  { %v4250_v35 = vadd.f32 1.0, %v2888_v8  ;;  %7451 = vst [vmem:[#allocation119_spill] sm:$0xff] %v4260_v23  ;;  %532 = vmatpush.msra.mxu2 %v4260_v23  ;;  %v4271_v8 = vld [vmem:[#allocation7 + $0x218] sm:$0xff] }
  0xbe   :  { %2889 = vrcp.f32 %v327_v7  ;;  %7453 = vst [vmem:[#allocation121_spill] sm:$0xff] %v4271_v8  ;;  %v339_v34 = vand.u32 2147483648, %v327_v7  ;;  %vm333_vm1 = vweird.f32 %v327_v7 }
  0xbf   :  { %2891 = vrcp.f32 %v4250_v35  ;;  %533 = vmatpush.msra.mxu2 %v4267_v37  ;;  %v320_v37 = vpop.f32.mrf.mxu2  ;;  %vm353_vm4 = vweird.f32 %v4250_v35 }
  0xc1   :  { %534 = vmatpush.msra.mxu2 %v4271_v8  ;;  %v337_v8 = vand.u32 2147483647, %v327_v7 }
  0xc2   :  { %535 = vmatmul.f32.vlgmr.msra.gmra.mxu2 %v7374_v45  ;;  %v321_v45 = vadd.f32 %v320_v37, %v4281_v43  ;;  %v7480_v37 = vld [vmem:[#allocation20_spill] sm:$0xff] }
  0xc3   :  { %695 = vmatpush.msrb.mxu2 %v3842_v46  ;;  %v340_v46 = vor.u32 1.1754944e-38, %v339_v34  ;;  %vm338_vm3 = vcmp.eq.f32.partialorder %v337_v8, 8.507059e+37  ;;  %v7478_v34 = vld [vmem:[#allocation27_spill] sm:$0xff]  ;;  %v7481_v8 = vld [vmem:[#allocation98_spill] sm:$0xff] }
  0xc4   :  { %v2890_v16 = vpop.eup %2889 }
  0xc5   :  { %v2892_v40 = vpop.eup %2891  ;;  %v329_v25 = vmul.f32 %v2890_v16, %v327_v7  ;;  %vm334_vm0 = vweird.f32 %v2890_v16  ;;  %696 = vmatpush.msrb.mxu2 %v3854_v51  ;;  %v255_v51 = vld [vmem:[#allocation3 + $0x10] sm:$0xff]  ;;  %v359_v7 = vand.u32 2147483648, %v4250_v35 }
  0xc6   :  { %v349_v12 = vmul.f32 %v2892_v40, %v4250_v35  ;;  %vm335_vm2 = vmor %vm333_vm1, %vm334_vm0  ;;  %vm354_vm5 = vweird.f32 %v2892_v40 }
  0xc7   :  { %v330_v23 = vsub.f32 1.0, %v329_v25  ;;  %697 = vmatpush.msrb.mxu2 %v3866_v55  ;;  %v357_v55 = vand.u32 2147483647, %v4250_v35  ;;  %vm355_vm6 = vmor %vm353_vm4, %vm354_vm5  ;;  %v7476_v35 = vld [vmem:[#allocation18_spill] sm:$0xff] }
  0xc8   :  { %v350_v47 = vsub.f32 1.0, %v349_v12  ;;  %v360_v12 = vor.u32 1.1754944e-38, %v359_v7  ;;  %v7493_v7 = vld [vmem:[#allocation30_spill] sm:$0xff] }
  0xc9   :  { %v331_v52 = vmul.f32 %v2890_v16, %v330_v23  ;;  %698 = vmatpush.msrb.mxu2 %v3878_v59  ;;  %vm358_vm7 = vcmp.eq.f32.partialorder %v357_v55, 8.507059e+37  ;;  %v7479_v23 = vld [vmem:[#allocation99_spill] sm:$0xff]  ;;  %v7497_v55 = vld [vmem:[#allocation34_spill] sm:$0xff] }
  0xca   :  { %v351_v4 = vmul.f32 %v2892_v40, %v350_v47  ;;  %v7483_v47 = vld [vmem:[#allocation102_spill] sm:$0xff] }
  0xcb   :  { %v332_v32 = vadd.f32 %v2890_v16, %v331_v52  ;;  %699 = vmatpush.msrb.mxu2 %v3890_v63  ;;  %v7484_v52 = vld [vmem:[#allocation22_spill] sm:$0xff] }
  0xcc   :  { %v352_v54 = vadd.f32 %v2892_v40, %v351_v4  ;;  %v7475_v4 = vld [vmem:[#allocation96_spill] sm:$0xff] }
  0xcd   :  { %v336_v56 = vsel %vm335_vm2, %v2890_v16, %v332_v32  ;;  %700 = vmatpush.msrb.mxu2 %v3902_v50  ;;  %v7477_v16 = vld [vmem:[#allocation95_spill] sm:$0xff] }
  0xce   :  { %v341_v60 = vsel %vm338_vm3, %v340_v46, %v336_v56  ;;  %v356_v59 = vsel %vm355_vm6, %v2892_v40, %v352_v54  ;;  %v7482_v40 = vld [vmem:[#allocation29_spill] sm:$0xff]  ;;  %v7486_v32 = vld [vmem:[#allocation31_spill] sm:$0xff]  ;;  %v7487_v46 = vld [vmem:[#allocation24_spill] sm:$0xff] }
  0xcf   :  { %v363_v25 = vmul.f32 %v341_v60, %v321_v45  ;;  %701 = vmatpush.msrb.mxu2 %v3914_v61  ;;  %v361_v53 = vsel %vm358_vm7, %v360_v12, %v356_v59  ;;  %v7473_v61 = vld [vmem:[#allocation92_spill] sm:$0xff]  ;;  %v7485_v45 = vld [vmem:[#allocation101_spill] sm:$0xff]  ;;  %v7490_v60 = vld [vmem:[#allocation35_spill] sm:$0xff] }
  0xd0   :  { %v366_v42 = vsub.f32 1.0, %v361_v53  ;;  %v368_v0 = vmul.f32 0.0, %v361_v53  ;;  %v7488_v56 = vld [vmem:[#allocation33_spill] sm:$0xff]  ;;  %v7491_v54 = vld [vmem:[#allocation28_spill] sm:$0xff]  ;;  %v7502_v53 = vld [vmem:[#allocation46_spill] sm:$0xff] }
  0xd1   :  { %v364_v57 = vadd.f32 %v363_v25, %v255_v51  ;;  %702 = vmatpush.msrb.mxu2 %v3983_v36  ;;  %v7466_v36 = vld [vmem:[#allocation21_spill] sm:$0xff]  ;;  %v7489_v51 = vld [vmem:[#allocation26_spill] sm:$0xff]  ;;  %v7495_v25 = vld [vmem:[#allocation32_spill] sm:$0xff] }
  0xd2   :  { %v7500_v59 = vld [vmem:[#allocation36_spill] sm:$0xff] }
  0xd3   :  { %2893 = vtanh.f32 %v364_v57  ;;  %703 = vmatpush.msrb.mxu2 %v3995_v39  ;;  %v7468_v39 = vld [vmem:[#allocation14_spill] sm:$0xff]  ;;  %v7499_v57 = vld [vmem:[#allocation111_spill] sm:$0xff]  ;;  %v7501_v12 = vld [vmem:[#allocation112_spill] sm:$0xff] }
  0xd5   :  { %704 = vmatpush.msrb.mxu2 %v4007_v33  ;;  %v7465_v33 = vld [vmem:[#allocation86_spill] sm:$0xff] }
  0xd7   :  { %705 = vmatpush.msrb.mxu2 %v4019_v30  ;;  %v7464_v30 = vld [vmem:[#allocation13_spill] sm:$0xff] }
  0xd9   :  { %v2894_v50 = vpop.eup %2893  ;;  %706 = vmatpush.msrb.mxu2 %v4031_v27  ;;  %v7463_v27 = vld [vmem:[#allocation87_spill] sm:$0xff] }
  0xda   :  { %v367_v63 = vmul.f32 %v2894_v50, %v366_v42  ;;  %v7503_v42 = vld [vmem:[#allocation38_spill] sm:$0xff]  ;;  %v7504_v50 = vld [vmem:[#allocation48_spill] sm:$0xff] }
  0xdb   :  { %707 = vmatpush.msrb.mxu2 %v4043_v24  ;;  %v7456_v24 = vld [vmem:[#allocation15_spill] sm:$0xff] }
  0xdc   :  { %v4308_v58 = vadd.f32 %v368_v0, %v367_v63  ;;  %v7506_v63 = vld [vmem:[#allocation115_spill] sm:$0xff]  ;;  %v7507_v0 = vld [vmem:[#allocation50_spill] sm:$0xff] }
  0xdd   :  { %708 = vmatpush.msrb.mxu2 %v4055_v21  ;;  %v7460_v21 = vld [vmem:[#allocation12_spill] sm:$0xff] }
  0xde   :  { %395 = vmatmul.f32.vlgmr.msra.gmra.mxu3 %v4308_v58  ;;  %435 = vmatmul.f32.vlgmr.msrb.gmra.mxu1 %v4308_v58 }
  0xdf   :  { %588 = vmatpush.msra.mxu3 %v3709_v1  ;;  %624 = vmatmul.f32.vlgmr.msrb.gmra.mxu0 %v4308_v58  ;;  %v7454_v1 = vld [vmem:[#allocation10_spill] sm:$0xff] }
  0xe0   :  { %628 = vmatpush.msrb.mxu1 %v3741_v13  ;;  %709 = vmatpush.msrb.mxu2 %v4067_v18  ;;  %v7455_v13 = vld [vmem:[#allocation84_spill] sm:$0xff]  ;;  %v7462_v18 = vld [vmem:[#allocation19_spill] sm:$0xff] }
  0xe1   :  { %589 = vmatpush.msra.mxu3 %v3713_v3  ;;  %815 = vmatpush.msrb.mxu0 %v7455_v13  ;;  %v7457_v3 = vld [vmem:[#allocation11_spill] sm:$0xff]  ;;  %v7509_v13 = vld [vmem:[#allocation41_spill] sm:$0xff] }
  0xe2   :  { %629 = vmatpush.msrb.mxu1 %v3745_v14  ;;  %v7458_v14 = vld [vmem:[#allocation17_spill] sm:$0xff] }
  0xe3   :  { %590 = vmatpush.msra.mxu3 %v3719_v5  ;;  %v7459_v5 = vld [vmem:[#allocation80_spill] sm:$0xff]  ;;  %816 = vmatpush.msrb.mxu0 %v7463_v27  ;;  %v7518_v27 = vld [vmem:[#allocation49_spill] sm:$0xff] }
  0xe4   :  { %630 = vmatpush.msrb.mxu1 %v3754_v17  ;;  %710 = vmatpush.msrb.mxu2 %v7459_v5  ;;  %v7461_v17 = vld [vmem:[#allocation83_spill] sm:$0xff]  ;;  %v7514_v5 = vld [vmem:[#allocation45_spill] sm:$0xff] }
  0xe5   :  { %591 = vmatpush.msra.mxu3 %v7454_v1  ;;  %817 = vmatpush.msrb.mxu0 %v7467_v38  ;;  %v7508_v1 = vld [vmem:[#allocation117_spill] sm:$0xff]  ;;  %v7522_v38 = vld [vmem:[#allocation52_spill] sm:$0xff] }
  0xe6   :  { %631 = vmatpush.msrb.mxu1 %v7456_v24  ;;  %475 = vmatmul.f32.vlgmr.msrb.gmra.mxu3 %v4308_v58  ;;  %v7510_v24 = vld [vmem:[#allocation118_spill] sm:$0xff] }
  0xe7   :  { %515 = vmatmul.f32.vlgmr.msra.gmra.mxu1 %v4308_v58  ;;  %592 = vmatpush.msra.mxu3 %v7457_v3  ;;  %v7511_v3 = vld [vmem:[#allocation64_spill] sm:$0xff] }
  0xe8   :  { %632 = vmatpush.msrb.mxu1 %v7458_v14  ;;  %775 = vmatpush.msra.mxu2 %v7461_v17  ;;  %v7512_v14 = vld [vmem:[#allocation43_spill] sm:$0xff] }
  0xe9   :  { %593 = vmatpush.msra.mxu3 %v7460_v21  ;;  %818 = vmatpush.msrb.mxu0 %v7471_v48  ;;  %v7515_v21 = vld [vmem:[#allocation68_spill] sm:$0xff]  ;;  %v7516_v17 = vld [vmem:[#allocation47_spill] sm:$0xff]  ;;  %v7525_v48 = vld [vmem:[#allocation78_spill] sm:$0xff] }
  0xea   :  { %633 = vmatpush.msrb.mxu1 %v7462_v18  ;;  %776 = vmatpush.msra.mxu2 %v7465_v33  ;;  %v7517_v18 = vld [vmem:[#allocation70_spill] sm:$0xff]  ;;  %v7520_v33 = vld [vmem:[#allocation51_spill] sm:$0xff] }
  0xeb   :  { %594 = vmatpush.msra.mxu3 %v7464_v30  ;;  %819 = vmatpush.msrb.mxu0 %v7475_v4  ;;  %v7519_v30 = vld [vmem:[#allocation72_spill] sm:$0xff]  ;;  %v7528_v4 = vld [vmem:[#allocation55_spill] sm:$0xff] }
  0xec   :  { %634 = vmatpush.msrb.mxu1 %v7466_v36  ;;  %777 = vmatpush.msra.mxu2 %v7469_v41  ;;  %v7521_v36 = vld [vmem:[#allocation74_spill] sm:$0xff] }
  0xed   :  { %595 = vmatpush.msra.mxu3 %v7468_v39  ;;  %820 = vmatpush.msrb.mxu0 %v7479_v23  ;;  %v7523_v39 = vld [vmem:[#allocation76_spill] sm:$0xff]  ;;  %v7531_v23 = vld [vmem:[#allocation57_spill] sm:$0xff] }
  0xee   :  { %635 = vmatpush.msrb.mxu1 %v7470_v44  ;;  %778 = vmatpush.msra.mxu2 %v7473_v61  ;;  %v7524_v44 = vld [vmem:[#allocation53_spill] sm:$0xff] }
  0xef   :  { %596 = vmatpush.msra.mxu3 %v7472_v49  ;;  %821 = vmatpush.msrb.mxu0 %v7483_v47  ;;  %v7526_v49 = vld [vmem:[#allocation54_spill] sm:$0xff] }
  0xf0   :  { %636 = vmatpush.msrb.mxu1 %v7474_v62  ;;  %779 = vmatpush.msra.mxu2 %v7477_v16  ;;  %v7527_v62 = vld [vmem:[#allocation81_spill] sm:$0xff]  ;;  %v7534_v47 = vld [vmem:[#allocation58_spill] sm:$0xff] }
  0xf1   :  { %597 = vmatpush.msra.mxu3 %v7476_v35  ;;  %822 = vmatpush.msrb.mxu0 %v4172_v26  ;;  %v7492_v26 = vld [vmem:[#allocation37_spill] sm:$0xff] }
  0xf2   :  { %637 = vmatpush.msrb.mxu1 %v7478_v34  ;;  %780 = vmatpush.msra.mxu2 %v7481_v8  ;;  %v7529_v35 = vld [vmem:[#allocation85_spill] sm:$0xff]  ;;  %v7530_v34 = vld [vmem:[#allocation56_spill] sm:$0xff] }
  0xf3   :  { %598 = vmatpush.msra.mxu3 %v7480_v37  ;;  %823 = vmatpush.msrb.mxu0 %v4184_v15  ;;  %v7494_v15 = vld [vmem:[#allocation39_spill] sm:$0xff]  ;;  %v7532_v37 = vld [vmem:[#allocation88_spill] sm:$0xff] }
  0xf4   :  { %638 = vmatpush.msrb.mxu1 %v7482_v40  ;;  %781 = vmatpush.msra.mxu2 %v7485_v45  ;;  %v7533_v40 = vld [vmem:[#allocation91_spill] sm:$0xff] }
  0xf5   :  { %599 = vmatpush.msra.mxu3 %v7484_v52  ;;  %824 = vmatpush.msrb.mxu0 %v4194_v6  ;;  %v7496_v6 = vld [vmem:[#allocation42_spill] sm:$0xff] }
  0xf6   :  { %639 = vmatpush.msrb.mxu1 %v7486_v32  ;;  %782 = vmatpush.msra.mxu2 %v4170_v10  ;;  %v7535_v52 = vld [vmem:[#allocation94_spill] sm:$0xff]  ;;  %v7536_v32 = vld [vmem:[#allocation59_spill] sm:$0xff] }
  0xf7   :  { %600 = vmatpush.msra.mxu3 %v7487_v46  ;;  %825 = vmatpush.msrb.mxu0 %v4204_v20  ;;  %v7498_v20 = vld [vmem:[#allocation44_spill] sm:$0xff]  ;;  %v7537_v46 = vld [vmem:[#allocation97_spill] sm:$0xff] }
  0xf8   :  { %640 = vmatpush.msrb.mxu1 %v7488_v56  ;;  %783 = vmatpush.msra.mxu2 %v4182_v29  ;;  %v7538_v56 = vld [vmem:[#allocation60_spill] sm:$0xff] }
  0xf9   :  { %601 = vmatpush.msra.mxu3 %v7489_v51  ;;  %826 = vmatpush.msrb.mxu0 %v4214_v2  ;;  %v7505_v2 = vld [vmem:[#allocation40_spill] sm:$0xff] }
  0xfa   :  { %641 = vmatpush.msrb.mxu1 %v7490_v60  ;;  %784 = vmatpush.msra.mxu2 %v4192_v11  ;;  %v7539_v51 = vld [vmem:[#allocation100_spill] sm:$0xff]  ;;  %v7540_v60 = vld [vmem:[#allocation61_spill] sm:$0xff] }
  0xfb   :  { %602 = vmatpush.msra.mxu3 %v7491_v54  ;;  %827 = vmatpush.msrb.mxu0 %v7501_v12  ;;  %v7541_v54 = vld [vmem:[#allocation105_spill] sm:$0xff] }
  0xfc   :  { %642 = vmatpush.msrb.mxu1 %v7492_v26  ;;  %785 = vmatpush.msra.mxu2 %v4202_v19  ;;  %v7542_v26 = vld [vmem:[#allocation62_spill] sm:$0xff]  ;;  %v7550_v12 = vld [vmem:[#allocation69_spill] sm:$0xff] }
  0xfd   :  { %603 = vmatpush.msra.mxu3 %v7493_v7  ;;  %828 = vmatpush.msrb.mxu0 %v4234_v28  ;;  %v7513_v28 = vld [vmem:[#allocation66_spill] sm:$0xff] }
  0xfe   :  { %643 = vmatpush.msrb.mxu1 %v7494_v15  ;;  %604 = vmatmul.f32.vlgmr.msra.gmra.mxu3 %v4308_v58  ;;  %v7543_v7 = vld [vmem:[#allocation106_spill] sm:$0xff]  ;;  %v7544_v15 = vld [vmem:[#allocation63_spill] sm:$0xff] }
  0xff   :  { %644 = vmatmul.f32.vlgmr.msrb.gmra.mxu1 %v4308_v58  ;;  %715 = vmatpush.msrb.mxu3 %v7495_v25  ;;  %v7545_v25 = vld [vmem:[#allocation107_spill] sm:$0xff] }
 0x100   :  { %755 = vmatpush.msra.mxu1 %v7496_v6  ;;  %786 = vmatpush.msra.mxu2 %v4212_v22  ;;  %v7546_v6 = vld [vmem:[#allocation65_spill] sm:$0xff] }
 0x101   :  { %716 = vmatpush.msrb.mxu3 %v7497_v55  ;;  %829 = vmatpush.msrb.mxu0 %v7506_v63  ;;  %v7547_v55 = vld [vmem:[#allocation108_spill] sm:$0xff]  ;;  %v7555_v63 = vld [vmem:[#allocation114_spill] sm:$0xff] }
 0x102   :  { %756 = vmatpush.msra.mxu1 %v7498_v20  ;;  %787 = vmatpush.msra.mxu2 %v7499_v57  ;;  %v7548_v20 = vld [vmem:[#allocation67_spill] sm:$0xff] }
 0x103   :  { %717 = vmatpush.msrb.mxu3 %v7500_v59  ;;  %830 = vmatpush.msrb.mxu0 %v7510_v24  ;;  %v7549_v59 = vld [vmem:[#allocation109_spill] sm:$0xff] }
 0x104   :  { %757 = vmatpush.msra.mxu1 %v7502_v53  ;;  %788 = vmatpush.msra.mxu2 %v4232_v9  ;;  %v7551_v53 = vld [vmem:[#allocation110_spill] sm:$0xff] }
 0x105   :  { %718 = vmatpush.msrb.mxu3 %v7503_v42  ;;  %v7552_v42 = vld [vmem:[#allocation71_spill] sm:$0xff] }
 0x106   :  { %758 = vmatpush.msra.mxu1 %v7504_v50  ;;  %789 = vmatpush.msra.mxu2 %v4242_v31  ;;  %v7553_v50 = vld [vmem:[#allocation113_spill] sm:$0xff] }
 0x107   :  { %719 = vmatpush.msrb.mxu3 %v7505_v2  ;;  %v7554_v2 = vld [vmem:[#allocation73_spill] sm:$0xff] }
 0x108   :  { %759 = vmatpush.msra.mxu1 %v7507_v0  ;;  %790 = vmatpush.msra.mxu2 %v7508_v1  ;;  %v7556_v0 = vld [vmem:[#allocation75_spill] sm:$0xff] }
 0x109   :  { %720 = vmatpush.msrb.mxu3 %v7509_v13  ;;  %v7557_v13 = vld [vmem:[#allocation116_spill] sm:$0xff] }
 0x10a   :  { %760 = vmatpush.msra.mxu1 %v7511_v3  ;;  %v7558_v3 = vld [vmem:[#allocation77_spill] sm:$0xff] }
 0x10b   :  { %721 = vmatpush.msrb.mxu3 %v7512_v14  ;;  %v7559_v14 = vld [vmem:[#allocation119_spill] sm:$0xff] }
 0x10c   :  { %761 = vmatpush.msra.mxu1 %v7513_v28  ;;  %v7560_v28 = vld [vmem:[#allocation79_spill] sm:$0xff] }
 0x10d   :  { %722 = vmatpush.msrb.mxu3 %v7514_v5  ;;  %v7561_v5 = vld [vmem:[#allocation120_spill] sm:$0xff] }
 0x10e   :  { %762 = vmatpush.msra.mxu1 %v7515_v21  ;;  %v7562_v21 = vld [vmem:[#allocation82_spill] sm:$0xff] }
 0x10f   :  { %723 = vmatpush.msrb.mxu3 %v7516_v17  ;;  %v7563_v17 = vld [vmem:[#allocation121_spill] sm:$0xff] }
 0x110   :  { %763 = vmatpush.msra.mxu1 %v7517_v18  ;;  %v252_v18 = vld [vmem:[%s6812_s4] sm:$0xf] }
 0x111   :  { %724 = vmatpush.msrb.mxu3 %v7518_v27  ;;  %v4456_v27 = vperm.slane %v252_v18, 1 }
 0x112   :  { %764 = vmatpush.msra.mxu1 %v7519_v30 }
 0x113   :  { %725 = vmatpush.msrb.mxu3 %v7520_v33  ;;  %7564 = vst [vmem:[#allocation10_spill] sm:$0xff] %v4456_v27  ;;  %v456_v33 = vpop.f32.mrf.mxu2 }
 0x114   :  { %765 = vmatpush.msra.mxu1 %v7521_v36  ;;  %v416_v36 = vpop.f32.mrf.mxu0 }
 0x115   :  { %726 = vmatpush.msrb.mxu3 %v7522_v38 }
 0x116   :  { %766 = vmatpush.msra.mxu1 %v7523_v39 }
 0x117   :  { %727 = vmatpush.msrb.mxu3 %v7524_v44  ;;  %v4459_v44 = vperm.slane %v252_v18, 0 }
 0x118   :  { %767 = vmatpush.msra.mxu1 %v7525_v48 }
 0x119   :  { %728 = vmatpush.msrb.mxu3 %v7526_v49  ;;  %7565 = vst [vmem:[#allocation84_spill] sm:$0xff] %v4459_v44 }
 0x11a   :  { %768 = vmatpush.msra.mxu1 %v7527_v62 }
 0x11b   :  { %729 = vmatpush.msrb.mxu3 %v7528_v4 }
 0x11c   :  { %769 = vmatpush.msra.mxu1 %v7529_v35  ;;  %v496_v35 = vpop.f32.mrf.mxu0 }
 0x11d   :  { %730 = vmatpush.msrb.mxu3 %v7530_v34 }
 0x11e   :  { %770 = vmatpush.msra.mxu1 %v7532_v37 }
 0x11f   :  { %795 = vmatpush.msra.mxu3 %v7531_v23 }
 0x120   :  { %835 = vmatpush.msrb.mxu1 %v7533_v40 }
 0x121   :  { %796 = vmatpush.msra.mxu3 %v7534_v47 }
 0x122   :  { %836 = vmatpush.msrb.mxu1 %v7535_v52 }
 0x123   :  { %797 = vmatpush.msra.mxu3 %v7536_v32 }
 0x124   :  { %837 = vmatpush.msrb.mxu1 %v7537_v46  ;;  %v7566_v46 = vld [vmem:[#allocation104_spill] sm:$0xff] }
 0x125   :  { %798 = vmatpush.msra.mxu3 %v7538_v56 }
 0x126   :  { %838 = vmatpush.msrb.mxu1 %v7539_v51  ;;  %v586_v51 = vld [vmem:[#allocation3 + $0x20] sm:$0xff] }
 0x127   :  { %799 = vmatpush.msra.mxu3 %v7540_v60 }
 0x128   :  { %839 = vmatpush.msrb.mxu1 %v7541_v54 }
 0x129   :  { %800 = vmatpush.msra.mxu3 %v7542_v26 }
 0x12a   :  { %840 = vmatpush.msrb.mxu1 %v7543_v7  ;;  %v4463_v7 = vperm.slane %v252_v18, 3 }
 0x12b   :  { %801 = vmatpush.msra.mxu3 %v7544_v15 }
 0x12c   :  { %841 = vmatpush.msrb.mxu1 %v7545_v25  ;;  %7567 = vst [vmem:[#allocation15_spill] sm:$0xff] %v4463_v7 }
 0x12d   :  { %802 = vmatpush.msra.mxu3 %v7546_v6 }
 0x12e   :  { %842 = vmatpush.msrb.mxu1 %v7547_v55 }
 0x12f   :  { %803 = vmatpush.msra.mxu3 %v7548_v20 }
 0x130   :  { %843 = vmatpush.msrb.mxu1 %v7549_v59  ;;  %v4465_v59 = vperm.slane %v252_v18, 2  ;;  %v585_v18 = vld [vmem:[#allocation3 + $0x18] sm:$0xff] }
 0x131   :  { %804 = vmatpush.msra.mxu3 %v7550_v12 }
 0x132   :  { %844 = vmatpush.msrb.mxu1 %v7551_v53  ;;  %7568 = vst [vmem:[#allocation11_spill] sm:$0xff] %v4465_v59 }
 0x133   :  { %805 = vmatpush.msra.mxu3 %v7552_v42 }
 0x134   :  { %845 = vmatpush.msrb.mxu1 %v7553_v50 }
 0x135   :  { %806 = vmatpush.msra.mxu3 %v7554_v2 }
 0x136   :  { %846 = vmatpush.msrb.mxu1 %v7555_v63 }
 0x137   :  { %807 = vmatpush.msra.mxu3 %v7556_v0 }
 0x138   :  { %847 = vmatpush.msrb.mxu1 %v7557_v13 }
 0x139   :  { %808 = vmatpush.msra.mxu3 %v7558_v3 }
 0x13a   :  { %848 = vmatpush.msrb.mxu1 %v7559_v14 }
 0x13b   :  { %809 = vmatpush.msra.mxu3 %v7560_v28 }
 0x13c   :  { %849 = vmatpush.msrb.mxu1 %v7561_v5 }
 0x13d   :  { %810 = vmatpush.msra.mxu3 %v7562_v21 }
 0x13e   :  { %850 = vmatpush.msrb.mxu1 %v7563_v17 }
 0x145   :  { %v536_v0 = vpop.f32.mrf.mxu2 }
 0x15b   :  { %v436_v30 = vpop.f32.mrf.mxu1 }
 0x15c   :  { %v437_v38 = vadd.f32 %v436_v30, %v4456_v27  ;;  %v625_v52 = vpop.f32.mrf.mxu0 }
 0x15d   :  { %v626_v56 = vadd.f32 %v625_v52, %v7566_v46 }
 0x15e   :  { %v457_v39 = vadd.f32 %v456_v33, %v437_v38 }
 0x15f   :  { %v668_v26 = vadd.f32 %v626_v56, %v586_v51 }
 0x160   :  { %v2847_v48 = vmul.f32 -1.442695, %v457_v39  ;;  %v7569_v39 = vld [vmem:[#allocation103_spill] sm:$0xff] }
 0x161   :  { %v396_v49 = vpop.f32.mrf.mxu3  ;;  %v2849_v12 = vmul.f32 -1.442695, %v668_v26 }
 0x162   :  { %2895 = vpow2.f32 %v2847_v48  ;;  %v397_v62 = vadd.f32 %v396_v49, %v4459_v44 }
 0x164   :  { %v417_v4 = vadd.f32 %v416_v36, %v397_v62  ;;  %v516_v6 = vpop.f32.mrf.mxu1 }
 0x165   :  { %v517_v42 = vadd.f32 %v516_v6, %v4463_v7  ;;  %v4482_v6 = vld [vmem:[#allocation7 + $0x1e0] sm:$0xff] }
 0x166   :  { %v2846_v34 = vmul.f32 -1.442695, %v417_v4 }
 0x167   :  { %v537_v28 = vadd.f32 %v536_v0, %v517_v42  ;;  %v4496_v42 = vld [vmem:[#allocation7 + $0x1a0] sm:$0xff] }
 0x168   :  { %v2896_v23 = vpop.eup %2895  ;;  %2897 = vpow2.f32 %v2846_v34  ;;  %v4502_v0 = vld [vmem:[#allocation7 + $0x180] sm:$0xff] }
 0x169   :  { %v561_v37 = vadd.f32 1.0, %v2896_v23  ;;  %v476_v55 = vpop.f32.mrf.mxu3 }
 0x16a   :  { %v477_v3 = vadd.f32 %v476_v55, %v4465_v59  ;;  %v4485_v55 = vld [vmem:[#allocation5 + $0x158] sm:$0xff] }
 0x16b   :  { %2899 = vrcp.f32 %v561_v37  ;;  %v573_v33 = vand.u32 2147483648, %v561_v37  ;;  %vm567_vm13 = vweird.f32 %v561_v37  ;;  %v571_v49 = vand.u32 2147483647, %v561_v37 }
 0x16c   :  { %v497_v38 = vadd.f32 %v496_v35, %v477_v3 }
 0x16d   :  { %vm572_vm15 = vcmp.eq.f32.partialorder %v571_v49, 8.507059e+37  ;;  %v4523_v49 = vld [vmem:[#allocation7 + $0x120] sm:$0xff] }
 0x16e   :  { %v2898_v40 = vpop.eup %2897 }
 0x16f   :  { %v542_v47 = vadd.f32 1.0, %v2898_v40  ;;  %v574_v40 = vor.u32 1.1754944e-38, %v573_v33 }
 0x171   :  { %2901 = vrcp.f32 %v542_v47  ;;  %v2900_v32 = vpop.eup %2899  ;;  %v554_v53 = vand.u32 2147483648, %v542_v47  ;;  %v552_v2 = vand.u32 2147483647, %v542_v47  ;;  %vm548_vm9 = vweird.f32 %v542_v47 }
 0x172   :  { %v563_v60 = vmul.f32 %v2900_v32, %v561_v37  ;;  %2903 = vpow2.f32 %v2849_v12  ;;  %vm568_vm12 = vweird.f32 %v2900_v32 }
 0x173   :  { %v555_v14 = vor.u32 1.1754944e-38, %v554_v53  ;;  %vm553_vm11 = vcmp.eq.f32.partialorder %v552_v2, 8.507059e+37  ;;  %vm569_vm14 = vmor %vm567_vm13, %vm568_vm12  ;;  %v4493_v53 = vld [vmem:[#allocation5 + $0x140] sm:$0xff] }
 0x174   :  { %v564_v25 = vsub.f32 1.0, %v563_v60 }
 0x176   :  { %v565_v63 = vmul.f32 %v2900_v32, %v564_v25  ;;  %v4479_v25 = vld [vmem:[#allocation5 + $0x170] sm:$0xff] }
 0x177   :  { %v2902_v54 = vpop.eup %2901 }
 0x178   :  { %v544_v15 = vmul.f32 %v2902_v54, %v542_v47  ;;  %vm549_vm8 = vweird.f32 %v2902_v54  ;;  %v566_v21 = vadd.f32 %v2900_v32, %v565_v63  ;;  %v2904_v34 = vpop.eup %2903  ;;  %v4499_v63 = vld [vmem:[#allocation5 + $0x128] sm:$0xff] }
 0x179   :  { %vm550_vm10 = vmor %vm548_vm9, %vm549_vm8  ;;  %v4470_v52 = vadd.f32 1.0, %v2904_v34 }
 0x17a   :  { %v545_v20 = vsub.f32 1.0, %v544_v15  ;;  %v570_v23 = vsel %vm569_vm14, %v2900_v32, %v566_v21 }
 0x17b   :  { %v575_v56 = vsel %vm572_vm15, %v574_v40, %v570_v23  ;;  %v4527_v23 = vld [vmem:[#allocation5 + $0xc8] sm:$0xff]  ;;  %v4530_v40 = vld [vmem:[#allocation7 + $0x100] sm:$0xff]  ;;  %vm678_vm5 = vweird.f32 %v4470_v52 }
 0x17c   :  { %v546_v50 = vmul.f32 %v2902_v54, %v545_v20  ;;  %v580_v51 = vsub.f32 1.0, %v575_v56  ;;  %v4488_v20 = vld [vmem:[#allocation7 + $0x1c0] sm:$0xff] }
 0x17e   :  { %v547_v13 = vadd.f32 %v2902_v54, %v546_v50 }
 0x180   :  { %v551_v5 = vsel %vm550_vm10, %v2902_v54, %v547_v13  ;;  %v582_v54 = vmul.f32 0.0, %v575_v56  ;;  %v587_v56 = vld [vmem:[#allocation3 + $0x28] sm:$0xff] }
 0x181   :  { %v556_v17 = vsel %vm553_vm11, %v555_v14, %v551_v5  ;;  %v605_v30 = vpop.f32.mrf.mxu3  ;;  %v4507_v14 = vld [vmem:[#allocation5 + $0x110] sm:$0xff] }
 0x182   :  { %v577_v36 = vmul.f32 %v556_v17, %v537_v28  ;;  %v606_v48 = vadd.f32 %v605_v30, %v7569_v39  ;;  %v4510_v28 = vld [vmem:[#allocation7 + $0x160] sm:$0xff] }
 0x183   :  { %v4516_v30 = vld [vmem:[#allocation7 + $0x140] sm:$0xff] }
 0x184   :  { %v578_v62 = vadd.f32 %v577_v36, %v497_v38  ;;  %v648_v4 = vadd.f32 %v606_v48, %v585_v18  ;;  %v4513_v18 = vld [vmem:[#allocation5 + $0xf8] sm:$0xff]  ;;  %v645_v36 = vpop.f32.mrf.mxu1  ;;  %v4520_v48 = vld [vmem:[#allocation5 + $0xe0] sm:$0xff] }
 0x186   :  { %2905 = vtanh.f32 %v578_v62  ;;  %v2848_v47 = vmul.f32 -1.442695, %v648_v4  ;;  %v646_v4 = vadd.f32 %v645_v36, %v4281_v43  ;;  %v4566_v36 = vld [vmem:[#allocation7 + $0x60] sm:$0xff] }
 0x188   :  { %2907 = vpow2.f32 %v2848_v47 }
 0x189   :  { %2909 = vrcp.f32 %v4470_v52 }
 0x18c   :  { %v2906_v60 = vpop.eup %2905 }
 0x18d   :  { %v581_v35 = vmul.f32 %v2906_v60, %v580_v51  ;;  %v684_v60 = vand.u32 2147483648, %v4470_v52 }
 0x18e   :  { %v2908_v37 = vpop.eup %2907 }
 0x18f   :  { %v652_v26 = vadd.f32 1.0, %v2908_v37  ;;  %v4473_v15 = vadd.f32 %v582_v54, %v581_v35  ;;  %v4477_v32 = vpop.eup %2909  ;;  %v4536_v54 = vld [vmem:[#allocation5 + $0xb0] sm:$0xff]  ;;  %v4539_v37 = vld [vmem:[#allocation7 + $0xe0] sm:$0xff] }
 0x190   :  { %v674_v12 = vmul.f32 %v4477_v32, %v4470_v52  ;;  %vm679_vm4 = vweird.f32 %v4477_v32 }
 0x191   :  { %2911 = vrcp.f32 %v652_v26  ;;  %731 = vmatmul.f32.vlgmr.msrb.gmra.mxu3 %v4473_v15  ;;  %771 = vmatmul.f32.vlgmr.msra.gmra.mxu1 %v4473_v15  ;;  %v664_v5 = vand.u32 2147483648, %v652_v26  ;;  %v662_v17 = vand.u32 2147483647, %v652_v26  ;;  %vm658_vm1 = vweird.f32 %v652_v26  ;;  %vm680_vm6 = vmor %vm678_vm5, %vm679_vm4 }
 0x192   :  { %924 = vmatpush.msrb.mxu3 %v4479_v25  ;;  %1011 = vmatpush.msra.mxu1 %v4482_v6  ;;  %v675_v13 = vsub.f32 1.0, %v674_v12 }
 0x193   :  { %v665_v62 = vor.u32 1.1754944e-38, %v664_v5  ;;  %vm663_vm3 = vcmp.eq.f32.partialorder %v662_v17, 8.507059e+37  ;;  %v4551_v5 = vld [vmem:[#allocation5 + $0x80] sm:$0xff]  ;;  %v4557_v17 = vld [vmem:[#allocation5 + $0x68] sm:$0xff] }
 0x194   :  { %925 = vmatpush.msrb.mxu3 %v4485_v55  ;;  %1012 = vmatpush.msra.mxu1 %v4488_v20  ;;  %v676_v33 = vmul.f32 %v4477_v32, %v675_v13 }
 0x196   :  { %926 = vmatpush.msrb.mxu3 %v4493_v53  ;;  %1013 = vmatpush.msra.mxu1 %v4496_v42  ;;  %v677_v47 = vadd.f32 %v4477_v32, %v676_v33  ;;  %v4560_v33 = vld [vmem:[#allocation7 + $0x80] sm:$0xff] }
 0x197   :  { %v2912_v50 = vpop.eup %2911 }
 0x198   :  { %v654_v2 = vmul.f32 %v2912_v50, %v652_v26  ;;  %927 = vmatpush.msrb.mxu3 %v4499_v63  ;;  %1014 = vmatpush.msra.mxu1 %v4502_v0  ;;  %vm659_vm0 = vweird.f32 %v2912_v50  ;;  %v682_v26 = vand.u32 2147483647, %v4470_v52  ;;  %v681_v13 = vsel %vm680_vm6, %v4477_v32, %v677_v47  ;;  %v4563_v32 = vld [vmem:[#allocation5 + $0x50] sm:$0xff] }
 0x199   :  { %811 = vmatmul.f32.vlgmr.msra.gmra.mxu3 %v4473_v15  ;;  %851 = vmatmul.f32.vlgmr.msrb.gmra.mxu1 %v4473_v15  ;;  %vm660_vm2 = vmor %vm658_vm1, %vm659_vm0 }
 0x19a   :  { %v655_v3 = vsub.f32 1.0, %v654_v2  ;;  %928 = vmatpush.msrb.mxu3 %v4507_v14  ;;  %1015 = vmatpush.msra.mxu1 %v4510_v28  ;;  %v4547_v2 = vld [vmem:[#allocation7 + $0xc0] sm:$0xff]  ;;  %vm683_vm7 = vcmp.eq.f32.partialorder %v682_v26, 8.507059e+37  ;;  %v4584_v26 = vld [vmem:[#allocation5 + $0x8] sm:$0xff] }
 0x19c   :  { %v656_v21 = vmul.f32 %v2912_v50, %v655_v3  ;;  %929 = vmatpush.msrb.mxu3 %v4513_v18  ;;  %1016 = vmatpush.msra.mxu1 %v4516_v30  ;;  %v685_v3 = vor.u32 1.1754944e-38, %v684_v60  ;;  %v4579_v60 = vld [vmem:[#allocation7 + $0x20] sm:$0xff] }
 0x19e   :  { %v657_v38 = vadd.f32 %v2912_v50, %v656_v21  ;;  %930 = vmatpush.msrb.mxu3 %v4520_v48  ;;  %1017 = vmatpush.msra.mxu1 %v4523_v49  ;;  %v4554_v21 = vld [vmem:[#allocation7 + $0xa0] sm:$0xff]  ;;  %v686_v52 = vsel %vm683_vm7, %v685_v3, %v681_v13  ;;  %v4596_v13 = vld [vmem:[#allocation5 + $0x178] sm:$0xff]  ;;  %v4599_v3 = vld [vmem:[#allocation7 + $0x1e8] sm:$0xff] }
 0x19f   :  { %v693_v47 = vmul.f32 %v686_v52, %v4308_v58  ;;  %v4592_v58 = vld [vmem:[#allocation5 + $0x168] sm:$0xff]  ;;  %7570 = vst [vmem:[#allocation17_spill] sm:$0xff] %v4596_v13 }
 0x1a0   :  { %v661_v34 = vsel %vm660_vm2, %v2912_v50, %v657_v38  ;;  %931 = vmatpush.msrb.mxu3 %v4527_v23  ;;  %1018 = vmatpush.msra.mxu1 %v4530_v40  ;;  %v4544_v50 = vld [vmem:[#allocation5 + $0x98] sm:$0xff]  ;;  %v691_v38 = vsub.f32 1.0, %v686_v52  ;;  %7571 = vst [vmem:[#allocation80_spill] sm:$0xff] %v4599_v3  ;;  %v4602_v52 = vld [vmem:[#allocation5 + $0x150] sm:$0xff] }
 0x1a1   :  { %v666_v51 = vsel %vm663_vm3, %v665_v62, %v661_v34  ;;  %v4572_v34 = vld [vmem:[#allocation7 + $0x40] sm:$0xff]  ;;  %7572 = vst [vmem:[#allocation12_spill] sm:$0xff] %v4602_v52 }
 0x1a2   :  { %v688_v35 = vmul.f32 %v666_v51, %v646_v4  ;;  %932 = vmatpush.msrb.mxu3 %v4536_v54  ;;  %1019 = vmatpush.msra.mxu1 %v4539_v37  ;;  %v4569_v4 = vld [vmem:[#allocation5 + $0x38] sm:$0xff]  ;;  %v4576_v51 = vld [vmem:[#allocation5 + $0x20] sm:$0xff] }
 0x1a4   :  { %v689_v12 = vadd.f32 %v688_v35, %v587_v56  ;;  %933 = vmatpush.msrb.mxu3 %v4544_v50  ;;  %1020 = vmatpush.msra.mxu1 %v4547_v2 }
 0x1a6   :  { %2913 = vtanh.f32 %v689_v12  ;;  %934 = vmatpush.msrb.mxu3 %v4551_v5  ;;  %1021 = vmatpush.msra.mxu1 %v4554_v21  ;;  %v4587_v12 = vld [vmem:[#allocation7] sm:$0xff] }
 0x1a8   :  { %935 = vmatpush.msrb.mxu3 %v4557_v17  ;;  %1022 = vmatpush.msra.mxu1 %v4560_v33 }
 0x1aa   :  { %936 = vmatpush.msrb.mxu3 %v4563_v32  ;;  %1023 = vmatpush.msra.mxu1 %v4566_v36 }
 0x1ac   :  { %v2914_v62 = vpop.eup %2913  ;;  %937 = vmatpush.msrb.mxu3 %v4569_v4  ;;  %1024 = vmatpush.msra.mxu1 %v4572_v34 }
 0x1ad   :  { %v692_v56 = vmul.f32 %v2914_v62, %v691_v38  ;;  %v4605_v38 = vld [vmem:[#allocation7 + $0x1f0] sm:$0xff]  ;;  %v4608_v62 = vld [vmem:[#allocation5 + $0x160] sm:$0xff] }
 0x1ae   :  { %938 = vmatpush.msrb.mxu3 %v4576_v51  ;;  %1025 = vmatpush.msra.mxu1 %v4579_v60  ;;  %7573 = vst [vmem:[#allocation83_spill] sm:$0xff] %v4605_v38 }
 0x1af   :  { %v4582_v35 = vadd.f32 %v693_v47, %v692_v56  ;;  %7574 = vst [vmem:[#allocation19_spill] sm:$0xff] %v4608_v62  ;;  %v4611_v47 = vld [vmem:[#allocation7 + $0x1c8] sm:$0xff]  ;;  %v4614_v56 = vld [vmem:[#allocation5 + $0x138] sm:$0xff] }
 0x1b0   :  { %939 = vmatpush.msrb.mxu3 %v4584_v26  ;;  %1026 = vmatpush.msra.mxu1 %v4587_v12  ;;  %7575 = vst [vmem:[#allocation87_spill] sm:$0xff] %v4611_v47 }
 0x1b1   :  { %711 = vmatmul.f32.vlgmr.msrb.gmra.mxu2 %v4582_v35  ;;  %751 = vmatmul.f32.vlgmr.msra.gmra.mxu0 %v4582_v35  ;;  %7576 = vst [vmem:[#allocation13_spill] sm:$0xff] %v4614_v56 }
 0x1b2   :  { %904 = vmatpush.msrb.mxu2 %v4592_v58  ;;  %940 = vmatmul.f32.vlgmr.msrb.gmra.mxu3 %v4582_v35 }
 0x1b3   :  { %944 = vmatpush.msra.mxu0 %v4596_v13  ;;  %1051 = vmatpush.msra.mxu3 %v4599_v3  ;;  %v4617_v3 = vld [vmem:[#allocation7 + $0x1d0] sm:$0xff] }
 0x1b4   :  { %905 = vmatpush.msrb.mxu2 %v4602_v52  ;;  %1091 = vmatpush.msrb.mxu1 %v4605_v38  ;;  %7577 = vst [vmem:[#allocation86_spill] sm:$0xff] %v4617_v3  ;;  %v4620_v52 = vld [vmem:[#allocation5 + $0x148] sm:$0xff] }
 0x1b5   :  { %945 = vmatpush.msra.mxu0 %v4608_v62  ;;  %1052 = vmatpush.msra.mxu3 %v4611_v47  ;;  %7578 = vst [vmem:[#allocation21_spill] sm:$0xff] %v4620_v52  ;;  %v4623_v38 = vld [vmem:[#allocation7 + $0x1a8] sm:$0xff]  ;;  %v4626_v62 = vld [vmem:[#allocation5 + $0x120] sm:$0xff]  ;;  %v4630_v47 = vld [vmem:[#allocation5 + $0x130] sm:$0xff] }
 0x1b6   :  { %906 = vmatpush.msrb.mxu2 %v4614_v56  ;;  %1092 = vmatpush.msrb.mxu1 %v4617_v3  ;;  %7579 = vst [vmem:[#allocation90_spill] sm:$0xff] %v4623_v38  ;;  %v4635_v3 = vld [vmem:[#allocation5 + $0x108] sm:$0xff]  ;;  %v901_v56 = vld [vmem:[#allocation3 + $0x30] sm:$0xff] }
 0x1b7   :  { %946 = vmatpush.msra.mxu0 %v4620_v52  ;;  %1053 = vmatpush.msra.mxu3 %v4623_v38  ;;  %7580 = vst [vmem:[#allocation14_spill] sm:$0xff] %v4626_v62  ;;  %v4638_v52 = vld [vmem:[#allocation5 + $0x118] sm:$0xff]  ;;  %v4641_v38 = vld [vmem:[#allocation7 + $0x188] sm:$0xff] }
 0x1b8   :  { %907 = vmatpush.msrb.mxu2 %v4626_v62  ;;  %1093 = vmatpush.msrb.mxu1 %v7469_v41  ;;  %7581 = vst [vmem:[#allocation89_spill] sm:$0xff] %v4630_v47  ;;  %v4644_v41 = vld [vmem:[#allocation5 + $0xf0] sm:$0xff]  ;;  %v4651_v62 = vld [vmem:[#allocation7 + $0x168] sm:$0xff] }
 0x1b9   :  { %947 = vmatpush.msra.mxu0 %v4630_v47  ;;  %791 = vmatmul.f32.vlgmr.msra.gmra.mxu2 %v4582_v35  ;;  %7582 = vst [vmem:[#allocation23_spill] sm:$0xff] %v4635_v3  ;;  %v4648_v47 = vld [vmem:[#allocation5 + $0x100] sm:$0xff] }
 0x1ba   :  { %831 = vmatmul.f32.vlgmr.msrb.gmra.mxu0 %v4582_v35  ;;  %908 = vmatpush.msrb.mxu2 %v4635_v3  ;;  %7583 = vst [vmem:[#allocation93_spill] sm:$0xff] %v4638_v52  ;;  %v4654_v3 = vld [vmem:[#allocation5 + $0xd8] sm:$0xff] }
 0x1bb   :  { %948 = vmatpush.msra.mxu0 %v4638_v52  ;;  %7584 = vst [vmem:[#allocation16_spill] sm:$0xff] %v4641_v38  ;;  %1054 = vmatpush.msra.mxu3 %v4641_v38  ;;  %v4658_v38 = vld [vmem:[#allocation5 + $0xe8] sm:$0xff] }
 0x1bc   :  { %7585 = vst [vmem:[#allocation92_spill] sm:$0xff] %v4644_v41  ;;  %909 = vmatpush.msrb.mxu2 %v4644_v41  ;;  %1094 = vmatpush.msrb.mxu1 %v7473_v61  ;;  %v4661_v41 = vld [vmem:[#allocation7 + $0x148] sm:$0xff]  ;;  %v4664_v61 = vld [vmem:[#allocation5 + $0xc0] sm:$0xff] }
 0x1bd   :  { %7586 = vst [vmem:[#allocation25_spill] sm:$0xff] %v4648_v47  ;;  %949 = vmatpush.msra.mxu0 %v4648_v47  ;;  %1055 = vmatpush.msra.mxu3 %v4651_v62 }
 0x1be   :  { %7587 = vst [vmem:[#allocation96_spill] sm:$0xff] %v4651_v62  ;;  %910 = vmatpush.msrb.mxu2 %v4654_v3  ;;  %1095 = vmatpush.msrb.mxu1 %v7477_v16  ;;  %v4668_v62 = vld [vmem:[#allocation5 + $0xd0] sm:$0xff]  ;;  %v4674_v16 = vld [vmem:[#allocation5 + $0xa8] sm:$0xff] }
 0x1bf   :  { %7588 = vst [vmem:[#allocation18_spill] sm:$0xff] %v4654_v3  ;;  %950 = vmatpush.msra.mxu0 %v4658_v38  ;;  %1056 = vmatpush.msra.mxu3 %v4661_v41  ;;  %v4671_v3 = vld [vmem:[#allocation7 + $0x128] sm:$0xff] }
 0x1c0   :  { %7589 = vst [vmem:[#allocation95_spill] sm:$0xff] %v4658_v38  ;;  %911 = vmatpush.msrb.mxu2 %v4664_v61  ;;  %1096 = vmatpush.msrb.mxu1 %v7481_v8  ;;  %v4684_v8 = vld [vmem:[#allocation5 + $0x90] sm:$0xff] }
 0x1c1   :  { %7590 = vst [vmem:[#allocation27_spill] sm:$0xff] %v4661_v41  ;;  %951 = vmatpush.msra.mxu0 %v4668_v62  ;;  %1057 = vmatpush.msra.mxu3 %v4671_v3  ;;  %v4678_v41 = vld [vmem:[#allocation5 + $0xb8] sm:$0xff] }
 0x1c2   :  { %7591 = vst [vmem:[#allocation99_spill] sm:$0xff] %v4664_v61  ;;  %912 = vmatpush.msrb.mxu2 %v4674_v16  ;;  %1097 = vmatpush.msrb.mxu1 %v7485_v45  ;;  %v4681_v61 = vld [vmem:[#allocation7 + $0x108] sm:$0xff]  ;;  %v4694_v45 = vld [vmem:[#allocation5 + $0x78] sm:$0xff] }
 0x1c3   :  { %7592 = vst [vmem:[#allocation20_spill] sm:$0xff] %v4668_v62  ;;  %952 = vmatpush.msra.mxu0 %v4678_v41  ;;  %1058 = vmatpush.msra.mxu3 %v4681_v61 }
 0x1c4   :  { %7593 = vst [vmem:[#allocation98_spill] sm:$0xff] %v4671_v3  ;;  %913 = vmatpush.msrb.mxu2 %v4684_v8  ;;  %1098 = vmatpush.msrb.mxu1 %v4170_v10  ;;  %v4688_v3 = vld [vmem:[#allocation5 + $0xa0] sm:$0xff] }
 0x1c5   :  { %7594 = vst [vmem:[#allocation29_spill] sm:$0xff] %v4674_v16  ;;  %953 = vmatpush.msra.mxu0 %v4688_v3  ;;  %v4691_v16 = vld [vmem:[#allocation7 + $0xe8] sm:$0xff]  ;;  %v4704_v10 = vld [vmem:[#allocation5 + $0x60] sm:$0xff] }
 0x1c6   :  { %7595 = vst [vmem:[#allocation102_spill] sm:$0xff] %v4678_v41  ;;  %1059 = vmatpush.msra.mxu3 %v4691_v16  ;;  %914 = vmatpush.msrb.mxu2 %v4694_v45 }
 0x1c7   :  { %7596 = vst [vmem:[#allocation22_spill] sm:$0xff] %v4681_v61  ;;  %1099 = vmatpush.msrb.mxu1 %v4182_v29  ;;  %v4698_v61 = vld [vmem:[#allocation5 + $0x88] sm:$0xff] }
 0x1c8   :  { %7597 = vst [vmem:[#allocation101_spill] sm:$0xff] %v4684_v8  ;;  %954 = vmatpush.msra.mxu0 %v4698_v61  ;;  %v4701_v8 = vld [vmem:[#allocation7 + $0xc8] sm:$0xff]  ;;  %915 = vmatpush.msrb.mxu2 %v4704_v10 }
 0x1c9   :  { %7598 = vst [vmem:[#allocation31_spill] sm:$0xff] %v4688_v3  ;;  %1060 = vmatpush.msra.mxu3 %v4701_v8  ;;  %1100 = vmatpush.msrb.mxu1 %v4192_v11  ;;  %v4714_v29 = vld [vmem:[#allocation5 + $0x48] sm:$0xff]  ;;  %v4724_v11 = vld [vmem:[#allocation5 + $0x30] sm:$0xff] }
 0x1ca   :  { %7599 = vst [vmem:[#allocation24_spill] sm:$0xff] %v4691_v16  ;;  %v4708_v16 = vld [vmem:[#allocation5 + $0x70] sm:$0xff]  ;;  %916 = vmatpush.msrb.mxu2 %v4714_v29 }
 0x1cb   :  { %7600 = vst [vmem:[#allocation33_spill] sm:$0xff] %v4694_v45  ;;  %955 = vmatpush.msra.mxu0 %v4708_v16  ;;  %v4711_v45 = vld [vmem:[#allocation7 + $0xa8] sm:$0xff]  ;;  %1101 = vmatpush.msrb.mxu1 %v4202_v19  ;;  %v4734_v19 = vld [vmem:[#allocation5 + $0x18] sm:$0xff] }
 0x1cc   :  { %7601 = vst [vmem:[#allocation26_spill] sm:$0xff] %v4698_v61  ;;  %1061 = vmatpush.msra.mxu3 %v4711_v45  ;;  %917 = vmatpush.msrb.mxu2 %v4724_v11 }
 0x1cd   :  { %7602 = vst [vmem:[#allocation35_spill] sm:$0xff] %v4701_v8  ;;  %v4718_v8 = vld [vmem:[#allocation5 + $0x58] sm:$0xff]  ;;  %1102 = vmatpush.msrb.mxu1 %v4212_v22  ;;  %v4744_v22 = vld [vmem:[#allocation5] sm:$0xff] }
 0x1ce   :  { %7603 = vst [vmem:[#allocation28_spill] sm:$0xff] %v4704_v10  ;;  %956 = vmatpush.msra.mxu0 %v4718_v8  ;;  %v4721_v10 = vld [vmem:[#allocation7 + $0x88] sm:$0xff]  ;;  %918 = vmatpush.msrb.mxu2 %v4734_v19 }
 0x1cf   :  { %7604 = vst [vmem:[#allocation37_spill] sm:$0xff] %v4708_v16  ;;  %1062 = vmatpush.msra.mxu3 %v4721_v10  ;;  %1103 = vmatpush.msrb.mxu1 %v7499_v57  ;;  %v4753_v57 = vld [vmem:[#allocation7 + $0x3e0] sm:$0xff] }
 0x1d0   :  { %7605 = vst [vmem:[#allocation30_spill] sm:$0xff] %v4711_v45  ;;  %v4728_v45 = vld [vmem:[#allocation5 + $0x40] sm:$0xff]  ;;  %919 = vmatpush.msrb.mxu2 %v4744_v22 }
 0x1d1   :  { %7606 = vst [vmem:[#allocation39_spill] sm:$0xff] %v4714_v29  ;;  %957 = vmatpush.msra.mxu0 %v4728_v45  ;;  %v4731_v29 = vld [vmem:[#allocation7 + $0x68] sm:$0xff]  ;;  %1104 = vmatpush.msrb.mxu1 %v4232_v9  ;;  %v4762_v9 = vld [vmem:[#allocation7 + $0x3c0] sm:$0xff] }
 0x1d2   :  { %7607 = vst [vmem:[#allocation32_spill] sm:$0xff] %v4718_v8  ;;  %1063 = vmatpush.msra.mxu3 %v4731_v29  ;;  %920 = vmatmul.f32.vlgmr.msrb.gmra.mxu2 %v4582_v35 }
 0x1d3   :  { %7608 = vst [vmem:[#allocation42_spill] sm:$0xff] %v4721_v10  ;;  %v4738_v10 = vld [vmem:[#allocation5 + $0x28] sm:$0xff]  ;;  %1031 = vmatpush.msra.mxu2 %v4753_v57  ;;  %1105 = vmatpush.msrb.mxu1 %v4242_v31  ;;  %v4782_v31 = vld [vmem:[#allocation7 + $0x380] sm:$0xff] }
 0x1d4   :  { %7609 = vst [vmem:[#allocation34_spill] sm:$0xff] %v4724_v11  ;;  %958 = vmatpush.msra.mxu0 %v4738_v10  ;;  %v4741_v11 = vld [vmem:[#allocation7 + $0x48] sm:$0xff] }
 0x1d5   :  { %7610 = vst [vmem:[#allocation44_spill] sm:$0xff] %v4728_v45  ;;  %1064 = vmatpush.msra.mxu3 %v4741_v11  ;;  %1032 = vmatpush.msra.mxu2 %v4762_v9 }
 0x1d6   :  { %7611 = vst [vmem:[#allocation111_spill] sm:$0xff] %v4731_v29  ;;  %v4748_v29 = vld [vmem:[#allocation5 + $0x10] sm:$0xff]  ;;  %1106 = vmatpush.msrb.mxu1 %v7508_v1  ;;  %v4797_v1 = vld [vmem:[#allocation7 + $0x368] sm:$0xff] }
 0x1d7   :  { %7612 = vst [vmem:[#allocation36_spill] sm:$0xff] %v4734_v19  ;;  %959 = vmatpush.msra.mxu0 %v4748_v29 }
 0x1d8   :  { %7613 = vst [vmem:[#allocation112_spill] sm:$0xff] %v4738_v10  ;;  %960 = vmatmul.f32.vlgmr.msra.gmra.mxu0 %v4582_v35  ;;  %v4756_v10 = vld [vmem:[#allocation7 + $0x3e8] sm:$0xff] }
 0x1d9   :  { %7614 = vst [vmem:[#allocation46_spill] sm:$0xff] %v4741_v11  ;;  %1071 = vmatpush.msrb.mxu0 %v4756_v10  ;;  %v4759_v11 = vld [vmem:[#allocation7 + $0x28] sm:$0xff] }
 0x1da   :  { %7615 = vst [vmem:[#allocation38_spill] sm:$0xff] %v4744_v22  ;;  %1065 = vmatpush.msra.mxu3 %v4759_v11  ;;  %v4769_v22 = vld [vmem:[#allocation7 + $0x8] sm:$0xff] }
 0x1db   :  { %7616 = vst [vmem:[#allocation48_spill] sm:$0xff] %v4748_v29  ;;  %v4766_v29 = vld [vmem:[#allocation7 + $0x3c8] sm:$0xff] }
 0x1dc   :  { %7617 = vst [vmem:[#allocation40_spill] sm:$0xff] %v4753_v57  ;;  %1072 = vmatpush.msrb.mxu0 %v4766_v29  ;;  %1066 = vmatpush.msra.mxu3 %v4769_v22  ;;  %v4772_v57 = vld [vmem:[#allocation7 + $0x3a0] sm:$0xff] }
 0x1dd   :  { %7618 = vst [vmem:[#allocation115_spill] sm:$0xff] %v4756_v10  ;;  %1033 = vmatpush.msra.mxu2 %v4772_v57  ;;  %v4775_v10 = vld [vmem:[#allocation7 + $0x1f8] sm:$0xff] }
 0x1de   :  { %7619 = vst [vmem:[#allocation50_spill] sm:$0xff] %v4759_v11  ;;  %1131 = vmatpush.msrb.mxu3 %v4775_v10  ;;  %v4778_v11 = vld [vmem:[#allocation7 + $0x3a8] sm:$0xff] }
 0x1df   :  { %7620 = vst [vmem:[#allocation117_spill] sm:$0xff] %v4762_v9  ;;  %1073 = vmatpush.msrb.mxu0 %v4778_v11  ;;  %1034 = vmatpush.msra.mxu2 %v4782_v31 }
 0x1e0   :  { %7621 = vst [vmem:[#allocation41_spill] sm:$0xff] %v4766_v29  ;;  %v4785_v29 = vld [vmem:[#allocation7 + $0x1d8] sm:$0xff] }
 0x1e1   :  { %7622 = vst [vmem:[#allocation118_spill] sm:$0xff] %v4769_v22  ;;  %1132 = vmatpush.msrb.mxu3 %v4785_v29  ;;  %v4788_v22 = vld [vmem:[#allocation7 + $0x388] sm:$0xff] }
 0x1e2   :  { %7623 = vst [vmem:[#allocation64_spill] sm:$0xff] %v4772_v57  ;;  %1074 = vmatpush.msrb.mxu0 %v4788_v22  ;;  %v4791_v57 = vld [vmem:[#allocation7 + $0x360] sm:$0xff] }
 0x1e3   :  { %7624 = vst [vmem:[#allocation43_spill] sm:$0xff] %v4775_v10  ;;  %1035 = vmatpush.msra.mxu2 %v4791_v57  ;;  %v4794_v10 = vld [vmem:[#allocation7 + $0x1b8] sm:$0xff] }
 0x1e4   :  { %7625 = vst [vmem:[#allocation66_spill] sm:$0xff] %v4778_v11  ;;  %1133 = vmatpush.msrb.mxu3 %v4794_v10  ;;  %1075 = vmatpush.msrb.mxu0 %v4797_v1 }
 0x1e5   :  { %7626 = vst [vmem:[#allocation45_spill] sm:$0xff] %v4782_v31  ;;  %v4800_v31 = vld [vmem:[#allocation7 + $0x340] sm:$0xff] }
 0x1e6   :  { %7627 = vst [vmem:[#allocation68_spill] sm:$0xff] %v4785_v29  ;;  %1036 = vmatpush.msra.mxu2 %v4800_v31  ;;  %v4803_v29 = vld [vmem:[#allocation7 + $0x198] sm:$0xff] }
 0x1e7   :  { %7628 = vst [vmem:[#allocation47_spill] sm:$0xff] %v4788_v22  ;;  %1134 = vmatpush.msrb.mxu3 %v4803_v29  ;;  %v4806_v22 = vld [vmem:[#allocation7 + $0x348] sm:$0xff] }
 0x1e8   :  { %7629 = vst [vmem:[#allocation70_spill] sm:$0xff] %v4791_v57  ;;  %1076 = vmatpush.msrb.mxu0 %v4806_v22  ;;  %v4809_v57 = vld [vmem:[#allocation7 + $0x320] sm:$0xff] }
 0x1e9   :  { %7630 = vst [vmem:[#allocation49_spill] sm:$0xff] %v4794_v10  ;;  %1037 = vmatpush.msra.mxu2 %v4809_v57  ;;  %v4812_v10 = vld [vmem:[#allocation7 + $0x178] sm:$0xff] }
 0x1ea   :  { %7631 = vst [vmem:[#allocation72_spill] sm:$0xff] %v4797_v1  ;;  %1135 = vmatpush.msrb.mxu3 %v4812_v10  ;;  %v4815_v1 = vld [vmem:[#allocation7 + $0x328] sm:$0xff] }
 0x1eb   :  { %7632 = vst [vmem:[#allocation51_spill] sm:$0xff] %v4800_v31  ;;  %1077 = vmatpush.msrb.mxu0 %v4815_v1  ;;  %v4818_v31 = vld [vmem:[#allocation7 + $0x300] sm:$0xff] }
 0x1ec   :  { %7633 = vst [vmem:[#allocation74_spill] sm:$0xff] %v4803_v29  ;;  %1038 = vmatpush.msra.mxu2 %v4818_v31  ;;  %v4821_v29 = vld [vmem:[#allocation7 + $0x158] sm:$0xff] }
 0x1ed   :  { %7634 = vst [vmem:[#allocation52_spill] sm:$0xff] %v4806_v22  ;;  %1136 = vmatpush.msrb.mxu3 %v4821_v29  ;;  %v4824_v22 = vld [vmem:[#allocation7 + $0x308] sm:$0xff] }
 0x1ee   :  { %7635 = vst [vmem:[#allocation76_spill] sm:$0xff] %v4809_v57  ;;  %1078 = vmatpush.msrb.mxu0 %v4824_v22  ;;  %v4827_v57 = vld [vmem:[#allocation7 + $0x2e0] sm:$0xff] }
 0x1ef   :  { %7636 = vst [vmem:[#allocation53_spill] sm:$0xff] %v4812_v10  ;;  %1039 = vmatpush.msra.mxu2 %v4827_v57  ;;  %v4830_v10 = vld [vmem:[#allocation7 + $0x138] sm:$0xff] }
 0x1f0   :  { %7637 = vst [vmem:[#allocation78_spill] sm:$0xff] %v4815_v1  ;;  %1137 = vmatpush.msrb.mxu3 %v4830_v10  ;;  %v4833_v1 = vld [vmem:[#allocation7 + $0x2e8] sm:$0xff] }
 0x1f1   :  { %7638 = vst [vmem:[#allocation54_spill] sm:$0xff] %v4818_v31  ;;  %1079 = vmatpush.msrb.mxu0 %v4833_v1  ;;  %v4836_v31 = vld [vmem:[#allocation7 + $0x2c0] sm:$0xff] }
 0x1f2   :  { %7639 = vst [vmem:[#allocation81_spill] sm:$0xff] %v4821_v29  ;;  %1040 = vmatpush.msra.mxu2 %v4836_v31  ;;  %v4839_v29 = vld [vmem:[#allocation7 + $0x118] sm:$0xff] }
 0x1f3   :  { %7640 = vst [vmem:[#allocation55_spill] sm:$0xff] %v4824_v22  ;;  %1138 = vmatpush.msrb.mxu3 %v4839_v29  ;;  %v4842_v22 = vld [vmem:[#allocation7 + $0x2c8] sm:$0xff] }
 0x1f4   :  { %7641 = vst [vmem:[#allocation85_spill] sm:$0xff] %v4827_v57  ;;  %1080 = vmatpush.msrb.mxu0 %v4842_v22  ;;  %v4845_v57 = vld [vmem:[#allocation7 + $0x2a0] sm:$0xff] }
 0x1f5   :  { %7642 = vst [vmem:[#allocation56_spill] sm:$0xff] %v4830_v10  ;;  %1041 = vmatpush.msra.mxu2 %v4845_v57  ;;  %v4848_v10 = vld [vmem:[#allocation7 + $0xf8] sm:$0xff] }
 0x1f6   :  { %7643 = vst [vmem:[#allocation57_spill] sm:$0xff] %v4833_v1  ;;  %1139 = vmatpush.msrb.mxu3 %v4848_v10  ;;  %v4851_v1 = vld [vmem:[#allocation7 + $0x2a8] sm:$0xff] }
 0x1f7   :  { %7644 = vst [vmem:[#allocation88_spill] sm:$0xff] %v4836_v31  ;;  %1081 = vmatpush.msrb.mxu0 %v4851_v1  ;;  %v4854_v31 = vld [vmem:[#allocation7 + $0x280] sm:$0xff] }
 0x1f8   :  { %7645 = vst [vmem:[#allocation91_spill] sm:$0xff] %v4839_v29  ;;  %1042 = vmatpush.msra.mxu2 %v4854_v31  ;;  %v4857_v29 = vld [vmem:[#allocation7 + $0xd8] sm:$0xff] }
 0x1f9   :  { %7646 = vst [vmem:[#allocation58_spill] sm:$0xff] %v4842_v22  ;;  %1140 = vmatpush.msrb.mxu3 %v4857_v29  ;;  %v4860_v22 = vld [vmem:[#allocation7 + $0x288] sm:$0xff] }
 0x1fa   :  { %7647 = vst [vmem:[#allocation94_spill] sm:$0xff] %v4845_v57  ;;  %1082 = vmatpush.msrb.mxu0 %v4860_v22  ;;  %v4863_v57 = vld [vmem:[#allocation7 + $0x260] sm:$0xff] }
 0x1fb   :  { %7648 = vst [vmem:[#allocation59_spill] sm:$0xff] %v4848_v10  ;;  %1043 = vmatpush.msra.mxu2 %v4863_v57  ;;  %v4866_v10 = vld [vmem:[#allocation7 + $0xb8] sm:$0xff] }
 0x1fc   :  { %7649 = vst [vmem:[#allocation97_spill] sm:$0xff] %v4851_v1  ;;  %1141 = vmatpush.msrb.mxu3 %v4866_v10  ;;  %v4869_v1 = vld [vmem:[#allocation7 + $0x268] sm:$0xff] }
 0x1fd   :  { %7650 = vst [vmem:[#allocation60_spill] sm:$0xff] %v4854_v31  ;;  %1083 = vmatpush.msrb.mxu0 %v4869_v1  ;;  %v4872_v31 = vld [vmem:[#allocation7 + $0x240] sm:$0xff] }
 0x1fe   :  { %7651 = vst [vmem:[#allocation100_spill] sm:$0xff] %v4857_v29  ;;  %1044 = vmatpush.msra.mxu2 %v4872_v31  ;;  %v4875_v29 = vld [vmem:[#allocation7 + $0x98] sm:$0xff] }
 0x1ff   :  { %7652 = vst [vmem:[#allocation61_spill] sm:$0xff] %v4860_v22  ;;  %1142 = vmatpush.msrb.mxu3 %v4875_v29  ;;  %v4878_v22 = vld [vmem:[#allocation7 + $0x248] sm:$0xff] }
 0x200   :  { %7653 = vst [vmem:[#allocation105_spill] sm:$0xff] %v4863_v57  ;;  %1084 = vmatpush.msrb.mxu0 %v4878_v22  ;;  %v4881_v57 = vld [vmem:[#allocation7 + $0x220] sm:$0xff] }
 0x201   :  { %7654 = vst [vmem:[#allocation62_spill] sm:$0xff] %v4866_v10  ;;  %1045 = vmatpush.msra.mxu2 %v4881_v57  ;;  %v4884_v10 = vld [vmem:[#allocation7 + $0x78] sm:$0xff] }
 0x202   :  { %7655 = vst [vmem:[#allocation106_spill] sm:$0xff] %v4869_v1  ;;  %1143 = vmatpush.msrb.mxu3 %v4884_v10  ;;  %v4887_v1 = vld [vmem:[#allocation7 + $0x228] sm:$0xff] }
 0x203   :  { %7656 = vst [vmem:[#allocation63_spill] sm:$0xff] %v4872_v31  ;;  %1085 = vmatpush.msrb.mxu0 %v4887_v1  ;;  %v4890_v31 = vld [vmem:[#allocation7 + $0x200] sm:$0xff] }
 0x204   :  { %7657 = vst [vmem:[#allocation107_spill] sm:$0xff] %v4875_v29  ;;  %1046 = vmatpush.msra.mxu2 %v4890_v31  ;;  %v4893_v29 = vld [vmem:[#allocation7 + $0x58] sm:$0xff] }
 0x205   :  { %7658 = vst [vmem:[#allocation65_spill] sm:$0xff] %v4878_v22  ;;  %1144 = vmatpush.msrb.mxu3 %v4893_v29  ;;  %v4896_v22 = vld [vmem:[#allocation7 + $0x3f0] sm:$0xff] }
 0x206   :  { %7659 = vst [vmem:[#allocation108_spill] sm:$0xff] %v4881_v57  ;;  %1111 = vmatpush.msrb.mxu2 %v4896_v22  ;;  %v4899_v57 = vld [vmem:[#allocation7 + $0x208] sm:$0xff] }
 0x207   :  { %7660 = vst [vmem:[#allocation67_spill] sm:$0xff] %v4884_v10  ;;  %1086 = vmatpush.msrb.mxu0 %v4899_v57  ;;  %v4902_v10 = vld [vmem:[#allocation7 + $0x3f8] sm:$0xff] }
 0x208   :  { %7661 = vst [vmem:[#allocation109_spill] sm:$0xff] %v4887_v1  ;;  %v4905_v1 = vld [vmem:[#allocation7 + $0x38] sm:$0xff] }
 0x209   :  { %7662 = vst [vmem:[#allocation69_spill] sm:$0xff] %v4890_v31  ;;  %1151 = vmatpush.msra.mxu0 %v4902_v10  ;;  %1145 = vmatpush.msrb.mxu3 %v4905_v1  ;;  %v4908_v31 = vld [vmem:[#allocation7 + $0x3d0] sm:$0xff] }
 0x20a   :  { %7663 = vst [vmem:[#allocation110_spill] sm:$0xff] %v4893_v29  ;;  %1112 = vmatpush.msrb.mxu2 %v4908_v31  ;;  %v4911_v29 = vld [vmem:[#allocation7 + $0x3d8] sm:$0xff] }
 0x20b   :  { %7664 = vst [vmem:[#allocation71_spill] sm:$0xff] %v4896_v22  ;;  %1152 = vmatpush.msra.mxu0 %v4911_v29  ;;  %1146 = vmatpush.msrb.mxu3 %v7510_v24  ;;  %v4915_v22 = vld [vmem:[#allocation7 + $0x3b0] sm:$0xff]  ;;  %v4930_v24 = vld [vmem:[#allocation7 + $0x378] sm:$0xff] }
 0x20c   :  { %7665 = vst [vmem:[#allocation113_spill] sm:$0xff] %v4899_v57  ;;  %1113 = vmatpush.msrb.mxu2 %v4915_v22  ;;  %v4918_v57 = vld [vmem:[#allocation7 + $0x3b8] sm:$0xff] }
 0x20d   :  { %7666 = vst [vmem:[#allocation73_spill] sm:$0xff] %v4902_v10  ;;  %1153 = vmatpush.msra.mxu0 %v4918_v57  ;;  %v4921_v10 = vld [vmem:[#allocation7 + $0x390] sm:$0xff] }
 0x20e   :  { %7667 = vst [vmem:[#allocation114_spill] sm:$0xff] %v4905_v1  ;;  %1114 = vmatpush.msrb.mxu2 %v4921_v10  ;;  %v4924_v1 = vld [vmem:[#allocation7 + $0x398] sm:$0xff] }
 0x20f   :  { %7668 = vst [vmem:[#allocation75_spill] sm:$0xff] %v4908_v31  ;;  %1154 = vmatpush.msra.mxu0 %v4924_v1  ;;  %v4927_v31 = vld [vmem:[#allocation7 + $0x370] sm:$0xff] }
 0x210   :  { %7669 = vst [vmem:[#allocation116_spill] sm:$0xff] %v4911_v29  ;;  %1115 = vmatpush.msrb.mxu2 %v4927_v31 }
 0x211   :  { %7670 = vst [vmem:[#allocation77_spill] sm:$0xff] %v4915_v22  ;;  %1155 = vmatpush.msra.mxu0 %v4930_v24  ;;  %v4933_v22 = vld [vmem:[#allocation7 + $0x350] sm:$0xff] }
 0x212   :  { %7671 = vst [vmem:[#allocation119_spill] sm:$0xff] %v4918_v57  ;;  %1116 = vmatpush.msrb.mxu2 %v4933_v22  ;;  %v4936_v57 = vld [vmem:[#allocation7 + $0x358] sm:$0xff] }
 0x213   :  { %7672 = vst [vmem:[#allocation79_spill] sm:$0xff] %v4921_v10  ;;  %1156 = vmatpush.msra.mxu0 %v4936_v57  ;;  %v4939_v10 = vld [vmem:[#allocation7 + $0x330] sm:$0xff] }
 0x214   :  { %7673 = vst [vmem:[#allocation120_spill] sm:$0xff] %v4924_v1  ;;  %1117 = vmatpush.msrb.mxu2 %v4939_v10  ;;  %v4942_v1 = vld [vmem:[#allocation7 + $0x338] sm:$0xff]  ;;  %v732_v11 = vpop.f32.mrf.mxu3 }
 0x215   :  { %7674 = vst [vmem:[#allocation82_spill] sm:$0xff] %v4927_v31  ;;  %1157 = vmatpush.msra.mxu0 %v4942_v1  ;;  %v4945_v31 = vld [vmem:[#allocation7 + $0x310] sm:$0xff] }
 0x216   :  { %7675 = vst [vmem:[#allocation121_spill] sm:$0xff] %v4930_v24  ;;  %1118 = vmatpush.msrb.mxu2 %v4945_v31  ;;  %v4948_v24 = vld [vmem:[#allocation7 + $0x318] sm:$0xff] }
 0x217   :  { %7676 = vst [vmem:[#allocation103_spill] sm:$0xff] %v4933_v22  ;;  %1158 = vmatpush.msra.mxu0 %v4948_v24  ;;  %v4951_v22 = vld [vmem:[#allocation7 + $0x2f0] sm:$0xff] }
 0x218   :  { %7677 = vst [vmem:[#allocation122_spill] sm:$0xff] %v4936_v57  ;;  %1119 = vmatpush.msrb.mxu2 %v4951_v22  ;;  %v4954_v57 = vld [vmem:[#allocation7 + $0x2f8] sm:$0xff] }
 0x219   :  { %7678 = vst [vmem:[#allocation123_spill] sm:$0xff] %v4939_v10  ;;  %1159 = vmatpush.msra.mxu0 %v4954_v57  ;;  %v4957_v10 = vld [vmem:[#allocation7 + $0x2d0] sm:$0xff] }
 0x21a   :  { %7679 = vst [vmem:[#allocation124_spill] sm:$0xff] %v4942_v1  ;;  %1120 = vmatpush.msrb.mxu2 %v4957_v10  ;;  %v4960_v1 = vld [vmem:[#allocation7 + $0x2d8] sm:$0xff] }
 0x21b   :  { %7680 = vst [vmem:[#allocation125_spill] sm:$0xff] %v4945_v31  ;;  %1160 = vmatpush.msra.mxu0 %v4960_v1  ;;  %v4963_v31 = vld [vmem:[#allocation7 + $0x2b0] sm:$0xff] }
 0x21c   :  { %7681 = vst [vmem:[#allocation126_spill] sm:$0xff] %v4948_v24  ;;  %1121 = vmatpush.msrb.mxu2 %v4963_v31  ;;  %v4966_v24 = vld [vmem:[#allocation7 + $0x2b8] sm:$0xff]  ;;  %v812_v61 = vpop.f32.mrf.mxu3 }
 0x21d   :  { %7682 = vst [vmem:[#allocation127_spill] sm:$0xff] %v4951_v22  ;;  %1161 = vmatpush.msra.mxu0 %v4966_v24  ;;  %v4969_v22 = vld [vmem:[#allocation7 + $0x290] sm:$0xff] }
 0x21e   :  { %7683 = vst [vmem:[#allocation128_spill] sm:$0xff] %v4954_v57  ;;  %1122 = vmatpush.msrb.mxu2 %v4969_v22  ;;  %v4972_v57 = vld [vmem:[#allocation7 + $0x298] sm:$0xff] }
 0x21f   :  { %7684 = vst [vmem:[#allocation129_spill] sm:$0xff] %v4957_v10  ;;  %1162 = vmatpush.msra.mxu0 %v4972_v57  ;;  %v4975_v10 = vld [vmem:[#allocation7 + $0x270] sm:$0xff] }
 0x220   :  { %7685 = vst [vmem:[#allocation130_spill] sm:$0xff] %v4960_v1  ;;  %1123 = vmatpush.msrb.mxu2 %v4975_v10  ;;  %v4978_v1 = vld [vmem:[#allocation7 + $0x278] sm:$0xff] }
 0x221   :  { %7686 = vst [vmem:[#allocation131_spill] sm:$0xff] %v4963_v31  ;;  %1163 = vmatpush.msra.mxu0 %v4978_v1  ;;  %v4981_v31 = vld [vmem:[#allocation7 + $0x250] sm:$0xff] }
 0x222   :  { %7687 = vst [vmem:[#allocation132_spill] sm:$0xff] %v4966_v24  ;;  %1124 = vmatpush.msrb.mxu2 %v4981_v31  ;;  %v4984_v24 = vld [vmem:[#allocation7 + $0x258] sm:$0xff] }
 0x223   :  { %7688 = vst [vmem:[#allocation133_spill] sm:$0xff] %v4969_v22  ;;  %1164 = vmatpush.msra.mxu0 %v4984_v24  ;;  %v4987_v22 = vld [vmem:[#allocation7 + $0x230] sm:$0xff] }
 0x224   :  { %7689 = vst [vmem:[#allocation134_spill] sm:$0xff] %v4972_v57  ;;  %1125 = vmatpush.msrb.mxu2 %v4987_v22  ;;  %v4990_v57 = vld [vmem:[#allocation7 + $0x238] sm:$0xff] }
 0x225   :  { %7690 = vst [vmem:[#allocation135_spill] sm:$0xff] %v4975_v10  ;;  %1165 = vmatpush.msra.mxu0 %v4990_v57  ;;  %v4993_v10 = vld [vmem:[#allocation7 + $0x210] sm:$0xff] }
 0x226   :  { %7691 = vst [vmem:[#allocation136_spill] sm:$0xff] %v4978_v1  ;;  %1126 = vmatpush.msrb.mxu2 %v4993_v10  ;;  %v4996_v1 = vld [vmem:[#allocation7 + $0x218] sm:$0xff] }
 0x227   :  { %7692 = vst [vmem:[#allocation137_spill] sm:$0xff] %v4981_v31  ;;  %1166 = vmatpush.msra.mxu0 %v4996_v1 }
 0x228   :  { %7693 = vst [vmem:[#allocation138_spill] sm:$0xff] %v4984_v24  ;;  %v772_v24 = vpop.f32.mrf.mxu1 }
 0x229   :  { %7694 = vst [vmem:[#allocation139_spill] sm:$0xff] %v4987_v22 }
 0x22a   :  { %7695 = vst [vmem:[#allocation140_spill] sm:$0xff] %v4990_v57 }
 0x22b   :  { %7696 = vst [vmem:[#allocation141_spill] sm:$0xff] %v4993_v10 }
 0x22c   :  { %7697 = vst [vmem:[#allocation142_spill] sm:$0xff] %v4996_v1 }
 0x22e   :  { %v752_v31 = vpop.f32.mrf.mxu0 }
 0x22f   :  { %v753_v29 = vadd.f32 %v752_v31, %v4456_v27 }
 0x231   :  { %v773_v9 = vadd.f32 %v772_v24, %v753_v29  ;;  %v902_v29 = vld [vmem:[#allocation3 + $0x38] sm:$0xff] }
 0x233   :  { %v2851_v19 = vmul.f32 -1.442695, %v773_v9 }
 0x234   :  { %v712_v22 = vpop.f32.mrf.mxu2 }
 0x235   :  { %2915 = vpow2.f32 %v2851_v19  ;;  %v713_v45 = vadd.f32 %v712_v22, %v4459_v44  ;;  %v941_v41 = vpop.f32.mrf.mxu3 }
 0x236   :  { %v942_v27 = vadd.f32 %v941_v41, %v7566_v46  ;;  %v852_v46 = vpop.f32.mrf.mxu1 }
 0x237   :  { %v733_v57 = vadd.f32 %v732_v11, %v713_v45  ;;  %v832_v45 = vpop.f32.mrf.mxu0 }
 0x238   :  { %v984_v19 = vadd.f32 %v942_v27, %v902_v29 }
 0x239   :  { %v2850_v8 = vmul.f32 -1.442695, %v733_v57 }
 0x23a   :  { %v2853_v44 = vmul.f32 -1.442695, %v984_v19 }
 0x23b   :  { %v2916_v16 = vpop.eup %2915  ;;  %2917 = vpow2.f32 %v2850_v8 }
 0x23c   :  { %v877_v10 = vadd.f32 1.0, %v2916_v16  ;;  %v792_v11 = vpop.f32.mrf.mxu2  ;;  %v833_v16 = vadd.f32 %v832_v45, %v4463_v7 }
 0x23d   :  { %v793_v41 = vadd.f32 %v792_v11, %v4465_v59 }
 0x23e   :  { %2919 = vrcp.f32 %v877_v10  ;;  %v853_v29 = vadd.f32 %v852_v46, %v833_v16  ;;  %vm883_vm13 = vweird.f32 %v877_v10 }
 0x23f   :  { %v813_v13 = vadd.f32 %v812_v61, %v793_v41 }
 0x241   :  { %v2918_v3 = vpop.eup %2917 }
 0x242   :  { %v858_v1 = vadd.f32 1.0, %v2918_v3 }
 0x244   :  { %2921 = vrcp.f32 %v858_v1  ;;  %v2920_v31 = vpop.eup %2919  ;;  %v870_v8 = vand.u32 2147483648, %v858_v1  ;;  %v868_v3 = vand.u32 2147483647, %v858_v1  ;;  %vm864_vm9 = vweird.f32 %v858_v1 }
 0x245   :  { %v879_v9 = vmul.f32 %v2920_v31, %v877_v10  ;;  %2923 = vpow2.f32 %v2853_v44  ;;  %vm884_vm12 = vweird.f32 %v2920_v31 }
 0x246   :  { %v871_v27 = vor.u32 1.1754944e-38, %v870_v8  ;;  %vm869_vm11 = vcmp.eq.f32.partialorder %v868_v3, 8.507059e+37  ;;  %vm885_vm14 = vmor %vm883_vm13, %vm884_vm12 }
 0x247   :  { %v880_v22 = vsub.f32 1.0, %v879_v9 }
 0x249   :  { %v881_v47 = vmul.f32 %v2920_v31, %v880_v22 }
 0x24a   :  { %v2922_v24 = vpop.eup %2921 }
 0x24b   :  { %v860_v62 = vmul.f32 %v2922_v24, %v858_v1  ;;  %vm865_vm8 = vweird.f32 %v2922_v24  ;;  %v882_v19 = vadd.f32 %v2920_v31, %v881_v47  ;;  %v887_v1 = vand.u32 2147483647, %v877_v10  ;;  %v2924_v11 = vpop.eup %2923 }
 0x24c   :  { %vm866_vm10 = vmor %vm864_vm9, %vm865_vm8 }
 0x24d   :  { %v861_v57 = vsub.f32 1.0, %v860_v62  ;;  %v886_v8 = vsel %vm885_vm14, %v2920_v31, %v882_v19  ;;  %vm888_vm15 = vcmp.eq.f32.partialorder %v887_v1, 8.507059e+37  ;;  %v7712_v1 = vld [vmem:[#allocation16_spill] sm:$0xff] }
 0x24f   :  { %v862_v38 = vmul.f32 %v2922_v24, %v861_v57  ;;  %v889_v57 = vand.u32 2147483648, %v877_v10 }
 0x251   :  { %v863_v52 = vadd.f32 %v2922_v24, %v862_v38  ;;  %v890_v46 = vor.u32 1.1754944e-38, %v889_v57  ;;  %v7710_v57 = vld [vmem:[#allocation23_spill] sm:$0xff] }
 0x253   :  { %v867_v9 = vsel %vm866_vm10, %v2922_v24, %v863_v52  ;;  %v5005_v24 = vadd.f32 1.0, %v2924_v11  ;;  %v891_v47 = vsel %vm888_vm15, %v890_v46, %v886_v8  ;;  %v7714_v11 = vld [vmem:[#allocation25_spill] sm:$0xff]  ;;  %v7715_v8 = vld [vmem:[#allocation96_spill] sm:$0xff]  ;;  %v7716_v46 = vld [vmem:[#allocation18_spill] sm:$0xff] }
 0x254   :  { %v872_v62 = vsel %vm869_vm11, %v871_v27, %v867_v9  ;;  %v896_v16 = vsub.f32 1.0, %v891_v47  ;;  %v898_v10 = vmul.f32 %v891_v47, %v4473_v15  ;;  %v7718_v47 = vld [vmem:[#allocation27_spill] sm:$0xff] }
 0x255   :  { %v921_v45 = vpop.f32.mrf.mxu2  ;;  %v893_v7 = vmul.f32 %v872_v62, %v853_v29  ;;  %v1000_v62 = vand.u32 2147483648, %v5005_v24  ;;  %vm994_vm5 = vweird.f32 %v5005_v24 }
 0x256   :  { %v922_v38 = vadd.f32 %v921_v45, %v7569_v39  ;;  %v7709_v45 = vld [vmem:[#allocation89_spill] sm:$0xff] }
 0x257   :  { %v894_v22 = vadd.f32 %v893_v7, %v813_v13 }
 0x258   :  { %v964_v44 = vadd.f32 %v922_v38, %v901_v56  ;;  %v7711_v38 = vld [vmem:[#allocation93_spill] sm:$0xff] }
 0x259   :  { %2925 = vtanh.f32 %v894_v22  ;;  %v7713_v22 = vld [vmem:[#allocation92_spill] sm:$0xff] }
 0x25a   :  { %v2852_v52 = vmul.f32 -1.442695, %v964_v44  ;;  %v5080_v44 = vld [vmem:[#allocation7 + $0x190] sm:$0xff] }
 0x25c   :  { %2927 = vpow2.f32 %v2852_v52  ;;  %v5086_v52 = vld [vmem:[#allocation7 + $0x170] sm:$0xff] }
 0x25d   :  { %2929 = vrcp.f32 %v5005_v24 }
 0x25f   :  { %v2926_v3 = vpop.eup %2925 }
 0x260   :  { %v897_v61 = vmul.f32 %v2926_v3, %v896_v16  ;;  %v7719_v16 = vld [vmem:[#allocation99_spill] sm:$0xff]  ;;  %v5092_v3 = vld [vmem:[#allocation7 + $0x150] sm:$0xff] }
 0x262   :  { %v2928_v41 = vpop.eup %2927  ;;  %v5009_v13 = vadd.f32 %v898_v10, %v897_v61  ;;  %v7720_v61 = vld [vmem:[#allocation20_spill] sm:$0xff]  ;;  %v7721_v10 = vld [vmem:[#allocation98_spill] sm:$0xff] }
 0x263   :  { %v968_v7 = vadd.f32 1.0, %v2928_v41  ;;  %v2930_v56 = vpop.eup %2929  ;;  %v7722_v41 = vld [vmem:[#allocation29_spill] sm:$0xff] }
 0x264   :  { %1047 = vmatmul.f32.vlgmr.msra.gmra.mxu2 %v5009_v13  ;;  %1087 = vmatmul.f32.vlgmr.msrb.gmra.mxu0 %v5009_v13  ;;  %v990_v15 = vmul.f32 %v2930_v56, %v5005_v24  ;;  %vm995_vm4 = vweird.f32 %v2930_v56 }
 0x265   :  { %2931 = vrcp.f32 %v968_v7  ;;  %1240 = vmatpush.msra.mxu2 %v4479_v25  ;;  %1327 = vmatpush.msrb.mxu0 %v4482_v6  ;;  %v980_v6 = vand.u32 2147483648, %v968_v7  ;;  %vm974_vm1 = vweird.f32 %v968_v7  ;;  %vm996_vm6 = vmor %vm994_vm5, %vm995_vm4 }
 0x266   :  { %v991_v29 = vsub.f32 1.0, %v990_v15  ;;  %v7724_v15 = vld [vmem:[#allocation22_spill] sm:$0xff] }
 0x267   :  { %1241 = vmatpush.msra.mxu2 %v4485_v55  ;;  %1328 = vmatpush.msrb.mxu0 %v4488_v20  ;;  %v978_v20 = vand.u32 2147483647, %v968_v7 }
 0x269   :  { %1242 = vmatpush.msra.mxu2 %v4493_v53  ;;  %1329 = vmatpush.msrb.mxu0 %v4496_v42  ;;  %v992_v53 = vmul.f32 %v2930_v56, %v991_v29  ;;  %v961_v42 = vpop.f32.mrf.mxu0  ;;  %vm979_vm3 = vcmp.eq.f32.partialorder %v978_v20, 8.507059e+37  ;;  %v7726_v29 = vld [vmem:[#allocation31_spill] sm:$0xff]  ;;  %v7729_v20 = vld [vmem:[#allocation26_spill] sm:$0xff] }
 0x26b   :  { %v2932_v31 = vpop.eup %2931  ;;  %1243 = vmatpush.msra.mxu2 %v4499_v63  ;;  %1330 = vmatpush.msrb.mxu0 %v4502_v0  ;;  %v981_v0 = vor.u32 1.1754944e-38, %v980_v6  ;;  %v7728_v6 = vld [vmem:[#allocation33_spill] sm:$0xff] }
 0x26c   :  { %v970_v27 = vmul.f32 %v2932_v31, %v968_v7  ;;  %1127 = vmatmul.f32.vlgmr.msrb.gmra.mxu2 %v5009_v13  ;;  %1167 = vmatmul.f32.vlgmr.msra.gmra.mxu0 %v5009_v13  ;;  %vm975_vm0 = vweird.f32 %v2932_v31  ;;  %v5098_v7 = vld [vmem:[#allocation7 + $0x130] sm:$0xff] }
 0x26d   :  { %1244 = vmatpush.msra.mxu2 %v4507_v14  ;;  %1331 = vmatpush.msrb.mxu0 %v4510_v28  ;;  %vm976_vm2 = vmor %vm974_vm1, %vm975_vm0  ;;  %v962_v14 = vadd.f32 %v961_v42, %v4281_v43  ;;  %v7731_v42 = vld [vmem:[#allocation28_spill] sm:$0xff] }
 0x26e   :  { %v971_v25 = vsub.f32 1.0, %v970_v27  ;;  %v5104_v27 = vld [vmem:[#allocation7 + $0x110] sm:$0xff] }
 0x26f   :  { %1245 = vmatpush.msra.mxu2 %v4513_v18  ;;  %1332 = vmatpush.msrb.mxu0 %v4516_v30  ;;  %v993_v18 = vadd.f32 %v2930_v56, %v992_v53  ;;  %v903_v30 = vld [vmem:[#allocation3 + $0x40] sm:$0xff]  ;;  %v7730_v53 = vld [vmem:[#allocation35_spill] sm:$0xff] }
 0x270   :  { %v972_v55 = vmul.f32 %v2932_v31, %v971_v25  ;;  %v7727_v25 = vld [vmem:[#allocation24_spill] sm:$0xff] }
 0x271   :  { %1246 = vmatpush.msra.mxu2 %v4520_v48  ;;  %1333 = vmatpush.msrb.mxu0 %v4523_v49  ;;  %v998_v48 = vand.u32 2147483647, %v5005_v24  ;;  %v7717_v24 = vld [vmem:[#allocation95_spill] sm:$0xff] }
 0x272   :  { %v973_v63 = vadd.f32 %v2932_v31, %v972_v55  ;;  %v5110_v55 = vld [vmem:[#allocation7 + $0xf0] sm:$0xff] }
 0x273   :  { %1247 = vmatpush.msra.mxu2 %v4527_v23  ;;  %1334 = vmatpush.msrb.mxu0 %v4530_v40  ;;  %v997_v23 = vsel %vm996_vm6, %v2930_v56, %v993_v18  ;;  %v1001_v40 = vor.u32 1.1754944e-38, %v1000_v62  ;;  %vm999_vm7 = vcmp.eq.f32.partialorder %v998_v48, 8.507059e+37  ;;  %v7723_v56 = vld [vmem:[#allocation102_spill] sm:$0xff]  ;;  %v5122_v18 = vld [vmem:[#allocation7 + $0xb0] sm:$0xff] }
 0x274   :  { %v977_v28 = vsel %vm976_vm2, %v2932_v31, %v973_v63  ;;  %v7725_v31 = vld [vmem:[#allocation101_spill] sm:$0xff]  ;;  %v5116_v63 = vld [vmem:[#allocation7 + $0xd0] sm:$0xff]  ;;  %v7737_v62 = vld [vmem:[#allocation34_spill] sm:$0xff] }
 0x275   :  { %v982_v9 = vsel %vm979_vm3, %v981_v0, %v977_v28  ;;  %1248 = vmatpush.msra.mxu2 %v4536_v54  ;;  %1335 = vmatpush.msrb.mxu0 %v4539_v37  ;;  %v1002_v54 = vsel %vm999_vm7, %v1001_v40, %v997_v23  ;;  %v7732_v0 = vld [vmem:[#allocation37_spill] sm:$0xff]  ;;  %v7734_v28 = vld [vmem:[#allocation39_spill] sm:$0xff]  ;;  %v7738_v48 = vld [vmem:[#allocation44_spill] sm:$0xff] }
 0x276   :  { %v1004_v19 = vmul.f32 %v982_v9, %v962_v14  ;;  %v1007_v37 = vsub.f32 1.0, %v1002_v54  ;;  %v7733_v14 = vld [vmem:[#allocation30_spill] sm:$0xff]  ;;  %v7740_v23 = vld [vmem:[#allocation36_spill] sm:$0xff] }
 0x277   :  { %1249 = vmatpush.msra.mxu2 %v4544_v50  ;;  %1336 = vmatpush.msrb.mxu0 %v4547_v2  ;;  %v1009_v2 = vmul.f32 %v1002_v54, %v4582_v35  ;;  %v7706_v35 = vld [vmem:[#allocation21_spill] sm:$0xff]  ;;  %v7736_v9 = vld [vmem:[#allocation42_spill] sm:$0xff]  ;;  %v5134_v40 = vld [vmem:[#allocation7 + $0x70] sm:$0xff] }
 0x278   :  { %v1005_v49 = vadd.f32 %v1004_v19, %v903_v30  ;;  %v7735_v30 = vld [vmem:[#allocation32_spill] sm:$0xff] }
 0x279   :  { %1250 = vmatpush.msra.mxu2 %v4551_v5  ;;  %1337 = vmatpush.msrb.mxu0 %v4554_v21  ;;  %v5128_v19 = vld [vmem:[#allocation7 + $0x90] sm:$0xff] }
 0x27a   :  { %2933 = vtanh.f32 %v1005_v49  ;;  %v7739_v49 = vld [vmem:[#allocation111_spill] sm:$0xff]  ;;  %v7741_v54 = vld [vmem:[#allocation112_spill] sm:$0xff] }
 0x27b   :  { %1251 = vmatpush.msra.mxu2 %v4557_v17  ;;  %1338 = vmatpush.msrb.mxu0 %v4560_v33  ;;  %v7698_v17 = vld [vmem:[#allocation17_spill] sm:$0xff]  ;;  %v7699_v33 = vld [vmem:[#allocation80_spill] sm:$0xff] }
 0x27d   :  { %1252 = vmatpush.msra.mxu2 %v4563_v32  ;;  %1339 = vmatpush.msrb.mxu0 %v4566_v36  ;;  %v7700_v32 = vld [vmem:[#allocation12_spill] sm:$0xff]  ;;  %v7701_v36 = vld [vmem:[#allocation83_spill] sm:$0xff] }
 0x27f   :  { %1253 = vmatpush.msra.mxu2 %v4569_v4  ;;  %1340 = vmatpush.msrb.mxu0 %v4572_v34  ;;  %v7702_v4 = vld [vmem:[#allocation19_spill] sm:$0xff] }
 0x280   :  { %v2934_v50 = vpop.eup %2933  ;;  %v7703_v34 = vld [vmem:[#allocation87_spill] sm:$0xff] }
 0x281   :  { %v1008_v5 = vmul.f32 %v2934_v50, %v1007_v37  ;;  %1254 = vmatpush.msra.mxu2 %v4576_v51  ;;  %1341 = vmatpush.msrb.mxu0 %v4579_v60  ;;  %v7704_v51 = vld [vmem:[#allocation13_spill] sm:$0xff]  ;;  %v7705_v60 = vld [vmem:[#allocation86_spill] sm:$0xff] }
 0x282   :  { %v7742_v37 = vld [vmem:[#allocation46_spill] sm:$0xff] }
 0x283   :  { %v5051_v21 = vadd.f32 %v1009_v2, %v1008_v5  ;;  %1255 = vmatpush.msra.mxu2 %v4584_v26  ;;  %1342 = vmatpush.msrb.mxu0 %v4587_v12  ;;  %v7707_v26 = vld [vmem:[#allocation90_spill] sm:$0xff]  ;;  %v5140_v2 = vld [vmem:[#allocation7 + $0x50] sm:$0xff] }
 0x284   :  { %v7708_v12 = vld [vmem:[#allocation14_spill] sm:$0xff]  ;;  %v7744_v5 = vld [vmem:[#allocation48_spill] sm:$0xff] }
 0x285   :  { %1027 = vmatmul.f32.vlgmr.msra.gmra.mxu1 %v5051_v21  ;;  %1067 = vmatmul.f32.vlgmr.msra.gmra.mxu3 %v5051_v21  ;;  %v7743_v50 = vld [vmem:[#allocation38_spill] sm:$0xff] }
 0x286   :  { %1220 = vmatpush.msra.mxu1 %v4592_v58  ;;  %1256 = vmatmul.f32.vlgmr.msra.gmra.mxu2 %v5051_v21  ;;  %v5070_v58 = vld [vmem:[#allocation7 + $0x1b0] sm:$0xff] }
 0x287   :  { %1260 = vmatpush.msra.mxu3 %v7698_v17  ;;  %1367 = vmatpush.msrb.mxu2 %v7699_v33  ;;  %v7745_v17 = vld [vmem:[#allocation40_spill] sm:$0xff]  ;;  %v7746_v33 = vld [vmem:[#allocation115_spill] sm:$0xff] }
 0x288   :  { %1221 = vmatpush.msra.mxu1 %v7700_v32  ;;  %1407 = vmatpush.msra.mxu0 %v7701_v36  ;;  %v7747_v32 = vld [vmem:[#allocation50_spill] sm:$0xff]  ;;  %v7748_v36 = vld [vmem:[#allocation117_spill] sm:$0xff] }
 0x289   :  { %1261 = vmatpush.msra.mxu3 %v7702_v4  ;;  %1368 = vmatpush.msrb.mxu2 %v7703_v34  ;;  %v5150_v4 = vld [vmem:[#allocation7 + $0x30] sm:$0xff]  ;;  %v7749_v34 = vld [vmem:[#allocation41_spill] sm:$0xff] }
 0x28a   :  { %1222 = vmatpush.msra.mxu1 %v7704_v51  ;;  %1408 = vmatpush.msra.mxu0 %v7705_v60  ;;  %v7750_v51 = vld [vmem:[#allocation118_spill] sm:$0xff]  ;;  %v7751_v60 = vld [vmem:[#allocation64_spill] sm:$0xff] }
 0x28b   :  { %1262 = vmatpush.msra.mxu3 %v7706_v35  ;;  %1369 = vmatpush.msrb.mxu2 %v7707_v26  ;;  %v7752_v35 = vld [vmem:[#allocation43_spill] sm:$0xff]  ;;  %v7753_v26 = vld [vmem:[#allocation66_spill] sm:$0xff] }
 0x28c   :  { %1223 = vmatpush.msra.mxu1 %v7708_v12  ;;  %1409 = vmatpush.msra.mxu0 %v5070_v58  ;;  %v5158_v12 = vld [vmem:[#allocation7 + $0x10] sm:$0xff] }
 0x28d   :  { %1263 = vmatpush.msra.mxu3 %v7709_v45  ;;  %1107 = vmatmul.f32.vlgmr.msrb.gmra.mxu1 %v5051_v21  ;;  %v7754_v45 = vld [vmem:[#allocation45_spill] sm:$0xff] }
 0x28e   :  { %1147 = vmatmul.f32.vlgmr.msrb.gmra.mxu3 %v5051_v21  ;;  %1224 = vmatpush.msra.mxu1 %v7710_v57  ;;  %v7755_v57 = vld [vmem:[#allocation68_spill] sm:$0xff] }
 0x28f   :  { %1264 = vmatpush.msra.mxu3 %v7711_v38  ;;  %1370 = vmatpush.msrb.mxu2 %v7712_v1  ;;  %v7756_v38 = vld [vmem:[#allocation47_spill] sm:$0xff]  ;;  %v7757_v1 = vld [vmem:[#allocation70_spill] sm:$0xff] }
 0x290   :  { %1225 = vmatpush.msra.mxu1 %v7713_v22  ;;  %1410 = vmatpush.msra.mxu0 %v5080_v44  ;;  %v7758_v22 = vld [vmem:[#allocation49_spill] sm:$0xff] }
 0x291   :  { %1265 = vmatpush.msra.mxu3 %v7714_v11  ;;  %1371 = vmatpush.msrb.mxu2 %v7715_v8  ;;  %v7759_v11 = vld [vmem:[#allocation72_spill] sm:$0xff]  ;;  %v7760_v8 = vld [vmem:[#allocation51_spill] sm:$0xff] }
 0x292   :  { %1226 = vmatpush.msra.mxu1 %v7716_v46  ;;  %1411 = vmatpush.msra.mxu0 %v5086_v52  ;;  %v7761_v46 = vld [vmem:[#allocation74_spill] sm:$0xff] }
 0x293   :  { %1266 = vmatpush.msra.mxu3 %v7717_v24  ;;  %1372 = vmatpush.msrb.mxu2 %v7718_v47  ;;  %v7762_v24 = vld [vmem:[#allocation52_spill] sm:$0xff] }
 0x294   :  { %1227 = vmatpush.msra.mxu1 %v7719_v16  ;;  %1412 = vmatpush.msra.mxu0 %v5092_v3  ;;  %v7763_v47 = vld [vmem:[#allocation76_spill] sm:$0xff]  ;;  %v7764_v16 = vld [vmem:[#allocation53_spill] sm:$0xff] }
 0x295   :  { %1267 = vmatpush.msra.mxu3 %v7720_v61  ;;  %1373 = vmatpush.msrb.mxu2 %v7721_v10  ;;  %v7765_v61 = vld [vmem:[#allocation78_spill] sm:$0xff] }
 0x296   :  { %1228 = vmatpush.msra.mxu1 %v7722_v41  ;;  %1413 = vmatpush.msra.mxu0 %v5098_v7  ;;  %v7766_v10 = vld [vmem:[#allocation54_spill] sm:$0xff]  ;;  %v7767_v41 = vld [vmem:[#allocation81_spill] sm:$0xff] }
 0x297   :  { %1268 = vmatpush.msra.mxu3 %v7723_v56  ;;  %1374 = vmatpush.msrb.mxu2 %v7724_v15  ;;  %v7768_v56 = vld [vmem:[#allocation55_spill] sm:$0xff]  ;;  %v7769_v15 = vld [vmem:[#allocation85_spill] sm:$0xff] }
 0x298   :  { %1229 = vmatpush.msra.mxu1 %v7725_v31  ;;  %1414 = vmatpush.msra.mxu0 %v5104_v27  ;;  %v7770_v31 = vld [vmem:[#allocation56_spill] sm:$0xff] }
 0x299   :  { %1269 = vmatpush.msra.mxu3 %v7726_v29  ;;  %1375 = vmatpush.msrb.mxu2 %v7727_v25  ;;  %v7771_v29 = vld [vmem:[#allocation57_spill] sm:$0xff]  ;;  %v7772_v25 = vld [vmem:[#allocation88_spill] sm:$0xff] }
 0x29a   :  { %1230 = vmatpush.msra.mxu1 %v7728_v6  ;;  %1415 = vmatpush.msra.mxu0 %v5110_v55  ;;  %v7773_v6 = vld [vmem:[#allocation91_spill] sm:$0xff] }
 0x29b   :  { %1270 = vmatpush.msra.mxu3 %v7729_v20  ;;  %1376 = vmatpush.msrb.mxu2 %v7730_v53  ;;  %v7774_v20 = vld [vmem:[#allocation58_spill] sm:$0xff] }
 0x29c   :  { %1231 = vmatpush.msra.mxu1 %v7731_v42  ;;  %1416 = vmatpush.msra.mxu0 %v5116_v63  ;;  %v7775_v53 = vld [vmem:[#allocation94_spill] sm:$0xff]  ;;  %v7776_v42 = vld [vmem:[#allocation59_spill] sm:$0xff] }
 0x29d   :  { %1271 = vmatpush.msra.mxu3 %v7732_v0  ;;  %1377 = vmatpush.msrb.mxu2 %v7733_v14  ;;  %v7777_v0 = vld [vmem:[#allocation97_spill] sm:$0xff]  ;;  %v7778_v14 = vld [vmem:[#allocation60_spill] sm:$0xff] }
 0x29e   :  { %1232 = vmatpush.msra.mxu1 %v7734_v28  ;;  %1417 = vmatpush.msra.mxu0 %v5122_v18  ;;  %v7779_v28 = vld [vmem:[#allocation100_spill] sm:$0xff] }
 0x29f   :  { %1272 = vmatpush.msra.mxu3 %v7735_v30  ;;  %1378 = vmatpush.msrb.mxu2 %v7736_v9  ;;  %v7780_v30 = vld [vmem:[#allocation61_spill] sm:$0xff] }
 0x2a0   :  { %1233 = vmatpush.msra.mxu1 %v7737_v62  ;;  %1418 = vmatpush.msra.mxu0 %v5128_v19  ;;  %v7781_v9 = vld [vmem:[#allocation105_spill] sm:$0xff]  ;;  %v7782_v62 = vld [vmem:[#allocation62_spill] sm:$0xff] }
 0x2a1   :  { %1273 = vmatpush.msra.mxu3 %v7738_v48  ;;  %1379 = vmatpush.msrb.mxu2 %v7739_v49  ;;  %v7783_v48 = vld [vmem:[#allocation106_spill] sm:$0xff]  ;;  %v7784_v49 = vld [vmem:[#allocation63_spill] sm:$0xff] }
 0x2a2   :  { %1234 = vmatpush.msra.mxu1 %v7740_v23  ;;  %1419 = vmatpush.msra.mxu0 %v5134_v40  ;;  %v7785_v23 = vld [vmem:[#allocation107_spill] sm:$0xff] }
 0x2a3   :  { %1274 = vmatpush.msra.mxu3 %v7741_v54  ;;  %1380 = vmatpush.msrb.mxu2 %v7742_v37  ;;  %v7786_v54 = vld [vmem:[#allocation65_spill] sm:$0xff]  ;;  %v7787_v37 = vld [vmem:[#allocation108_spill] sm:$0xff] }
 0x2a4   :  { %1235 = vmatpush.msra.mxu1 %v7743_v50  ;;  %1420 = vmatpush.msra.mxu0 %v5140_v2  ;;  %v7788_v50 = vld [vmem:[#allocation67_spill] sm:$0xff] }
 0x2a5   :  { %1275 = vmatpush.msra.mxu3 %v7744_v5  ;;  %1236 = vmatmul.f32.vlgmr.msra.gmra.mxu1 %v5051_v21  ;;  %v7789_v5 = vld [vmem:[#allocation109_spill] sm:$0xff] }
 0x2a6   :  { %1276 = vmatmul.f32.vlgmr.msra.gmra.mxu3 %v5051_v21  ;;  %1347 = vmatpush.msrb.mxu1 %v7745_v17  ;;  %v7790_v17 = vld [vmem:[#allocation69_spill] sm:$0xff] }
 0x2a7   :  { %1387 = vmatpush.msrb.mxu3 %v7746_v33  ;;  %1381 = vmatpush.msrb.mxu2 %v7747_v32  ;;  %v7791_v33 = vld [vmem:[#allocation110_spill] sm:$0xff]  ;;  %v7792_v32 = vld [vmem:[#allocation71_spill] sm:$0xff] }
 0x2a8   :  { %1348 = vmatpush.msrb.mxu1 %v7748_v36  ;;  %1421 = vmatpush.msra.mxu0 %v5150_v4  ;;  %v7793_v36 = vld [vmem:[#allocation113_spill] sm:$0xff] }
 0x2a9   :  { %1388 = vmatpush.msrb.mxu3 %v7749_v34  ;;  %1382 = vmatpush.msrb.mxu2 %v7750_v51  ;;  %v7794_v34 = vld [vmem:[#allocation73_spill] sm:$0xff]  ;;  %v7795_v51 = vld [vmem:[#allocation114_spill] sm:$0xff] }
 0x2aa   :  { %1349 = vmatpush.msrb.mxu1 %v7751_v60  ;;  %1422 = vmatpush.msra.mxu0 %v5158_v12  ;;  %v7796_v60 = vld [vmem:[#allocation75_spill] sm:$0xff] }
 0x2ab   :  { %1447 = vmatpush.msra.mxu2 %v7752_v35  ;;  %1389 = vmatpush.msrb.mxu3 %v7753_v26  ;;  %v7797_v35 = vld [vmem:[#allocation116_spill] sm:$0xff]  ;;  %v5205_v26 = vld [vmem:[#allocation7 + $0x18] sm:$0xff] }
 0x2ac   :  { %1350 = vmatpush.msrb.mxu1 %v7754_v45  ;;  %v7798_v45 = vld [vmem:[#allocation77_spill] sm:$0xff] }
 0x2ad   :  { %1448 = vmatpush.msra.mxu2 %v7755_v57  ;;  %1390 = vmatpush.msrb.mxu3 %v7756_v38  ;;  %v7799_v57 = vld [vmem:[#allocation119_spill] sm:$0xff] }
 0x2ae   :  { %1351 = vmatpush.msrb.mxu1 %v7757_v1  ;;  %v7800_v38 = vld [vmem:[#allocation79_spill] sm:$0xff]  ;;  %v7801_v1 = vld [vmem:[#allocation120_spill] sm:$0xff] }
 0x2af   :  { %1449 = vmatpush.msra.mxu2 %v7758_v22  ;;  %1391 = vmatpush.msrb.mxu3 %v7759_v11  ;;  %v7802_v22 = vld [vmem:[#allocation82_spill] sm:$0xff]  ;;  %v7803_v11 = vld [vmem:[#allocation121_spill] sm:$0xff] }
 0x2b0   :  { %1352 = vmatpush.msrb.mxu1 %v7760_v8  ;;  %v7804_v8 = vld [vmem:[#allocation103_spill] sm:$0xff] }
 0x2b1   :  { %1450 = vmatpush.msra.mxu2 %v7761_v46  ;;  %1392 = vmatpush.msrb.mxu3 %v7762_v24  ;;  %v7805_v46 = vld [vmem:[#allocation122_spill] sm:$0xff]  ;;  %v7806_v24 = vld [vmem:[#allocation123_spill] sm:$0xff] }
 0x2b2   :  { %1353 = vmatpush.msrb.mxu1 %v7763_v47  ;;  %v7807_v47 = vld [vmem:[#allocation124_spill] sm:$0xff] }
 0x2b3   :  { %1451 = vmatpush.msra.mxu2 %v7764_v16  ;;  %1393 = vmatpush.msrb.mxu3 %v7765_v61  ;;  %v7808_v16 = vld [vmem:[#allocation125_spill] sm:$0xff]  ;;  %v7809_v61 = vld [vmem:[#allocation126_spill] sm:$0xff] }
 0x2b4   :  { %1354 = vmatpush.msrb.mxu1 %v7766_v10  ;;  %v7810_v10 = vld [vmem:[#allocation127_spill] sm:$0xff] }
 0x2b5   :  { %1452 = vmatpush.msra.mxu2 %v7767_v41  ;;  %1394 = vmatpush.msrb.mxu3 %v7768_v56  ;;  %v7811_v41 = vld [vmem:[#allocation128_spill] sm:$0xff]  ;;  %v7812_v56 = vld [vmem:[#allocation129_spill] sm:$0xff] }
 0x2b6   :  { %1355 = vmatpush.msrb.mxu1 %v7769_v15  ;;  %v7813_v15 = vld [vmem:[#allocation130_spill] sm:$0xff] }
 0x2b7   :  { %1453 = vmatpush.msra.mxu2 %v7770_v31  ;;  %1395 = vmatpush.msrb.mxu3 %v7771_v29  ;;  %v7814_v31 = vld [vmem:[#allocation131_spill] sm:$0xff]  ;;  %v7815_v29 = vld [vmem:[#allocation132_spill] sm:$0xff] }
 0x2b8   :  { %1356 = vmatpush.msrb.mxu1 %v7772_v25  ;;  %v7816_v25 = vld [vmem:[#allocation133_spill] sm:$0xff] }
 0x2b9   :  { %1454 = vmatpush.msra.mxu2 %v7773_v6  ;;  %1396 = vmatpush.msrb.mxu3 %v7774_v20  ;;  %v7817_v6 = vld [vmem:[#allocation134_spill] sm:$0xff]  ;;  %v7818_v20 = vld [vmem:[#allocation135_spill] sm:$0xff] }
 0x2ba   :  { %1357 = vmatpush.msrb.mxu1 %v7775_v53  ;;  %v7819_v53 = vld [vmem:[#allocation136_spill] sm:$0xff] }
 0x2bb   :  { %1455 = vmatpush.msra.mxu2 %v7776_v42  ;;  %1397 = vmatpush.msrb.mxu3 %v7777_v0  ;;  %v7820_v42 = vld [vmem:[#allocation137_spill] sm:$0xff]  ;;  %v7821_v0 = vld [vmem:[#allocation138_spill] sm:$0xff] }
 0x2bc   :  { %1358 = vmatpush.msrb.mxu1 %v7778_v14  ;;  %v7822_v14 = vld [vmem:[#allocation139_spill] sm:$0xff] }
 0x2bd   :  { %1456 = vmatpush.msra.mxu2 %v7779_v28  ;;  %1398 = vmatpush.msrb.mxu3 %v7780_v30  ;;  %v7823_v28 = vld [vmem:[#allocation140_spill] sm:$0xff]  ;;  %v7824_v30 = vld [vmem:[#allocation141_spill] sm:$0xff] }
 0x2be   :  { %1359 = vmatpush.msrb.mxu1 %v7781_v9  ;;  %v7825_v9 = vld [vmem:[#allocation142_spill] sm:$0xff] }
 0x2bf   :  { %1457 = vmatpush.msra.mxu2 %v7782_v62  ;;  %1399 = vmatpush.msrb.mxu3 %v7783_v48 }
 0x2c0   :  { %1360 = vmatpush.msrb.mxu1 %v7784_v49  ;;  %v7826_v49 = vld [vmem:[#allocation84_spill] sm:$0xff] }
 0x2c1   :  { %1458 = vmatpush.msra.mxu2 %v7785_v23  ;;  %1400 = vmatpush.msrb.mxu3 %v7786_v54 }
 0x2c2   :  { %1361 = vmatpush.msrb.mxu1 %v7787_v37 }
 0x2c3   :  { %1459 = vmatpush.msra.mxu2 %v7788_v50  ;;  %1401 = vmatpush.msrb.mxu3 %v7789_v5 }
 0x2c4   :  { %1362 = vmatpush.msrb.mxu1 %v7790_v17  ;;  %v7827_v17 = vld [vmem:[#allocation10_spill] sm:$0xff] }
 0x2c5   :  { %1460 = vmatpush.msra.mxu2 %v7791_v33  ;;  %1402 = vmatpush.msrb.mxu3 %v7793_v36 }
 0x2c6   :  { %1427 = vmatpush.msra.mxu1 %v7792_v32 }
 0x2c7   :  { %1467 = vmatpush.msra.mxu3 %v7794_v34  ;;  %1461 = vmatpush.msra.mxu2 %v7795_v51 }
 0x2c8   :  { %1428 = vmatpush.msra.mxu1 %v7796_v60 }
 0x2c9   :  { %1468 = vmatpush.msra.mxu3 %v7797_v35  ;;  %1462 = vmatpush.msra.mxu2 %v5205_v26 }
 0x2ca   :  { %1429 = vmatpush.msra.mxu1 %v7798_v45  ;;  %v7828_v45 = vld [vmem:[#allocation104_spill] sm:$0xff] }
 0x2cb   :  { %1469 = vmatpush.msra.mxu3 %v7799_v57 }
 0x2cc   :  { %1430 = vmatpush.msra.mxu1 %v7800_v38 }
 0x2cd   :  { %1470 = vmatpush.msra.mxu3 %v7801_v1  ;;  %v1218_v1 = vld [vmem:[#allocation3 + $0x50] sm:$0xff] }
 0x2ce   :  { %1431 = vmatpush.msra.mxu1 %v7802_v22 }
 0x2cf   :  { %1471 = vmatpush.msra.mxu3 %v7803_v11 }
 0x2d0   :  { %1432 = vmatpush.msra.mxu1 %v7804_v8 }
 0x2d1   :  { %1472 = vmatpush.msra.mxu3 %v7805_v46 }
 0x2d2   :  { %1433 = vmatpush.msra.mxu1 %v7806_v24 }
 0x2d3   :  { %1473 = vmatpush.msra.mxu3 %v7807_v47 }
 0x2d4   :  { %1434 = vmatpush.msra.mxu1 %v7808_v16 }
 0x2d5   :  { %1474 = vmatpush.msra.mxu3 %v7809_v61 }
 0x2d6   :  { %1435 = vmatpush.msra.mxu1 %v7810_v10 }
 0x2d7   :  { %1475 = vmatpush.msra.mxu3 %v7811_v41  ;;  %v7829_v41 = vld [vmem:[#allocation15_spill] sm:$0xff] }
 0x2d8   :  { %1436 = vmatpush.msra.mxu1 %v7812_v56 }
 0x2d9   :  { %1476 = vmatpush.msra.mxu3 %v7813_v15 }
 0x2da   :  { %1437 = vmatpush.msra.mxu1 %v7814_v31 }
 0x2db   :  { %1477 = vmatpush.msra.mxu3 %v7815_v29 }
 0x2dc   :  { %1438 = vmatpush.msra.mxu1 %v7816_v25 }
 0x2dd   :  { %1478 = vmatpush.msra.mxu3 %v7817_v6 }
 0x2de   :  { %1439 = vmatpush.msra.mxu1 %v7818_v20 }
 0x2df   :  { %1479 = vmatpush.msra.mxu3 %v7819_v53 }
 0x2e0   :  { %1440 = vmatpush.msra.mxu1 %v7820_v42 }
 0x2e1   :  { %1480 = vmatpush.msra.mxu3 %v7821_v0  ;;  %v1088_v32 = vpop.f32.mrf.mxu0 }
 0x2e2   :  { %1441 = vmatpush.msra.mxu1 %v7822_v14 }
 0x2e3   :  { %1481 = vmatpush.msra.mxu3 %v7823_v28 }
 0x2e4   :  { %1442 = vmatpush.msra.mxu1 %v7824_v30 }
 0x2e5   :  { %1482 = vmatpush.msra.mxu3 %v7825_v9 }
 0x2e7   :  { %v1048_v62 = vpop.f32.mrf.mxu2 }
 0x2e9   :  { %v1168_v53 = vpop.f32.mrf.mxu0 }
 0x2ef   :  { %v1128_v5 = vpop.f32.mrf.mxu2 }
 0x302   :  { %v1028_v48 = vpop.f32.mrf.mxu1 }
 0x303   :  { %v1029_v23 = vadd.f32 %v1028_v48, %v7826_v49  ;;  %v1217_v48 = vld [vmem:[#allocation3 + $0x48] sm:$0xff] }
 0x305   :  { %v1049_v54 = vadd.f32 %v1048_v62, %v1029_v23 }
 0x307   :  { %v2854_v37 = vmul.f32 -1.442695, %v1049_v54 }
 0x308   :  { %v1068_v50 = vpop.f32.mrf.mxu3 }
 0x309   :  { %2935 = vpow2.f32 %v2854_v37  ;;  %v1069_v33 = vadd.f32 %v1068_v50, %v7827_v17  ;;  %v1257_v35 = vpop.f32.mrf.mxu2 }
 0x30a   :  { %v1258_v57 = vadd.f32 %v1257_v35, %v7828_v45  ;;  %v1108_v24 = vpop.f32.mrf.mxu1 }
 0x30b   :  { %v1089_v36 = vadd.f32 %v1088_v32, %v1069_v33  ;;  %v1109_v25 = vadd.f32 %v1108_v24, %v4465_v59 }
 0x30c   :  { %v1300_v8 = vadd.f32 %v1258_v57, %v1218_v1 }
 0x30d   :  { %v2855_v34 = vmul.f32 -1.442695, %v1089_v36  ;;  %v1129_v9 = vadd.f32 %v1128_v5, %v1109_v25 }
 0x30e   :  { %v2857_v61 = vmul.f32 -1.442695, %v1300_v8 }
 0x30f   :  { %v2936_v51 = vpop.eup %2935  ;;  %2937 = vpow2.f32 %v2855_v34 }
 0x310   :  { %v1174_v60 = vadd.f32 1.0, %v2936_v51 }
 0x311   :  { %v1148_v47 = vpop.f32.mrf.mxu3 }
 0x312   :  { %2939 = vrcp.f32 %v1174_v60  ;;  %v1186_v10 = vand.u32 2147483648, %v1174_v60  ;;  %v1149_v56 = vadd.f32 %v1148_v47, %v7829_v41  ;;  %v1184_v31 = vand.u32 2147483647, %v1174_v60 }
 0x313   :  { %vm1180_vm9 = vweird.f32 %v1174_v60 }
 0x314   :  { %v1187_v42 = vor.u32 1.1754944e-38, %v1186_v10  ;;  %v1169_v14 = vadd.f32 %v1168_v53, %v1149_v56  ;;  %vm1185_vm11 = vcmp.eq.f32.partialorder %v1184_v31, 8.507059e+37  ;;  %v5255_v10 = vld [vmem:[#allocation7 + $0x1e0] sm:$0xff] }
 0x315   :  { %v2938_v38 = vpop.eup %2937  ;;  %v5261_v56 = vld [vmem:[#allocation7 + $0x1c0] sm:$0xff] }
 0x316   :  { %v1193_v22 = vadd.f32 1.0, %v2938_v38  ;;  %v5266_v31 = vld [vmem:[#allocation5 + $0x140] sm:$0xff] }
 0x317   :  { %v5275_v53 = vld [vmem:[#allocation7 + $0x180] sm:$0xff] }
 0x318   :  { %v2940_v11 = vpop.eup %2939  ;;  %2941 = vrcp.f32 %v1193_v22  ;;  %v1205_v30 = vand.u32 2147483648, %v1193_v22  ;;  %v1203_v33 = vand.u32 2147483647, %v1193_v22  ;;  %vm1199_vm13 = vweird.f32 %v1193_v22 }
 0x319   :  { %v1176_v46 = vmul.f32 %v2940_v11, %v1174_v60  ;;  %vm1181_vm8 = vweird.f32 %v2940_v11  ;;  %2943 = vpow2.f32 %v2857_v61  ;;  %v5252_v61 = vld [vmem:[#allocation5 + $0x170] sm:$0xff] }
 0x31a   :  { %vm1182_vm10 = vmor %vm1180_vm9, %vm1181_vm8  ;;  %v1206_v60 = vor.u32 1.1754944e-38, %v1205_v30  ;;  %vm1204_vm15 = vcmp.eq.f32.partialorder %v1203_v33, 8.507059e+37  ;;  %v5293_v33 = vld [vmem:[#allocation5 + $0xe0] sm:$0xff] }
 0x31b   :  { %v1177_v16 = vsub.f32 1.0, %v1176_v46 }
 0x31d   :  { %v1178_v15 = vmul.f32 %v2940_v11, %v1177_v16 }
 0x31e   :  { %v2942_v29 = vpop.eup %2941 }
 0x31f   :  { %v1195_v6 = vmul.f32 %v2942_v29, %v1193_v22  ;;  %v1179_v20 = vadd.f32 %v2940_v11, %v1178_v15  ;;  %vm1200_vm12 = vweird.f32 %v2942_v29  ;;  %v2944_v51 = vpop.eup %2943 }
 0x320   :  { %vm1201_vm14 = vmor %vm1199_vm13, %vm1200_vm12  ;;  %v5242_v5 = vadd.f32 1.0, %v2944_v51 }
 0x321   :  { %v1196_v0 = vsub.f32 1.0, %v1195_v6  ;;  %v1183_v28 = vsel %vm1182_vm10, %v2940_v11, %v1179_v20  ;;  %v5272_v20 = vld [vmem:[#allocation5 + $0x128] sm:$0xff] }
 0x322   :  { %v1188_v62 = vsel %vm1185_vm11, %v1187_v42, %v1183_v28  ;;  %v1237_v23 = vpop.f32.mrf.mxu1  ;;  %v5283_v28 = vld [vmem:[#allocation7 + $0x160] sm:$0xff]  ;;  %vm1310_vm5 = vweird.f32 %v5242_v5 }
 0x323   :  { %v1197_v54 = vmul.f32 %v2942_v29, %v1196_v0  ;;  %v1209_v37 = vmul.f32 %v1188_v62, %v1169_v14  ;;  %v1238_v50 = vadd.f32 %v1237_v23, %v7569_v39  ;;  %v5280_v14 = vld [vmem:[#allocation5 + $0x110] sm:$0xff]  ;;  %v5289_v23 = vld [vmem:[#allocation7 + $0x140] sm:$0xff] }
 0x325   :  { %v1210_v32 = vadd.f32 %v1209_v37, %v1129_v9  ;;  %v1280_v36 = vadd.f32 %v1238_v50, %v1217_v48  ;;  %v1198_v34 = vadd.f32 %v2942_v29, %v1197_v54  ;;  %v5286_v48 = vld [vmem:[#allocation5 + $0xf8] sm:$0xff] }
 0x327   :  { %2945 = vtanh.f32 %v1210_v32  ;;  %v2856_v35 = vmul.f32 -1.442695, %v1280_v36  ;;  %v1202_v57 = vsel %vm1201_vm14, %v2942_v29, %v1198_v34  ;;  %v5269_v29 = vld [vmem:[#allocation7 + $0x1a0] sm:$0xff] }
 0x328   :  { %v1207_v38 = vsel %vm1204_vm15, %v1206_v60, %v1202_v57  ;;  %v5296_v32 = vld [vmem:[#allocation7 + $0x120] sm:$0xff]  ;;  %v5300_v60 = vld [vmem:[#allocation5 + $0xc8] sm:$0xff]  ;;  %v1219_v57 = vld [vmem:[#allocation3 + $0x58] sm:$0xff] }
 0x329   :  { %2947 = vpow2.f32 %v2856_v35  ;;  %v1212_v1 = vsub.f32 1.0, %v1207_v38  ;;  %v1214_v22 = vmul.f32 %v1207_v38, %v5009_v13  ;;  %v5258_v13 = vld [vmem:[#allocation5 + $0x158] sm:$0xff]  ;;  %v1277_v37 = vpop.f32.mrf.mxu3  ;;  %v5303_v35 = vld [vmem:[#allocation7 + $0x100] sm:$0xff] }
 0x32a   :  { %2949 = vrcp.f32 %v5242_v5  ;;  %v1278_v34 = vadd.f32 %v1277_v37, %v4281_v43  ;;  %v5339_v37 = vld [vmem:[#allocation7 + $0x60] sm:$0xff] }
 0x32d   :  { %v2946_v11 = vpop.eup %2945 }
 0x32e   :  { %v1213_v8 = vmul.f32 %v2946_v11, %v1212_v1  ;;  %v1316_v11 = vand.u32 2147483648, %v5242_v5 }
 0x32f   :  { %v2948_v46 = vpop.eup %2947 }
 0x330   :  { %v1284_v24 = vadd.f32 1.0, %v2948_v46  ;;  %v5246_v47 = vadd.f32 %v1214_v22, %v1213_v8  ;;  %v5250_v16 = vpop.eup %2949  ;;  %v5309_v22 = vld [vmem:[#allocation5 + $0xb0] sm:$0xff]  ;;  %v5312_v46 = vld [vmem:[#allocation7 + $0xe0] sm:$0xff] }
 0x331   :  { %v1306_v15 = vmul.f32 %v5250_v16, %v5242_v5  ;;  %vm1311_vm4 = vweird.f32 %v5250_v16 }
 0x332   :  { %2951 = vrcp.f32 %v1284_v24  ;;  %1363 = vmatmul.f32.vlgmr.msrb.gmra.mxu1 %v5246_v47  ;;  %1403 = vmatmul.f32.vlgmr.msrb.gmra.mxu3 %v5246_v47  ;;  %v1296_v30 = vand.u32 2147483648, %v1284_v24  ;;  %v1294_v62 = vand.u32 2147483647, %v1284_v24  ;;  %vm1290_vm1 = vweird.f32 %v1284_v24  ;;  %vm1312_vm6 = vmor %vm1310_vm5, %vm1311_vm4 }
 0x333   :  { %1556 = vmatpush.msrb.mxu1 %v5252_v61  ;;  %1643 = vmatpush.msrb.mxu3 %v5255_v10  ;;  %v1307_v42 = vsub.f32 1.0, %v1306_v15 }
 0x334   :  { %v1297_v36 = vor.u32 1.1754944e-38, %v1296_v30  ;;  %vm1295_vm3 = vcmp.eq.f32.partialorder %v1294_v62, 8.507059e+37  ;;  %v5324_v30 = vld [vmem:[#allocation5 + $0x80] sm:$0xff]  ;;  %v5330_v62 = vld [vmem:[#allocation5 + $0x68] sm:$0xff] }
 0x335   :  { %1557 = vmatpush.msrb.mxu1 %v5258_v13  ;;  %1644 = vmatpush.msrb.mxu3 %v5261_v56  ;;  %v1308_v54 = vmul.f32 %v5250_v16, %v1307_v42 }
 0x337   :  { %1558 = vmatpush.msrb.mxu1 %v5266_v31  ;;  %1645 = vmatpush.msrb.mxu3 %v5269_v29  ;;  %v1309_v1 = vadd.f32 %v5250_v16, %v1308_v54  ;;  %v5333_v54 = vld [vmem:[#allocation7 + $0x80] sm:$0xff] }
 0x338   :  { %v2952_v25 = vpop.eup %2951 }
 0x339   :  { %v1286_v6 = vmul.f32 %v2952_v25, %v1284_v24  ;;  %1559 = vmatpush.msrb.mxu1 %v5272_v20  ;;  %1646 = vmatpush.msrb.mxu3 %v5275_v53  ;;  %vm1291_vm0 = vweird.f32 %v2952_v25  ;;  %v1314_v24 = vand.u32 2147483647, %v5242_v5  ;;  %v1313_v42 = vsel %vm1312_vm6, %v5250_v16, %v1309_v1  ;;  %v5336_v16 = vld [vmem:[#allocation5 + $0x50] sm:$0xff]  ;;  %v5349_v1 = vld [vmem:[#allocation5 + $0x20] sm:$0xff] }
 0x33a   :  { %1443 = vmatmul.f32.vlgmr.msra.gmra.mxu1 %v5246_v47  ;;  %1483 = vmatmul.f32.vlgmr.msra.gmra.mxu3 %v5246_v47  ;;  %vm1292_vm2 = vmor %vm1290_vm1, %vm1291_vm0 }
 0x33b   :  { %v1287_v0 = vsub.f32 1.0, %v1286_v6  ;;  %1560 = vmatpush.msrb.mxu1 %v5280_v14  ;;  %1647 = vmatpush.msrb.mxu3 %v5283_v28  ;;  %v5320_v6 = vld [vmem:[#allocation7 + $0xc0] sm:$0xff]  ;;  %vm1315_vm7 = vcmp.eq.f32.partialorder %v1314_v24, 8.507059e+37  ;;  %v5357_v24 = vld [vmem:[#allocation5 + $0x8] sm:$0xff] }
 0x33d   :  { %v1288_v9 = vmul.f32 %v2952_v25, %v1287_v0  ;;  %1561 = vmatpush.msrb.mxu1 %v5286_v48  ;;  %1648 = vmatpush.msrb.mxu3 %v5289_v23  ;;  %v1317_v0 = vor.u32 1.1754944e-38, %v1316_v11  ;;  %v5352_v11 = vld [vmem:[#allocation7 + $0x20] sm:$0xff] }
 0x33f   :  { %v1289_v50 = vadd.f32 %v2952_v25, %v1288_v9  ;;  %1562 = vmatpush.msrb.mxu1 %v5293_v33  ;;  %1649 = vmatpush.msrb.mxu3 %v5296_v32  ;;  %v5327_v9 = vld [vmem:[#allocation7 + $0xa0] sm:$0xff]  ;;  %v1318_v5 = vsel %vm1315_vm7, %v1317_v0, %v1313_v42  ;;  %v5369_v42 = vld [vmem:[#allocation5 + $0x178] sm:$0xff]  ;;  %v5372_v0 = vld [vmem:[#allocation7 + $0x1e8] sm:$0xff] }
 0x340   :  { %7830 = vst [vmem:[#allocation17_spill] sm:$0xff] %v5369_v42 }
 0x341   :  { %v1293_v51 = vsel %vm1292_vm2, %v2952_v25, %v1289_v50  ;;  %1563 = vmatpush.msrb.mxu1 %v5300_v60  ;;  %1650 = vmatpush.msrb.mxu3 %v5303_v35  ;;  %v5317_v25 = vld [vmem:[#allocation5 + $0x98] sm:$0xff]  ;;  %v1323_v50 = vsub.f32 1.0, %v1318_v5  ;;  %7831 = vst [vmem:[#allocation80_spill] sm:$0xff] %v5372_v0 }
 0x342   :  { %v1298_v38 = vsel %vm1295_vm3, %v1297_v36, %v1293_v51  ;;  %v5345_v51 = vld [vmem:[#allocation7 + $0x40] sm:$0xff] }
 0x343   :  { %v1320_v8 = vmul.f32 %v1298_v38, %v1278_v34  ;;  %1564 = vmatpush.msrb.mxu1 %v5309_v22  ;;  %1651 = vmatpush.msrb.mxu3 %v5312_v46  ;;  %v5342_v34 = vld [vmem:[#allocation5 + $0x38] sm:$0xff]  ;;  %v1325_v38 = vmul.f32 %v1318_v5, %v5051_v21  ;;  %v5365_v21 = vld [vmem:[#allocation5 + $0x168] sm:$0xff]  ;;  %v5375_v5 = vld [vmem:[#allocation5 + $0x150] sm:$0xff] }
 0x344   :  { %7832 = vst [vmem:[#allocation12_spill] sm:$0xff] %v5375_v5 }
 0x345   :  { %v1321_v15 = vadd.f32 %v1320_v8, %v1219_v57  ;;  %1565 = vmatpush.msrb.mxu1 %v5317_v25  ;;  %1652 = vmatpush.msrb.mxu3 %v5320_v6 }
 0x347   :  { %2953 = vtanh.f32 %v1321_v15  ;;  %1566 = vmatpush.msrb.mxu1 %v5324_v30  ;;  %1653 = vmatpush.msrb.mxu3 %v5327_v9  ;;  %v5360_v15 = vld [vmem:[#allocation7] sm:$0xff] }
 0x349   :  { %1567 = vmatpush.msrb.mxu1 %v5330_v62  ;;  %1654 = vmatpush.msrb.mxu3 %v5333_v54 }
 0x34b   :  { %1568 = vmatpush.msrb.mxu1 %v5336_v16  ;;  %1655 = vmatpush.msrb.mxu3 %v5339_v37 }
 0x34d   :  { %v2954_v36 = vpop.eup %2953  ;;  %1569 = vmatpush.msrb.mxu1 %v5342_v34  ;;  %1656 = vmatpush.msrb.mxu3 %v5345_v51 }
 0x34e   :  { %v1324_v57 = vmul.f32 %v2954_v36, %v1323_v50  ;;  %v5378_v50 = vld [vmem:[#allocation7 + $0x1f0] sm:$0xff]  ;;  %v5381_v36 = vld [vmem:[#allocation5 + $0x160] sm:$0xff] }
 0x34f   :  { %1570 = vmatpush.msrb.mxu1 %v5349_v1  ;;  %1657 = vmatpush.msrb.mxu3 %v5352_v11  ;;  %7833 = vst [vmem:[#allocation83_spill] sm:$0xff] %v5378_v50 }
 0x350   :  { %v5355_v8 = vadd.f32 %v1325_v38, %v1324_v57  ;;  %7834 = vst [vmem:[#allocation19_spill] sm:$0xff] %v5381_v36  ;;  %v5384_v57 = vld [vmem:[#allocation7 + $0x1c8] sm:$0xff]  ;;  %v5387_v38 = vld [vmem:[#allocation5 + $0x138] sm:$0xff] }
 0x351   :  { %1571 = vmatpush.msrb.mxu1 %v5357_v24  ;;  %1658 = vmatpush.msrb.mxu3 %v5360_v15  ;;  %7835 = vst [vmem:[#allocation87_spill] sm:$0xff] %v5384_v57 }
 0x352   :  { %1343 = vmatmul.f32.vlgmr.msrb.gmra.mxu0 %v5355_v8  ;;  %1383 = vmatmul.f32.vlgmr.msrb.gmra.mxu2 %v5355_v8  ;;  %7836 = vst [vmem:[#allocation13_spill] sm:$0xff] %v5387_v38 }
 0x353   :  { %1536 = vmatpush.msrb.mxu0 %v5365_v21  ;;  %1572 = vmatmul.f32.vlgmr.msrb.gmra.mxu1 %v5355_v8 }
 0x354   :  { %1576 = vmatpush.msrb.mxu2 %v5369_v42  ;;  %1683 = vmatpush.msra.mxu1 %v5372_v0  ;;  %v5390_v0 = vld [vmem:[#allocation7 + $0x1d0] sm:$0xff] }
 0x355   :  { %1537 = vmatpush.msrb.mxu0 %v5375_v5  ;;  %1723 = vmatpush.msra.mxu3 %v5378_v50  ;;  %7837 = vst [vmem:[#allocation86_spill] sm:$0xff] %v5390_v0  ;;  %v5393_v5 = vld [vmem:[#allocation5 + $0x148] sm:$0xff] }
 0x356   :  { %1577 = vmatpush.msrb.mxu2 %v5381_v36  ;;  %1684 = vmatpush.msra.mxu1 %v5384_v57  ;;  %7838 = vst [vmem:[#allocation21_spill] sm:$0xff] %v5393_v5  ;;  %v5396_v50 = vld [vmem:[#allocation7 + $0x1a8] sm:$0xff]  ;;  %v5399_v36 = vld [vmem:[#allocation5 + $0x120] sm:$0xff]  ;;  %v5403_v57 = vld [vmem:[#allocation5 + $0x130] sm:$0xff] }
 0x357   :  { %1538 = vmatpush.msrb.mxu0 %v5387_v38  ;;  %1724 = vmatpush.msra.mxu3 %v5390_v0  ;;  %7839 = vst [vmem:[#allocation90_spill] sm:$0xff] %v5396_v50  ;;  %v5408_v0 = vld [vmem:[#allocation5 + $0x108] sm:$0xff] }
 0x358   :  { %1578 = vmatpush.msrb.mxu2 %v5393_v5  ;;  %1685 = vmatpush.msra.mxu1 %v5396_v50  ;;  %7840 = vst [vmem:[#allocation14_spill] sm:$0xff] %v5399_v36  ;;  %v5411_v5 = vld [vmem:[#allocation5 + $0x118] sm:$0xff]  ;;  %v5414_v50 = vld [vmem:[#allocation7 + $0x188] sm:$0xff] }
 0x359   :  { %1539 = vmatpush.msrb.mxu0 %v5399_v36  ;;  %1725 = vmatpush.msra.mxu3 %v5070_v58  ;;  %7841 = vst [vmem:[#allocation89_spill] sm:$0xff] %v5403_v57  ;;  %v5417_v58 = vld [vmem:[#allocation5 + $0xf0] sm:$0xff]  ;;  %v5424_v36 = vld [vmem:[#allocation7 + $0x168] sm:$0xff] }
 0x35a   :  { %1579 = vmatpush.msrb.mxu2 %v5403_v57  ;;  %1423 = vmatmul.f32.vlgmr.msra.gmra.mxu0 %v5355_v8  ;;  %7842 = vst [vmem:[#allocation23_spill] sm:$0xff] %v5408_v0  ;;  %v5421_v57 = vld [vmem:[#allocation5 + $0x100] sm:$0xff] }
 0x35b   :  { %1463 = vmatmul.f32.vlgmr.msra.gmra.mxu2 %v5355_v8  ;;  %1540 = vmatpush.msrb.mxu0 %v5408_v0  ;;  %7843 = vst [vmem:[#allocation93_spill] sm:$0xff] %v5411_v5  ;;  %v5427_v0 = vld [vmem:[#allocation5 + $0xd8] sm:$0xff] }
 0x35c   :  { %1580 = vmatpush.msrb.mxu2 %v5411_v5  ;;  %7844 = vst [vmem:[#allocation16_spill] sm:$0xff] %v5414_v50  ;;  %1686 = vmatpush.msra.mxu1 %v5414_v50  ;;  %v5431_v50 = vld [vmem:[#allocation5 + $0xe8] sm:$0xff] }
 0x35d   :  { %7845 = vst [vmem:[#allocation92_spill] sm:$0xff] %v5417_v58  ;;  %1541 = vmatpush.msrb.mxu0 %v5417_v58  ;;  %1726 = vmatpush.msra.mxu3 %v5080_v44  ;;  %v5434_v58 = vld [vmem:[#allocation7 + $0x148] sm:$0xff]  ;;  %v5437_v44 = vld [vmem:[#allocation5 + $0xc0] sm:$0xff] }
 0x35e   :  { %7846 = vst [vmem:[#allocation25_spill] sm:$0xff] %v5421_v57  ;;  %1581 = vmatpush.msrb.mxu2 %v5421_v57  ;;  %1687 = vmatpush.msra.mxu1 %v5424_v36 }
 0x35f   :  { %7847 = vst [vmem:[#allocation96_spill] sm:$0xff] %v5424_v36  ;;  %1542 = vmatpush.msrb.mxu0 %v5427_v0  ;;  %1727 = vmatpush.msra.mxu3 %v5086_v52  ;;  %v5441_v36 = vld [vmem:[#allocation5 + $0xd0] sm:$0xff]  ;;  %v5447_v52 = vld [vmem:[#allocation5 + $0xa8] sm:$0xff] }
 0x360   :  { %7848 = vst [vmem:[#allocation18_spill] sm:$0xff] %v5427_v0  ;;  %1582 = vmatpush.msrb.mxu2 %v5431_v50  ;;  %1688 = vmatpush.msra.mxu1 %v5434_v58  ;;  %v5444_v0 = vld [vmem:[#allocation7 + $0x128] sm:$0xff] }
 0x361   :  { %7849 = vst [vmem:[#allocation95_spill] sm:$0xff] %v5431_v50  ;;  %1543 = vmatpush.msrb.mxu0 %v5437_v44  ;;  %1728 = vmatpush.msra.mxu3 %v5092_v3  ;;  %v5457_v3 = vld [vmem:[#allocation5 + $0x90] sm:$0xff] }
 0x362   :  { %7850 = vst [vmem:[#allocation27_spill] sm:$0xff] %v5434_v58  ;;  %1583 = vmatpush.msrb.mxu2 %v5441_v36  ;;  %1689 = vmatpush.msra.mxu1 %v5444_v0  ;;  %v5451_v58 = vld [vmem:[#allocation5 + $0xb8] sm:$0xff] }
 0x363   :  { %7851 = vst [vmem:[#allocation99_spill] sm:$0xff] %v5437_v44  ;;  %1544 = vmatpush.msrb.mxu0 %v5447_v52  ;;  %1729 = vmatpush.msra.mxu3 %v5098_v7  ;;  %v5454_v44 = vld [vmem:[#allocation7 + $0x108] sm:$0xff]  ;;  %v5467_v7 = vld [vmem:[#allocation5 + $0x78] sm:$0xff] }
 0x364   :  { %7852 = vst [vmem:[#allocation20_spill] sm:$0xff] %v5441_v36  ;;  %1584 = vmatpush.msrb.mxu2 %v5451_v58  ;;  %1690 = vmatpush.msra.mxu1 %v5454_v44  ;;  %v1534_v36 = vld [vmem:[#allocation3 + $0x68] sm:$0xff] }
 0x365   :  { %7853 = vst [vmem:[#allocation98_spill] sm:$0xff] %v5444_v0  ;;  %1545 = vmatpush.msrb.mxu0 %v5457_v3  ;;  %1730 = vmatpush.msra.mxu3 %v5104_v27  ;;  %v5461_v0 = vld [vmem:[#allocation5 + $0xa0] sm:$0xff] }
 0x366   :  { %7854 = vst [vmem:[#allocation29_spill] sm:$0xff] %v5447_v52  ;;  %1585 = vmatpush.msrb.mxu2 %v5461_v0  ;;  %v5464_v52 = vld [vmem:[#allocation7 + $0xe8] sm:$0xff]  ;;  %v5477_v27 = vld [vmem:[#allocation5 + $0x60] sm:$0xff] }
 0x367   :  { %7855 = vst [vmem:[#allocation102_spill] sm:$0xff] %v5451_v58  ;;  %1691 = vmatpush.msra.mxu1 %v5464_v52  ;;  %1546 = vmatpush.msrb.mxu0 %v5467_v7 }
 0x368   :  { %7856 = vst [vmem:[#allocation22_spill] sm:$0xff] %v5454_v44  ;;  %1731 = vmatpush.msra.mxu3 %v5110_v55  ;;  %v5471_v44 = vld [vmem:[#allocation5 + $0x88] sm:$0xff] }
 0x369   :  { %7857 = vst [vmem:[#allocation101_spill] sm:$0xff] %v5457_v3  ;;  %1586 = vmatpush.msrb.mxu2 %v5471_v44  ;;  %v5474_v3 = vld [vmem:[#allocation7 + $0xc8] sm:$0xff]  ;;  %1547 = vmatpush.msrb.mxu0 %v5477_v27 }
 0x36a   :  { %7858 = vst [vmem:[#allocation31_spill] sm:$0xff] %v5461_v0  ;;  %1692 = vmatpush.msra.mxu1 %v5474_v3  ;;  %1732 = vmatpush.msra.mxu3 %v5116_v63  ;;  %v5487_v55 = vld [vmem:[#allocation5 + $0x48] sm:$0xff]  ;;  %v5497_v63 = vld [vmem:[#allocation5 + $0x30] sm:$0xff] }
 0x36b   :  { %7859 = vst [vmem:[#allocation24_spill] sm:$0xff] %v5464_v52  ;;  %v5481_v52 = vld [vmem:[#allocation5 + $0x70] sm:$0xff]  ;;  %1548 = vmatpush.msrb.mxu0 %v5487_v55 }
 0x36c   :  { %7860 = vst [vmem:[#allocation33_spill] sm:$0xff] %v5467_v7  ;;  %1587 = vmatpush.msrb.mxu2 %v5481_v52  ;;  %v5484_v7 = vld [vmem:[#allocation7 + $0xa8] sm:$0xff]  ;;  %1733 = vmatpush.msra.mxu3 %v5122_v18  ;;  %v5507_v18 = vld [vmem:[#allocation5 + $0x18] sm:$0xff] }
 0x36d   :  { %7861 = vst [vmem:[#allocation26_spill] sm:$0xff] %v5471_v44  ;;  %1693 = vmatpush.msra.mxu1 %v5484_v7  ;;  %1549 = vmatpush.msrb.mxu0 %v5497_v63 }
 0x36e   :  { %7862 = vst [vmem:[#allocation35_spill] sm:$0xff] %v5474_v3  ;;  %v5491_v3 = vld [vmem:[#allocation5 + $0x58] sm:$0xff]  ;;  %1734 = vmatpush.msra.mxu3 %v5128_v19  ;;  %v5517_v19 = vld [vmem:[#allocation5] sm:$0xff] }
 0x36f   :  { %7863 = vst [vmem:[#allocation28_spill] sm:$0xff] %v5477_v27  ;;  %1588 = vmatpush.msrb.mxu2 %v5491_v3  ;;  %v5494_v27 = vld [vmem:[#allocation7 + $0x88] sm:$0xff]  ;;  %1550 = vmatpush.msrb.mxu0 %v5507_v18 }
 0x370   :  { %7864 = vst [vmem:[#allocation37_spill] sm:$0xff] %v5481_v52  ;;  %1694 = vmatpush.msra.mxu1 %v5494_v27  ;;  %1735 = vmatpush.msra.mxu3 %v5134_v40  ;;  %v5526_v40 = vld [vmem:[#allocation7 + $0x3e0] sm:$0xff] }
 0x371   :  { %7865 = vst [vmem:[#allocation30_spill] sm:$0xff] %v5484_v7  ;;  %v5501_v7 = vld [vmem:[#allocation5 + $0x40] sm:$0xff]  ;;  %1551 = vmatpush.msrb.mxu0 %v5517_v19 }
 0x372   :  { %7866 = vst [vmem:[#allocation39_spill] sm:$0xff] %v5487_v55  ;;  %1589 = vmatpush.msrb.mxu2 %v5501_v7  ;;  %v5504_v55 = vld [vmem:[#allocation7 + $0x68] sm:$0xff]  ;;  %1736 = vmatpush.msra.mxu3 %v5140_v2  ;;  %v5535_v2 = vld [vmem:[#allocation7 + $0x3c0] sm:$0xff] }
 0x373   :  { %7867 = vst [vmem:[#allocation32_spill] sm:$0xff] %v5491_v3  ;;  %1695 = vmatpush.msra.mxu1 %v5504_v55  ;;  %1552 = vmatmul.f32.vlgmr.msrb.gmra.mxu0 %v5355_v8 }
 0x374   :  { %7868 = vst [vmem:[#allocation42_spill] sm:$0xff] %v5494_v27  ;;  %v5511_v27 = vld [vmem:[#allocation5 + $0x28] sm:$0xff]  ;;  %1663 = vmatpush.msra.mxu0 %v5526_v40  ;;  %1737 = vmatpush.msra.mxu3 %v5150_v4  ;;  %v5555_v4 = vld [vmem:[#allocation7 + $0x380] sm:$0xff] }
 0x375   :  { %7869 = vst [vmem:[#allocation34_spill] sm:$0xff] %v5497_v63  ;;  %1590 = vmatpush.msrb.mxu2 %v5511_v27  ;;  %v5514_v63 = vld [vmem:[#allocation7 + $0x48] sm:$0xff] }
 0x376   :  { %7870 = vst [vmem:[#allocation44_spill] sm:$0xff] %v5501_v7  ;;  %1696 = vmatpush.msra.mxu1 %v5514_v63  ;;  %1664 = vmatpush.msra.mxu0 %v5535_v2 }
 0x377   :  { %7871 = vst [vmem:[#allocation111_spill] sm:$0xff] %v5504_v55  ;;  %v5521_v55 = vld [vmem:[#allocation5 + $0x10] sm:$0xff]  ;;  %1738 = vmatpush.msra.mxu3 %v5158_v12  ;;  %v5570_v12 = vld [vmem:[#allocation7 + $0x368] sm:$0xff] }
 0x378   :  { %7872 = vst [vmem:[#allocation36_spill] sm:$0xff] %v5507_v18  ;;  %1591 = vmatpush.msrb.mxu2 %v5521_v55 }
 0x379   :  { %7873 = vst [vmem:[#allocation112_spill] sm:$0xff] %v5511_v27  ;;  %1592 = vmatmul.f32.vlgmr.msrb.gmra.mxu2 %v5355_v8  ;;  %v5529_v27 = vld [vmem:[#allocation7 + $0x3e8] sm:$0xff] }
 0x37a   :  { %7874 = vst [vmem:[#allocation46_spill] sm:$0xff] %v5514_v63  ;;  %1703 = vmatpush.msra.mxu2 %v5529_v27  ;;  %v5532_v63 = vld [vmem:[#allocation7 + $0x28] sm:$0xff] }
 0x37b   :  { %7875 = vst [vmem:[#allocation38_spill] sm:$0xff] %v5517_v19  ;;  %1697 = vmatpush.msra.mxu1 %v5532_v63  ;;  %v5542_v19 = vld [vmem:[#allocation7 + $0x8] sm:$0xff] }
 0x37c   :  { %7876 = vst [vmem:[#allocation48_spill] sm:$0xff] %v5521_v55  ;;  %v5539_v55 = vld [vmem:[#allocation7 + $0x3c8] sm:$0xff] }
 0x37d   :  { %7877 = vst [vmem:[#allocation40_spill] sm:$0xff] %v5526_v40  ;;  %1704 = vmatpush.msra.mxu2 %v5539_v55  ;;  %1698 = vmatpush.msra.mxu1 %v5542_v19  ;;  %v5545_v40 = vld [vmem:[#allocation7 + $0x3a0] sm:$0xff] }
 0x37e   :  { %7878 = vst [vmem:[#allocation115_spill] sm:$0xff] %v5529_v27  ;;  %1665 = vmatpush.msra.mxu0 %v5545_v40  ;;  %v5548_v27 = vld [vmem:[#allocation7 + $0x1f8] sm:$0xff] }
 0x37f   :  { %7879 = vst [vmem:[#allocation50_spill] sm:$0xff] %v5532_v63  ;;  %1763 = vmatpush.msrb.mxu1 %v5548_v27  ;;  %v5551_v63 = vld [vmem:[#allocation7 + $0x3a8] sm:$0xff] }
 0x380   :  { %7880 = vst [vmem:[#allocation117_spill] sm:$0xff] %v5535_v2  ;;  %1705 = vmatpush.msra.mxu2 %v5551_v63  ;;  %1666 = vmatpush.msra.mxu0 %v5555_v4 }
 0x381   :  { %7881 = vst [vmem:[#allocation41_spill] sm:$0xff] %v5539_v55  ;;  %v5558_v55 = vld [vmem:[#allocation7 + $0x1d8] sm:$0xff] }
 0x382   :  { %7882 = vst [vmem:[#allocation118_spill] sm:$0xff] %v5542_v19  ;;  %1764 = vmatpush.msrb.mxu1 %v5558_v55  ;;  %v5561_v19 = vld [vmem:[#allocation7 + $0x388] sm:$0xff] }
 0x383   :  { %7883 = vst [vmem:[#allocation64_spill] sm:$0xff] %v5545_v40  ;;  %1706 = vmatpush.msra.mxu2 %v5561_v19  ;;  %v5564_v40 = vld [vmem:[#allocation7 + $0x360] sm:$0xff] }
 0x384   :  { %7884 = vst [vmem:[#allocation43_spill] sm:$0xff] %v5548_v27  ;;  %1667 = vmatpush.msra.mxu0 %v5564_v40  ;;  %v5567_v27 = vld [vmem:[#allocation7 + $0x1b8] sm:$0xff] }
 0x385   :  { %7885 = vst [vmem:[#allocation66_spill] sm:$0xff] %v5551_v63  ;;  %1765 = vmatpush.msrb.mxu1 %v5567_v27  ;;  %1707 = vmatpush.msra.mxu2 %v5570_v12 }
 0x386   :  { %7886 = vst [vmem:[#allocation45_spill] sm:$0xff] %v5555_v4  ;;  %v5573_v4 = vld [vmem:[#allocation7 + $0x340] sm:$0xff] }
 0x387   :  { %7887 = vst [vmem:[#allocation68_spill] sm:$0xff] %v5558_v55  ;;  %1668 = vmatpush.msra.mxu0 %v5573_v4  ;;  %v5576_v55 = vld [vmem:[#allocation7 + $0x198] sm:$0xff] }
 0x388   :  { %7888 = vst [vmem:[#allocation47_spill] sm:$0xff] %v5561_v19  ;;  %1766 = vmatpush.msrb.mxu1 %v5576_v55  ;;  %v5579_v19 = vld [vmem:[#allocation7 + $0x348] sm:$0xff] }
 0x389   :  { %7889 = vst [vmem:[#allocation70_spill] sm:$0xff] %v5564_v40  ;;  %1708 = vmatpush.msra.mxu2 %v5579_v19  ;;  %v5582_v40 = vld [vmem:[#allocation7 + $0x320] sm:$0xff] }
 0x38a   :  { %7890 = vst [vmem:[#allocation49_spill] sm:$0xff] %v5567_v27  ;;  %1669 = vmatpush.msra.mxu0 %v5582_v40  ;;  %v5585_v27 = vld [vmem:[#allocation7 + $0x178] sm:$0xff] }
 0x38b   :  { %7891 = vst [vmem:[#allocation72_spill] sm:$0xff] %v5570_v12  ;;  %1767 = vmatpush.msrb.mxu1 %v5585_v27  ;;  %v5588_v12 = vld [vmem:[#allocation7 + $0x328] sm:$0xff] }
 0x38c   :  { %7892 = vst [vmem:[#allocation51_spill] sm:$0xff] %v5573_v4  ;;  %1709 = vmatpush.msra.mxu2 %v5588_v12  ;;  %v5591_v4 = vld [vmem:[#allocation7 + $0x300] sm:$0xff] }
 0x38d   :  { %7893 = vst [vmem:[#allocation74_spill] sm:$0xff] %v5576_v55  ;;  %1670 = vmatpush.msra.mxu0 %v5591_v4  ;;  %v5594_v55 = vld [vmem:[#allocation7 + $0x158] sm:$0xff] }
 0x38e   :  { %7894 = vst [vmem:[#allocation52_spill] sm:$0xff] %v5579_v19  ;;  %1768 = vmatpush.msrb.mxu1 %v5594_v55  ;;  %v5597_v19 = vld [vmem:[#allocation7 + $0x308] sm:$0xff] }
 0x38f   :  { %7895 = vst [vmem:[#allocation76_spill] sm:$0xff] %v5582_v40  ;;  %1710 = vmatpush.msra.mxu2 %v5597_v19  ;;  %v5600_v40 = vld [vmem:[#allocation7 + $0x2e0] sm:$0xff] }
 0x390   :  { %7896 = vst [vmem:[#allocation53_spill] sm:$0xff] %v5585_v27  ;;  %1671 = vmatpush.msra.mxu0 %v5600_v40  ;;  %v5603_v27 = vld [vmem:[#allocation7 + $0x138] sm:$0xff] }
 0x391   :  { %7897 = vst [vmem:[#allocation78_spill] sm:$0xff] %v5588_v12  ;;  %1769 = vmatpush.msrb.mxu1 %v5603_v27  ;;  %v5606_v12 = vld [vmem:[#allocation7 + $0x2e8] sm:$0xff] }
 0x392   :  { %7898 = vst [vmem:[#allocation54_spill] sm:$0xff] %v5591_v4  ;;  %1711 = vmatpush.msra.mxu2 %v5606_v12  ;;  %v5609_v4 = vld [vmem:[#allocation7 + $0x2c0] sm:$0xff] }
 0x393   :  { %7899 = vst [vmem:[#allocation81_spill] sm:$0xff] %v5594_v55  ;;  %1672 = vmatpush.msra.mxu0 %v5609_v4  ;;  %v5612_v55 = vld [vmem:[#allocation7 + $0x118] sm:$0xff] }
 0x394   :  { %7900 = vst [vmem:[#allocation55_spill] sm:$0xff] %v5597_v19  ;;  %1770 = vmatpush.msrb.mxu1 %v5612_v55  ;;  %v5615_v19 = vld [vmem:[#allocation7 + $0x2c8] sm:$0xff] }
 0x395   :  { %7901 = vst [vmem:[#allocation85_spill] sm:$0xff] %v5600_v40  ;;  %1712 = vmatpush.msra.mxu2 %v5615_v19  ;;  %v5618_v40 = vld [vmem:[#allocation7 + $0x2a0] sm:$0xff] }
 0x396   :  { %7902 = vst [vmem:[#allocation56_spill] sm:$0xff] %v5603_v27  ;;  %1673 = vmatpush.msra.mxu0 %v5618_v40  ;;  %v5621_v27 = vld [vmem:[#allocation7 + $0xf8] sm:$0xff] }
 0x397   :  { %7903 = vst [vmem:[#allocation57_spill] sm:$0xff] %v5606_v12  ;;  %1771 = vmatpush.msrb.mxu1 %v5621_v27  ;;  %v5624_v12 = vld [vmem:[#allocation7 + $0x2a8] sm:$0xff] }
 0x398   :  { %7904 = vst [vmem:[#allocation88_spill] sm:$0xff] %v5609_v4  ;;  %1713 = vmatpush.msra.mxu2 %v5624_v12  ;;  %v5627_v4 = vld [vmem:[#allocation7 + $0x280] sm:$0xff] }
 0x399   :  { %7905 = vst [vmem:[#allocation91_spill] sm:$0xff] %v5612_v55  ;;  %1674 = vmatpush.msra.mxu0 %v5627_v4  ;;  %v5630_v55 = vld [vmem:[#allocation7 + $0xd8] sm:$0xff] }
 0x39a   :  { %7906 = vst [vmem:[#allocation58_spill] sm:$0xff] %v5615_v19  ;;  %1772 = vmatpush.msrb.mxu1 %v5630_v55  ;;  %v5633_v19 = vld [vmem:[#allocation7 + $0x288] sm:$0xff] }
 0x39b   :  { %7907 = vst [vmem:[#allocation94_spill] sm:$0xff] %v5618_v40  ;;  %1714 = vmatpush.msra.mxu2 %v5633_v19  ;;  %v5636_v40 = vld [vmem:[#allocation7 + $0x260] sm:$0xff] }
 0x39c   :  { %7908 = vst [vmem:[#allocation59_spill] sm:$0xff] %v5621_v27  ;;  %1675 = vmatpush.msra.mxu0 %v5636_v40  ;;  %v5639_v27 = vld [vmem:[#allocation7 + $0xb8] sm:$0xff] }
 0x39d   :  { %7909 = vst [vmem:[#allocation97_spill] sm:$0xff] %v5624_v12  ;;  %1773 = vmatpush.msrb.mxu1 %v5639_v27  ;;  %v5642_v12 = vld [vmem:[#allocation7 + $0x268] sm:$0xff] }
 0x39e   :  { %7910 = vst [vmem:[#allocation60_spill] sm:$0xff] %v5627_v4  ;;  %1715 = vmatpush.msra.mxu2 %v5642_v12  ;;  %v5645_v4 = vld [vmem:[#allocation7 + $0x240] sm:$0xff] }
 0x39f   :  { %7911 = vst [vmem:[#allocation100_spill] sm:$0xff] %v5630_v55  ;;  %1676 = vmatpush.msra.mxu0 %v5645_v4  ;;  %v5648_v55 = vld [vmem:[#allocation7 + $0x98] sm:$0xff] }
 0x3a0   :  { %7912 = vst [vmem:[#allocation61_spill] sm:$0xff] %v5633_v19  ;;  %1774 = vmatpush.msrb.mxu1 %v5648_v55  ;;  %v5651_v19 = vld [vmem:[#allocation7 + $0x248] sm:$0xff] }
 0x3a1   :  { %7913 = vst [vmem:[#allocation105_spill] sm:$0xff] %v5636_v40  ;;  %1716 = vmatpush.msra.mxu2 %v5651_v19  ;;  %v5654_v40 = vld [vmem:[#allocation7 + $0x220] sm:$0xff] }
 0x3a2   :  { %7914 = vst [vmem:[#allocation62_spill] sm:$0xff] %v5639_v27  ;;  %1677 = vmatpush.msra.mxu0 %v5654_v40  ;;  %v5657_v27 = vld [vmem:[#allocation7 + $0x78] sm:$0xff] }
 0x3a3   :  { %7915 = vst [vmem:[#allocation106_spill] sm:$0xff] %v5642_v12  ;;  %1775 = vmatpush.msrb.mxu1 %v5657_v27  ;;  %v5660_v12 = vld [vmem:[#allocation7 + $0x228] sm:$0xff] }
 0x3a4   :  { %7916 = vst [vmem:[#allocation63_spill] sm:$0xff] %v5645_v4  ;;  %1717 = vmatpush.msra.mxu2 %v5660_v12  ;;  %v5663_v4 = vld [vmem:[#allocation7 + $0x200] sm:$0xff] }
 0x3a5   :  { %7917 = vst [vmem:[#allocation107_spill] sm:$0xff] %v5648_v55  ;;  %1678 = vmatpush.msra.mxu0 %v5663_v4  ;;  %v5666_v55 = vld [vmem:[#allocation7 + $0x58] sm:$0xff] }
 0x3a6   :  { %7918 = vst [vmem:[#allocation65_spill] sm:$0xff] %v5651_v19  ;;  %1776 = vmatpush.msrb.mxu1 %v5666_v55  ;;  %v5669_v19 = vld [vmem:[#allocation7 + $0x3f0] sm:$0xff] }
 0x3a7   :  { %7919 = vst [vmem:[#allocation108_spill] sm:$0xff] %v5654_v40  ;;  %1743 = vmatpush.msrb.mxu0 %v5669_v19  ;;  %v5672_v40 = vld [vmem:[#allocation7 + $0x208] sm:$0xff] }
 0x3a8   :  { %7920 = vst [vmem:[#allocation67_spill] sm:$0xff] %v5657_v27  ;;  %1718 = vmatpush.msra.mxu2 %v5672_v40  ;;  %v5675_v27 = vld [vmem:[#allocation7 + $0x3f8] sm:$0xff] }
 0x3a9   :  { %7921 = vst [vmem:[#allocation109_spill] sm:$0xff] %v5660_v12  ;;  %v5678_v12 = vld [vmem:[#allocation7 + $0x38] sm:$0xff] }
 0x3aa   :  { %7922 = vst [vmem:[#allocation69_spill] sm:$0xff] %v5663_v4  ;;  %1783 = vmatpush.msrb.mxu2 %v5675_v27  ;;  %1777 = vmatpush.msrb.mxu1 %v5678_v12  ;;  %v5681_v4 = vld [vmem:[#allocation7 + $0x3d0] sm:$0xff] }
 0x3ab   :  { %7923 = vst [vmem:[#allocation110_spill] sm:$0xff] %v5666_v55  ;;  %1744 = vmatpush.msrb.mxu0 %v5681_v4  ;;  %v5684_v55 = vld [vmem:[#allocation7 + $0x3d8] sm:$0xff] }
 0x3ac   :  { %7924 = vst [vmem:[#allocation71_spill] sm:$0xff] %v5669_v19  ;;  %1784 = vmatpush.msrb.mxu2 %v5684_v55  ;;  %1778 = vmatpush.msrb.mxu1 %v5205_v26  ;;  %v5688_v19 = vld [vmem:[#allocation7 + $0x3b0] sm:$0xff]  ;;  %v5703_v26 = vld [vmem:[#allocation7 + $0x378] sm:$0xff] }
 0x3ad   :  { %7925 = vst [vmem:[#allocation113_spill] sm:$0xff] %v5672_v40  ;;  %1745 = vmatpush.msrb.mxu0 %v5688_v19  ;;  %v5691_v40 = vld [vmem:[#allocation7 + $0x3b8] sm:$0xff] }
 0x3ae   :  { %7926 = vst [vmem:[#allocation73_spill] sm:$0xff] %v5675_v27  ;;  %1785 = vmatpush.msrb.mxu2 %v5691_v40  ;;  %v5694_v27 = vld [vmem:[#allocation7 + $0x390] sm:$0xff] }
 0x3af   :  { %7927 = vst [vmem:[#allocation114_spill] sm:$0xff] %v5678_v12  ;;  %1746 = vmatpush.msrb.mxu0 %v5694_v27  ;;  %v5697_v12 = vld [vmem:[#allocation7 + $0x398] sm:$0xff] }
 0x3b0   :  { %7928 = vst [vmem:[#allocation75_spill] sm:$0xff] %v5681_v4  ;;  %1786 = vmatpush.msrb.mxu2 %v5697_v12  ;;  %v5700_v4 = vld [vmem:[#allocation7 + $0x370] sm:$0xff] }
 0x3b1   :  { %7929 = vst [vmem:[#allocation116_spill] sm:$0xff] %v5684_v55  ;;  %1747 = vmatpush.msrb.mxu0 %v5700_v4 }
 0x3b2   :  { %7930 = vst [vmem:[#allocation77_spill] sm:$0xff] %v5688_v19  ;;  %1787 = vmatpush.msrb.mxu2 %v5703_v26  ;;  %v5706_v19 = vld [vmem:[#allocation7 + $0x350] sm:$0xff] }
 0x3b3   :  { %7931 = vst [vmem:[#allocation119_spill] sm:$0xff] %v5691_v40  ;;  %1748 = vmatpush.msrb.mxu0 %v5706_v19  ;;  %v5709_v40 = vld [vmem:[#allocation7 + $0x358] sm:$0xff] }
 0x3b4   :  { %7932 = vst [vmem:[#allocation79_spill] sm:$0xff] %v5694_v27  ;;  %1788 = vmatpush.msrb.mxu2 %v5709_v40  ;;  %v5712_v27 = vld [vmem:[#allocation7 + $0x330] sm:$0xff] }
 0x3b5   :  { %7933 = vst [vmem:[#allocation120_spill] sm:$0xff] %v5697_v12  ;;  %1749 = vmatpush.msrb.mxu0 %v5712_v27  ;;  %v5715_v12 = vld [vmem:[#allocation7 + $0x338] sm:$0xff] }
 0x3b6   :  { %7934 = vst [vmem:[#allocation82_spill] sm:$0xff] %v5700_v4  ;;  %1789 = vmatpush.msrb.mxu2 %v5715_v12  ;;  %v5718_v4 = vld [vmem:[#allocation7 + $0x310] sm:$0xff] }
 0x3b7   :  { %7935 = vst [vmem:[#allocation121_spill] sm:$0xff] %v5703_v26  ;;  %1750 = vmatpush.msrb.mxu0 %v5718_v4  ;;  %v5721_v26 = vld [vmem:[#allocation7 + $0x318] sm:$0xff] }
 0x3b8   :  { %7936 = vst [vmem:[#allocation103_spill] sm:$0xff] %v5706_v19  ;;  %1790 = vmatpush.msrb.mxu2 %v5721_v26  ;;  %v5724_v19 = vld [vmem:[#allocation7 + $0x2f0] sm:$0xff] }
 0x3b9   :  { %7937 = vst [vmem:[#allocation122_spill] sm:$0xff] %v5709_v40  ;;  %1751 = vmatpush.msrb.mxu0 %v5724_v19  ;;  %v5727_v40 = vld [vmem:[#allocation7 + $0x2f8] sm:$0xff] }
 0x3ba   :  { %7938 = vst [vmem:[#allocation123_spill] sm:$0xff] %v5712_v27  ;;  %1791 = vmatpush.msrb.mxu2 %v5727_v40  ;;  %v5730_v27 = vld [vmem:[#allocation7 + $0x2d0] sm:$0xff] }
 0x3bb   :  { %7939 = vst [vmem:[#allocation124_spill] sm:$0xff] %v5715_v12  ;;  %1752 = vmatpush.msrb.mxu0 %v5730_v27  ;;  %v5733_v12 = vld [vmem:[#allocation7 + $0x2d8] sm:$0xff] }
 0x3bc   :  { %7940 = vst [vmem:[#allocation125_spill] sm:$0xff] %v5718_v4  ;;  %1792 = vmatpush.msrb.mxu2 %v5733_v12  ;;  %v5736_v4 = vld [vmem:[#allocation7 + $0x2b0] sm:$0xff] }
 0x3bd   :  { %7941 = vst [vmem:[#allocation126_spill] sm:$0xff] %v5721_v26  ;;  %1753 = vmatpush.msrb.mxu0 %v5736_v4  ;;  %v5739_v26 = vld [vmem:[#allocation7 + $0x2b8] sm:$0xff] }
 0x3be   :  { %7942 = vst [vmem:[#allocation127_spill] sm:$0xff] %v5724_v19  ;;  %1793 = vmatpush.msrb.mxu2 %v5739_v26  ;;  %v5742_v19 = vld [vmem:[#allocation7 + $0x290] sm:$0xff] }
 0x3bf   :  { %7943 = vst [vmem:[#allocation128_spill] sm:$0xff] %v5727_v40  ;;  %1754 = vmatpush.msrb.mxu0 %v5742_v19  ;;  %v5745_v40 = vld [vmem:[#allocation7 + $0x298] sm:$0xff] }
 0x3c0   :  { %7944 = vst [vmem:[#allocation129_spill] sm:$0xff] %v5730_v27  ;;  %1794 = vmatpush.msrb.mxu2 %v5745_v40  ;;  %v5748_v27 = vld [vmem:[#allocation7 + $0x270] sm:$0xff] }
 0x3c1   :  { %7945 = vst [vmem:[#allocation130_spill] sm:$0xff] %v5733_v12  ;;  %1755 = vmatpush.msrb.mxu0 %v5748_v27  ;;  %v5751_v12 = vld [vmem:[#allocation7 + $0x278] sm:$0xff] }
 0x3c2   :  { %7946 = vst [vmem:[#allocation131_spill] sm:$0xff] %v5736_v4  ;;  %1795 = vmatpush.msrb.mxu2 %v5751_v12  ;;  %v5754_v4 = vld [vmem:[#allocation7 + $0x250] sm:$0xff] }
 0x3c3   :  { %7947 = vst [vmem:[#allocation132_spill] sm:$0xff] %v5739_v26  ;;  %1756 = vmatpush.msrb.mxu0 %v5754_v4  ;;  %v5757_v26 = vld [vmem:[#allocation7 + $0x258] sm:$0xff] }
 0x3c4   :  { %7948 = vst [vmem:[#allocation133_spill] sm:$0xff] %v5742_v19  ;;  %1796 = vmatpush.msrb.mxu2 %v5757_v26  ;;  %v5760_v19 = vld [vmem:[#allocation7 + $0x230] sm:$0xff] }
 0x3c5   :  { %7949 = vst [vmem:[#allocation134_spill] sm:$0xff] %v5745_v40  ;;  %1757 = vmatpush.msrb.mxu0 %v5760_v19  ;;  %v5763_v40 = vld [vmem:[#allocation7 + $0x238] sm:$0xff] }
 0x3c6   :  { %7950 = vst [vmem:[#allocation135_spill] sm:$0xff] %v5748_v27  ;;  %1797 = vmatpush.msrb.mxu2 %v5763_v40  ;;  %v5766_v27 = vld [vmem:[#allocation7 + $0x210] sm:$0xff] }
 0x3c7   :  { %7951 = vst [vmem:[#allocation136_spill] sm:$0xff] %v5751_v12  ;;  %1758 = vmatpush.msrb.mxu0 %v5766_v27  ;;  %v5769_v12 = vld [vmem:[#allocation7 + $0x218] sm:$0xff] }
 0x3c8   :  { %7952 = vst [vmem:[#allocation137_spill] sm:$0xff] %v5754_v4  ;;  %1798 = vmatpush.msrb.mxu2 %v5769_v12  ;;  %v1364_v4 = vpop.f32.mrf.mxu1 }
 0x3c9   :  { %7953 = vst [vmem:[#allocation138_spill] sm:$0xff] %v5757_v26 }
 0x3ca   :  { %7954 = vst [vmem:[#allocation139_spill] sm:$0xff] %v5760_v19 }
 0x3cb   :  { %7955 = vst [vmem:[#allocation140_spill] sm:$0xff] %v5763_v40  ;;  %v1404_v40 = vpop.f32.mrf.mxu3 }
 0x3cc   :  { %7956 = vst [vmem:[#allocation141_spill] sm:$0xff] %v5766_v27 }
 0x3cd   :  { %7957 = vst [vmem:[#allocation142_spill] sm:$0xff] %v5769_v12 }
 0x3cf   :  { %v1344_v55 = vpop.f32.mrf.mxu0 }
 0x3d0   :  { %v1345_v26 = vadd.f32 %v1344_v55, %v7826_v49  ;;  %v1444_v19 = vpop.f32.mrf.mxu1 }
 0x3d2   :  { %v1365_v63 = vadd.f32 %v1364_v4, %v1345_v26 }
 0x3d4   :  { %v2858_v2 = vmul.f32 -1.442695, %v1365_v63 }
 0x3d5   :  { %v1384_v18 = vpop.f32.mrf.mxu2 }
 0x3d6   :  { %2955 = vpow2.f32 %v2858_v2  ;;  %v1385_v7 = vadd.f32 %v1384_v18, %v7827_v17 }
 0x3d7   :  { %v1424_v2 = vpop.f32.mrf.mxu0 }
 0x3d8   :  { %v1405_v3 = vadd.f32 %v1404_v40, %v1385_v7  ;;  %v1573_v0 = vpop.f32.mrf.mxu1 }
 0x3d9   :  { %v1574_v12 = vadd.f32 %v1573_v0, %v7828_v45  ;;  %v1425_v0 = vadd.f32 %v1424_v2, %v4465_v59 }
 0x3da   :  { %v2859_v52 = vmul.f32 -1.442695, %v1405_v3 }
 0x3db   :  { %v1616_v63 = vadd.f32 %v1574_v12, %v1534_v36  ;;  %v1445_v5 = vadd.f32 %v1444_v19, %v1425_v0 }
 0x3dc   :  { %v2956_v44 = vpop.eup %2955  ;;  %2957 = vpow2.f32 %v2859_v52 }
 0x3dd   :  { %v1490_v27 = vadd.f32 1.0, %v2956_v44  ;;  %v2861_v17 = vmul.f32 -1.442695, %v1616_v63 }
 0x3de   :  { %v1464_v49 = vpop.f32.mrf.mxu2 }
 0x3df   :  { %2959 = vrcp.f32 %v1490_v27  ;;  %v1502_v7 = vand.u32 2147483648, %v1490_v27  ;;  %v1465_v3 = vadd.f32 %v1464_v49, %v7829_v41  ;;  %v1500_v44 = vand.u32 2147483647, %v1490_v27 }
 0x3e0   :  { %vm1496_vm9 = vweird.f32 %v1490_v27 }
 0x3e1   :  { %v1503_v36 = vor.u32 1.1754944e-38, %v1502_v7  ;;  %vm1501_vm11 = vcmp.eq.f32.partialorder %v1500_v44, 8.507059e+37 }
 0x3e2   :  { %v2958_v58 = vpop.eup %2957 }
 0x3e3   :  { %v1509_v55 = vadd.f32 1.0, %v2958_v58  ;;  %v1484_v58 = vpop.f32.mrf.mxu3 }
 0x3e4   :  { %v1485_v57 = vadd.f32 %v1484_v58, %v1465_v3 }
 0x3e5   :  { %v2960_v4 = vpop.eup %2959  ;;  %2961 = vrcp.f32 %v1509_v55  ;;  %v1521_v63 = vand.u32 2147483648, %v1509_v55  ;;  %vm1515_vm13 = vweird.f32 %v1509_v55 }
 0x3e6   :  { %v1492_v26 = vmul.f32 %v2960_v4, %v1490_v27  ;;  %vm1497_vm8 = vweird.f32 %v2960_v4  ;;  %2963 = vpow2.f32 %v2861_v17 }
 0x3e7   :  { %vm1498_vm10 = vmor %vm1496_vm9, %vm1497_vm8 }
 0x3e8   :  { %v1493_v18 = vsub.f32 1.0, %v1492_v26 }
 0x3ea   :  { %v1494_v52 = vmul.f32 %v2960_v4, %v1493_v18  ;;  %v1533_v18 = vld [vmem:[#allocation3 + $0x60] sm:$0xff] }
 0x3eb   :  { %v2962_v40 = vpop.eup %2961 }
 0x3ec   :  { %v1511_v45 = vmul.f32 %v2962_v40, %v1509_v55  ;;  %v1495_v50 = vadd.f32 %v2960_v4, %v1494_v52  ;;  %vm1516_vm12 = vweird.f32 %v2962_v40  ;;  %v1519_v52 = vand.u32 2147483647, %v1509_v55  ;;  %v2964_v7 = vpop.eup %2963 }
 0x3ed   :  { %vm1517_vm14 = vmor %vm1515_vm13, %vm1516_vm12  ;;  %v5778_v19 = vadd.f32 1.0, %v2964_v7  ;;  %v7975_v7 = vld [vmem:[#allocation96_spill] sm:$0xff] }
 0x3ee   :  { %v1512_v12 = vsub.f32 1.0, %v1511_v45  ;;  %v1499_v26 = vsel %vm1498_vm10, %v2960_v4, %v1495_v50  ;;  %v1522_v45 = vor.u32 1.1754944e-38, %v1521_v63  ;;  %vm1520_vm15 = vcmp.eq.f32.partialorder %v1519_v52, 8.507059e+37  ;;  %v7969_v63 = vld [vmem:[#allocation89_spill] sm:$0xff]  ;;  %v7973_v52 = vld [vmem:[#allocation92_spill] sm:$0xff] }
 0x3ef   :  { %v1504_v49 = vsel %vm1501_vm11, %v1503_v36, %v1499_v26  ;;  %vm1626_vm5 = vweird.f32 %v5778_v19 }
 0x3f0   :  { %v1553_v41 = vpop.f32.mrf.mxu0  ;;  %v1513_v38 = vmul.f32 %v2962_v40, %v1512_v12  ;;  %v1525_v42 = vmul.f32 %v1504_v49, %v1485_v57  ;;  %v1632_v12 = vand.u32 2147483648, %v5778_v19  ;;  %v7970_v49 = vld [vmem:[#allocation23_spill] sm:$0xff] }
 0x3f1   :  { %v1554_v2 = vadd.f32 %v1553_v41, %v7569_v39 }
 0x3f2   :  { %v1526_v27 = vadd.f32 %v1525_v42, %v1445_v5  ;;  %v1514_v59 = vadd.f32 %v2962_v40, %v1513_v38 }
 0x3f3   :  { %v1596_v17 = vadd.f32 %v1554_v2, %v1533_v18  ;;  %v7971_v18 = vld [vmem:[#allocation93_spill] sm:$0xff]  ;;  %v7972_v2 = vld [vmem:[#allocation16_spill] sm:$0xff] }
 0x3f4   :  { %2965 = vtanh.f32 %v1526_v27  ;;  %v1518_v4 = vsel %vm1517_vm14, %v2962_v40, %v1514_v59  ;;  %v5853_v27 = vld [vmem:[#allocation7 + $0x190] sm:$0xff] }
 0x3f5   :  { %v2860_v50 = vmul.f32 -1.442695, %v1596_v17  ;;  %v1523_v3 = vsel %vm1520_vm15, %v1522_v45, %v1518_v4  ;;  %v7974_v17 = vld [vmem:[#allocation25_spill] sm:$0xff]  ;;  %v7976_v45 = vld [vmem:[#allocation18_spill] sm:$0xff]  ;;  %v7977_v4 = vld [vmem:[#allocation95_spill] sm:$0xff] }
 0x3f6   :  { %v1528_v44 = vsub.f32 1.0, %v1523_v3  ;;  %v1530_v42 = vmul.f32 %v1523_v3, %v5246_v47  ;;  %v7979_v3 = vld [vmem:[#allocation99_spill] sm:$0xff] }
 0x3f7   :  { %2967 = vpow2.f32 %v2860_v50  ;;  %v5859_v50 = vld [vmem:[#allocation7 + $0x170] sm:$0xff] }
 0x3f8   :  { %2969 = vrcp.f32 %v5778_v19 }
 0x3fa   :  { %v2966_v57 = vpop.eup %2965 }
 0x3fb   :  { %v1529_v41 = vmul.f32 %v2966_v57, %v1528_v44  ;;  %v5865_v44 = vld [vmem:[#allocation7 + $0x150] sm:$0xff] }
 0x3fc   :  { %v7980_v57 = vld [vmem:[#allocation20_spill] sm:$0xff] }
 0x3fd   :  { %v2968_v5 = vpop.eup %2967  ;;  %v5782_v55 = vadd.f32 %v1530_v42, %v1529_v41  ;;  %v7981_v41 = vld [vmem:[#allocation98_spill] sm:$0xff]  ;;  %v7982_v42 = vld [vmem:[#allocation29_spill] sm:$0xff] }
 0x3fe   :  { %v1600_v38 = vadd.f32 1.0, %v2968_v5  ;;  %v2970_v59 = vpop.eup %2969  ;;  %v5871_v5 = vld [vmem:[#allocation7 + $0x130] sm:$0xff] }
 0x3ff   :  { %1679 = vmatmul.f32.vlgmr.msra.gmra.mxu0 %v5782_v55  ;;  %1719 = vmatmul.f32.vlgmr.msra.gmra.mxu2 %v5782_v55  ;;  %v1622_v47 = vmul.f32 %v2970_v59, %v5778_v19  ;;  %vm1627_vm4 = vweird.f32 %v2970_v59 }
 0x400   :  { %2971 = vrcp.f32 %v1600_v38  ;;  %1872 = vmatpush.msra.mxu0 %v5252_v61  ;;  %1959 = vmatpush.msra.mxu2 %v5255_v10  ;;  %v1612_v10 = vand.u32 2147483648, %v1600_v38  ;;  %vm1606_vm1 = vweird.f32 %v1600_v38  ;;  %vm1628_vm6 = vmor %vm1626_vm5, %vm1627_vm4 }
 0x401   :  { %v1623_v58 = vsub.f32 1.0, %v1622_v47  ;;  %v7985_v47 = vld [vmem:[#allocation101_spill] sm:$0xff] }
 0x402   :  { %1873 = vmatpush.msra.mxu0 %v5258_v13  ;;  %1960 = vmatpush.msra.mxu2 %v5261_v56  ;;  %v1610_v56 = vand.u32 2147483647, %v1600_v38 }
 0x404   :  { %1874 = vmatpush.msra.mxu0 %v5266_v31  ;;  %1961 = vmatpush.msra.mxu2 %v5269_v29  ;;  %v1624_v31 = vmul.f32 %v2970_v59, %v1623_v58  ;;  %v1593_v29 = vpop.f32.mrf.mxu2  ;;  %vm1611_vm3 = vcmp.eq.f32.partialorder %v1610_v56, 8.507059e+37  ;;  %v7987_v58 = vld [vmem:[#allocation24_spill] sm:$0xff]  ;;  %v7990_v56 = vld [vmem:[#allocation35_spill] sm:$0xff] }
 0x406   :  { %v2972_v40 = vpop.eup %2971  ;;  %1875 = vmatpush.msra.mxu0 %v5272_v20  ;;  %1962 = vmatpush.msra.mxu2 %v5275_v53  ;;  %v1613_v53 = vor.u32 1.1754944e-38, %v1612_v10  ;;  %v1625_v36 = vadd.f32 %v2970_v59, %v1624_v31  ;;  %v5883_v10 = vld [vmem:[#allocation7 + $0xf0] sm:$0xff] }
 0x407   :  { %v1602_v0 = vmul.f32 %v2972_v40, %v1600_v38  ;;  %1759 = vmatmul.f32.vlgmr.msrb.gmra.mxu0 %v5782_v55  ;;  %1799 = vmatmul.f32.vlgmr.msrb.gmra.mxu2 %v5782_v55  ;;  %vm1607_vm0 = vweird.f32 %v2972_v40  ;;  %v7983_v38 = vld [vmem:[#allocation102_spill] sm:$0xff]  ;;  %v7991_v31 = vld [vmem:[#allocation28_spill] sm:$0xff] }
 0x408   :  { %1876 = vmatpush.msra.mxu0 %v5280_v14  ;;  %1963 = vmatpush.msra.mxu2 %v5283_v28  ;;  %vm1608_vm2 = vmor %vm1606_vm1, %vm1607_vm0  ;;  %v1594_v14 = vadd.f32 %v1593_v29, %v4281_v43  ;;  %v5889_v29 = vld [vmem:[#allocation7 + $0xd0] sm:$0xff] }
 0x409   :  { %v1603_v61 = vsub.f32 1.0, %v1602_v0  ;;  %v7986_v0 = vld [vmem:[#allocation31_spill] sm:$0xff] }
 0x40a   :  { %1877 = vmatpush.msra.mxu0 %v5286_v48  ;;  %1964 = vmatpush.msra.mxu2 %v5289_v23  ;;  %v1535_v48 = vld [vmem:[#allocation3 + $0x70] sm:$0xff] }
 0x40b   :  { %v1604_v13 = vmul.f32 %v2972_v40, %v1603_v61  ;;  %v7988_v61 = vld [vmem:[#allocation33_spill] sm:$0xff] }
 0x40c   :  { %1878 = vmatpush.msra.mxu0 %v5293_v33  ;;  %1965 = vmatpush.msra.mxu2 %v5296_v32  ;;  %v1630_v33 = vand.u32 2147483647, %v5778_v19  ;;  %v7978_v19 = vld [vmem:[#allocation27_spill] sm:$0xff] }
 0x40d   :  { %v1605_v20 = vadd.f32 %v2972_v40, %v1604_v13  ;;  %v7989_v13 = vld [vmem:[#allocation26_spill] sm:$0xff] }
 0x40e   :  { %1879 = vmatpush.msra.mxu0 %v5300_v60  ;;  %1966 = vmatpush.msra.mxu2 %v5303_v35  ;;  %v1629_v60 = vsel %vm1628_vm6, %v2970_v59, %v1625_v36  ;;  %v1633_v35 = vor.u32 1.1754944e-38, %v1632_v12  ;;  %vm1631_vm7 = vcmp.eq.f32.partialorder %v1630_v33, 8.507059e+37  ;;  %v7984_v59 = vld [vmem:[#allocation22_spill] sm:$0xff]  ;;  %v5901_v12 = vld [vmem:[#allocation7 + $0x90] sm:$0xff]  ;;  %v7999_v33 = vld [vmem:[#allocation111_spill] sm:$0xff] }
 0x40f   :  { %v1609_v28 = vsel %vm1608_vm2, %v2972_v40, %v1605_v20  ;;  %v5877_v40 = vld [vmem:[#allocation7 + $0x110] sm:$0xff]  ;;  %v7992_v20 = vld [vmem:[#allocation37_spill] sm:$0xff]  ;;  %v7997_v36 = vld [vmem:[#allocation34_spill] sm:$0xff] }
 0x410   :  { %v1614_v23 = vsel %vm1611_vm3, %v1613_v53, %v1609_v28  ;;  %1880 = vmatpush.msra.mxu0 %v5309_v22  ;;  %1967 = vmatpush.msra.mxu2 %v5312_v46  ;;  %v1634_v22 = vsel %vm1631_vm7, %v1633_v35, %v1629_v60  ;;  %v7993_v53 = vld [vmem:[#allocation30_spill] sm:$0xff]  ;;  %v5895_v28 = vld [vmem:[#allocation7 + $0xb0] sm:$0xff] }
 0x411   :  { %v1636_v26 = vmul.f32 %v1614_v23, %v1594_v14  ;;  %v1639_v46 = vsub.f32 1.0, %v1634_v22  ;;  %v7994_v14 = vld [vmem:[#allocation39_spill] sm:$0xff]  ;;  %v7996_v23 = vld [vmem:[#allocation42_spill] sm:$0xff]  ;;  %v5907_v60 = vld [vmem:[#allocation7 + $0x70] sm:$0xff] }
 0x412   :  { %1881 = vmatpush.msra.mxu0 %v5317_v25  ;;  %1968 = vmatpush.msra.mxu2 %v5320_v6  ;;  %v8001_v35 = vld [vmem:[#allocation112_spill] sm:$0xff] }
 0x413   :  { %v1637_v32 = vadd.f32 %v1636_v26, %v1535_v48  ;;  %v7995_v48 = vld [vmem:[#allocation32_spill] sm:$0xff] }
 0x414   :  { %1882 = vmatpush.msra.mxu0 %v5324_v30  ;;  %1969 = vmatpush.msra.mxu2 %v5327_v9  ;;  %v1641_v30 = vmul.f32 %v1634_v22, %v5355_v8  ;;  %v7966_v8 = vld [vmem:[#allocation21_spill] sm:$0xff]  ;;  %v7998_v26 = vld [vmem:[#allocation44_spill] sm:$0xff]  ;;  %v8002_v22 = vld [vmem:[#allocation46_spill] sm:$0xff] }
 0x415   :  { %2973 = vtanh.f32 %v1637_v32  ;;  %v8000_v32 = vld [vmem:[#allocation36_spill] sm:$0xff] }
 0x416   :  { %1883 = vmatpush.msra.mxu0 %v5330_v62  ;;  %1970 = vmatpush.msra.mxu2 %v5333_v54  ;;  %v7958_v62 = vld [vmem:[#allocation17_spill] sm:$0xff]  ;;  %v7959_v54 = vld [vmem:[#allocation80_spill] sm:$0xff] }
 0x418   :  { %1884 = vmatpush.msra.mxu0 %v5336_v16  ;;  %1971 = vmatpush.msra.mxu2 %v5339_v37  ;;  %v7960_v16 = vld [vmem:[#allocation12_spill] sm:$0xff]  ;;  %v7961_v37 = vld [vmem:[#allocation83_spill] sm:$0xff] }
 0x41a   :  { %1885 = vmatpush.msra.mxu0 %v5342_v34  ;;  %1972 = vmatpush.msra.mxu2 %v5345_v51  ;;  %v7962_v34 = vld [vmem:[#allocation19_spill] sm:$0xff] }
 0x41b   :  { %v2974_v25 = vpop.eup %2973  ;;  %v7963_v51 = vld [vmem:[#allocation87_spill] sm:$0xff] }
 0x41c   :  { %v1640_v6 = vmul.f32 %v2974_v25, %v1639_v46  ;;  %1886 = vmatpush.msra.mxu0 %v5349_v1  ;;  %1973 = vmatpush.msra.mxu2 %v5352_v11  ;;  %v7964_v1 = vld [vmem:[#allocation13_spill] sm:$0xff]  ;;  %v7965_v11 = vld [vmem:[#allocation86_spill] sm:$0xff]  ;;  %v5913_v25 = vld [vmem:[#allocation7 + $0x50] sm:$0xff] }
 0x41d   :  { %v8003_v46 = vld [vmem:[#allocation38_spill] sm:$0xff] }
 0x41e   :  { %v5824_v9 = vadd.f32 %v1641_v30, %v1640_v6  ;;  %1887 = vmatpush.msra.mxu0 %v5357_v24  ;;  %1974 = vmatpush.msra.mxu2 %v5360_v15  ;;  %v7967_v24 = vld [vmem:[#allocation90_spill] sm:$0xff]  ;;  %v8004_v6 = vld [vmem:[#allocation48_spill] sm:$0xff] }
 0x41f   :  { %v7968_v15 = vld [vmem:[#allocation14_spill] sm:$0xff]  ;;  %v8005_v30 = vld [vmem:[#allocation40_spill] sm:$0xff] }
 0x420   :  { %1659 = vmatmul.f32.vlgmr.msrb.gmra.mxu3 %v5824_v9  ;;  %1699 = vmatmul.f32.vlgmr.msra.gmra.mxu1 %v5824_v9 }
 0x421   :  { %1852 = vmatpush.msrb.mxu3 %v5365_v21  ;;  %1888 = vmatmul.f32.vlgmr.msra.gmra.mxu0 %v5824_v9  ;;  %v5843_v21 = vld [vmem:[#allocation7 + $0x1b0] sm:$0xff] }
 0x422   :  { %1892 = vmatpush.msra.mxu1 %v7958_v62  ;;  %1999 = vmatpush.msrb.mxu0 %v7959_v54  ;;  %v8006_v62 = vld [vmem:[#allocation115_spill] sm:$0xff]  ;;  %v8007_v54 = vld [vmem:[#allocation50_spill] sm:$0xff] }
 0x423   :  { %1853 = vmatpush.msrb.mxu3 %v7960_v16  ;;  %2039 = vmatpush.msrb.mxu2 %v7961_v37  ;;  %v8008_v16 = vld [vmem:[#allocation117_spill] sm:$0xff]  ;;  %v5923_v37 = vld [vmem:[#allocation7 + $0x30] sm:$0xff] }
 0x424   :  { %1893 = vmatpush.msra.mxu1 %v7962_v34  ;;  %2000 = vmatpush.msrb.mxu0 %v7963_v51  ;;  %v8009_v34 = vld [vmem:[#allocation41_spill] sm:$0xff]  ;;  %v8010_v51 = vld [vmem:[#allocation118_spill] sm:$0xff] }
 0x425   :  { %1854 = vmatpush.msrb.mxu3 %v7964_v1  ;;  %2040 = vmatpush.msrb.mxu2 %v7965_v11  ;;  %v8011_v1 = vld [vmem:[#allocation64_spill] sm:$0xff]  ;;  %v8012_v11 = vld [vmem:[#allocation43_spill] sm:$0xff] }
 0x426   :  { %1894 = vmatpush.msra.mxu1 %v7966_v8  ;;  %2001 = vmatpush.msrb.mxu0 %v7967_v24  ;;  %v8013_v8 = vld [vmem:[#allocation66_spill] sm:$0xff]  ;;  %v5931_v24 = vld [vmem:[#allocation7 + $0x10] sm:$0xff] }
 0x427   :  { %1855 = vmatpush.msrb.mxu3 %v7968_v15  ;;  %2041 = vmatpush.msrb.mxu2 %v5843_v21  ;;  %v8014_v15 = vld [vmem:[#allocation45_spill] sm:$0xff] }
 0x428   :  { %1895 = vmatpush.msra.mxu1 %v7969_v63  ;;  %1739 = vmatmul.f32.vlgmr.msra.gmra.mxu3 %v5824_v9  ;;  %v8015_v63 = vld [vmem:[#allocation68_spill] sm:$0xff] }
 0x429   :  { %1779 = vmatmul.f32.vlgmr.msrb.gmra.mxu1 %v5824_v9  ;;  %1856 = vmatpush.msrb.mxu3 %v7970_v49  ;;  %v8016_v49 = vld [vmem:[#allocation47_spill] sm:$0xff] }
 0x42a   :  { %1896 = vmatpush.msra.mxu1 %v7971_v18  ;;  %2002 = vmatpush.msrb.mxu0 %v7972_v2  ;;  %v8017_v18 = vld [vmem:[#allocation70_spill] sm:$0xff]  ;;  %v8018_v2 = vld [vmem:[#allocation49_spill] sm:$0xff] }
 0x42b   :  { %1857 = vmatpush.msrb.mxu3 %v7973_v52  ;;  %2042 = vmatpush.msrb.mxu2 %v5853_v27  ;;  %v8019_v52 = vld [vmem:[#allocation72_spill] sm:$0xff] }
 0x42c   :  { %1897 = vmatpush.msra.mxu1 %v7974_v17  ;;  %2003 = vmatpush.msrb.mxu0 %v7975_v7  ;;  %v8020_v17 = vld [vmem:[#allocation51_spill] sm:$0xff]  ;;  %v8021_v7 = vld [vmem:[#allocation74_spill] sm:$0xff] }
 0x42d   :  { %1858 = vmatpush.msrb.mxu3 %v7976_v45  ;;  %2043 = vmatpush.msrb.mxu2 %v5859_v50  ;;  %v8022_v45 = vld [vmem:[#allocation52_spill] sm:$0xff] }
 0x42e   :  { %1898 = vmatpush.msra.mxu1 %v7977_v4  ;;  %2004 = vmatpush.msrb.mxu0 %v7978_v19  ;;  %v8023_v4 = vld [vmem:[#allocation76_spill] sm:$0xff]  ;;  %v8024_v19 = vld [vmem:[#allocation53_spill] sm:$0xff] }
 0x42f   :  { %1859 = vmatpush.msrb.mxu3 %v7979_v3  ;;  %2044 = vmatpush.msrb.mxu2 %v5865_v44  ;;  %v8025_v3 = vld [vmem:[#allocation78_spill] sm:$0xff] }
 0x430   :  { %1899 = vmatpush.msra.mxu1 %v7980_v57  ;;  %2005 = vmatpush.msrb.mxu0 %v7981_v41  ;;  %v8026_v57 = vld [vmem:[#allocation54_spill] sm:$0xff]  ;;  %v8027_v41 = vld [vmem:[#allocation81_spill] sm:$0xff] }
 0x431   :  { %1860 = vmatpush.msrb.mxu3 %v7982_v42  ;;  %2045 = vmatpush.msrb.mxu2 %v5871_v5  ;;  %v8028_v42 = vld [vmem:[#allocation55_spill] sm:$0xff] }
 0x432   :  { %1900 = vmatpush.msra.mxu1 %v7983_v38  ;;  %2006 = vmatpush.msrb.mxu0 %v7984_v59  ;;  %v8029_v38 = vld [vmem:[#allocation85_spill] sm:$0xff]  ;;  %v8030_v59 = vld [vmem:[#allocation56_spill] sm:$0xff] }
 0x433   :  { %1861 = vmatpush.msrb.mxu3 %v7985_v47  ;;  %2046 = vmatpush.msrb.mxu2 %v5877_v40  ;;  %v8031_v47 = vld [vmem:[#allocation57_spill] sm:$0xff] }
 0x434   :  { %1901 = vmatpush.msra.mxu1 %v7986_v0  ;;  %2007 = vmatpush.msrb.mxu0 %v7987_v58  ;;  %v8032_v0 = vld [vmem:[#allocation88_spill] sm:$0xff]  ;;  %v8033_v58 = vld [vmem:[#allocation91_spill] sm:$0xff] }
 0x435   :  { %1862 = vmatpush.msrb.mxu3 %v7988_v61  ;;  %2047 = vmatpush.msrb.mxu2 %v5883_v10  ;;  %v8034_v61 = vld [vmem:[#allocation58_spill] sm:$0xff] }
 0x436   :  { %1902 = vmatpush.msra.mxu1 %v7989_v13  ;;  %2008 = vmatpush.msrb.mxu0 %v7990_v56  ;;  %v8035_v13 = vld [vmem:[#allocation94_spill] sm:$0xff]  ;;  %v8036_v56 = vld [vmem:[#allocation59_spill] sm:$0xff] }
 0x437   :  { %1863 = vmatpush.msrb.mxu3 %v7991_v31  ;;  %2048 = vmatpush.msrb.mxu2 %v5889_v29  ;;  %v8037_v31 = vld [vmem:[#allocation97_spill] sm:$0xff] }
 0x438   :  { %1903 = vmatpush.msra.mxu1 %v7992_v20  ;;  %2009 = vmatpush.msrb.mxu0 %v7993_v53  ;;  %v8038_v20 = vld [vmem:[#allocation60_spill] sm:$0xff] }
 0x439   :  { %1864 = vmatpush.msrb.mxu3 %v7994_v14  ;;  %2049 = vmatpush.msrb.mxu2 %v5895_v28  ;;  %v8039_v53 = vld [vmem:[#allocation100_spill] sm:$0xff]  ;;  %v8040_v14 = vld [vmem:[#allocation61_spill] sm:$0xff] }
 0x43a   :  { %1904 = vmatpush.msra.mxu1 %v7995_v48  ;;  %2010 = vmatpush.msrb.mxu0 %v7996_v23  ;;  %v8041_v48 = vld [vmem:[#allocation105_spill] sm:$0xff]  ;;  %v8042_v23 = vld [vmem:[#allocation62_spill] sm:$0xff] }
 0x43b   :  { %1865 = vmatpush.msrb.mxu3 %v7997_v36  ;;  %2050 = vmatpush.msrb.mxu2 %v5901_v12  ;;  %v8043_v36 = vld [vmem:[#allocation106_spill] sm:$0xff] }
 0x43c   :  { %1905 = vmatpush.msra.mxu1 %v7998_v26  ;;  %2011 = vmatpush.msrb.mxu0 %v7999_v33  ;;  %v8044_v26 = vld [vmem:[#allocation63_spill] sm:$0xff] }
 0x43d   :  { %1866 = vmatpush.msrb.mxu3 %v8000_v32  ;;  %2051 = vmatpush.msrb.mxu2 %v5907_v60  ;;  %v8045_v33 = vld [vmem:[#allocation107_spill] sm:$0xff]  ;;  %v8046_v32 = vld [vmem:[#allocation65_spill] sm:$0xff] }
 0x43e   :  { %1906 = vmatpush.msra.mxu1 %v8001_v35  ;;  %2012 = vmatpush.msrb.mxu0 %v8002_v22  ;;  %v8047_v35 = vld [vmem:[#allocation108_spill] sm:$0xff]  ;;  %v8048_v22 = vld [vmem:[#allocation67_spill] sm:$0xff] }
 0x43f   :  { %1867 = vmatpush.msrb.mxu3 %v8003_v46  ;;  %2052 = vmatpush.msrb.mxu2 %v5913_v25  ;;  %v8049_v46 = vld [vmem:[#allocation109_spill] sm:$0xff] }
 0x440   :  { %1907 = vmatpush.msra.mxu1 %v8004_v6  ;;  %1868 = vmatmul.f32.vlgmr.msrb.gmra.mxu3 %v5824_v9  ;;  %v8050_v6 = vld [vmem:[#allocation69_spill] sm:$0xff] }
 0x441   :  { %1908 = vmatmul.f32.vlgmr.msra.gmra.mxu1 %v5824_v9  ;;  %1979 = vmatpush.msra.mxu3 %v8005_v30  ;;  %v8051_v30 = vld [vmem:[#allocation110_spill] sm:$0xff] }
 0x442   :  { %2019 = vmatpush.msrb.mxu1 %v8006_v62  ;;  %2013 = vmatpush.msrb.mxu0 %v8007_v54  ;;  %v8052_v62 = vld [vmem:[#allocation71_spill] sm:$0xff]  ;;  %v8053_v54 = vld [vmem:[#allocation113_spill] sm:$0xff] }
 0x443   :  { %1980 = vmatpush.msra.mxu3 %v8008_v16  ;;  %2053 = vmatpush.msrb.mxu2 %v5923_v37  ;;  %v8054_v16 = vld [vmem:[#allocation73_spill] sm:$0xff] }
 0x444   :  { %2020 = vmatpush.msrb.mxu1 %v8009_v34  ;;  %2014 = vmatpush.msrb.mxu0 %v8010_v51  ;;  %v8055_v34 = vld [vmem:[#allocation114_spill] sm:$0xff]  ;;  %v8056_v51 = vld [vmem:[#allocation75_spill] sm:$0xff] }
 0x445   :  { %1981 = vmatpush.msra.mxu3 %v8011_v1  ;;  %2054 = vmatpush.msrb.mxu2 %v5931_v24  ;;  %v8057_v1 = vld [vmem:[#allocation116_spill] sm:$0xff] }
 0x446   :  { %2079 = vmatpush.msra.mxu0 %v8012_v11  ;;  %2021 = vmatpush.msrb.mxu1 %v8013_v8  ;;  %v5978_v11 = vld [vmem:[#allocation7 + $0x18] sm:$0xff] }
 0x447   :  { %1982 = vmatpush.msra.mxu3 %v8014_v15  ;;  %v8058_v8 = vld [vmem:[#allocation77_spill] sm:$0xff]  ;;  %v8059_v15 = vld [vmem:[#allocation119_spill] sm:$0xff] }
 0x448   :  { %2080 = vmatpush.msra.mxu0 %v8015_v63  ;;  %2022 = vmatpush.msrb.mxu1 %v8016_v49  ;;  %v8060_v63 = vld [vmem:[#allocation79_spill] sm:$0xff]  ;;  %v8061_v49 = vld [vmem:[#allocation120_spill] sm:$0xff] }
 0x449   :  { %1983 = vmatpush.msra.mxu3 %v8017_v18  ;;  %v8062_v18 = vld [vmem:[#allocation82_spill] sm:$0xff] }
 0x44a   :  { %2081 = vmatpush.msra.mxu0 %v8018_v2  ;;  %2023 = vmatpush.msrb.mxu1 %v8019_v52  ;;  %v8063_v2 = vld [vmem:[#allocation121_spill] sm:$0xff]  ;;  %v8064_v52 = vld [vmem:[#allocation103_spill] sm:$0xff] }
 0x44b   :  { %1984 = vmatpush.msra.mxu3 %v8020_v17  ;;  %v8065_v17 = vld [vmem:[#allocation122_spill] sm:$0xff] }
 0x44c   :  { %2082 = vmatpush.msra.mxu0 %v8021_v7  ;;  %2024 = vmatpush.msrb.mxu1 %v8022_v45  ;;  %v8066_v7 = vld [vmem:[#allocation123_spill] sm:$0xff]  ;;  %v8067_v45 = vld [vmem:[#allocation124_spill] sm:$0xff] }
 0x44d   :  { %1985 = vmatpush.msra.mxu3 %v8023_v4  ;;  %v8068_v4 = vld [vmem:[#allocation125_spill] sm:$0xff] }
 0x44e   :  { %2083 = vmatpush.msra.mxu0 %v8024_v19  ;;  %2025 = vmatpush.msrb.mxu1 %v8025_v3  ;;  %v8069_v19 = vld [vmem:[#allocation126_spill] sm:$0xff]  ;;  %v8070_v3 = vld [vmem:[#allocation127_spill] sm:$0xff] }
 0x44f   :  { %1986 = vmatpush.msra.mxu3 %v8026_v57  ;;  %v8071_v57 = vld [vmem:[#allocation128_spill] sm:$0xff] }
 0x450   :  { %2084 = vmatpush.msra.mxu0 %v8027_v41  ;;  %2026 = vmatpush.msrb.mxu1 %v8028_v42  ;;  %v8072_v41 = vld [vmem:[#allocation129_spill] sm:$0xff]  ;;  %v8073_v42 = vld [vmem:[#allocation130_spill] sm:$0xff] }
 0x451   :  { %1987 = vmatpush.msra.mxu3 %v8029_v38  ;;  %v8074_v38 = vld [vmem:[#allocation131_spill] sm:$0xff] }
 0x452   :  { %2085 = vmatpush.msra.mxu0 %v8030_v59  ;;  %2027 = vmatpush.msrb.mxu1 %v8031_v47  ;;  %v8075_v59 = vld [vmem:[#allocation132_spill] sm:$0xff]  ;;  %v8076_v47 = vld [vmem:[#allocation133_spill] sm:$0xff] }
 0x453   :  { %1988 = vmatpush.msra.mxu3 %v8032_v0  ;;  %v8077_v0 = vld [vmem:[#allocation134_spill] sm:$0xff] }
 0x454   :  { %2086 = vmatpush.msra.mxu0 %v8033_v58  ;;  %2028 = vmatpush.msrb.mxu1 %v8034_v61  ;;  %v8078_v58 = vld [vmem:[#allocation135_spill] sm:$0xff]  ;;  %v8079_v61 = vld [vmem:[#allocation136_spill] sm:$0xff] }
 0x455   :  { %1989 = vmatpush.msra.mxu3 %v8035_v13  ;;  %v8080_v13 = vld [vmem:[#allocation137_spill] sm:$0xff] }
 0x456   :  { %2087 = vmatpush.msra.mxu0 %v8036_v56  ;;  %2029 = vmatpush.msrb.mxu1 %v8037_v31  ;;  %v8081_v56 = vld [vmem:[#allocation138_spill] sm:$0xff]  ;;  %v8082_v31 = vld [vmem:[#allocation139_spill] sm:$0xff] }
 0x457   :  { %1990 = vmatpush.msra.mxu3 %v8038_v20  ;;  %v8083_v20 = vld [vmem:[#allocation140_spill] sm:$0xff] }
 0x458   :  { %2088 = vmatpush.msra.mxu0 %v8039_v53  ;;  %2030 = vmatpush.msrb.mxu1 %v8040_v14  ;;  %v8084_v53 = vld [vmem:[#allocation141_spill] sm:$0xff]  ;;  %v8085_v14 = vld [vmem:[#allocation142_spill] sm:$0xff] }
 0x459   :  { %1991 = vmatpush.msra.mxu3 %v8041_v48 }
 0x45a   :  { %2089 = vmatpush.msra.mxu0 %v8042_v23  ;;  %2031 = vmatpush.msrb.mxu1 %v8043_v36  ;;  %v8086_v23 = vld [vmem:[#allocation10_spill] sm:$0xff] }
 0x45b   :  { %1992 = vmatpush.msra.mxu3 %v8044_v26 }
 0x45c   :  { %2090 = vmatpush.msra.mxu0 %v8045_v33  ;;  %2032 = vmatpush.msrb.mxu1 %v8046_v32 }
 0x45d   :  { %1993 = vmatpush.msra.mxu3 %v8047_v35 }
 0x45e   :  { %2091 = vmatpush.msra.mxu0 %v8048_v22  ;;  %2033 = vmatpush.msrb.mxu1 %v8049_v46  ;;  %v8087_v46 = vld [vmem:[#allocation84_spill] sm:$0xff] }
 0x45f   :  { %1994 = vmatpush.msra.mxu3 %v8050_v6 }
 0x460   :  { %2092 = vmatpush.msra.mxu0 %v8051_v30  ;;  %2034 = vmatpush.msrb.mxu1 %v8053_v54 }
 0x461   :  { %2059 = vmatpush.msrb.mxu3 %v8052_v62 }
 0x462   :  { %2099 = vmatpush.msra.mxu1 %v8054_v16  ;;  %2093 = vmatpush.msra.mxu0 %v8055_v34 }
 0x463   :  { %2060 = vmatpush.msrb.mxu3 %v8056_v51 }
 0x464   :  { %2100 = vmatpush.msra.mxu1 %v8057_v1  ;;  %2094 = vmatpush.msra.mxu0 %v5978_v11 }
 0x465   :  { %2061 = vmatpush.msrb.mxu3 %v8058_v8 }
 0x466   :  { %2101 = vmatpush.msra.mxu1 %v8059_v15 }
 0x467   :  { %2062 = vmatpush.msrb.mxu3 %v8060_v63  ;;  %v8088_v63 = vld [vmem:[#allocation104_spill] sm:$0xff] }
 0x468   :  { %2102 = vmatpush.msra.mxu1 %v8061_v49 }
 0x469   :  { %2063 = vmatpush.msrb.mxu3 %v8062_v18  ;;  %v1850_v18 = vld [vmem:[#allocation3 + $0x80] sm:$0xff] }
 0x46a   :  { %2103 = vmatpush.msra.mxu1 %v8063_v2 }
 0x46b   :  { %2064 = vmatpush.msrb.mxu3 %v8064_v52 }
 0x46c   :  { %2104 = vmatpush.msra.mxu1 %v8065_v17 }
 0x46d   :  { %2065 = vmatpush.msrb.mxu3 %v8066_v7 }
 0x46e   :  { %2105 = vmatpush.msra.mxu1 %v8067_v45 }
 0x46f   :  { %2066 = vmatpush.msrb.mxu3 %v8068_v4 }
 0x470   :  { %2106 = vmatpush.msra.mxu1 %v8069_v19 }
 0x471   :  { %2067 = vmatpush.msrb.mxu3 %v8070_v3 }
 0x472   :  { %2107 = vmatpush.msra.mxu1 %v8071_v57 }
 0x473   :  { %2068 = vmatpush.msrb.mxu3 %v8072_v41 }
 0x474   :  { %2108 = vmatpush.msra.mxu1 %v8073_v42  ;;  %v8089_v42 = vld [vmem:[#allocation15_spill] sm:$0xff] }
 0x475   :  { %2069 = vmatpush.msrb.mxu3 %v8074_v38 }
 0x476   :  { %2109 = vmatpush.msra.mxu1 %v8075_v59 }
 0x477   :  { %2070 = vmatpush.msrb.mxu3 %v8076_v47 }
 0x478   :  { %2110 = vmatpush.msra.mxu1 %v8077_v0 }
 0x479   :  { %2071 = vmatpush.msrb.mxu3 %v8078_v58 }
 0x47a   :  { %2111 = vmatpush.msra.mxu1 %v8079_v61  ;;  %v8090_v61 = vld [vmem:[#allocation11_spill] sm:$0xff] }
 0x47b   :  { %2072 = vmatpush.msrb.mxu3 %v8080_v13 }
 0x47c   :  { %2112 = vmatpush.msra.mxu1 %v8081_v56  ;;  %v1680_v33 = vpop.f32.mrf.mxu0 }
 0x47d   :  { %2073 = vmatpush.msrb.mxu3 %v8082_v31 }
 0x47e   :  { %2113 = vmatpush.msra.mxu1 %v8083_v20 }
 0x47f   :  { %2074 = vmatpush.msrb.mxu3 %v8084_v53 }
 0x480   :  { %2114 = vmatpush.msra.mxu1 %v8085_v14 }
 0x482   :  { %v1720_v26 = vpop.f32.mrf.mxu2 }
 0x484   :  { %v1760_v16 = vpop.f32.mrf.mxu0 }
 0x48a   :  { %v1800_v56 = vpop.f32.mrf.mxu2 }
 0x49d   :  { %v1700_v48 = vpop.f32.mrf.mxu1 }
 0x49e   :  { %v1701_v36 = vadd.f32 %v1700_v48, %v8086_v23  ;;  %v1889_v8 = vpop.f32.mrf.mxu0 }
 0x49f   :  { %v1890_v49 = vadd.f32 %v1889_v8, %v8088_v63 }
 0x4a0   :  { %v1721_v32 = vadd.f32 %v1720_v26, %v1701_v36  ;;  %v1849_v36 = vld [vmem:[#allocation3 + $0x78] sm:$0xff] }
 0x4a1   :  { %v1932_v17 = vadd.f32 %v1890_v49, %v1850_v18 }
 0x4a2   :  { %v2863_v35 = vmul.f32 -1.442695, %v1721_v32 }
 0x4a3   :  { %v1660_v22 = vpop.f32.mrf.mxu3  ;;  %v2865_v57 = vmul.f32 -1.442695, %v1932_v17 }
 0x4a4   :  { %2975 = vpow2.f32 %v2863_v35  ;;  %v1661_v6 = vadd.f32 %v1660_v22, %v8087_v46 }
 0x4a6   :  { %v1681_v30 = vadd.f32 %v1680_v33, %v1661_v6  ;;  %v1780_v4 = vpop.f32.mrf.mxu1 }
 0x4a7   :  { %v1781_v38 = vadd.f32 %v1780_v4, %v8089_v42  ;;  %v6025_v4 = vld [vmem:[#allocation5 + $0x170] sm:$0xff] }
 0x4a8   :  { %v2862_v62 = vmul.f32 -1.442695, %v1681_v30 }
 0x4a9   :  { %v1801_v20 = vadd.f32 %v1800_v56, %v1781_v38  ;;  %v6042_v38 = vld [vmem:[#allocation7 + $0x1a0] sm:$0xff] }
 0x4aa   :  { %v2976_v54 = vpop.eup %2975  ;;  %2977 = vpow2.f32 %v2862_v62 }
 0x4ab   :  { %v1825_v34 = vadd.f32 1.0, %v2976_v54  ;;  %v1740_v19 = vpop.f32.mrf.mxu3 }
 0x4ac   :  { %v1741_v13 = vadd.f32 %v1740_v19, %v8090_v61  ;;  %v6028_v19 = vld [vmem:[#allocation7 + $0x1e0] sm:$0xff] }
 0x4ad   :  { %2979 = vrcp.f32 %v1825_v34  ;;  %v1837_v33 = vand.u32 2147483648, %v1825_v34  ;;  %vm1831_vm13 = vweird.f32 %v1825_v34  ;;  %v1835_v6 = vand.u32 2147483647, %v1825_v34 }
 0x4ae   :  { %v1761_v35 = vadd.f32 %v1760_v16, %v1741_v13 }
 0x4af   :  { %vm1836_vm15 = vcmp.eq.f32.partialorder %v1835_v6, 8.507059e+37  ;;  %v6069_v6 = vld [vmem:[#allocation7 + $0x120] sm:$0xff] }
 0x4b0   :  { %v2978_v51 = vpop.eup %2977 }
 0x4b1   :  { %v1806_v1 = vadd.f32 1.0, %v2978_v51 }
 0x4b3   :  { %2981 = vrcp.f32 %v1806_v1  ;;  %v2980_v15 = vpop.eup %2979  ;;  %v1818_v41 = vand.u32 2147483648, %v1806_v1  ;;  %v1816_v47 = vand.u32 2147483647, %v1806_v1  ;;  %vm1812_vm9 = vweird.f32 %v1806_v1 }
 0x4b4   :  { %v1827_v2 = vmul.f32 %v2980_v15, %v1825_v34  ;;  %2983 = vpow2.f32 %v2865_v57  ;;  %vm1832_vm12 = vweird.f32 %v2980_v15 }
 0x4b5   :  { %v1819_v31 = vor.u32 1.1754944e-38, %v1818_v41  ;;  %vm1817_vm11 = vcmp.eq.f32.partialorder %v1816_v47, 8.507059e+37  ;;  %vm1833_vm14 = vmor %vm1831_vm13, %vm1832_vm12  ;;  %v6039_v41 = vld [vmem:[#allocation5 + $0x140] sm:$0xff] }
 0x4b6   :  { %v1828_v45 = vsub.f32 1.0, %v1827_v2 }
 0x4b8   :  { %v1829_v0 = vmul.f32 %v2980_v15, %v1828_v45 }
 0x4b9   :  { %v2982_v52 = vpop.eup %2981 }
 0x4ba   :  { %v1808_v7 = vmul.f32 %v2982_v52, %v1806_v1  ;;  %vm1813_vm8 = vweird.f32 %v2982_v52  ;;  %v1830_v48 = vadd.f32 %v2980_v15, %v1829_v0  ;;  %v2984_v54 = vpop.eup %2983  ;;  %v1838_v1 = vor.u32 1.1754944e-38, %v1837_v33  ;;  %v6045_v0 = vld [vmem:[#allocation5 + $0x128] sm:$0xff] }
 0x4bb   :  { %vm1814_vm10 = vmor %vm1812_vm9, %vm1813_vm8  ;;  %v6015_v49 = vadd.f32 1.0, %v2984_v54 }
 0x4bc   :  { %v1809_v3 = vsub.f32 1.0, %v1808_v7  ;;  %v1834_v51 = vsel %vm1833_vm14, %v2980_v15, %v1830_v48 }
 0x4bd   :  { %v1839_v18 = vsel %vm1836_vm15, %v1838_v1, %v1834_v51  ;;  %v6073_v51 = vld [vmem:[#allocation5 + $0xc8] sm:$0xff]  ;;  %v6076_v1 = vld [vmem:[#allocation7 + $0x100] sm:$0xff]  ;;  %vm1942_vm5 = vweird.f32 %v6015_v49 }
 0x4be   :  { %v1810_v59 = vmul.f32 %v2982_v52, %v1809_v3  ;;  %v1844_v2 = vsub.f32 1.0, %v1839_v18  ;;  %v1846_v34 = vmul.f32 %v1839_v18, %v5782_v55  ;;  %v6031_v55 = vld [vmem:[#allocation5 + $0x158] sm:$0xff]  ;;  %v6034_v3 = vld [vmem:[#allocation7 + $0x1c0] sm:$0xff]  ;;  %v1851_v18 = vld [vmem:[#allocation3 + $0x88] sm:$0xff] }
 0x4c0   :  { %v1811_v58 = vadd.f32 %v2982_v52, %v1810_v59 }
 0x4c2   :  { %v1815_v53 = vsel %vm1814_vm10, %v2982_v52, %v1811_v58  ;;  %v6048_v58 = vld [vmem:[#allocation7 + $0x180] sm:$0xff] }
 0x4c3   :  { %v1820_v14 = vsel %vm1817_vm11, %v1819_v31, %v1815_v53  ;;  %v1869_v26 = vpop.f32.mrf.mxu3  ;;  %v6053_v31 = vld [vmem:[#allocation5 + $0x110] sm:$0xff] }
 0x4c4   :  { %v1841_v32 = vmul.f32 %v1820_v14, %v1801_v20  ;;  %v1870_v22 = vadd.f32 %v1869_v26, %v7569_v39  ;;  %v6056_v20 = vld [vmem:[#allocation7 + $0x160] sm:$0xff] }
 0x4c5   :  { %v6062_v26 = vld [vmem:[#allocation7 + $0x140] sm:$0xff] }
 0x4c6   :  { %v1842_v30 = vadd.f32 %v1841_v32, %v1761_v35  ;;  %v1912_v62 = vadd.f32 %v1870_v22, %v1849_v36  ;;  %v6059_v36 = vld [vmem:[#allocation5 + $0xf8] sm:$0xff]  ;;  %v1909_v32 = vpop.f32.mrf.mxu1  ;;  %v6066_v22 = vld [vmem:[#allocation5 + $0xe0] sm:$0xff] }
 0x4c8   :  { %2985 = vtanh.f32 %v1842_v30  ;;  %v2864_v8 = vmul.f32 -1.442695, %v1912_v62  ;;  %v1910_v62 = vadd.f32 %v1909_v32, %v4281_v43  ;;  %v6112_v32 = vld [vmem:[#allocation7 + $0x60] sm:$0xff] }
 0x4ca   :  { %2987 = vpow2.f32 %v2864_v8 }
 0x4cb   :  { %2989 = vrcp.f32 %v6015_v49 }
 0x4ce   :  { %v2986_v52 = vpop.eup %2985 }
 0x4cf   :  { %v1845_v16 = vmul.f32 %v2986_v52, %v1844_v2  ;;  %v1948_v52 = vand.u32 2147483648, %v6015_v49 }
 0x4d0   :  { %v2988_v17 = vpop.eup %2987 }
 0x4d1   :  { %v1916_v7 = vadd.f32 1.0, %v2988_v17  ;;  %v6019_v45 = vadd.f32 %v1846_v34, %v1845_v16  ;;  %v6023_v15 = vpop.eup %2989  ;;  %v6082_v34 = vld [vmem:[#allocation5 + $0xb0] sm:$0xff]  ;;  %v6085_v17 = vld [vmem:[#allocation7 + $0xe0] sm:$0xff] }
 0x4d2   :  { %v1938_v57 = vmul.f32 %v6023_v15, %v6015_v49  ;;  %vm1943_vm4 = vweird.f32 %v6023_v15 }
 0x4d3   :  { %2991 = vrcp.f32 %v1916_v7  ;;  %1995 = vmatmul.f32.vlgmr.msra.gmra.mxu3 %v6019_v45  ;;  %2035 = vmatmul.f32.vlgmr.msrb.gmra.mxu1 %v6019_v45  ;;  %v1928_v53 = vand.u32 2147483648, %v1916_v7  ;;  %v1926_v48 = vand.u32 2147483647, %v1916_v7  ;;  %vm1922_vm1 = vweird.f32 %v1916_v7  ;;  %vm1944_vm6 = vmor %vm1942_vm5, %vm1943_vm4 }
 0x4d4   :  { %2188 = vmatpush.msra.mxu3 %v6025_v4  ;;  %2275 = vmatpush.msrb.mxu1 %v6028_v19  ;;  %v1939_v13 = vsub.f32 1.0, %v1938_v57 }
 0x4d5   :  { %v1929_v30 = vor.u32 1.1754944e-38, %v1928_v53  ;;  %vm1927_vm3 = vcmp.eq.f32.partialorder %v1926_v48, 8.507059e+37  ;;  %v6097_v53 = vld [vmem:[#allocation5 + $0x80] sm:$0xff]  ;;  %v6103_v48 = vld [vmem:[#allocation5 + $0x68] sm:$0xff] }
 0x4d6   :  { %2189 = vmatpush.msra.mxu3 %v6031_v55  ;;  %2276 = vmatpush.msrb.mxu1 %v6034_v3  ;;  %v1940_v33 = vmul.f32 %v6023_v15, %v1939_v13 }
 0x4d8   :  { %2190 = vmatpush.msra.mxu3 %v6039_v41  ;;  %2277 = vmatpush.msrb.mxu1 %v6042_v38  ;;  %v1941_v8 = vadd.f32 %v6023_v15, %v1940_v33  ;;  %v6106_v33 = vld [vmem:[#allocation7 + $0x80] sm:$0xff] }
 0x4d9   :  { %v2992_v59 = vpop.eup %2991 }
 0x4da   :  { %v1918_v47 = vmul.f32 %v2992_v59, %v1916_v7  ;;  %2191 = vmatpush.msra.mxu3 %v6045_v0  ;;  %2278 = vmatpush.msrb.mxu1 %v6048_v58  ;;  %vm1923_vm0 = vweird.f32 %v2992_v59  ;;  %v1946_v7 = vand.u32 2147483647, %v6015_v49  ;;  %v1945_v13 = vsel %vm1944_vm6, %v6023_v15, %v1941_v8  ;;  %v6109_v15 = vld [vmem:[#allocation5 + $0x50] sm:$0xff] }
 0x4db   :  { %2075 = vmatmul.f32.vlgmr.msrb.gmra.mxu3 %v6019_v45  ;;  %2115 = vmatmul.f32.vlgmr.msra.gmra.mxu1 %v6019_v45  ;;  %vm1924_vm2 = vmor %vm1922_vm1, %vm1923_vm0 }
 0x4dc   :  { %v1919_v56 = vsub.f32 1.0, %v1918_v47  ;;  %2192 = vmatpush.msra.mxu3 %v6053_v31  ;;  %2279 = vmatpush.msrb.mxu1 %v6056_v20  ;;  %v6093_v47 = vld [vmem:[#allocation7 + $0xc0] sm:$0xff]  ;;  %vm1947_vm7 = vcmp.eq.f32.partialorder %v1946_v7, 8.507059e+37  ;;  %v6130_v7 = vld [vmem:[#allocation5 + $0x8] sm:$0xff] }
 0x4de   :  { %v1920_v14 = vmul.f32 %v2992_v59, %v1919_v56  ;;  %2193 = vmatpush.msra.mxu3 %v6059_v36  ;;  %2280 = vmatpush.msrb.mxu1 %v6062_v26  ;;  %v1949_v56 = vor.u32 1.1754944e-38, %v1948_v52  ;;  %v6125_v52 = vld [vmem:[#allocation7 + $0x20] sm:$0xff] }
 0x4e0   :  { %v1921_v35 = vadd.f32 %v2992_v59, %v1920_v14  ;;  %2194 = vmatpush.msra.mxu3 %v6066_v22  ;;  %2281 = vmatpush.msrb.mxu1 %v6069_v6  ;;  %v6100_v14 = vld [vmem:[#allocation7 + $0xa0] sm:$0xff]  ;;  %v1950_v49 = vsel %vm1947_vm7, %v1949_v56, %v1945_v13  ;;  %v6142_v13 = vld [vmem:[#allocation5 + $0x178] sm:$0xff]  ;;  %v6145_v56 = vld [vmem:[#allocation7 + $0x1e8] sm:$0xff] }
 0x4e1   :  { %v1957_v8 = vmul.f32 %v1950_v49, %v5824_v9  ;;  %v6138_v9 = vld [vmem:[#allocation5 + $0x168] sm:$0xff]  ;;  %8091 = vst [vmem:[#allocation17_spill] sm:$0xff] %v6142_v13 }
 0x4e2   :  { %v1925_v54 = vsel %vm1924_vm2, %v2992_v59, %v1921_v35  ;;  %2195 = vmatpush.msra.mxu3 %v6073_v51  ;;  %2282 = vmatpush.msrb.mxu1 %v6076_v1  ;;  %v6090_v59 = vld [vmem:[#allocation5 + $0x98] sm:$0xff]  ;;  %v1955_v35 = vsub.f32 1.0, %v1950_v49  ;;  %8092 = vst [vmem:[#allocation80_spill] sm:$0xff] %v6145_v56  ;;  %v6148_v49 = vld [vmem:[#allocation5 + $0x150] sm:$0xff] }
 0x4e3   :  { %v1930_v2 = vsel %vm1927_vm3, %v1929_v30, %v1925_v54  ;;  %v6118_v54 = vld [vmem:[#allocation7 + $0x40] sm:$0xff]  ;;  %8093 = vst [vmem:[#allocation12_spill] sm:$0xff] %v6148_v49 }
 0x4e4   :  { %v1952_v16 = vmul.f32 %v1930_v2, %v1910_v62  ;;  %2196 = vmatpush.msra.mxu3 %v6082_v34  ;;  %2283 = vmatpush.msrb.mxu1 %v6085_v17  ;;  %v6115_v62 = vld [vmem:[#allocation5 + $0x38] sm:$0xff]  ;;  %v6122_v2 = vld [vmem:[#allocation5 + $0x20] sm:$0xff] }
 0x4e6   :  { %v1953_v57 = vadd.f32 %v1952_v16, %v1851_v18  ;;  %2197 = vmatpush.msra.mxu3 %v6090_v59  ;;  %2284 = vmatpush.msrb.mxu1 %v6093_v47 }
 0x4e8   :  { %2993 = vtanh.f32 %v1953_v57  ;;  %2198 = vmatpush.msra.mxu3 %v6097_v53  ;;  %2285 = vmatpush.msrb.mxu1 %v6100_v14  ;;  %v6133_v57 = vld [vmem:[#allocation7] sm:$0xff] }
 0x4ea   :  { %2199 = vmatpush.msra.mxu3 %v6103_v48  ;;  %2286 = vmatpush.msrb.mxu1 %v6106_v33 }
 0x4ec   :  { %2200 = vmatpush.msra.mxu3 %v6109_v15  ;;  %2287 = vmatpush.msrb.mxu1 %v6112_v32 }
 0x4ee   :  { %v2994_v30 = vpop.eup %2993  ;;  %2201 = vmatpush.msra.mxu3 %v6115_v62  ;;  %2288 = vmatpush.msrb.mxu1 %v6118_v54 }
 0x4ef   :  { %v1956_v18 = vmul.f32 %v2994_v30, %v1955_v35  ;;  %v6151_v35 = vld [vmem:[#allocation7 + $0x1f0] sm:$0xff]  ;;  %v6154_v30 = vld [vmem:[#allocation5 + $0x160] sm:$0xff] }
 0x4f0   :  { %2202 = vmatpush.msra.mxu3 %v6122_v2  ;;  %2289 = vmatpush.msrb.mxu1 %v6125_v52  ;;  %8094 = vst [vmem:[#allocation83_spill] sm:$0xff] %v6151_v35 }
 0x4f1   :  { %v6128_v16 = vadd.f32 %v1957_v8, %v1956_v18  ;;  %8095 = vst [vmem:[#allocation19_spill] sm:$0xff] %v6154_v30  ;;  %v6157_v8 = vld [vmem:[#allocation7 + $0x1c8] sm:$0xff]  ;;  %v6160_v18 = vld [vmem:[#allocation5 + $0x138] sm:$0xff] }
 0x4f2   :  { %2203 = vmatpush.msra.mxu3 %v6130_v7  ;;  %2290 = vmatpush.msrb.mxu1 %v6133_v57  ;;  %8096 = vst [vmem:[#allocation87_spill] sm:$0xff] %v6157_v8 }
 0x4f3   :  { %1975 = vmatmul.f32.vlgmr.msra.gmra.mxu2 %v6128_v16  ;;  %2015 = vmatmul.f32.vlgmr.msrb.gmra.mxu0 %v6128_v16  ;;  %8097 = vst [vmem:[#allocation13_spill] sm:$0xff] %v6160_v18 }
 0x4f4   :  { %2168 = vmatpush.msra.mxu2 %v6138_v9  ;;  %2204 = vmatmul.f32.vlgmr.msra.gmra.mxu3 %v6128_v16 }
 0x4f5   :  { %2208 = vmatpush.msrb.mxu0 %v6142_v13  ;;  %2315 = vmatpush.msrb.mxu3 %v6145_v56  ;;  %v6163_v56 = vld [vmem:[#allocation7 + $0x1d0] sm:$0xff] }
 0x4f6   :  { %2169 = vmatpush.msra.mxu2 %v6148_v49  ;;  %2355 = vmatpush.msra.mxu1 %v6151_v35  ;;  %8098 = vst [vmem:[#allocation86_spill] sm:$0xff] %v6163_v56  ;;  %v6166_v49 = vld [vmem:[#allocation5 + $0x148] sm:$0xff] }
 0x4f7   :  { %2209 = vmatpush.msrb.mxu0 %v6154_v30  ;;  %2316 = vmatpush.msrb.mxu3 %v6157_v8  ;;  %8099 = vst [vmem:[#allocation21_spill] sm:$0xff] %v6166_v49  ;;  %v6169_v35 = vld [vmem:[#allocation7 + $0x1a8] sm:$0xff]  ;;  %v6172_v30 = vld [vmem:[#allocation5 + $0x120] sm:$0xff]  ;;  %v6176_v8 = vld [vmem:[#allocation5 + $0x130] sm:$0xff] }
 0x4f8   :  { %2170 = vmatpush.msra.mxu2 %v6160_v18  ;;  %2356 = vmatpush.msra.mxu1 %v6163_v56  ;;  %8100 = vst [vmem:[#allocation90_spill] sm:$0xff] %v6169_v35  ;;  %v6181_v56 = vld [vmem:[#allocation5 + $0x108] sm:$0xff]  ;;  %v2165_v18 = vld [vmem:[#allocation3 + $0x90] sm:$0xff] }
 0x4f9   :  { %2210 = vmatpush.msrb.mxu0 %v6166_v49  ;;  %2317 = vmatpush.msrb.mxu3 %v6169_v35  ;;  %8101 = vst [vmem:[#allocation14_spill] sm:$0xff] %v6172_v30  ;;  %v6184_v49 = vld [vmem:[#allocation5 + $0x118] sm:$0xff]  ;;  %v6187_v35 = vld [vmem:[#allocation7 + $0x188] sm:$0xff] }
 0x4fa   :  { %2171 = vmatpush.msra.mxu2 %v6172_v30  ;;  %2357 = vmatpush.msra.mxu1 %v5843_v21  ;;  %8102 = vst [vmem:[#allocation89_spill] sm:$0xff] %v6176_v8  ;;  %v6190_v21 = vld [vmem:[#allocation5 + $0xf0] sm:$0xff]  ;;  %v6197_v30 = vld [vmem:[#allocation7 + $0x168] sm:$0xff] }
 0x4fb   :  { %2211 = vmatpush.msrb.mxu0 %v6176_v8  ;;  %2055 = vmatmul.f32.vlgmr.msrb.gmra.mxu2 %v6128_v16  ;;  %8103 = vst [vmem:[#allocation23_spill] sm:$0xff] %v6181_v56  ;;  %v6194_v8 = vld [vmem:[#allocation5 + $0x100] sm:$0xff] }
 0x4fc   :  { %2095 = vmatmul.f32.vlgmr.msra.gmra.mxu0 %v6128_v16  ;;  %2172 = vmatpush.msra.mxu2 %v6181_v56  ;;  %8104 = vst [vmem:[#allocation93_spill] sm:$0xff] %v6184_v49  ;;  %v6200_v56 = vld [vmem:[#allocation5 + $0xd8] sm:$0xff] }
 0x4fd   :  { %2212 = vmatpush.msrb.mxu0 %v6184_v49  ;;  %8105 = vst [vmem:[#allocation16_spill] sm:$0xff] %v6187_v35  ;;  %2318 = vmatpush.msrb.mxu3 %v6187_v35  ;;  %v6204_v35 = vld [vmem:[#allocation5 + $0xe8] sm:$0xff] }
 0x4fe   :  { %8106 = vst [vmem:[#allocation92_spill] sm:$0xff] %v6190_v21  ;;  %2173 = vmatpush.msra.mxu2 %v6190_v21  ;;  %2358 = vmatpush.msra.mxu1 %v5853_v27  ;;  %v6207_v21 = vld [vmem:[#allocation7 + $0x148] sm:$0xff]  ;;  %v6210_v27 = vld [vmem:[#allocation5 + $0xc0] sm:$0xff] }
 0x4ff   :  { %8107 = vst [vmem:[#allocation25_spill] sm:$0xff] %v6194_v8  ;;  %2213 = vmatpush.msrb.mxu0 %v6194_v8  ;;  %2319 = vmatpush.msrb.mxu3 %v6197_v30 }
 0x500   :  { %8108 = vst [vmem:[#allocation96_spill] sm:$0xff] %v6197_v30  ;;  %2174 = vmatpush.msra.mxu2 %v6200_v56  ;;  %2359 = vmatpush.msra.mxu1 %v5859_v50  ;;  %v6214_v30 = vld [vmem:[#allocation5 + $0xd0] sm:$0xff]  ;;  %v6220_v50 = vld [vmem:[#allocation5 + $0xa8] sm:$0xff] }
 0x501   :  { %8109 = vst [vmem:[#allocation18_spill] sm:$0xff] %v6200_v56  ;;  %2214 = vmatpush.msrb.mxu0 %v6204_v35  ;;  %2320 = vmatpush.msrb.mxu3 %v6207_v21  ;;  %v6217_v56 = vld [vmem:[#allocation7 + $0x128] sm:$0xff] }
 0x502   :  { %8110 = vst [vmem:[#allocation95_spill] sm:$0xff] %v6204_v35  ;;  %2175 = vmatpush.msra.mxu2 %v6210_v27  ;;  %2360 = vmatpush.msra.mxu1 %v5865_v44  ;;  %v6230_v44 = vld [vmem:[#allocation5 + $0x90] sm:$0xff] }
 0x503   :  { %8111 = vst [vmem:[#allocation27_spill] sm:$0xff] %v6207_v21  ;;  %2215 = vmatpush.msrb.mxu0 %v6214_v30  ;;  %2321 = vmatpush.msrb.mxu3 %v6217_v56  ;;  %v6224_v21 = vld [vmem:[#allocation5 + $0xb8] sm:$0xff] }
 0x504   :  { %8112 = vst [vmem:[#allocation99_spill] sm:$0xff] %v6210_v27  ;;  %2176 = vmatpush.msra.mxu2 %v6220_v50  ;;  %2361 = vmatpush.msra.mxu1 %v5871_v5  ;;  %v6227_v27 = vld [vmem:[#allocation7 + $0x108] sm:$0xff]  ;;  %v6240_v5 = vld [vmem:[#allocation5 + $0x78] sm:$0xff] }
 0x505   :  { %8113 = vst [vmem:[#allocation20_spill] sm:$0xff] %v6214_v30  ;;  %2216 = vmatpush.msrb.mxu0 %v6224_v21  ;;  %2322 = vmatpush.msrb.mxu3 %v6227_v27 }
 0x506   :  { %8114 = vst [vmem:[#allocation98_spill] sm:$0xff] %v6217_v56  ;;  %2177 = vmatpush.msra.mxu2 %v6230_v44  ;;  %2362 = vmatpush.msra.mxu1 %v5877_v40  ;;  %v6234_v56 = vld [vmem:[#allocation5 + $0xa0] sm:$0xff] }
 0x507   :  { %8115 = vst [vmem:[#allocation29_spill] sm:$0xff] %v6220_v50  ;;  %2217 = vmatpush.msrb.mxu0 %v6234_v56  ;;  %v6237_v50 = vld [vmem:[#allocation7 + $0xe8] sm:$0xff]  ;;  %v6250_v40 = vld [vmem:[#allocation5 + $0x60] sm:$0xff] }
 0x508   :  { %8116 = vst [vmem:[#allocation102_spill] sm:$0xff] %v6224_v21  ;;  %2323 = vmatpush.msrb.mxu3 %v6237_v50  ;;  %2178 = vmatpush.msra.mxu2 %v6240_v5 }
 0x509   :  { %8117 = vst [vmem:[#allocation22_spill] sm:$0xff] %v6227_v27  ;;  %2363 = vmatpush.msra.mxu1 %v5883_v10  ;;  %v6244_v27 = vld [vmem:[#allocation5 + $0x88] sm:$0xff] }
 0x50a   :  { %8118 = vst [vmem:[#allocation101_spill] sm:$0xff] %v6230_v44  ;;  %2218 = vmatpush.msrb.mxu0 %v6244_v27  ;;  %v6247_v44 = vld [vmem:[#allocation7 + $0xc8] sm:$0xff]  ;;  %2179 = vmatpush.msra.mxu2 %v6250_v40 }
 0x50b   :  { %8119 = vst [vmem:[#allocation31_spill] sm:$0xff] %v6234_v56  ;;  %2324 = vmatpush.msrb.mxu3 %v6247_v44  ;;  %2364 = vmatpush.msra.mxu1 %v5889_v29  ;;  %v6260_v10 = vld [vmem:[#allocation5 + $0x48] sm:$0xff]  ;;  %v6270_v29 = vld [vmem:[#allocation5 + $0x30] sm:$0xff] }
 0x50c   :  { %8120 = vst [vmem:[#allocation24_spill] sm:$0xff] %v6237_v50  ;;  %v6254_v50 = vld [vmem:[#allocation5 + $0x70] sm:$0xff]  ;;  %2180 = vmatpush.msra.mxu2 %v6260_v10 }
 0x50d   :  { %8121 = vst [vmem:[#allocation33_spill] sm:$0xff] %v6240_v5  ;;  %2219 = vmatpush.msrb.mxu0 %v6254_v50  ;;  %v6257_v5 = vld [vmem:[#allocation7 + $0xa8] sm:$0xff]  ;;  %2365 = vmatpush.msra.mxu1 %v5895_v28  ;;  %v6280_v28 = vld [vmem:[#allocation5 + $0x18] sm:$0xff] }
 0x50e   :  { %8122 = vst [vmem:[#allocation26_spill] sm:$0xff] %v6244_v27  ;;  %2325 = vmatpush.msrb.mxu3 %v6257_v5  ;;  %2181 = vmatpush.msra.mxu2 %v6270_v29 }
 0x50f   :  { %8123 = vst [vmem:[#allocation35_spill] sm:$0xff] %v6247_v44  ;;  %v6264_v44 = vld [vmem:[#allocation5 + $0x58] sm:$0xff]  ;;  %2366 = vmatpush.msra.mxu1 %v5901_v12  ;;  %v6290_v12 = vld [vmem:[#allocation5] sm:$0xff] }
 0x510   :  { %8124 = vst [vmem:[#allocation28_spill] sm:$0xff] %v6250_v40  ;;  %2220 = vmatpush.msrb.mxu0 %v6264_v44  ;;  %v6267_v40 = vld [vmem:[#allocation7 + $0x88] sm:$0xff]  ;;  %2182 = vmatpush.msra.mxu2 %v6280_v28 }
 0x511   :  { %8125 = vst [vmem:[#allocation37_spill] sm:$0xff] %v6254_v50  ;;  %2326 = vmatpush.msrb.mxu3 %v6267_v40  ;;  %2367 = vmatpush.msra.mxu1 %v5907_v60  ;;  %v6299_v60 = vld [vmem:[#allocation7 + $0x3e0] sm:$0xff] }
 0x512   :  { %8126 = vst [vmem:[#allocation30_spill] sm:$0xff] %v6257_v5  ;;  %v6274_v5 = vld [vmem:[#allocation5 + $0x40] sm:$0xff]  ;;  %2183 = vmatpush.msra.mxu2 %v6290_v12 }
 0x513   :  { %8127 = vst [vmem:[#allocation39_spill] sm:$0xff] %v6260_v10  ;;  %2221 = vmatpush.msrb.mxu0 %v6274_v5  ;;  %v6277_v10 = vld [vmem:[#allocation7 + $0x68] sm:$0xff]  ;;  %2368 = vmatpush.msra.mxu1 %v5913_v25  ;;  %v6308_v25 = vld [vmem:[#allocation7 + $0x3c0] sm:$0xff] }
 0x514   :  { %8128 = vst [vmem:[#allocation32_spill] sm:$0xff] %v6264_v44  ;;  %2327 = vmatpush.msrb.mxu3 %v6277_v10  ;;  %2184 = vmatmul.f32.vlgmr.msra.gmra.mxu2 %v6128_v16 }
 0x515   :  { %8129 = vst [vmem:[#allocation42_spill] sm:$0xff] %v6267_v40  ;;  %v6284_v40 = vld [vmem:[#allocation5 + $0x28] sm:$0xff]  ;;  %2295 = vmatpush.msrb.mxu2 %v6299_v60  ;;  %2369 = vmatpush.msra.mxu1 %v5923_v37  ;;  %v6328_v37 = vld [vmem:[#allocation7 + $0x380] sm:$0xff] }
 0x516   :  { %8130 = vst [vmem:[#allocation34_spill] sm:$0xff] %v6270_v29  ;;  %2222 = vmatpush.msrb.mxu0 %v6284_v40  ;;  %v6287_v29 = vld [vmem:[#allocation7 + $0x48] sm:$0xff] }
 0x517   :  { %8131 = vst [vmem:[#allocation44_spill] sm:$0xff] %v6274_v5  ;;  %2328 = vmatpush.msrb.mxu3 %v6287_v29  ;;  %2296 = vmatpush.msrb.mxu2 %v6308_v25 }
 0x518   :  { %8132 = vst [vmem:[#allocation111_spill] sm:$0xff] %v6277_v10  ;;  %v6294_v10 = vld [vmem:[#allocation5 + $0x10] sm:$0xff]  ;;  %2370 = vmatpush.msra.mxu1 %v5931_v24  ;;  %v6343_v24 = vld [vmem:[#allocation7 + $0x368] sm:$0xff] }
 0x519   :  { %8133 = vst [vmem:[#allocation36_spill] sm:$0xff] %v6280_v28  ;;  %2223 = vmatpush.msrb.mxu0 %v6294_v10 }
 0x51a   :  { %8134 = vst [vmem:[#allocation112_spill] sm:$0xff] %v6284_v40  ;;  %2224 = vmatmul.f32.vlgmr.msrb.gmra.mxu0 %v6128_v16  ;;  %v6302_v40 = vld [vmem:[#allocation7 + $0x3e8] sm:$0xff] }
 0x51b   :  { %8135 = vst [vmem:[#allocation46_spill] sm:$0xff] %v6287_v29  ;;  %2335 = vmatpush.msra.mxu0 %v6302_v40  ;;  %v6305_v29 = vld [vmem:[#allocation7 + $0x28] sm:$0xff] }
 0x51c   :  { %8136 = vst [vmem:[#allocation38_spill] sm:$0xff] %v6290_v12  ;;  %2329 = vmatpush.msrb.mxu3 %v6305_v29  ;;  %v6315_v12 = vld [vmem:[#allocation7 + $0x8] sm:$0xff] }
 0x51d   :  { %8137 = vst [vmem:[#allocation48_spill] sm:$0xff] %v6294_v10  ;;  %v6312_v10 = vld [vmem:[#allocation7 + $0x3c8] sm:$0xff] }
 0x51e   :  { %8138 = vst [vmem:[#allocation40_spill] sm:$0xff] %v6299_v60  ;;  %2336 = vmatpush.msra.mxu0 %v6312_v10  ;;  %2330 = vmatpush.msrb.mxu3 %v6315_v12  ;;  %v6318_v60 = vld [vmem:[#allocation7 + $0x3a0] sm:$0xff] }
 0x51f   :  { %8139 = vst [vmem:[#allocation115_spill] sm:$0xff] %v6302_v40  ;;  %2297 = vmatpush.msrb.mxu2 %v6318_v60  ;;  %v6321_v40 = vld [vmem:[#allocation7 + $0x1f8] sm:$0xff] }
 0x520   :  { %8140 = vst [vmem:[#allocation50_spill] sm:$0xff] %v6305_v29  ;;  %2395 = vmatpush.msra.mxu3 %v6321_v40  ;;  %v6324_v29 = vld [vmem:[#allocation7 + $0x3a8] sm:$0xff] }
 0x521   :  { %8141 = vst [vmem:[#allocation117_spill] sm:$0xff] %v6308_v25  ;;  %2337 = vmatpush.msra.mxu0 %v6324_v29  ;;  %2298 = vmatpush.msrb.mxu2 %v6328_v37 }
 0x522   :  { %8142 = vst [vmem:[#allocation41_spill] sm:$0xff] %v6312_v10  ;;  %v6331_v10 = vld [vmem:[#allocation7 + $0x1d8] sm:$0xff] }
 0x523   :  { %8143 = vst [vmem:[#allocation118_spill] sm:$0xff] %v6315_v12  ;;  %2396 = vmatpush.msra.mxu3 %v6331_v10  ;;  %v6334_v12 = vld [vmem:[#allocation7 + $0x388] sm:$0xff] }
 0x524   :  { %8144 = vst [vmem:[#allocation64_spill] sm:$0xff] %v6318_v60  ;;  %2338 = vmatpush.msra.mxu0 %v6334_v12  ;;  %v6337_v60 = vld [vmem:[#allocation7 + $0x360] sm:$0xff] }
 0x525   :  { %8145 = vst [vmem:[#allocation43_spill] sm:$0xff] %v6321_v40  ;;  %2299 = vmatpush.msrb.mxu2 %v6337_v60  ;;  %v6340_v40 = vld [vmem:[#allocation7 + $0x1b8] sm:$0xff] }
 0x526   :  { %8146 = vst [vmem:[#allocation66_spill] sm:$0xff] %v6324_v29  ;;  %2397 = vmatpush.msra.mxu3 %v6340_v40  ;;  %2339 = vmatpush.msra.mxu0 %v6343_v24 }
 0x527   :  { %8147 = vst [vmem:[#allocation45_spill] sm:$0xff] %v6328_v37  ;;  %v6346_v37 = vld [vmem:[#allocation7 + $0x340] sm:$0xff] }
 0x528   :  { %8148 = vst [vmem:[#allocation68_spill] sm:$0xff] %v6331_v10  ;;  %2300 = vmatpush.msrb.mxu2 %v6346_v37  ;;  %v6349_v10 = vld [vmem:[#allocation7 + $0x198] sm:$0xff] }
 0x529   :  { %8149 = vst [vmem:[#allocation47_spill] sm:$0xff] %v6334_v12  ;;  %2398 = vmatpush.msra.mxu3 %v6349_v10  ;;  %v6352_v12 = vld [vmem:[#allocation7 + $0x348] sm:$0xff] }
 0x52a   :  { %8150 = vst [vmem:[#allocation70_spill] sm:$0xff] %v6337_v60  ;;  %2340 = vmatpush.msra.mxu0 %v6352_v12  ;;  %v6355_v60 = vld [vmem:[#allocation7 + $0x320] sm:$0xff] }
 0x52b   :  { %8151 = vst [vmem:[#allocation49_spill] sm:$0xff] %v6340_v40  ;;  %2301 = vmatpush.msrb.mxu2 %v6355_v60  ;;  %v6358_v40 = vld [vmem:[#allocation7 + $0x178] sm:$0xff] }
 0x52c   :  { %8152 = vst [vmem:[#allocation72_spill] sm:$0xff] %v6343_v24  ;;  %2399 = vmatpush.msra.mxu3 %v6358_v40  ;;  %v6361_v24 = vld [vmem:[#allocation7 + $0x328] sm:$0xff] }
 0x52d   :  { %8153 = vst [vmem:[#allocation51_spill] sm:$0xff] %v6346_v37  ;;  %2341 = vmatpush.msra.mxu0 %v6361_v24  ;;  %v6364_v37 = vld [vmem:[#allocation7 + $0x300] sm:$0xff] }
 0x52e   :  { %8154 = vst [vmem:[#allocation74_spill] sm:$0xff] %v6349_v10  ;;  %2302 = vmatpush.msrb.mxu2 %v6364_v37  ;;  %v6367_v10 = vld [vmem:[#allocation7 + $0x158] sm:$0xff] }
 0x52f   :  { %8155 = vst [vmem:[#allocation52_spill] sm:$0xff] %v6352_v12  ;;  %2400 = vmatpush.msra.mxu3 %v6367_v10  ;;  %v6370_v12 = vld [vmem:[#allocation7 + $0x308] sm:$0xff] }
 0x530   :  { %8156 = vst [vmem:[#allocation76_spill] sm:$0xff] %v6355_v60  ;;  %2342 = vmatpush.msra.mxu0 %v6370_v12  ;;  %v6373_v60 = vld [vmem:[#allocation7 + $0x2e0] sm:$0xff] }
 0x531   :  { %8157 = vst [vmem:[#allocation53_spill] sm:$0xff] %v6358_v40  ;;  %2303 = vmatpush.msrb.mxu2 %v6373_v60  ;;  %v6376_v40 = vld [vmem:[#allocation7 + $0x138] sm:$0xff] }
 0x532   :  { %8158 = vst [vmem:[#allocation78_spill] sm:$0xff] %v6361_v24  ;;  %2401 = vmatpush.msra.mxu3 %v6376_v40  ;;  %v6379_v24 = vld [vmem:[#allocation7 + $0x2e8] sm:$0xff] }
 0x533   :  { %8159 = vst [vmem:[#allocation54_spill] sm:$0xff] %v6364_v37  ;;  %2343 = vmatpush.msra.mxu0 %v6379_v24  ;;  %v6382_v37 = vld [vmem:[#allocation7 + $0x2c0] sm:$0xff] }
 0x534   :  { %8160 = vst [vmem:[#allocation81_spill] sm:$0xff] %v6367_v10  ;;  %2304 = vmatpush.msrb.mxu2 %v6382_v37  ;;  %v6385_v10 = vld [vmem:[#allocation7 + $0x118] sm:$0xff] }
 0x535   :  { %8161 = vst [vmem:[#allocation55_spill] sm:$0xff] %v6370_v12  ;;  %2402 = vmatpush.msra.mxu3 %v6385_v10  ;;  %v6388_v12 = vld [vmem:[#allocation7 + $0x2c8] sm:$0xff] }
 0x536   :  { %8162 = vst [vmem:[#allocation85_spill] sm:$0xff] %v6373_v60  ;;  %2344 = vmatpush.msra.mxu0 %v6388_v12  ;;  %v6391_v60 = vld [vmem:[#allocation7 + $0x2a0] sm:$0xff] }
 0x537   :  { %8163 = vst [vmem:[#allocation56_spill] sm:$0xff] %v6376_v40  ;;  %2305 = vmatpush.msrb.mxu2 %v6391_v60  ;;  %v6394_v40 = vld [vmem:[#allocation7 + $0xf8] sm:$0xff] }
 0x538   :  { %8164 = vst [vmem:[#allocation57_spill] sm:$0xff] %v6379_v24  ;;  %2403 = vmatpush.msra.mxu3 %v6394_v40  ;;  %v6397_v24 = vld [vmem:[#allocation7 + $0x2a8] sm:$0xff] }
 0x539   :  { %8165 = vst [vmem:[#allocation88_spill] sm:$0xff] %v6382_v37  ;;  %2345 = vmatpush.msra.mxu0 %v6397_v24  ;;  %v6400_v37 = vld [vmem:[#allocation7 + $0x280] sm:$0xff] }
 0x53a   :  { %8166 = vst [vmem:[#allocation91_spill] sm:$0xff] %v6385_v10  ;;  %2306 = vmatpush.msrb.mxu2 %v6400_v37  ;;  %v6403_v10 = vld [vmem:[#allocation7 + $0xd8] sm:$0xff] }
 0x53b   :  { %8167 = vst [vmem:[#allocation58_spill] sm:$0xff] %v6388_v12  ;;  %2404 = vmatpush.msra.mxu3 %v6403_v10  ;;  %v6406_v12 = vld [vmem:[#allocation7 + $0x288] sm:$0xff] }
 0x53c   :  { %8168 = vst [vmem:[#allocation94_spill] sm:$0xff] %v6391_v60  ;;  %2346 = vmatpush.msra.mxu0 %v6406_v12  ;;  %v6409_v60 = vld [vmem:[#allocation7 + $0x260] sm:$0xff] }
 0x53d   :  { %8169 = vst [vmem:[#allocation59_spill] sm:$0xff] %v6394_v40  ;;  %2307 = vmatpush.msrb.mxu2 %v6409_v60  ;;  %v6412_v40 = vld [vmem:[#allocation7 + $0xb8] sm:$0xff] }
 0x53e   :  { %8170 = vst [vmem:[#allocation97_spill] sm:$0xff] %v6397_v24  ;;  %2405 = vmatpush.msra.mxu3 %v6412_v40  ;;  %v6415_v24 = vld [vmem:[#allocation7 + $0x268] sm:$0xff] }
 0x53f   :  { %8171 = vst [vmem:[#allocation60_spill] sm:$0xff] %v6400_v37  ;;  %2347 = vmatpush.msra.mxu0 %v6415_v24  ;;  %v6418_v37 = vld [vmem:[#allocation7 + $0x240] sm:$0xff] }
 0x540   :  { %8172 = vst [vmem:[#allocation100_spill] sm:$0xff] %v6403_v10  ;;  %2308 = vmatpush.msrb.mxu2 %v6418_v37  ;;  %v6421_v10 = vld [vmem:[#allocation7 + $0x98] sm:$0xff] }
 0x541   :  { %8173 = vst [vmem:[#allocation61_spill] sm:$0xff] %v6406_v12  ;;  %2406 = vmatpush.msra.mxu3 %v6421_v10  ;;  %v6424_v12 = vld [vmem:[#allocation7 + $0x248] sm:$0xff] }
 0x542   :  { %8174 = vst [vmem:[#allocation105_spill] sm:$0xff] %v6409_v60  ;;  %2348 = vmatpush.msra.mxu0 %v6424_v12  ;;  %v6427_v60 = vld [vmem:[#allocation7 + $0x220] sm:$0xff] }
 0x543   :  { %8175 = vst [vmem:[#allocation62_spill] sm:$0xff] %v6412_v40  ;;  %2309 = vmatpush.msrb.mxu2 %v6427_v60  ;;  %v6430_v40 = vld [vmem:[#allocation7 + $0x78] sm:$0xff] }
 0x544   :  { %8176 = vst [vmem:[#allocation106_spill] sm:$0xff] %v6415_v24  ;;  %2407 = vmatpush.msra.mxu3 %v6430_v40  ;;  %v6433_v24 = vld [vmem:[#allocation7 + $0x228] sm:$0xff] }
 0x545   :  { %8177 = vst [vmem:[#allocation63_spill] sm:$0xff] %v6418_v37  ;;  %2349 = vmatpush.msra.mxu0 %v6433_v24  ;;  %v6436_v37 = vld [vmem:[#allocation7 + $0x200] sm:$0xff] }
 0x546   :  { %8178 = vst [vmem:[#allocation107_spill] sm:$0xff] %v6421_v10  ;;  %2310 = vmatpush.msrb.mxu2 %v6436_v37  ;;  %v6439_v10 = vld [vmem:[#allocation7 + $0x58] sm:$0xff] }
 0x547   :  { %8179 = vst [vmem:[#allocation65_spill] sm:$0xff] %v6424_v12  ;;  %2408 = vmatpush.msra.mxu3 %v6439_v10  ;;  %v6442_v12 = vld [vmem:[#allocation7 + $0x3f0] sm:$0xff] }
 0x548   :  { %8180 = vst [vmem:[#allocation108_spill] sm:$0xff] %v6427_v60  ;;  %2375 = vmatpush.msra.mxu2 %v6442_v12  ;;  %v6445_v60 = vld [vmem:[#allocation7 + $0x208] sm:$0xff] }
 0x549   :  { %8181 = vst [vmem:[#allocation67_spill] sm:$0xff] %v6430_v40  ;;  %2350 = vmatpush.msra.mxu0 %v6445_v60  ;;  %v6448_v40 = vld [vmem:[#allocation7 + $0x3f8] sm:$0xff] }
 0x54a   :  { %8182 = vst [vmem:[#allocation109_spill] sm:$0xff] %v6433_v24  ;;  %v6451_v24 = vld [vmem:[#allocation7 + $0x38] sm:$0xff] }
 0x54b   :  { %8183 = vst [vmem:[#allocation69_spill] sm:$0xff] %v6436_v37  ;;  %2415 = vmatpush.msrb.mxu0 %v6448_v40  ;;  %2409 = vmatpush.msra.mxu3 %v6451_v24  ;;  %v6454_v37 = vld [vmem:[#allocation7 + $0x3d0] sm:$0xff] }
 0x54c   :  { %8184 = vst [vmem:[#allocation110_spill] sm:$0xff] %v6439_v10  ;;  %2376 = vmatpush.msra.mxu2 %v6454_v37  ;;  %v6457_v10 = vld [vmem:[#allocation7 + $0x3d8] sm:$0xff] }
 0x54d   :  { %8185 = vst [vmem:[#allocation71_spill] sm:$0xff] %v6442_v12  ;;  %2416 = vmatpush.msrb.mxu0 %v6457_v10  ;;  %2410 = vmatpush.msra.mxu3 %v5978_v11  ;;  %v6461_v12 = vld [vmem:[#allocation7 + $0x3b0] sm:$0xff]  ;;  %v6476_v11 = vld [vmem:[#allocation7 + $0x378] sm:$0xff] }
 0x54e   :  { %8186 = vst [vmem:[#allocation113_spill] sm:$0xff] %v6445_v60  ;;  %2377 = vmatpush.msra.mxu2 %v6461_v12  ;;  %v6464_v60 = vld [vmem:[#allocation7 + $0x3b8] sm:$0xff] }
 0x54f   :  { %8187 = vst [vmem:[#allocation73_spill] sm:$0xff] %v6448_v40  ;;  %2417 = vmatpush.msrb.mxu0 %v6464_v60  ;;  %v6467_v40 = vld [vmem:[#allocation7 + $0x390] sm:$0xff] }
 0x550   :  { %8188 = vst [vmem:[#allocation114_spill] sm:$0xff] %v6451_v24  ;;  %2378 = vmatpush.msra.mxu2 %v6467_v40  ;;  %v6470_v24 = vld [vmem:[#allocation7 + $0x398] sm:$0xff] }
 0x551   :  { %8189 = vst [vmem:[#allocation75_spill] sm:$0xff] %v6454_v37  ;;  %2418 = vmatpush.msrb.mxu0 %v6470_v24  ;;  %v6473_v37 = vld [vmem:[#allocation7 + $0x370] sm:$0xff] }
 0x552   :  { %8190 = vst [vmem:[#allocation116_spill] sm:$0xff] %v6457_v10  ;;  %2379 = vmatpush.msra.mxu2 %v6473_v37 }
 0x553   :  { %8191 = vst [vmem:[#allocation77_spill] sm:$0xff] %v6461_v12  ;;  %2419 = vmatpush.msrb.mxu0 %v6476_v11  ;;  %v6479_v12 = vld [vmem:[#allocation7 + $0x350] sm:$0xff] }
 0x554   :  { %8192 = vst [vmem:[#allocation119_spill] sm:$0xff] %v6464_v60  ;;  %2380 = vmatpush.msra.mxu2 %v6479_v12  ;;  %v6482_v60 = vld [vmem:[#allocation7 + $0x358] sm:$0xff] }
 0x555   :  { %8193 = vst [vmem:[#allocation79_spill] sm:$0xff] %v6467_v40  ;;  %2420 = vmatpush.msrb.mxu0 %v6482_v60  ;;  %v6485_v40 = vld [vmem:[#allocation7 + $0x330] sm:$0xff] }
 0x556   :  { %8194 = vst [vmem:[#allocation120_spill] sm:$0xff] %v6470_v24  ;;  %2381 = vmatpush.msra.mxu2 %v6485_v40  ;;  %v6488_v24 = vld [vmem:[#allocation7 + $0x338] sm:$0xff]  ;;  %v1996_v29 = vpop.f32.mrf.mxu3 }
 0x557   :  { %8195 = vst [vmem:[#allocation82_spill] sm:$0xff] %v6473_v37  ;;  %2421 = vmatpush.msrb.mxu0 %v6488_v24  ;;  %v6491_v37 = vld [vmem:[#allocation7 + $0x310] sm:$0xff] }
 0x558   :  { %8196 = vst [vmem:[#allocation121_spill] sm:$0xff] %v6476_v11  ;;  %2382 = vmatpush.msra.mxu2 %v6491_v37  ;;  %v6494_v11 = vld [vmem:[#allocation7 + $0x318] sm:$0xff] }
 0x559   :  { %8197 = vst [vmem:[#allocation103_spill] sm:$0xff] %v6479_v12  ;;  %2422 = vmatpush.msrb.mxu0 %v6494_v11  ;;  %v6497_v12 = vld [vmem:[#allocation7 + $0x2f0] sm:$0xff] }
 0x55a   :  { %8198 = vst [vmem:[#allocation122_spill] sm:$0xff] %v6482_v60  ;;  %2383 = vmatpush.msra.mxu2 %v6497_v12  ;;  %v6500_v60 = vld [vmem:[#allocation7 + $0x2f8] sm:$0xff] }
 0x55b   :  { %8199 = vst [vmem:[#allocation123_spill] sm:$0xff] %v6485_v40  ;;  %2423 = vmatpush.msrb.mxu0 %v6500_v60  ;;  %v6503_v40 = vld [vmem:[#allocation7 + $0x2d0] sm:$0xff] }
 0x55c   :  { %8200 = vst [vmem:[#allocation124_spill] sm:$0xff] %v6488_v24  ;;  %2384 = vmatpush.msra.mxu2 %v6503_v40  ;;  %v6506_v24 = vld [vmem:[#allocation7 + $0x2d8] sm:$0xff] }
 0x55d   :  { %8201 = vst [vmem:[#allocation125_spill] sm:$0xff] %v6491_v37  ;;  %2424 = vmatpush.msrb.mxu0 %v6506_v24  ;;  %v6509_v37 = vld [vmem:[#allocation7 + $0x2b0] sm:$0xff] }
 0x55e   :  { %8202 = vst [vmem:[#allocation126_spill] sm:$0xff] %v6494_v11  ;;  %2385 = vmatpush.msra.mxu2 %v6509_v37  ;;  %v6512_v11 = vld [vmem:[#allocation7 + $0x2b8] sm:$0xff]  ;;  %v2076_v27 = vpop.f32.mrf.mxu3 }
 0x55f   :  { %8203 = vst [vmem:[#allocation127_spill] sm:$0xff] %v6497_v12  ;;  %2425 = vmatpush.msrb.mxu0 %v6512_v11  ;;  %v6515_v12 = vld [vmem:[#allocation7 + $0x290] sm:$0xff] }
 0x560   :  { %8204 = vst [vmem:[#allocation128_spill] sm:$0xff] %v6500_v60  ;;  %2386 = vmatpush.msra.mxu2 %v6515_v12  ;;  %v6518_v60 = vld [vmem:[#allocation7 + $0x298] sm:$0xff] }
 0x561   :  { %8205 = vst [vmem:[#allocation129_spill] sm:$0xff] %v6503_v40  ;;  %2426 = vmatpush.msrb.mxu0 %v6518_v60  ;;  %v6521_v40 = vld [vmem:[#allocation7 + $0x270] sm:$0xff] }
 0x562   :  { %8206 = vst [vmem:[#allocation130_spill] sm:$0xff] %v6506_v24  ;;  %2387 = vmatpush.msra.mxu2 %v6521_v40  ;;  %v6524_v24 = vld [vmem:[#allocation7 + $0x278] sm:$0xff] }
 0x563   :  { %8207 = vst [vmem:[#allocation131_spill] sm:$0xff] %v6509_v37  ;;  %2427 = vmatpush.msrb.mxu0 %v6524_v24  ;;  %v6527_v37 = vld [vmem:[#allocation7 + $0x250] sm:$0xff] }
 0x564   :  { %8208 = vst [vmem:[#allocation132_spill] sm:$0xff] %v6512_v11  ;;  %2388 = vmatpush.msra.mxu2 %v6527_v37  ;;  %v6530_v11 = vld [vmem:[#allocation7 + $0x258] sm:$0xff] }
 0x565   :  { %8209 = vst [vmem:[#allocation133_spill] sm:$0xff] %v6515_v12  ;;  %2428 = vmatpush.msrb.mxu0 %v6530_v11  ;;  %v6533_v12 = vld [vmem:[#allocation7 + $0x230] sm:$0xff] }
 0x566   :  { %8210 = vst [vmem:[#allocation134_spill] sm:$0xff] %v6518_v60  ;;  %2389 = vmatpush.msra.mxu2 %v6533_v12  ;;  %v6536_v60 = vld [vmem:[#allocation7 + $0x238] sm:$0xff] }
 0x567   :  { %8211 = vst [vmem:[#allocation135_spill] sm:$0xff] %v6521_v40  ;;  %2429 = vmatpush.msrb.mxu0 %v6536_v60  ;;  %v6539_v40 = vld [vmem:[#allocation7 + $0x210] sm:$0xff] }
 0x568   :  { %8212 = vst [vmem:[#allocation136_spill] sm:$0xff] %v6524_v24  ;;  %2390 = vmatpush.msra.mxu2 %v6539_v40  ;;  %v6542_v24 = vld [vmem:[#allocation7 + $0x218] sm:$0xff] }
 0x569   :  { %8213 = vst [vmem:[#allocation137_spill] sm:$0xff] %v6527_v37  ;;  %2430 = vmatpush.msrb.mxu0 %v6542_v24 }
 0x56a   :  { %8214 = vst [vmem:[#allocation138_spill] sm:$0xff] %v6530_v11  ;;  %v2036_v11 = vpop.f32.mrf.mxu1 }
 0x56b   :  { %8215 = vst [vmem:[#allocation139_spill] sm:$0xff] %v6533_v12 }
 0x56c   :  { %8216 = vst [vmem:[#allocation140_spill] sm:$0xff] %v6536_v60 }
 0x56d   :  { %8217 = vst [vmem:[#allocation141_spill] sm:$0xff] %v6539_v40 }
 0x56e   :  { %8218 = vst [vmem:[#allocation142_spill] sm:$0xff] %v6542_v24 }
 0x570   :  { %v2016_v37 = vpop.f32.mrf.mxu0 }
 0x571   :  { %v2017_v10 = vadd.f32 %v2016_v37, %v8086_v23 }
 0x573   :  { %v2037_v25 = vadd.f32 %v2036_v11, %v2017_v10  ;;  %v2166_v10 = vld [vmem:[#allocation3 + $0x98] sm:$0xff] }
 0x575   :  { %v2867_v28 = vmul.f32 -1.442695, %v2037_v25 }
 0x576   :  { %v1976_v12 = vpop.f32.mrf.mxu2 }
 0x577   :  { %2995 = vpow2.f32 %v2867_v28  ;;  %v1977_v5 = vadd.f32 %v1976_v12, %v8087_v46  ;;  %v2205_v21 = vpop.f32.mrf.mxu3 }
 0x578   :  { %v2206_v23 = vadd.f32 %v2205_v21, %v8088_v63  ;;  %v2116_v63 = vpop.f32.mrf.mxu1 }
 0x579   :  { %v1997_v60 = vadd.f32 %v1996_v29, %v1977_v5  ;;  %v2096_v5 = vpop.f32.mrf.mxu0 }
 0x57a   :  { %v2248_v28 = vadd.f32 %v2206_v23, %v2166_v10 }
 0x57b   :  { %v2866_v44 = vmul.f32 -1.442695, %v1997_v60 }
 0x57c   :  { %v2869_v46 = vmul.f32 -1.442695, %v2248_v28 }
 0x57d   :  { %v2996_v50 = vpop.eup %2995  ;;  %2997 = vpow2.f32 %v2866_v44 }
 0x57e   :  { %v2141_v40 = vadd.f32 1.0, %v2996_v50  ;;  %v2056_v29 = vpop.f32.mrf.mxu2  ;;  %v2097_v50 = vadd.f32 %v2096_v5, %v8089_v42 }
 0x57f   :  { %v2057_v21 = vadd.f32 %v2056_v29, %v8090_v61 }
 0x580   :  { %2999 = vrcp.f32 %v2141_v40  ;;  %v2117_v10 = vadd.f32 %v2116_v63, %v2097_v50  ;;  %vm2147_vm13 = vweird.f32 %v2141_v40 }
 0x581   :  { %v2077_v13 = vadd.f32 %v2076_v27, %v2057_v21 }
 0x583   :  { %v2998_v56 = vpop.eup %2997 }
 0x584   :  { %v2122_v24 = vadd.f32 1.0, %v2998_v56 }
 0x586   :  { %3001 = vrcp.f32 %v2122_v24  ;;  %v3000_v37 = vpop.eup %2999  ;;  %v2134_v44 = vand.u32 2147483648, %v2122_v24  ;;  %v2132_v56 = vand.u32 2147483647, %v2122_v24  ;;  %vm2128_vm9 = vweird.f32 %v2122_v24 }
 0x587   :  { %v2143_v25 = vmul.f32 %v3000_v37, %v2141_v40  ;;  %3003 = vpow2.f32 %v2869_v46  ;;  %vm2148_vm12 = vweird.f32 %v3000_v37 }
 0x588   :  { %v2135_v23 = vor.u32 1.1754944e-38, %v2134_v44  ;;  %vm2133_vm11 = vcmp.eq.f32.partialorder %v2132_v56, 8.507059e+37  ;;  %vm2149_vm14 = vmor %vm2147_vm13, %vm2148_vm12 }
 0x589   :  { %v2144_v12 = vsub.f32 1.0, %v2143_v25 }
 0x58b   :  { %v2145_v8 = vmul.f32 %v3000_v37, %v2144_v12 }
 0x58c   :  { %v3002_v11 = vpop.eup %3001 }
 0x58d   :  { %v2124_v30 = vmul.f32 %v3002_v11, %v2122_v24  ;;  %vm2129_vm8 = vweird.f32 %v3002_v11  ;;  %v2146_v28 = vadd.f32 %v3000_v37, %v2145_v8  ;;  %v2151_v24 = vand.u32 2147483647, %v2141_v40  ;;  %v3004_v29 = vpop.eup %3003 }
 0x58e   :  { %vm2130_vm10 = vmor %vm2128_vm9, %vm2129_vm8 }
 0x58f   :  { %v2125_v60 = vsub.f32 1.0, %v2124_v30  ;;  %v2150_v44 = vsel %vm2149_vm14, %v3000_v37, %v2146_v28  ;;  %vm2152_vm15 = vcmp.eq.f32.partialorder %v2151_v24, 8.507059e+37  ;;  %v8233_v24 = vld [vmem:[#allocation16_spill] sm:$0xff] }
 0x591   :  { %v2126_v35 = vmul.f32 %v3002_v11, %v2125_v60  ;;  %v2153_v60 = vand.u32 2147483648, %v2141_v40 }
 0x593   :  { %v2127_v49 = vadd.f32 %v3002_v11, %v2126_v35  ;;  %v2154_v63 = vor.u32 1.1754944e-38, %v2153_v60  ;;  %v8231_v60 = vld [vmem:[#allocation23_spill] sm:$0xff] }
 0x595   :  { %v2131_v25 = vsel %vm2130_vm10, %v3002_v11, %v2127_v49  ;;  %v6551_v11 = vadd.f32 1.0, %v3004_v29  ;;  %v2155_v8 = vsel %vm2152_vm15, %v2154_v63, %v2150_v44  ;;  %v8235_v29 = vld [vmem:[#allocation25_spill] sm:$0xff]  ;;  %v8236_v44 = vld [vmem:[#allocation96_spill] sm:$0xff]  ;;  %v8237_v63 = vld [vmem:[#allocation18_spill] sm:$0xff] }
 0x596   :  { %v2136_v30 = vsel %vm2133_vm11, %v2135_v23, %v2131_v25  ;;  %v2160_v50 = vsub.f32 1.0, %v2155_v8  ;;  %v2162_v40 = vmul.f32 %v2155_v8, %v6019_v45  ;;  %v8239_v8 = vld [vmem:[#allocation27_spill] sm:$0xff] }
 0x597   :  { %v2185_v5 = vpop.f32.mrf.mxu2  ;;  %v2157_v42 = vmul.f32 %v2136_v30, %v2117_v10  ;;  %v2264_v30 = vand.u32 2147483648, %v6551_v11  ;;  %vm2258_vm5 = vweird.f32 %v6551_v11 }
 0x598   :  { %v2186_v35 = vadd.f32 %v2185_v5, %v7569_v39  ;;  %v8230_v5 = vld [vmem:[#allocation89_spill] sm:$0xff] }
 0x599   :  { %v2158_v12 = vadd.f32 %v2157_v42, %v2077_v13 }
 0x59a   :  { %v2228_v46 = vadd.f32 %v2186_v35, %v2165_v18  ;;  %v8232_v35 = vld [vmem:[#allocation93_spill] sm:$0xff] }
 0x59b   :  { %3005 = vtanh.f32 %v2158_v12  ;;  %v8234_v12 = vld [vmem:[#allocation92_spill] sm:$0xff] }
 0x59c   :  { %v2868_v49 = vmul.f32 -1.442695, %v2228_v46  ;;  %v3559_v46 = vld [vmem:[#allocation7 + $0x190] sm:$0xff] }
 0x59e   :  { %3007 = vpow2.f32 %v2868_v49  ;;  %v3560_v49 = vld [vmem:[#allocation7 + $0x170] sm:$0xff] }
 0x59f   :  { %3009 = vrcp.f32 %v6551_v11 }
 0x5a1   :  { %v3006_v56 = vpop.eup %3005 }
 0x5a2   :  { %v2161_v27 = vmul.f32 %v3006_v56, %v2160_v50  ;;  %v8240_v50 = vld [vmem:[#allocation99_spill] sm:$0xff]  ;;  %v3561_v56 = vld [vmem:[#allocation7 + $0x150] sm:$0xff] }
 0x5a4   :  { %v3008_v21 = vpop.eup %3007  ;;  %v6555_v13 = vadd.f32 %v2162_v40, %v2161_v27  ;;  %v8241_v27 = vld [vmem:[#allocation20_spill] sm:$0xff]  ;;  %v8242_v40 = vld [vmem:[#allocation98_spill] sm:$0xff] }
 0x5a5   :  { %v2232_v42 = vadd.f32 1.0, %v3008_v21  ;;  %v3010_v18 = vpop.eup %3009  ;;  %v8243_v21 = vld [vmem:[#allocation29_spill] sm:$0xff] }
 0x5a6   :  { %2311 = vmatmul.f32.vlgmr.msrb.gmra.mxu2 %v6555_v13  ;;  %2351 = vmatmul.f32.vlgmr.msra.gmra.mxu0 %v6555_v13  ;;  %v2254_v45 = vmul.f32 %v3010_v18, %v6551_v11  ;;  %vm2259_vm4 = vweird.f32 %v3010_v18 }
 0x5a7   :  { %3011 = vrcp.f32 %v2232_v42  ;;  %2504 = vmatpush.msrb.mxu2 %v6025_v4  ;;  %2591 = vmatpush.msra.mxu0 %v6028_v19  ;;  %v2244_v19 = vand.u32 2147483648, %v2232_v42  ;;  %vm2238_vm1 = vweird.f32 %v2232_v42  ;;  %vm2260_vm6 = vmor %vm2258_vm5, %vm2259_vm4 }
 0x5a8   :  { %v2255_v10 = vsub.f32 1.0, %v2254_v45  ;;  %v8245_v45 = vld [vmem:[#allocation22_spill] sm:$0xff] }
 0x5a9   :  { %2505 = vmatpush.msrb.mxu2 %v6031_v55  ;;  %2592 = vmatpush.msra.mxu0 %v6034_v3  ;;  %v2242_v3 = vand.u32 2147483647, %v2232_v42 }
 0x5ab   :  { %2506 = vmatpush.msrb.mxu2 %v6039_v41  ;;  %2593 = vmatpush.msra.mxu0 %v6042_v38  ;;  %v2256_v41 = vmul.f32 %v3010_v18, %v2255_v10  ;;  %v2225_v38 = vpop.f32.mrf.mxu0  ;;  %vm2243_vm3 = vcmp.eq.f32.partialorder %v2242_v3, 8.507059e+37  ;;  %v8247_v10 = vld [vmem:[#allocation31_spill] sm:$0xff]  ;;  %v8250_v3 = vld [vmem:[#allocation26_spill] sm:$0xff] }
 0x5ad   :  { %v3012_v37 = vpop.eup %3011  ;;  %2507 = vmatpush.msrb.mxu2 %v6045_v0  ;;  %2594 = vmatpush.msra.mxu0 %v6048_v58  ;;  %v2245_v58 = vor.u32 1.1754944e-38, %v2244_v19  ;;  %v8249_v19 = vld [vmem:[#allocation33_spill] sm:$0xff] }
 0x5ae   :  { %v2234_v23 = vmul.f32 %v3012_v37, %v2232_v42  ;;  %2391 = vmatmul.f32.vlgmr.msra.gmra.mxu2 %v6555_v13  ;;  %2431 = vmatmul.f32.vlgmr.msrb.gmra.mxu0 %v6555_v13  ;;  %vm2239_vm0 = vweird.f32 %v3012_v37  ;;  %v3562_v42 = vld [vmem:[#allocation7 + $0x130] sm:$0xff] }
 0x5af   :  { %2508 = vmatpush.msrb.mxu2 %v6053_v31  ;;  %2595 = vmatpush.msra.mxu0 %v6056_v20  ;;  %vm2240_vm2 = vmor %vm2238_vm1, %vm2239_vm0  ;;  %v2226_v31 = vadd.f32 %v2225_v38, %v4281_v43  ;;  %v8252_v38 = vld [vmem:[#allocation28_spill] sm:$0xff] }
 0x5b0   :  { %v2235_v4 = vsub.f32 1.0, %v2234_v23  ;;  %v3563_v23 = vld [vmem:[#allocation7 + $0x110] sm:$0xff] }
 0x5b1   :  { %2509 = vmatpush.msrb.mxu2 %v6059_v36  ;;  %2596 = vmatpush.msra.mxu0 %v6062_v26  ;;  %v2257_v36 = vadd.f32 %v3010_v18, %v2256_v41  ;;  %v2167_v26 = vld [vmem:[#allocation3 + $0xa0] sm:$0xff]  ;;  %v8251_v41 = vld [vmem:[#allocation35_spill] sm:$0xff] }
 0x5b2   :  { %v2236_v55 = vmul.f32 %v3012_v37, %v2235_v4  ;;  %v8248_v4 = vld [vmem:[#allocation24_spill] sm:$0xff] }
 0x5b3   :  { %2510 = vmatpush.msrb.mxu2 %v6066_v22  ;;  %2597 = vmatpush.msra.mxu0 %v6069_v6  ;;  %v2262_v22 = vand.u32 2147483647, %v6551_v11  ;;  %v8238_v11 = vld [vmem:[#allocation95_spill] sm:$0xff] }
 0x5b4   :  { %v2237_v0 = vadd.f32 %v3012_v37, %v2236_v55  ;;  %v3564_v55 = vld [vmem:[#allocation7 + $0xf0] sm:$0xff] }
 0x5b5   :  { %2511 = vmatpush.msrb.mxu2 %v6073_v51  ;;  %2598 = vmatpush.msra.mxu0 %v6076_v1  ;;  %v2261_v51 = vsel %vm2260_vm6, %v3010_v18, %v2257_v36  ;;  %v2265_v1 = vor.u32 1.1754944e-38, %v2264_v30  ;;  %vm2263_vm7 = vcmp.eq.f32.partialorder %v2262_v22, 8.507059e+37  ;;  %v8244_v18 = vld [vmem:[#allocation102_spill] sm:$0xff]  ;;  %v3566_v36 = vld [vmem:[#allocation7 + $0xb0] sm:$0xff] }
 0x5b6   :  { %v2241_v20 = vsel %vm2240_vm2, %v3012_v37, %v2237_v0  ;;  %v8246_v37 = vld [vmem:[#allocation101_spill] sm:$0xff]  ;;  %v3565_v0 = vld [vmem:[#allocation7 + $0xd0] sm:$0xff]  ;;  %v8258_v30 = vld [vmem:[#allocation34_spill] sm:$0xff] }
 0x5b7   :  { %v2246_v25 = vsel %vm2243_vm3, %v2245_v58, %v2241_v20  ;;  %2512 = vmatpush.msrb.mxu2 %v6082_v34  ;;  %2599 = vmatpush.msra.mxu0 %v6085_v17  ;;  %v2266_v34 = vsel %vm2263_vm7, %v2265_v1, %v2261_v51  ;;  %v8253_v58 = vld [vmem:[#allocation37_spill] sm:$0xff]  ;;  %v8255_v20 = vld [vmem:[#allocation39_spill] sm:$0xff]  ;;  %v8259_v22 = vld [vmem:[#allocation44_spill] sm:$0xff] }
 0x5b8   :  { %v2268_v28 = vmul.f32 %v2246_v25, %v2226_v31  ;;  %v2271_v17 = vsub.f32 1.0, %v2266_v34  ;;  %v8254_v31 = vld [vmem:[#allocation30_spill] sm:$0xff]  ;;  %v8261_v51 = vld [vmem:[#allocation36_spill] sm:$0xff] }
 0x5b9   :  { %2513 = vmatpush.msrb.mxu2 %v6090_v59  ;;  %2600 = vmatpush.msra.mxu0 %v6093_v47  ;;  %v2273_v47 = vmul.f32 %v2266_v34, %v6128_v16  ;;  %v8227_v16 = vld [vmem:[#allocation21_spill] sm:$0xff]  ;;  %v8257_v25 = vld [vmem:[#allocation42_spill] sm:$0xff]  ;;  %v3568_v1 = vld [vmem:[#allocation7 + $0x70] sm:$0xff] }
 0x5ba   :  { %v2269_v6 = vadd.f32 %v2268_v28, %v2167_v26  ;;  %v8256_v26 = vld [vmem:[#allocation32_spill] sm:$0xff] }
 0x5bb   :  { %2514 = vmatpush.msrb.mxu2 %v6097_v53  ;;  %2601 = vmatpush.msra.mxu0 %v6100_v14  ;;  %v3567_v28 = vld [vmem:[#allocation7 + $0x90] sm:$0xff] }
 0x5bc   :  { %3013 = vtanh.f32 %v2269_v6  ;;  %v8260_v6 = vld [vmem:[#allocation111_spill] sm:$0xff]  ;;  %v8262_v34 = vld [vmem:[#allocation112_spill] sm:$0xff] }
 0x5bd   :  { %2515 = vmatpush.msrb.mxu2 %v6103_v48  ;;  %2602 = vmatpush.msra.mxu0 %v6106_v33  ;;  %v8219_v48 = vld [vmem:[#allocation17_spill] sm:$0xff]  ;;  %v8220_v33 = vld [vmem:[#allocation80_spill] sm:$0xff] }
 0x5bf   :  { %2516 = vmatpush.msrb.mxu2 %v6109_v15  ;;  %2603 = vmatpush.msra.mxu0 %v6112_v32  ;;  %v8221_v15 = vld [vmem:[#allocation12_spill] sm:$0xff]  ;;  %v8222_v32 = vld [vmem:[#allocation83_spill] sm:$0xff] }
 0x5c1   :  { %2517 = vmatpush.msrb.mxu2 %v6115_v62  ;;  %2604 = vmatpush.msra.mxu0 %v6118_v54  ;;  %v8223_v62 = vld [vmem:[#allocation19_spill] sm:$0xff] }
 0x5c2   :  { %v3014_v59 = vpop.eup %3013  ;;  %v8224_v54 = vld [vmem:[#allocation87_spill] sm:$0xff] }
 0x5c3   :  { %v2272_v53 = vmul.f32 %v3014_v59, %v2271_v17  ;;  %2518 = vmatpush.msrb.mxu2 %v6122_v2  ;;  %2605 = vmatpush.msra.mxu0 %v6125_v52  ;;  %v8225_v2 = vld [vmem:[#allocation13_spill] sm:$0xff]  ;;  %v8226_v52 = vld [vmem:[#allocation86_spill] sm:$0xff] }
 0x5c4   :  { %v8263_v17 = vld [vmem:[#allocation46_spill] sm:$0xff] }
 0x5c5   :  { %v6597_v14 = vadd.f32 %v2273_v47, %v2272_v53  ;;  %2519 = vmatpush.msrb.mxu2 %v6130_v7  ;;  %2606 = vmatpush.msra.mxu0 %v6133_v57  ;;  %v8228_v7 = vld [vmem:[#allocation90_spill] sm:$0xff]  ;;  %v3569_v47 = vld [vmem:[#allocation7 + $0x50] sm:$0xff] }
 0x5c6   :  { %v8229_v57 = vld [vmem:[#allocation14_spill] sm:$0xff]  ;;  %v8265_v53 = vld [vmem:[#allocation48_spill] sm:$0xff] }
 0x5c7   :  { %2291 = vmatmul.f32.vlgmr.msrb.gmra.mxu1 %v6597_v14  ;;  %2331 = vmatmul.f32.vlgmr.msrb.gmra.mxu3 %v6597_v14  ;;  %v8264_v59 = vld [vmem:[#allocation38_spill] sm:$0xff] }
 0x5c8   :  { %2484 = vmatpush.msrb.mxu1 %v6138_v9  ;;  %2520 = vmatmul.f32.vlgmr.msrb.gmra.mxu2 %v6597_v14  ;;  %v3558_v9 = vld [vmem:[#allocation7 + $0x1b0] sm:$0xff] }
 0x5c9   :  { %2524 = vmatpush.msrb.mxu3 %v8219_v48  ;;  %2631 = vmatpush.msra.mxu2 %v8220_v33  ;;  %v8266_v48 = vld [vmem:[#allocation40_spill] sm:$0xff]  ;;  %v8267_v33 = vld [vmem:[#allocation115_spill] sm:$0xff] }
 0x5ca   :  { %2485 = vmatpush.msrb.mxu1 %v8221_v15  ;;  %2671 = vmatpush.msrb.mxu0 %v8222_v32  ;;  %v8268_v15 = vld [vmem:[#allocation50_spill] sm:$0xff]  ;;  %v8269_v32 = vld [vmem:[#allocation117_spill] sm:$0xff] }
 0x5cb   :  { %2525 = vmatpush.msrb.mxu3 %v8223_v62  ;;  %2632 = vmatpush.msra.mxu2 %v8224_v54  ;;  %v3570_v62 = vld [vmem:[#allocation7 + $0x30] sm:$0xff]  ;;  %v8270_v54 = vld [vmem:[#allocation41_spill] sm:$0xff] }
 0x5cc   :  { %2486 = vmatpush.msrb.mxu1 %v8225_v2  ;;  %2672 = vmatpush.msrb.mxu0 %v8226_v52  ;;  %v8271_v2 = vld [vmem:[#allocation118_spill] sm:$0xff]  ;;  %v8272_v52 = vld [vmem:[#allocation64_spill] sm:$0xff] }
 0x5cd   :  { %2526 = vmatpush.msrb.mxu3 %v8227_v16  ;;  %2633 = vmatpush.msra.mxu2 %v8228_v7  ;;  %v8273_v16 = vld [vmem:[#allocation43_spill] sm:$0xff]  ;;  %v8274_v7 = vld [vmem:[#allocation66_spill] sm:$0xff] }
 0x5ce   :  { %2487 = vmatpush.msrb.mxu1 %v8229_v57  ;;  %2673 = vmatpush.msrb.mxu0 %v3558_v9  ;;  %v3571_v57 = vld [vmem:[#allocation7 + $0x10] sm:$0xff]  ;;  %v8275_v9 = vld [vmem:[#allocation45_spill] sm:$0xff] }
 0x5cf   :  { %2527 = vmatpush.msrb.mxu3 %v8230_v5  ;;  %2371 = vmatmul.f32.vlgmr.msra.gmra.mxu1 %v6597_v14  ;;  %v8276_v5 = vld [vmem:[#allocation68_spill] sm:$0xff] }
 0x5d0   :  { %2411 = vmatmul.f32.vlgmr.msra.gmra.mxu3 %v6597_v14  ;;  %2488 = vmatpush.msrb.mxu1 %v8231_v60  ;;  %v8277_v60 = vld [vmem:[#allocation47_spill] sm:$0xff] }
 0x5d1   :  { %2528 = vmatpush.msrb.mxu3 %v8232_v35  ;;  %2634 = vmatpush.msra.mxu2 %v8233_v24  ;;  %v8278_v35 = vld [vmem:[#allocation70_spill] sm:$0xff]  ;;  %v8279_v24 = vld [vmem:[#allocation49_spill] sm:$0xff] }
 0x5d2   :  { %2489 = vmatpush.msrb.mxu1 %v8234_v12  ;;  %2674 = vmatpush.msrb.mxu0 %v3559_v46  ;;  %v8280_v12 = vld [vmem:[#allocation72_spill] sm:$0xff]  ;;  %v8281_v46 = vld [vmem:[#allocation51_spill] sm:$0xff] }
 0x5d3   :  { %2529 = vmatpush.msrb.mxu3 %v8235_v29  ;;  %2635 = vmatpush.msra.mxu2 %v8236_v44  ;;  %v8282_v29 = vld [vmem:[#allocation74_spill] sm:$0xff]  ;;  %v8283_v44 = vld [vmem:[#allocation52_spill] sm:$0xff] }
 0x5d4   :  { %2490 = vmatpush.msrb.mxu1 %v8237_v63  ;;  %2675 = vmatpush.msrb.mxu0 %v3560_v49  ;;  %v8284_v63 = vld [vmem:[#allocation76_spill] sm:$0xff]  ;;  %v8285_v49 = vld [vmem:[#allocation53_spill] sm:$0xff] }
 0x5d5   :  { %2530 = vmatpush.msrb.mxu3 %v8238_v11  ;;  %2636 = vmatpush.msra.mxu2 %v8239_v8  ;;  %v8286_v11 = vld [vmem:[#allocation78_spill] sm:$0xff] }
 0x5d6   :  { %2491 = vmatpush.msrb.mxu1 %v8240_v50  ;;  %2676 = vmatpush.msrb.mxu0 %v3561_v56  ;;  %v8287_v8 = vld [vmem:[#allocation54_spill] sm:$0xff]  ;;  %v8288_v50 = vld [vmem:[#allocation81_spill] sm:$0xff]  ;;  %v8289_v56 = vld [vmem:[#allocation55_spill] sm:$0xff] }
 0x5d7   :  { %2531 = vmatpush.msrb.mxu3 %v8241_v27  ;;  %2637 = vmatpush.msra.mxu2 %v8242_v40  ;;  %v8290_v27 = vld [vmem:[#allocation85_spill] sm:$0xff]  ;;  %v8291_v40 = vld [vmem:[#allocation56_spill] sm:$0xff] }
 0x5d8   :  { %2492 = vmatpush.msrb.mxu1 %v8243_v21  ;;  %2677 = vmatpush.msrb.mxu0 %v3562_v42  ;;  %v8292_v21 = vld [vmem:[#allocation57_spill] sm:$0xff]  ;;  %v8293_v42 = vld [vmem:[#allocation88_spill] sm:$0xff] }
 0x5d9   :  { %2532 = vmatpush.msrb.mxu3 %v8244_v18  ;;  %2638 = vmatpush.msra.mxu2 %v8245_v45  ;;  %v8294_v18 = vld [vmem:[#allocation91_spill] sm:$0xff]  ;;  %v8295_v45 = vld [vmem:[#allocation58_spill] sm:$0xff] }
 0x5da   :  { %2493 = vmatpush.msrb.mxu1 %v8246_v37  ;;  %2678 = vmatpush.msrb.mxu0 %v3563_v23  ;;  %v8296_v37 = vld [vmem:[#allocation94_spill] sm:$0xff]  ;;  %v8297_v23 = vld [vmem:[#allocation59_spill] sm:$0xff] }
 0x5db   :  { %2533 = vmatpush.msrb.mxu3 %v8247_v10  ;;  %2639 = vmatpush.msra.mxu2 %v8248_v4  ;;  %v8298_v10 = vld [vmem:[#allocation97_spill] sm:$0xff]  ;;  %v8299_v4 = vld [vmem:[#allocation60_spill] sm:$0xff] }
 0x5dc   :  { %2494 = vmatpush.msrb.mxu1 %v8249_v19  ;;  %2679 = vmatpush.msrb.mxu0 %v3564_v55  ;;  %v8300_v19 = vld [vmem:[#allocation100_spill] sm:$0xff]  ;;  %v8301_v55 = vld [vmem:[#allocation61_spill] sm:$0xff] }
 0x5dd   :  { %2534 = vmatpush.msrb.mxu3 %v8250_v3  ;;  %2640 = vmatpush.msra.mxu2 %v8251_v41  ;;  %v8302_v3 = vld [vmem:[#allocation105_spill] sm:$0xff]  ;;  %v8303_v41 = vld [vmem:[#allocation62_spill] sm:$0xff] }
 0x5de   :  { %2495 = vmatpush.msrb.mxu1 %v8252_v38  ;;  %2680 = vmatpush.msrb.mxu0 %v3565_v0  ;;  %v8304_v38 = vld [vmem:[#allocation106_spill] sm:$0xff]  ;;  %v8305_v0 = vld [vmem:[#allocation63_spill] sm:$0xff] }
 0x5df   :  { %2535 = vmatpush.msrb.mxu3 %v8253_v58  ;;  %2641 = vmatpush.msra.mxu2 %v8254_v31  ;;  %v8306_v58 = vld [vmem:[#allocation107_spill] sm:$0xff]  ;;  %v8307_v31 = vld [vmem:[#allocation65_spill] sm:$0xff] }
 0x5e0   :  { %2496 = vmatpush.msrb.mxu1 %v8255_v20  ;;  %2681 = vmatpush.msrb.mxu0 %v3566_v36  ;;  %v8308_v20 = vld [vmem:[#allocation108_spill] sm:$0xff]  ;;  %v8309_v36 = vld [vmem:[#allocation67_spill] sm:$0xff] }
 0x5e1   :  { %2536 = vmatpush.msrb.mxu3 %v8256_v26  ;;  %2642 = vmatpush.msra.mxu2 %v8257_v25  ;;  %v8310_v26 = vld [vmem:[#allocation109_spill] sm:$0xff] }
 0x5e2   :  { %2497 = vmatpush.msrb.mxu1 %v8258_v30  ;;  %2682 = vmatpush.msrb.mxu0 %v3567_v28  ;;  %v8311_v25 = vld [vmem:[#allocation69_spill] sm:$0xff]  ;;  %v8312_v30 = vld [vmem:[#allocation110_spill] sm:$0xff] }
 0x5e3   :  { %2537 = vmatpush.msrb.mxu3 %v8259_v22  ;;  %2643 = vmatpush.msra.mxu2 %v8260_v6  ;;  %v8313_v28 = vld [vmem:[#allocation113_spill] sm:$0xff]  ;;  %v8314_v22 = vld [vmem:[#allocation71_spill] sm:$0xff] }
 0x5e4   :  { %2498 = vmatpush.msrb.mxu1 %v8261_v51  ;;  %2683 = vmatpush.msrb.mxu0 %v3568_v1  ;;  %v8315_v6 = vld [vmem:[#allocation73_spill] sm:$0xff]  ;;  %v8316_v51 = vld [vmem:[#allocation114_spill] sm:$0xff]  ;;  %v8317_v1 = vld [vmem:[#allocation75_spill] sm:$0xff] }
 0x5e5   :  { %2538 = vmatpush.msrb.mxu3 %v8262_v34  ;;  %2644 = vmatpush.msra.mxu2 %v8263_v17  ;;  %v8318_v34 = vld [vmem:[#allocation116_spill] sm:$0xff]  ;;  %v3572_v17 = vld [vmem:[#allocation7 + $0x18] sm:$0xff] }
 0x5e6   :  { %2499 = vmatpush.msrb.mxu1 %v8264_v59  ;;  %2684 = vmatpush.msrb.mxu0 %v3569_v47  ;;  %v8319_v59 = vld [vmem:[#allocation77_spill] sm:$0xff]  ;;  %v8320_v47 = vld [vmem:[#allocation119_spill] sm:$0xff] }
 0x5e7   :  { %2539 = vmatpush.msrb.mxu3 %v8265_v53  ;;  %2500 = vmatmul.f32.vlgmr.msrb.gmra.mxu1 %v6597_v14  ;;  %v8321_v53 = vld [vmem:[#allocation79_spill] sm:$0xff] }
 0x5e8   :  { %2540 = vmatmul.f32.vlgmr.msrb.gmra.mxu3 %v6597_v14  ;;  %2611 = vmatpush.msra.mxu1 %v8266_v48  ;;  %v8322_v48 = vld [vmem:[#allocation120_spill] sm:$0xff] }
 0x5e9   :  { %2651 = vmatpush.msra.mxu3 %v8267_v33  ;;  %2645 = vmatpush.msra.mxu2 %v8268_v15  ;;  %v8323_v33 = vld [vmem:[#allocation82_spill] sm:$0xff]  ;;  %v8324_v15 = vld [vmem:[#allocation121_spill] sm:$0xff] }
 0x5ea   :  { %2612 = vmatpush.msra.mxu1 %v8269_v32  ;;  %2685 = vmatpush.msrb.mxu0 %v3570_v62  ;;  %v8325_v32 = vld [vmem:[#allocation103_spill] sm:$0xff]  ;;  %v8326_v62 = vld [vmem:[#allocation122_spill] sm:$0xff] }
 0x5eb   :  { %2652 = vmatpush.msra.mxu3 %v8270_v54  ;;  %2646 = vmatpush.msra.mxu2 %v8271_v2  ;;  %v8327_v54 = vld [vmem:[#allocation123_spill] sm:$0xff]  ;;  %v8328_v2 = vld [vmem:[#allocation124_spill] sm:$0xff] }
 0x5ec   :  { %2613 = vmatpush.msra.mxu1 %v8272_v52  ;;  %2686 = vmatpush.msrb.mxu0 %v3571_v57  ;;  %v8329_v52 = vld [vmem:[#allocation125_spill] sm:$0xff]  ;;  %v8332_v57 = vld [vmem:[#allocation128_spill] sm:$0xff] }
 0x5ed   :  { %2711 = vmatpush.msrb.mxu2 %v8273_v16  ;;  %2653 = vmatpush.msra.mxu3 %v8274_v7  ;;  %v8330_v16 = vld [vmem:[#allocation126_spill] sm:$0xff]  ;;  %v8331_v7 = vld [vmem:[#allocation127_spill] sm:$0xff] }
 0x5ee   :  { %2614 = vmatpush.msra.mxu1 %v8275_v9  ;;  %v8333_v9 = vld [vmem:[#allocation129_spill] sm:$0xff] }
 0x5ef   :  { %2712 = vmatpush.msrb.mxu2 %v8276_v5  ;;  %2654 = vmatpush.msra.mxu3 %v8277_v60  ;;  %v8334_v5 = vld [vmem:[#allocation130_spill] sm:$0xff]  ;;  %v8335_v60 = vld [vmem:[#allocation131_spill] sm:$0xff] }
 0x5f0   :  { %2615 = vmatpush.msra.mxu1 %v8278_v35  ;;  %v8336_v35 = vld [vmem:[#allocation132_spill] sm:$0xff] }
 0x5f1   :  { %2713 = vmatpush.msrb.mxu2 %v8279_v24  ;;  %2655 = vmatpush.msra.mxu3 %v8280_v12  ;;  %v8337_v24 = vld [vmem:[#allocation133_spill] sm:$0xff]  ;;  %v8338_v12 = vld [vmem:[#allocation134_spill] sm:$0xff] }
 0x5f2   :  { %2616 = vmatpush.msra.mxu1 %v8281_v46  ;;  %v8339_v46 = vld [vmem:[#allocation135_spill] sm:$0xff] }
 0x5f3   :  { %2714 = vmatpush.msrb.mxu2 %v8282_v29  ;;  %2656 = vmatpush.msra.mxu3 %v8283_v44  ;;  %v8340_v29 = vld [vmem:[#allocation136_spill] sm:$0xff]  ;;  %v8341_v44 = vld [vmem:[#allocation137_spill] sm:$0xff] }
 0x5f4   :  { %2617 = vmatpush.msra.mxu1 %v8284_v63  ;;  %v8342_v63 = vld [vmem:[#allocation138_spill] sm:$0xff] }
 0x5f5   :  { %2715 = vmatpush.msrb.mxu2 %v8285_v49  ;;  %2657 = vmatpush.msra.mxu3 %v8286_v11  ;;  %v8343_v49 = vld [vmem:[#allocation139_spill] sm:$0xff]  ;;  %v8344_v11 = vld [vmem:[#allocation140_spill] sm:$0xff] }
 0x5f6   :  { %2618 = vmatpush.msra.mxu1 %v8287_v8  ;;  %v8345_v8 = vld [vmem:[#allocation141_spill] sm:$0xff] }
 0x5f7   :  { %2716 = vmatpush.msrb.mxu2 %v8288_v50  ;;  %2658 = vmatpush.msra.mxu3 %v8289_v56  ;;  %v8346_v50 = vld [vmem:[#allocation142_spill] sm:$0xff] }
 0x5f8   :  { %2619 = vmatpush.msra.mxu1 %v8290_v27 }
 0x5f9   :  { %2717 = vmatpush.msrb.mxu2 %v8291_v40  ;;  %2659 = vmatpush.msra.mxu3 %v8292_v21  ;;  %v8347_v40 = vld [vmem:[#allocation84_spill] sm:$0xff] }
 0x5fa   :  { %2620 = vmatpush.msra.mxu1 %v8293_v42 }
 0x5fb   :  { %2718 = vmatpush.msrb.mxu2 %v8294_v18  ;;  %2660 = vmatpush.msra.mxu3 %v8295_v45 }
 0x5fc   :  { %2621 = vmatpush.msra.mxu1 %v8296_v37 }
 0x5fd   :  { %2719 = vmatpush.msrb.mxu2 %v8297_v23  ;;  %2661 = vmatpush.msra.mxu3 %v8298_v10  ;;  %v8348_v23 = vld [vmem:[#allocation10_spill] sm:$0xff] }
 0x5fe   :  { %2622 = vmatpush.msra.mxu1 %v8299_v4 }
 0x5ff   :  { %2720 = vmatpush.msrb.mxu2 %v8300_v19  ;;  %2662 = vmatpush.msra.mxu3 %v8301_v55 }
 0x600   :  { %2623 = vmatpush.msra.mxu1 %v8302_v3 }
 0x601   :  { %2721 = vmatpush.msrb.mxu2 %v8303_v41  ;;  %2663 = vmatpush.msra.mxu3 %v8304_v38 }
 0x602   :  { %2624 = vmatpush.msra.mxu1 %v8305_v0  ;;  %v8349_v0 = vld [vmem:[#allocation104_spill] sm:$0xff] }
 0x603   :  { %2722 = vmatpush.msrb.mxu2 %v8306_v58  ;;  %2664 = vmatpush.msra.mxu3 %v8307_v31 }
 0x604   :  { %2625 = vmatpush.msra.mxu1 %v8308_v20  ;;  %v2482_v20 = vld [vmem:[#allocation3 + $0xb0] sm:$0xff] }
 0x605   :  { %2723 = vmatpush.msrb.mxu2 %v8309_v36  ;;  %2665 = vmatpush.msra.mxu3 %v8310_v26 }
 0x606   :  { %2626 = vmatpush.msra.mxu1 %v8311_v25 }
 0x607   :  { %2724 = vmatpush.msrb.mxu2 %v8312_v30  ;;  %2666 = vmatpush.msra.mxu3 %v8313_v28 }
 0x608   :  { %2691 = vmatpush.msrb.mxu1 %v8314_v22 }
 0x609   :  { %2731 = vmatpush.msrb.mxu3 %v8315_v6  ;;  %2725 = vmatpush.msrb.mxu2 %v8316_v51 }
 0x60a   :  { %2692 = vmatpush.msrb.mxu1 %v8317_v1 }
 0x60b   :  { %2732 = vmatpush.msrb.mxu3 %v8318_v34  ;;  %2726 = vmatpush.msrb.mxu2 %v3572_v17  ;;  %v8350_v34 = vld [vmem:[#allocation15_spill] sm:$0xff] }
 0x60c   :  { %2693 = vmatpush.msrb.mxu1 %v8319_v59 }
 0x60d   :  { %2733 = vmatpush.msrb.mxu3 %v8320_v47 }
 0x60e   :  { %2694 = vmatpush.msrb.mxu1 %v8321_v53 }
 0x60f   :  { %2734 = vmatpush.msrb.mxu3 %v8322_v48 }
 0x610   :  { %2695 = vmatpush.msrb.mxu1 %v8323_v33 }
 0x611   :  { %2735 = vmatpush.msrb.mxu3 %v8324_v15 }
 0x612   :  { %2696 = vmatpush.msrb.mxu1 %v8325_v32 }
 0x613   :  { %2736 = vmatpush.msrb.mxu3 %v8326_v62 }
 0x614   :  { %2697 = vmatpush.msrb.mxu1 %v8327_v54 }
 0x615   :  { %2737 = vmatpush.msrb.mxu3 %v8328_v2 }
 0x616   :  { %2698 = vmatpush.msrb.mxu1 %v8329_v52 }
 0x617   :  { %2738 = vmatpush.msrb.mxu3 %v8330_v16 }
 0x618   :  { %2699 = vmatpush.msrb.mxu1 %v8331_v7 }
 0x619   :  { %2739 = vmatpush.msrb.mxu3 %v8332_v57 }
 0x61a   :  { %2700 = vmatpush.msrb.mxu1 %v8333_v9  ;;  %v2481_v9 = vld [vmem:[#allocation3 + $0xa8] sm:$0xff] }
 0x61b   :  { %2740 = vmatpush.msrb.mxu3 %v8334_v5 }
 0x61c   :  { %2701 = vmatpush.msrb.mxu1 %v8335_v60 }
 0x61d   :  { %2741 = vmatpush.msrb.mxu3 %v8336_v35 }
 0x61e   :  { %2702 = vmatpush.msrb.mxu1 %v8337_v24 }
 0x61f   :  { %2742 = vmatpush.msrb.mxu3 %v8338_v12 }
 0x620   :  { %2703 = vmatpush.msrb.mxu1 %v8339_v46 }
 0x621   :  { %2743 = vmatpush.msrb.mxu3 %v8340_v29 }
 0x622   :  { %2704 = vmatpush.msrb.mxu1 %v8341_v44 }
 0x623   :  { %2744 = vmatpush.msrb.mxu3 %v8342_v63  ;;  %v2352_v4 = vpop.f32.mrf.mxu0 }
 0x624   :  { %2705 = vmatpush.msrb.mxu1 %v8343_v49 }
 0x625   :  { %2745 = vmatpush.msrb.mxu3 %v8344_v11 }
 0x626   :  { %2706 = vmatpush.msrb.mxu1 %v8345_v8 }
 0x627   :  { %2746 = vmatpush.msrb.mxu3 %v8346_v50 }
 0x629   :  { %v2312_v56 = vpop.f32.mrf.mxu2 }
 0x62b   :  { %v2432_v32 = vpop.f32.mrf.mxu0 }
 0x631   :  { %v2392_v37 = vpop.f32.mrf.mxu2 }
 0x644   :  { %v2292_v27 = vpop.f32.mrf.mxu1 }
 0x645   :  { %v2293_v21 = vadd.f32 %v2292_v27, %v8347_v40 }
 0x647   :  { %v2313_v42 = vadd.f32 %v2312_v56, %v2293_v21 }
 0x649   :  { %v2870_v18 = vmul.f32 -1.442695, %v2313_v42 }
 0x64a   :  { %v2332_v45 = vpop.f32.mrf.mxu3 }
 0x64b   :  { %3015 = vpow2.f32 %v2870_v18  ;;  %v2333_v10 = vadd.f32 %v2332_v45, %v8348_v23  ;;  %v2521_v38 = vpop.f32.mrf.mxu2 }
 0x64c   :  { %v2522_v58 = vadd.f32 %v2521_v38, %v8349_v0  ;;  %v2372_v28 = vpop.f32.mrf.mxu1 }
 0x64d   :  { %v2353_v19 = vadd.f32 %v2352_v4, %v2333_v10  ;;  %v2373_v48 = vadd.f32 %v2372_v28, %v8090_v61 }
 0x64e   :  { %v2564_v25 = vadd.f32 %v2522_v58, %v2482_v20 }
 0x64f   :  { %v2871_v55 = vmul.f32 -1.442695, %v2353_v19  ;;  %v2393_v7 = vadd.f32 %v2392_v37, %v2373_v48 }
 0x650   :  { %v2873_v51 = vmul.f32 -1.442695, %v2564_v25 }
 0x651   :  { %v3016_v3 = vpop.eup %3015  ;;  %3017 = vpow2.f32 %v2871_v55 }
 0x652   :  { %v2438_v41 = vadd.f32 1.0, %v3016_v3 }
 0x653   :  { %v2412_v22 = vpop.f32.mrf.mxu3 }
 0x654   :  { %3019 = vrcp.f32 %v2438_v41  ;;  %v2450_v1 = vand.u32 2147483648, %v2438_v41  ;;  %v2413_v17 = vadd.f32 %v2412_v22, %v8350_v34  ;;  %v2448_v47 = vand.u32 2147483647, %v2438_v41 }
 0x655   :  { %vm2444_vm9 = vweird.f32 %v2438_v41 }
 0x656   :  { %v2451_v62 = vor.u32 1.1754944e-38, %v2450_v1  ;;  %v2433_v2 = vadd.f32 %v2432_v32, %v2413_v17  ;;  %vm2449_vm11 = vcmp.eq.f32.partialorder %v2448_v47, 8.507059e+37 }
 0x657   :  { %v3018_v31 = vpop.eup %3017 }
 0x658   :  { %v2457_v36 = vadd.f32 1.0, %v3018_v31 }
 0x65a   :  { %v3020_v26 = vpop.eup %3019  ;;  %3021 = vrcp.f32 %v2457_v36  ;;  %v2469_v16 = vand.u32 2147483648, %v2457_v36  ;;  %v2467_v12 = vand.u32 2147483647, %v2457_v36  ;;  %vm2463_vm13 = vweird.f32 %v2457_v36 }
 0x65b   :  { %v2440_v30 = vmul.f32 %v3020_v26, %v2438_v41  ;;  %vm2445_vm8 = vweird.f32 %v3020_v26  ;;  %3023 = vpow2.f32 %v2873_v51 }
 0x65c   :  { %vm2446_vm10 = vmor %vm2444_vm9, %vm2445_vm8  ;;  %v2470_v49 = vor.u32 1.1754944e-38, %v2469_v16  ;;  %vm2468_vm15 = vcmp.eq.f32.partialorder %v2467_v12, 8.507059e+37  ;;  %v2806_v16 = vld [vmem:[%s6813_s5 + $0x50] sm:$0xff] }
 0x65d   :  { %v2441_v6 = vsub.f32 1.0, %v2440_v30  ;;  %v2483_v30 = vld [vmem:[#allocation3 + $0xb8] sm:$0xff]  ;;  %v2802_v12 = vld [vmem:[%s6813_s5 + $0x30] sm:$0xff] }
 0x65f   :  { %v2442_v59 = vmul.f32 %v3020_v26, %v2441_v6 }
 0x660   :  { %v3022_v53 = vpop.eup %3021 }
 0x661   :  { %v2459_v33 = vmul.f32 %v3022_v53, %v2457_v36  ;;  %v2443_v15 = vadd.f32 %v3020_v26, %v2442_v59  ;;  %vm2464_vm12 = vweird.f32 %v3022_v53  ;;  %v3024_v63 = vpop.eup %3023 }
 0x662   :  { %vm2465_vm14 = vmor %vm2463_vm13, %vm2464_vm12  ;;  %v2568_v50 = vadd.f32 1.0, %v3024_v63 }
 0x663   :  { %v2460_v54 = vsub.f32 1.0, %v2459_v33  ;;  %v2447_v52 = vsel %vm2446_vm10, %v3020_v26, %v2443_v15 }
 0x664   :  { %v2452_v57 = vsel %vm2449_vm11, %v2451_v62, %v2447_v52  ;;  %v2501_v5 = vpop.f32.mrf.mxu1  ;;  %v2580_v51 = vand.u32 2147483648, %v2568_v50  ;;  %vm2574_vm5 = vweird.f32 %v2568_v50  ;;  %v2578_v1 = vand.u32 2147483647, %v2568_v50  ;;  %v2811_v62 = vld [vmem:[%s6813_s5 + $0x78] sm:$0xff] }
 0x665   :  { %v2461_v60 = vmul.f32 %v3022_v53, %v2460_v54  ;;  %v2473_v35 = vmul.f32 %v2452_v57, %v2433_v2  ;;  %v2502_v24 = vadd.f32 %v2501_v5, %v7569_v39  ;;  %v2810_v54 = vld [vmem:[%s6813_s5 + $0x70] sm:$0xff]  ;;  %v2809_v2 = vld [vmem:[%s6813_s5 + $0x68] sm:$0xff]  ;;  %v2807_v52 = vld [vmem:[%s6813_s5 + $0x58] sm:$0xff] }
 0x666   :  { %v2581_v47 = vor.u32 1.1754944e-38, %v2580_v51  ;;  %vm2579_vm7 = vcmp.eq.f32.partialorder %v2578_v1, 8.507059e+37  ;;  %v2804_v57 = vld [vmem:[%s6813_s5 + $0x40] sm:$0xff] }
 0x667   :  { %v2474_v46 = vadd.f32 %v2473_v35, %v2393_v7  ;;  %v2544_v29 = vadd.f32 %v2502_v24, %v2481_v9  ;;  %v2462_v44 = vadd.f32 %v3022_v53, %v2461_v60  ;;  %v2805_v7 = vld [vmem:[%s6813_s5 + $0x48] sm:$0xff]  ;;  %v2803_v60 = vld [vmem:[%s6813_s5 + $0x38] sm:$0xff] }
 0x669   :  { %3025 = vtanh.f32 %v2474_v46  ;;  %v2872_v11 = vmul.f32 -1.442695, %v2544_v29  ;;  %v2466_v8 = vsel %vm2465_vm14, %v3022_v53, %v2462_v44  ;;  %v2801_v29 = vld [vmem:[%s6813_s5 + $0x28] sm:$0xff] }
 0x66a   :  { %v2471_v56 = vsel %vm2468_vm15, %v2470_v49, %v2466_v8  ;;  %v2799_v49 = vld [vmem:[%s6813_s5 + $0x18] sm:$0xff] }
 0x66b   :  { %3027 = vpow2.f32 %v2872_v11  ;;  %v2476_v27 = vsub.f32 1.0, %v2471_v56  ;;  %v2478_v39 = vmul.f32 %v2471_v56, %v6555_v13  ;;  %v2541_v58 = vpop.f32.mrf.mxu3 }
 0x66c   :  { %3029 = vrcp.f32 %v2568_v50  ;;  %v2542_v26 = vadd.f32 %v2541_v58, %v4281_v43 }
 0x66f   :  { %v3026_v21 = vpop.eup %3025 }
 0x670   :  { %v2477_v42 = vmul.f32 %v3026_v21, %v2476_v27  ;;  %v2797_v27 = vld [vmem:[%s6813_s5 + $0x8] sm:$0xff] }
 0x671   :  { %v3028_v18 = vpop.eup %3027 }
 0x672   :  { %v2548_v45 = vadd.f32 1.0, %v3028_v18  ;;  %v6744_v37 = vadd.f32 %v2478_v39, %v2477_v42  ;;  %v3030_v10 = vpop.eup %3029 }
 0x673   :  { %v2570_v4 = vmul.f32 %v3030_v10, %v2568_v50  ;;  %vm2575_vm4 = vweird.f32 %v3030_v10  ;;  %v2798_v50 = vld [vmem:[%s6813_s5 + $0x10] sm:$0xff] }
 0x674   :  { %3031 = vrcp.f32 %v2548_v45  ;;  %2627 = vmatmul.f32.vlgmr.msra.gmra.mxu1 %v6744_v37  ;;  %2667 = vmatmul.f32.vlgmr.msra.gmra.mxu3 %v6744_v37  ;;  %v2560_v13 = vand.u32 2147483648, %v2548_v45  ;;  %v2558_v0 = vand.u32 2147483647, %v2548_v45  ;;  %vm2554_vm1 = vweird.f32 %v2548_v45  ;;  %vm2576_vm6 = vmor %vm2574_vm5, %vm2575_vm4 }
 0x675   :  { %v2571_v3 = vsub.f32 1.0, %v2570_v4 }
 0x676   :  { %v2561_v36 = vor.u32 1.1754944e-38, %v2560_v13  ;;  %vm2559_vm3 = vcmp.eq.f32.partialorder %v2558_v0, 8.507059e+37 }
 0x677   :  { %v2572_v31 = vmul.f32 %v3030_v10, %v2571_v3 }
 0x679   :  { %v2573_v22 = vadd.f32 %v3030_v10, %v2572_v31 }
 0x67a   :  { %v3032_v19 = vpop.eup %3031 }
 0x67b   :  { %v2550_v55 = vmul.f32 %v3032_v19, %v2548_v45  ;;  %vm2555_vm0 = vweird.f32 %v3032_v19  ;;  %v2577_v59 = vsel %vm2576_vm6, %v3030_v10, %v2573_v22 }
 0x67c   :  { %2707 = vmatmul.f32.vlgmr.msrb.gmra.mxu1 %v6744_v37  ;;  %2747 = vmatmul.f32.vlgmr.msrb.gmra.mxu3 %v6744_v37  ;;  %vm2556_vm2 = vmor %vm2554_vm1, %vm2555_vm0  ;;  %v2582_v53 = vsel %vm2579_vm7, %v2581_v47, %v2577_v59  ;;  %vm2836_vm0 = vcmask 7168  }
 0x67d   :  { %v2551_v41 = vsub.f32 1.0, %v2550_v55  ;;  %v2587_v48 = vsub.f32 1.0, %v2582_v53  ;;  %v2589_v15 = vmul.f32 %v2582_v53, %v6597_v14  ;;  %v2808_v14 = vld [vmem:[%s6813_s5 + $0x60] sm:$0xff] }
 0x67f   :  { %v2552_v38 = vmul.f32 %v3032_v19, %v2551_v41 }
 0x681   :  { %v2553_v20 = vadd.f32 %v3032_v19, %v2552_v38 }
 0x683   :  { %v2557_v25 = vsel %vm2556_vm2, %v3032_v19, %v2553_v20 }
 0x684   :  { %v2562_v28 = vsel %vm2559_vm3, %v2561_v36, %v2557_v25 }
 0x685   :  { %v2584_v6 = vmul.f32 %v2562_v28, %v2542_v26 }
 0x687   :  { %v2585_v17 = vadd.f32 %v2584_v6, %v2483_v30 }
 0x689   :  { %3033 = vtanh.f32 %v2585_v17 }
 0x68f   :  { %v3034_v33 = vpop.eup %3033 }
 0x690   :  { %v2588_v43 = vmul.f32 %v3034_v33, %v2587_v48 }
 0x692   :  { %v2590_v32 = vadd.f32 %v2589_v15, %v2588_v43 }
 0x694   :  { %2607 = vmatmul.f32.vlgmr.msra.gmra.mxu0 %v2590_v32  ;;  %2647 = vmatmul.f32.vlgmr.msra.gmra.mxu2 %v2590_v32 }
 0x695   :  { %2816 = vmatpush.msra.mxu0 %v2811_v62 }
 0x697   :  { %2817 = vmatpush.msra.mxu0 %v2810_v54 }
 0x699   :  { %2818 = vmatpush.msra.mxu0 %v2809_v2  ;;  %v2884_v2 = vld [vmem:[#allocation2] ss:$0 sm:$0xff] }
 0x69b   :  { %2819 = vmatpush.msra.mxu0 %v2808_v14 }
 0x69c   :  { %2687 = vmatmul.f32.vlgmr.msrb.gmra.mxu0 %v2590_v32  ;;  %2727 = vmatmul.f32.vlgmr.msrb.gmra.mxu2 %v2590_v32 }
 0x69d   :  { %2820 = vmatpush.msra.mxu0 %v2807_v52 }
 0x69f   :  { %2821 = vmatpush.msra.mxu0 %v2806_v16 }
 0x6a1   :  { %2822 = vmatpush.msra.mxu0 %v2805_v7 }
 0x6a3   :  { %2823 = vmatpush.msra.mxu0 %v2804_v57 }
 0x6a5   :  { %2824 = vmatpush.msra.mxu0 %v2803_v60 }
 0x6a7   :  { %2825 = vmatpush.msra.mxu0 %v2802_v12 }
 0x6a9   :  { %2826 = vmatpush.msra.mxu0 %v2801_v29 }
 0x6f1   :  { %v2628_v35 = vpop.f32.mrf.mxu1 }
 0x6f7   :  { %v2668_v11 = vpop.f32.mrf.mxu3 }
 0x6f9   :  { %v2708_v25 = vpop.f32.mrf.mxu1 }
 0x6ff   :  { %v2748_v36 = vpop.f32.mrf.mxu3 }
 0x711   :  { %v2608_v9 = vpop.f32.mrf.mxu0 }
 0x712   :  { %v2609_v5 = vadd.f32 %v2608_v9, %v8347_v40  ;;  %v2800_v40 = vld [vmem:[%s6813_s5 + $0x20] sm:$0xff] }
 0x713   :  { %2827 = vmatpush.msra.mxu0 %v2800_v40 }
 0x714   :  { %v2629_v24 = vadd.f32 %v2628_v35, %v2609_v5 }
 0x715   :  { %2828 = vmatpush.msra.mxu0 %v2799_v49 }
 0x716   :  { %v2874_v46 = vmul.f32 -1.442695, %v2629_v24 }
 0x717   :  { %v2648_v44 = vpop.f32.mrf.mxu2  ;;  %2829 = vmatpush.msra.mxu0 %v2798_v50 }
 0x718   :  { %3035 = vpow2.f32 %v2874_v46  ;;  %v2649_v63 = vadd.f32 %v2648_v44, %v8348_v23  ;;  %v2796_v23 = vld [vmem:[%s6813_s5] sm:$0xff] }
 0x719   :  { %2830 = vmatpush.msra.mxu0 %v2797_v27  ;;  %v2688_v19 = vpop.f32.mrf.mxu0 }
 0x71a   :  { %v2669_v8 = vadd.f32 %v2668_v11, %v2649_v63  ;;  %v2689_v58 = vadd.f32 %v2688_v19, %v8090_v61 }
 0x71b   :  { %2831 = vmatpush.msra.mxu0 %v2796_v23 }
 0x71c   :  { %v2875_v56 = vmul.f32 -1.442695, %v2669_v8  ;;  %v2709_v6 = vadd.f32 %v2708_v25, %v2689_v58 }
 0x71e   :  { %v3036_v21 = vpop.eup %3035  ;;  %3037 = vpow2.f32 %v2875_v56 }
 0x71f   :  { %v2754_v42 = vadd.f32 1.0, %v3036_v21  ;;  %v2728_v4 = vpop.f32.mrf.mxu2 }
 0x720   :  { %v2729_v41 = vadd.f32 %v2728_v4, %v8350_v34 }
 0x721   :  { %3039 = vrcp.f32 %v2754_v42  ;;  %v2766_v3 = vand.u32 2147483648, %v2754_v42  ;;  %v2764_v38 = vand.u32 2147483647, %v2754_v42  ;;  %vm2760_vm9 = vweird.f32 %v2754_v42 }
 0x722   :  { %v2749_v28 = vadd.f32 %v2748_v36, %v2729_v41 }
 0x723   :  { %v2767_v26 = vor.u32 1.1754944e-38, %v2766_v3  ;;  %vm2765_vm11 = vcmp.eq.f32.partialorder %v2764_v38, 8.507059e+37 }
 0x724   :  { %v3038_v39 = vpop.eup %3037 }
 0x725   :  { %v2773_v18 = vadd.f32 1.0, %v3038_v39 }
 0x727   :  { %v3040_v45 = vpop.eup %3039  ;;  %3041 = vrcp.f32 %v2773_v18  ;;  %v2785_v17 = vand.u32 2147483648, %v2773_v18  ;;  %v2783_v59 = vand.u32 2147483647, %v2773_v18  ;;  %vm2779_vm13 = vweird.f32 %v2773_v18 }
 0x728   :  { %v2756_v10 = vmul.f32 %v3040_v45, %v2754_v42  ;;  %vm2761_vm8 = vweird.f32 %v3040_v45 }
 0x729   :  { %vm2762_vm10 = vmor %vm2760_vm9, %vm2761_vm8  ;;  %v2786_v48 = vor.u32 1.1754944e-38, %v2785_v17  ;;  %vm2784_vm15 = vcmp.eq.f32.partialorder %v2783_v59, 8.507059e+37 }
 0x72a   :  { %v2757_v55 = vsub.f32 1.0, %v2756_v10 }
 0x72c   :  { %v2758_v13 = vmul.f32 %v3040_v45, %v2757_v55 }
 0x72d   :  { %v3042_v0 = vpop.eup %3041 }
 0x72e   :  { %v2775_v31 = vmul.f32 %v3042_v0, %v2773_v18  ;;  %v2759_v20 = vadd.f32 %v3040_v45, %v2758_v13  ;;  %vm2780_vm12 = vweird.f32 %v3042_v0 }
 0x72f   :  { %vm2781_vm14 = vmor %vm2779_vm13, %vm2780_vm12 }
 0x730   :  { %v2776_v30 = vsub.f32 1.0, %v2775_v31  ;;  %v2763_v22 = vsel %vm2762_vm10, %v3040_v45, %v2759_v20 }
 0x731   :  { %v2768_v51 = vsel %vm2765_vm11, %v2767_v26, %v2763_v22 }
 0x732   :  { %v2789_v34 = vmul.f32 %v2768_v51, %v2749_v28  ;;  %v2777_v1 = vmul.f32 %v3042_v0, %v2776_v30 }
 0x734   :  { %v2790_v47 = vadd.f32 %v2789_v34, %v2709_v6  ;;  %v2778_v61 = vadd.f32 %v3042_v0, %v2777_v1 }
 0x736   :  { %3043 = vtanh.f32 %v2790_v47  ;;  %v2782_v53 = vsel %vm2781_vm14, %v3042_v0, %v2778_v61 }
 0x737   :  { %v2787_v33 = vsel %vm2784_vm15, %v2786_v48, %v2782_v53 }
 0x738   :  { %v2792_v43 = vsub.f32 1.0, %v2787_v33  ;;  %v2794_v62 = vmul.f32 %v2787_v33, %v6744_v37 }
 0x73c   :  { %v3044_v15 = vpop.eup %3043 }
 0x73d   :  { %v2793_v32 = vmul.f32 %v3044_v15, %v2792_v43 }
 0x73f   :  { %v2795_v54 = vadd.f32 %v2794_v62, %v2793_v32 }
 0x741   :  { %2832 = vmatmul.f32.vlgmr.msra.gmra.mxu0 %v2795_v54 }
 0x7be   :  { %v2833_v14 = vpop.f32.mrf.mxu0 }
 0x7bf   :  { %v2834_v52 = vadd.f32 %v2884_v2, %v2833_v14 }
 0x7c1   :  { %2837 = vst.msk [vmem:[%s6815_s7] sm:$0xff] %vm2836_vm0, %v2834_v52 }
 0x7c2   :  { %2842 = vsyncpa [#allocation4], 1 }
 0x7c3   :  { %2843 = vsyncpa [#allocation6], 1 }

</bundles_post_ra>
